<compile_context>
chip_gen: v5e
topology: v5e:2x2
jax: 0.10.0
libtpu: 0.0.40
codegen_flags: <defaults>
</compile_context>

<pallas_src>
import functools

import jax
import jax.numpy as jnp
from jax.experimental import pallas as pl
from jax.experimental.pallas import tpu as pltpu


# --------------------------------------------------------------------------
# Kernel 1: fused QKV projection.  grid = (B, N//tn)
#   x_ref : (1, tn, C)   w_ref : (C, 3C) (resident)   qkv_ref : (1, tn, 3C)
# --------------------------------------------------------------------------
def _qkv_proj_kernel(x_ref, w_ref, qkv_ref):
    qkv_ref[0] = jnp.dot(
        x_ref[0], w_ref[...], preferred_element_type=jnp.float32
    ).astype(qkv_ref.dtype)


# --------------------------------------------------------------------------
# Kernel 2: flash attention (heads unrolled in-kernel) + batched output proj.
#   grid = (B, N//tq, N//tkv)   ("parallel", "parallel", "arbitrary")
#   q_ref : (1, tq, C)   k_ref/v_ref : (1, tkv, C)   wp_ref : (C, C)
#   bp_ref : (1, C)      o_ref : (1, tq, C)
#   scratch: m/l (tq, H) f32, ctx (tq, C) f32 (per-head column ranges)
# --------------------------------------------------------------------------
def _flash_attn_proj_kernel(q_ref, k_ref, v_ref, wp_ref, bp_ref, o_ref,
                            m_scr, l_scr, ctx_scr,
                            *, num_heads, head_dim, exact_recip):
    kv = pl.program_id(2)
    nkv = pl.num_programs(2)

    # Reset online-softmax state at the start of each (b, q-tile).
    @pl.when(kv == 0)
    def _():
        m_scr[...] = jnp.full(m_scr.shape, -jnp.inf, m_scr.dtype)
        l_scr[...] = jnp.zeros(l_scr.shape, l_scr.dtype)
        ctx_scr[...] = jnp.zeros(ctx_scr.shape, ctx_scr.dtype)

    q = q_ref[0]                       # (tq, C), 1/sqrt(Dh) folded into W_q
    k = k_ref[0]                       # (tkv, C)
    v = v_ref[0]                       # (tkv, C)

    # Static unroll over heads: all slices are static, lane offsets h*Dh.
    for h in range(num_heads):
        sl = slice(h * head_dim, (h + 1) * head_dim)
        q_h = q[:, sl]                 # (tq, Dh)
        k_h = k[:, sl]                 # (tkv, Dh)
        v_h = v[:, sl]                 # (tkv, Dh)

        # s = q_h @ k_h^T  (contraction over Dh, f32 accumulation on the MXU)
        s = jax.lax.dot_general(q_h, k_h, (((1,), (1,)), ((), ())),
                                preferred_element_type=jnp.float32)  # (tq, tkv)

        m_prev = m_scr[:, h:h + 1]
        m_new = jnp.maximum(m_prev, jnp.max(s, axis=-1, keepdims=True))
        alpha = jnp.exp(m_prev - m_new)
        p = jnp.exp(s - m_new)
        l_scr[:, h:h + 1] = alpha * l_scr[:, h:h + 1] + jnp.sum(
            p, axis=-1, keepdims=True)
        ctx_scr[:, sl] = alpha * ctx_scr[:, sl] + jnp.dot(
            p.astype(v_h.dtype), v_h, preferred_element_type=jnp.float32)
        m_scr[:, h:h + 1] = m_new

    # Last KV block: normalize all heads, then ONE full-depth output projection.
    @pl.when(kv == nkv - 1)
    def _():
        for h in range(num_heads):
            sl = slice(h * head_dim, (h + 1) * head_dim)
            l_h = l_scr[:, h:h + 1]
            if exact_recip:
                ctx_scr[:, sl] = ctx_scr[:, sl] / l_h
            else:
                ctx_scr[:, sl] = ctx_scr[:, sl] * pl.reciprocal(l_h, approx=True)
        y = jnp.dot(ctx_scr[...].astype(wp_ref.dtype), wp_ref[...],
                    preferred_element_type=jnp.float32)              # (tq, C)
        o_ref[0] = (y + bp_ref[...]).astype(o_ref.dtype)


# --------------------------------------------------------------------------
# Wrapper
# --------------------------------------------------------------------------
def attention_forward(x, w_qkv, w_proj, b_proj, *, num_heads,
                      compute_dtype=jnp.bfloat16, tq=None, tkv=None, tn=None):
    """x:(B,N,C); w_qkv:(C,3C) (pre-transposed, no bias); w_proj:(C,C); b_proj:(C,)."""
    B, N, C = x.shape
    H = num_heads
    assert C % H == 0
    Dh = C // H
    assert Dh % 8 == 0          # Dh % 128 == 0 gives the best (lane-dense) layout
    out_dtype = x.dtype
    scale = Dh ** (-0.5)

    # Tile selection (review: bigger tiles; collapse the kv axis when N is small).
    tq = min(256, N) if tq is None else min(tq, N)
    tn = min(256, N) if tn is None else min(tn, N)
    if tkv is None:
        tkv = N if N <= 2048 else 512
    tkv = min(tkv, N)
    assert N % tq == 0 and N % tkv == 0 and N % tn == 0

    # ---- wrapper-side layout only: fold softmax scale into the Q columns.
    w_fused = jnp.concatenate([w_qkv[:, :C] * scale, w_qkv[:, C:]], axis=1)

    x_c = x.astype(compute_dtype)
    w_fused = w_fused.astype(compute_dtype)
    wp = w_proj.astype(compute_dtype)
    bp = b_proj.reshape(1, C).astype(jnp.float32)

    cbytes = jnp.dtype(compute_dtype).itemsize
    vmem_limit = 32 * 1024 * 1024   # safe across v5e/v6e/v7x; usage is far below

    # -------------------- kernel 1: fused QKV projection --------------------
    nN = N // tn
    qkv_cost = pl.CostEstimate(
        flops=2 * B * N * C * 3 * C,
        transcendentals=0,
        bytes_accessed=(B * N * C + C * 3 * C + B * N * 3 * C) * cbytes)
    qkv = pl.pallas_call(
        _qkv_proj_kernel,
        out_shape=jax.ShapeDtypeStruct((B, N, 3 * C), compute_dtype),
        grid_spec=pltpu.PrefetchScalarGridSpec(
            num_scalar_prefetch=0,
            grid=(B, nN),
            in_specs=[
                pl.BlockSpec((1, tn, C), lambda b, n: (b, n, 0)),
                pl.BlockSpec((C, 3 * C), lambda b, n: (0, 0)),   # resident weight
            ],
            out_specs=pl.BlockSpec((1, tn, 3 * C), lambda b, n: (b, n, 0)),
        ),
        compiler_params=pltpu.CompilerParams(
            dimension_semantics=("parallel", "parallel"),
            vmem_limit_bytes=vmem_limit),
        cost_estimate=qkv_cost,
    )(x_c, w_fused)

    # ---------- kernel 2: flash attention + batched output projection -------
    nQ, nKV = N // tq, N // tkv
    kernel2 = functools.partial(
        _flash_attn_proj_kernel, num_heads=H, head_dim=Dh,
        exact_recip=(jnp.dtype(compute_dtype) == jnp.dtype(jnp.float32)))
    attn_cost = pl.CostEstimate(
        flops=4 * B * H * N * N * Dh + 2 * B * N * C * C,
        transcendentals=B * H * N * N,
        bytes_accessed=((1 + 2 * nQ) * B * N * C + C * C) * cbytes
                       + B * N * C * jnp.dtype(out_dtype).itemsize)
    out = pl.pallas_call(
        kernel2,
        out_shape=jax.ShapeDtypeStruct((B, N, C), out_dtype),
        grid_spec=pltpu.PrefetchScalarGridSpec(
            num_scalar_prefetch=0,
            grid=(B, nQ, nKV),
            in_specs=[
                # Q / K / V are block slices of the same qkv array along its
                # last dim (block size C -> block indices 0 / 1 / 2).
                pl.BlockSpec((1, tq, C), lambda b, qi, kv: (b, qi, 0)),
                pl.BlockSpec((1, tkv, C), lambda b, qi, kv: (b, kv, 1)),
                pl.BlockSpec((1, tkv, C), lambda b, qi, kv: (b, kv, 2)),
                pl.BlockSpec((C, C), lambda b, qi, kv: (0, 0)),      # resident
                pl.BlockSpec((1, C), lambda b, qi, kv: (0, 0)),
            ],
            out_specs=pl.BlockSpec((1, tq, C), lambda b, qi, kv: (b, qi, 0)),
            scratch_shapes=[
                pltpu.VMEM((tq, H), jnp.float32),    # m (running max, per head)
                pltpu.VMEM((tq, H), jnp.float32),    # l (running denom, per head)
                pltpu.VMEM((tq, C), jnp.float32),    # ctx accumulator (all heads)
            ],
        ),
        compiler_params=pltpu.CompilerParams(
            dimension_semantics=("parallel", "parallel", "arbitrary"),
            vmem_limit_bytes=vmem_limit),
        cost_estimate=attn_cost,
    )(qkv, qkv, qkv, wp, bp)
    return out


def attention_reference(x, w_qkv, w_proj, b_proj, *, num_heads):
    """Pure-JAX f32 reference mirroring the PyTorch forward."""
    B, N, C = x.shape
    Dh = C // num_heads
    scale = Dh ** (-0.5)
    qkv = x @ w_qkv
    qkv = qkv.reshape(B, N, 3, num_heads, Dh).transpose(2, 0, 3, 1, 4)
    q, k, v = qkv[0], qkv[1], qkv[2]
    attn = jax.nn.softmax((q @ jnp.swapaxes(k, -2, -1)) * scale, axis=-1)
    ctx = (attn @ v).transpose(0, 2, 1, 3).reshape(B, N, C)
    return ctx @ w_proj + b_proj


if __name__ == "__main__":
    # Small but lane-dense shapes: B=2, N=128 tokens, C=512 (4 heads, Dh=128).
    B, N, C, H = 2, 128, 512, 4

    key = jax.random.PRNGKey(0)
    kx, kq, kp, kb = jax.random.split(key, 4)
    x = jax.random.normal(kx, (B, N, C), dtype=jnp.float32)
    w_qkv = jax.random.normal(kq, (C, 3 * C), dtype=jnp.float32) * 0.05   # Linear(dim,3*dim,bias=False).weight.T
    w_proj = jax.random.normal(kp, (C, C), dtype=jnp.float32) * 0.05      # Linear(dim,dim).weight.T
    b_proj = jax.random.normal(kb, (C,), dtype=jnp.float32) * 0.05        # Linear(dim,dim).bias

    # TODO(synk): attn_drop / proj_drop are identity at p=0.0 (eval); train-mode
    # dropout would use pltpu.prng_seed + pltpu.stateful_bernoulli. The
    # require_attn=True path (returning the (N,N) attention map) is not
    # materialized by the flash formulation.

    ref = attention_reference(x, w_qkv, w_proj, b_proj, num_heads=H)

    # f32 compute path (exact reciprocal -> tight check).
    out_f32 = attention_forward(x, w_qkv, w_proj, b_proj, num_heads=H,
                                compute_dtype=jnp.float32)
    out_f32 = jax.block_until_ready(out_f32)
    assert out_f32.shape == (B, N, C)
    assert jnp.allclose(out_f32, ref, atol=5e-3, rtol=5e-3), "f32 mismatch vs reference"

    # bf16 matmul operands, f32 accumulation + f32 softmax (perf config).
    out_bf16 = attention_forward(x, w_qkv, w_proj, b_proj, num_heads=H,
                                 compute_dtype=jnp.bfloat16)
    out_bf16 = jax.block_until_ready(out_bf16)
    assert jnp.allclose(out_bf16, ref, atol=1e-1, rtol=1e-1), "bf16 mismatch vs reference"

    print("KERNEL_OK")
</pallas_src>

<mosaic_0001>
module attributes {stable_mosaic.version = 11 : i64} {
  func.func @_qkv_proj_kernel(%arg0: i32, %arg1: i32, %arg2: memref<1x128x512xf32, #tpu.memory_space<vmem>>, %arg3: memref<512x1536xf32, #tpu.memory_space<vmem>>, %arg4: memref<1x128x1536xf32, #tpu.memory_space<vmem>>) attributes {dimension_semantics = [#tpu.dimension_semantics<parallel>, #tpu.dimension_semantics<parallel>], iteration_bounds = array<i64: 2, 1>, scalar_prefetch = 0 : i64, scratch_operands = 0 : i64, tpu.core_type = #tpu.core_type<tc>, window_params = [{transform_indices = @transform_0, window_bounds = array<i64: 1, 128, 512>}, {pipeline_mode = #tpu.pipeline_mode<synchronous>, transform_indices = @transform_1, window_bounds = array<i64: 512, 1536>}, {transform_indices = @transform_2, window_bounds = array<i64: 1, 128, 1536>}]} {
    %c0 = arith.constant 0 : index
    %c0_0 = arith.constant 0 : index
    %c0_1 = arith.constant 0 : index
    %0 = vector.load %arg2[%c0, %c0_0, %c0_1] : memref<1x128x512xf32, #tpu.memory_space<vmem>>, vector<1x128x512xf32>
    %1 = vector.shape_cast %0 : vector<1x128x512xf32> to vector<128x512xf32>
    %c0_2 = arith.constant 0 : index
    %c0_3 = arith.constant 0 : index
    %2 = vector.load %arg3[%c0_2, %c0_3] : memref<512x1536xf32, #tpu.memory_space<vmem>>, vector<512x1536xf32>
    %cst = arith.constant dense<0.000000e+00> : vector<128x1536xf32>
    %3 = tpu.matmul %1, %2, %cst {dimension_numbers = #tpu.dot_dimension_numbers<[1], [0], [0], [1], [0, 0, 1, 1], [], []>} : vector<128x512xf32>, vector<512x1536xf32>, vector<128x1536xf32> -> vector<128x1536xf32>
    %c0_4 = arith.constant 0 : index
    %c0_5 = arith.constant 0 : index
    %c0_6 = arith.constant 0 : index
    %4 = vector.load %arg4[%c0_4, %c0_5, %c0_6] : memref<1x128x1536xf32, #tpu.memory_space<vmem>>, vector<1x128x1536xf32>
    %5 = vector.shape_cast %4 : vector<1x128x1536xf32> to vector<128x1536xf32>
    %6 = vector.shape_cast %3 : vector<128x1536xf32> to vector<1x128x1536xf32>
    tpu.vector_store %arg4[%c0_4, %c0_5, %c0_6], %6 {strides = array<i32>} : memref<1x128x1536xf32, #tpu.memory_space<vmem>>, vector<1x128x1536xf32>,
    return
  }
  func.func @transform_0(%arg0: i32, %arg1: i32) -> (i32, i32, i32) {
    %c0_i32 = arith.constant 0 : i32
    %c0_i32_0 = arith.constant 0 : i32
    return %arg0, %arg1, %c0_i32 : i32, i32, i32
  }
  func.func @transform_1(%arg0: i32, %arg1: i32) -> (i32, i32) {
    %c0_i32 = arith.constant 0 : i32
    %c0_i32_0 = arith.constant 0 : i32
    %c0_i32_1 = arith.constant 0 : i32
    return %c0_i32, %c0_i32_0 : i32, i32
  }
  func.func @transform_2(%arg0: i32, %arg1: i32) -> (i32, i32, i32) {
    %c0_i32 = arith.constant 0 : i32
    %c0_i32_0 = arith.constant 0 : i32
    return %arg0, %arg1, %c0_i32 : i32, i32, i32
  }
}

</mosaic_0001>

<bundles_post_ra>
// kernel: tpu_custom_call.1
= control target key start
LH: loop header
LB: loop body
LE: loop exit
PB: predicated region body
PF: predicated region fallthrough
CT: control target
= control target key end

     0   :  { %7 = vsyncpa [#allocation3], 0  ;;  %s7315_s0 = inlined_call_operand.hbm [shape: f32[2,128,512], index: 0, kind: input, shape index: {}]   ;;  %s7316_s1 = inlined_call_operand.hbm [shape: f32[512,1536], index: 1, kind: input, shape index: {}]   ;;  %s7317_s2 = inlined_call_operand.hbm [shape: f32[2,128,1536], index: 2, kind: output, shape index: {}]  }
   0x1   :  { %9 = vsyncpa [#allocation3 + $0x1], 0 }
   0x2   :  { %10 = vsyncpa [#allocation6], 0 }
   0x3   :  { %11 = vsyncpa [#allocation4], 0 }
   0x4   :  { %13 = vsyncpa [#allocation4 + $0x1], 0  ;;  %s5048_s9 = smov 0   ;;  %s5050_s10 = smov 0  }
   0x5   :  { %s5052_s11 = smov 0   ;;  %s5054_s12 = smov 0  }
   0x6   :  { %s5056_s13 = smov 0   ;;  %s5058_s14 = smov 0  }
   0x7 LB: > { %s4462_s15 = sadd.s32 4294967295, %s5024_s14   ;;  %s4463_s16 = sadd.s32 4294967294, %s5024_s14   ;;  %s5024_s14 = sphi %s5058_s14, %s19_s14   ;;  %s5020_s13 = sphi %s5056_s13, %s7551_s13   ;;  %s5016_s12 = sphi %s5054_s12, %s7550_s12   ;;  %s5012_s11 = sphi %s5052_s11, %s7549_s11   ;;  %s5008_s10 = sphi %s5050_s10, %s7548_s10   ;;  %s5004_s9 = sphi %s5048_s9, %s7547_s9  }
   0x8   : > { %p53_p0 = scmp.ne.s32.totalorder %s5008_s10, %s5004_s9  ;;  %p5082_p1 = scmp.eq.s32.totalorder %s4462_s15, 0 }
   0x9   : > { %p5086_p2 = scmp.eq.s32.totalorder %s4462_s15, 1  ;;  %p106_p3 = scmp.eq.s32.totalorder %s4463_s16, 1 }
   0xa   : > { %p5092_p4 = por %p5082_p1, %p53_p0  ;;  %p4464_p5 = scmp.ge.s32.totalorder %s5024_s14, 1 }
   0xb   : > { %p5097_p6 = por %p106_p3, %p53_p0  ;;  %p113_p7 = scmp.lt.s32.totalorder %s5024_s14, 3 }
   0xc   : > { %s124_s23 = sshll.u32 %s7316_s1, 4  ;;  %s5026_s25 = smov [#allocation5]   ;;  %s125_s23 = int_to_ptr.hbm [resolvable:$true] %s124_s23 }
   0xd   : > { %p5105_p8 = pnand %p4464_p5, %p113_p7  ;;  %s126_s26 = sshll.u32 %s5026_s25, 4  ;;  %s127_s26 = int_to_ptr.vmem [resolvable:$true] %s126_s26 }
   0xe   : > { %p4466_p11 = scmp.ge.s32.totalorder %s5024_s14, 2  ;;  %s5027_s27 = smov 1536  }
   0xf   : > { %p4487_p9 = pneg %p5105_p8  ;;  %s5028_s28 = smov 96  }
  0x10   : > { %s31_s29 = sadd.s32 1, %s5020_s13  ;;  %s40_s30 = sadd.s32 1, %s5012_s11 }
  0x11   : > { %p4488_p10 = pnand %p4487_p9, %p5082_p1  ;;  %p33_p12 = scmp.ge.s32.totalorder %s31_s29, 2 }
  0x12   : > { %p47_p13 = scmp.ne.s32.totalorder %s5012_s11, %s5008_s10  ;;  %p48_p0 = scmp.eq.s32.totalorder %s5024_s14, 0 }
  0x13   : > { %4490 = dma.hbm_to_vmem [thread:$0]  (!%p4488_p10), %s125_s23, 98304, %s127_s26, [#allocation6], %s5027_s27, %s5027_s27, %s5028_s28  }
  0x14   : > { %s7553_s29 = smov (%p33_p12, %s31_s29), 0  ;;  %p5121_p3 = por %p48_p0, %p47_p13 }
  0x15   : > { %p5127_p5 = por %p5086_p2, %p47_p13  ;;  %s35_s5 = ssub.s32 %s5020_s13, %s7553_s29 }
  0x16   : > { %p4500_p7 = scmp.lt.s32.totalorder %s5024_s14, 2  ;;  %p38_p9 = scmp.eq.s32.totalorder %s35_s5, 0 }
  0x17   : > { %s140_s6 = sand.u32 1, %s5012_s11   ;;  %s4476_s15 = sshll.u32 %s5020_s13, 9 }
  0x18   : > { %s4467_s7 = sshll.u32 %s140_s6, 9  ;;  %s152_s22 = scalar_lea.hbm %s7315_s0, %s4476_s15 }
  0x19   : > { %s5136_s8 = scalar_select %p38_p9, %s5012_s11, %s40_s30  }
  0x1a   : > { %s144_s23 = scalar_lea.vmem [#allocation2], %s4467_s7  ;;  %s153_s18 = sshll.u32 %s152_s22, 4  ;;  %s154_s18 = int_to_ptr.hbm [resolvable:$true] %s153_s18 }
  0x1b   : > { %s155_s25 = sshll.u32 %s144_s23, 4  ;;  %p4492_p2 = pnand %p4500_p7, %p5121_p3  ;;  %s156_s25 = int_to_ptr.vmem [resolvable:$true] %s155_s25 }
  0x1c   : > { %s141_s26 = scalar_lea.sflag [#allocation3], %s140_s6  ;;  %s5029_s27 = smov 512  }
  0x1d   : > { %s5030_s28 = smov 32   ;;  %167 = sbr.rel (%p5105_p8) target bundleno = 1770 (0x6ea), region = 28 }
  0x1e   : > { %4494 = dma.hbm_to_vmem [thread:$0]  (!%p4492_p2), %s154_s18, 8192, %s156_s25, %s141_s26, %s5029_s27, %s5029_s27, %s5030_s28  }
  0x22   : > { %s5147_s30 = sand.u32 1, %s5008_s10  }
  0x23   : > { %s4471_s5 = sshll.u32 %s5147_s30, 9  ;;  %s170_s7 = scalar_lea.sflag [#allocation3], %s5147_s30 }
  0x24   : > { %s5151_s15 = scalar_lea.vmem [#allocation2], %s4471_s5 }
  0x25   : > { %4991 = dma.done.wait (%p5092_p4), %s170_s7, 8192  }
  0x26   : > { %4993 = vsyncadd (%p5092_p4), %s170_s7, 4294959104 }
  0x27   : > { %4995 = dma.done.wait (%p5082_p1), [#allocation6], 98304  }
  0x28   : > { %4997 = vsyncadd (%p5082_p1), [#allocation6], 4294868992  ;;  %v830_v0 = vld [vmem:[#allocation5 + $0x11a0] sm:$0xff]  ;;  %v5162_v62 = vld [vmem:[%s5151_s15 + $0x10] sm:$0xff]  ;;  %s4477_s17 = smul.u32 1536, %s5147_s30  ;;  %s4958_s27 = scalar_lea.hbm %s7317_s2, 3072 }
  0x29   : > { %v818_v1 = vld [vmem:[#allocation5 + $0x1140] sm:$0xff]  ;;  %1164 = vmatpush.msra.mxu2 %v830_v0  ;;  %v5165_v63 = vld [vmem:[%s5151_s15 + $0x18] sm:$0xff]  ;;  %v831_v0 = vld [vmem:[#allocation5 + $0x11a8] sm:$0xff]  ;;  %s4478_s24 = smul.u32 1536, %s5016_s12  ;;  %s4347_s12 = scalar_lea.sflag [#allocation4], %s5147_s30 }
  0x2a   : > { %v1022_v2 = vld [vmem:[#allocation5 + $0x17a0] sm:$0xff]  ;;  %s5422_s19 = scalar_lea.vmem [#allocation7], %s4477_s17 }
  0x2b   : > { %1229 = vmatpush.msra.mxu3 %v1022_v2  ;;  %v446_v3 = vld [vmem:[#allocation5 + $0x5a0] sm:$0xff]  ;;  %1165 = vmatpush.msra.mxu2 %v818_v1  ;;  %v1023_v1 = vld [vmem:[#allocation5 + $0x17a8] sm:$0xff]  ;;  %s4361_s16 = scalar_lea.hbm %s7317_s2, %s4478_s24  ;;  %s4362_s21 = sshll.u32 %s5422_s19, 4  ;;  %s4363_s21 = int_to_ptr.vmem [resolvable:$true] %s4362_s21 }
  0x2c   : > { %v638_v4 = vld [vmem:[#allocation5 + $0xba0] sm:$0xff]  ;;  %1034 = vmatpush.msra.mxu0 %v446_v3  ;;  %s4364_s22 = sshll.u32 %s4361_s16, 4  ;;  %s4365_s22 = int_to_ptr.hbm [resolvable:$true] %s4364_s22 }
  0x2d   : > { %v806_v5 = vld [vmem:[#allocation5 + $0x10e0] sm:$0xff]  ;;  %1099 = vmatpush.msra.mxu1 %v638_v4  ;;  %s4952_s23 = sshra.s32 %s4365_s22, 4  ;;  %s4953_s23 = int_to_ptr.hbm [resolvable:$true] %s4952_s23 }
  0x2e   : > { %v1010_v6 = vld [vmem:[#allocation5 + $0x1740] sm:$0xff]  ;;  %1166 = vmatpush.msra.mxu2 %v806_v5  ;;  %v5173_v5 = vld [vmem:[%s5151_s15 + $0x8] sm:$0xff]  ;;  %s4954_s25 = scalar_lea.hbm %s4953_s23, 1536  ;;  %p4959_p10 = scmp.lt.s32.totalorder %s4953_s23, %s7317_s2 }
  0x2f   : > { %v434_v7 = vld [vmem:[#allocation5 + $0x540] sm:$0xff]  ;;  %1230 = vmatpush.msra.mxu3 %v1010_v6  ;;  %v447_v6 = vld [vmem:[#allocation5 + $0x5a8] sm:$0xff]  ;;  %p4955_p1 = scmp.ne.s32.totalorder %s4953_s23, %s4954_s25  ;;  %p4960_p12 = scmp.lt.s32.totalorder %s4958_s27, %s4954_s25 }
  0x30   : > { %v626_v8 = vld [vmem:[#allocation5 + $0xb40] sm:$0xff]  ;;  %1035 = vmatpush.msra.mxu0 %v434_v7  ;;  %v639_v7 = vld [vmem:[#allocation5 + $0xba8] sm:$0xff] }
  0x31   : > { %v998_v9 = vld [vmem:[#allocation5 + $0x16e0] sm:$0xff]  ;;  %1100 = vmatpush.msra.mxu1 %v626_v8  ;;  %v819_v8 = vld [vmem:[#allocation5 + $0x1148] sm:$0xff]  ;;  %p4956_p4 = pnand %p4955_p1, %p5127_p5  ;;  %p4961_p13 = por %p4960_p12, %p4959_p10 }
  0x32   : > { %v422_v10 = vld [vmem:[#allocation5 + $0x4e0] sm:$0xff]  ;;  %1231 = vmatpush.msra.mxu3 %v998_v9  ;;  %v1011_v9 = vld [vmem:[#allocation5 + $0x1748] sm:$0xff] }
  0x33   : > { %v794_v11 = vld [vmem:[#allocation5 + $0x1080] sm:$0xff]  ;;  %1036 = vmatpush.msra.mxu0 %v422_v10  ;;  %v435_v10 = vld [vmem:[#allocation5 + $0x548] sm:$0xff]  ;;  %p4957_p8 = pneg %p4956_p4 }
  0x34   : > { %v614_v12 = vld [vmem:[#allocation5 + $0xae0] sm:$0xff]  ;;  %1167 = vmatpush.msra.mxu2 %v794_v11  ;;  %v627_v11 = vld [vmem:[#allocation5 + $0xb48] sm:$0xff] }
  0x35   : > { %v986_v13 = vld [vmem:[#allocation5 + $0x1680] sm:$0xff]  ;;  %1101 = vmatpush.msra.mxu1 %v614_v12  ;;  %v807_v12 = vld [vmem:[#allocation5 + $0x10e8] sm:$0xff]  ;;  %p4962_p0 = pnand %p4961_p13, %p4957_p8 }
  0x36   : > { %v410_v14 = vld [vmem:[#allocation5 + $0x480] sm:$0xff]  ;;  %1232 = vmatpush.msra.mxu3 %v986_v13  ;;  %v999_v13 = vld [vmem:[#allocation5 + $0x16e8] sm:$0xff] }
  0x37   : > { %v602_v15 = vld [vmem:[#allocation5 + $0xa80] sm:$0xff]  ;;  %1037 = vmatpush.msra.mxu0 %v410_v14  ;;  %v5178_v14 = vld [vmem:[%s5151_s15 + $0x30] sm:$0xff] }
  0x38   : > { %v782_v16 = vld [vmem:[#allocation5 + $0x1020] sm:$0xff]  ;;  %1102 = vmatpush.msra.mxu1 %v602_v15  ;;  %v5181_v15 = vld [vmem:[%s5151_s15 + $0x38] sm:$0xff] }
  0x39   : > { %v974_v17 = vld [vmem:[#allocation5 + $0x1620] sm:$0xff]  ;;  %1168 = vmatpush.msra.mxu2 %v782_v16  ;;  %v423_v16 = vld [vmem:[#allocation5 + $0x4e8] sm:$0xff] }
  0x3a   : > { %v398_v18 = vld [vmem:[#allocation5 + $0x420] sm:$0xff]  ;;  %1233 = vmatpush.msra.mxu3 %v974_v17  ;;  %v615_v17 = vld [vmem:[#allocation5 + $0xae8] sm:$0xff] }
  0x3b   : > { %v590_v19 = vld [vmem:[#allocation5 + $0xa20] sm:$0xff]  ;;  %1038 = vmatpush.msra.mxu0 %v398_v18  ;;  %v795_v18 = vld [vmem:[#allocation5 + $0x1088] sm:$0xff] }
  0x3c   : > { %v770_v20 = vld [vmem:[#allocation5 + $0xfc0] sm:$0xff]  ;;  %1103 = vmatpush.msra.mxu1 %v590_v19  ;;  %v987_v19 = vld [vmem:[#allocation5 + $0x1688] sm:$0xff] }
  0x3d   : > { %v962_v21 = vld [vmem:[#allocation5 + $0x15c0] sm:$0xff]  ;;  %1169 = vmatpush.msra.mxu2 %v770_v20 }
  0x3e   : > { %v386_v22 = vld [vmem:[#allocation5 + $0x3c0] sm:$0xff]  ;;  %1234 = vmatpush.msra.mxu3 %v962_v21  ;;  %v5189_v21 = vld [vmem:[%s5151_s15 + $0x28] sm:$0xff] }
  0x3f   : > { %v578_v23 = vld [vmem:[#allocation5 + $0x9c0] sm:$0xff]  ;;  %1039 = vmatpush.msra.mxu0 %v386_v22  ;;  %v411_v22 = vld [vmem:[#allocation5 + $0x488] sm:$0xff] }
  0x40   : > { %v758_v24 = vld [vmem:[#allocation5 + $0xf60] sm:$0xff]  ;;  %1104 = vmatpush.msra.mxu1 %v578_v23  ;;  %v603_v23 = vld [vmem:[#allocation5 + $0xa88] sm:$0xff] }
  0x41   : > { %v950_v25 = vld [vmem:[#allocation5 + $0x1560] sm:$0xff]  ;;  %1170 = vmatpush.msra.mxu2 %v758_v24  ;;  %v783_v24 = vld [vmem:[#allocation5 + $0x1028] sm:$0xff] }
  0x42   : > { %v374_v26 = vld [vmem:[#allocation5 + $0x360] sm:$0xff]  ;;  %1235 = vmatpush.msra.mxu3 %v950_v25  ;;  %v975_v25 = vld [vmem:[#allocation5 + $0x1628] sm:$0xff] }
  0x43   : > { %v566_v27 = vld [vmem:[#allocation5 + $0x960] sm:$0xff]  ;;  %1040 = vmatpush.msra.mxu0 %v374_v26  ;;  %v399_v26 = vld [vmem:[#allocation5 + $0x428] sm:$0xff] }
  0x44   : > { %v746_v28 = vld [vmem:[#allocation5 + $0xf00] sm:$0xff]  ;;  %1105 = vmatpush.msra.mxu1 %v566_v27  ;;  %v591_v27 = vld [vmem:[#allocation5 + $0xa28] sm:$0xff] }
  0x45   : > { %v938_v29 = vld [vmem:[#allocation5 + $0x1500] sm:$0xff]  ;;  %1171 = vmatpush.msra.mxu2 %v746_v28  ;;  %v771_v28 = vld [vmem:[#allocation5 + $0xfc8] sm:$0xff] }
  0x46   : > { %v362_v30 = vld [vmem:[#allocation5 + $0x300] sm:$0xff]  ;;  %1236 = vmatpush.msra.mxu3 %v938_v29  ;;  %v963_v29 = vld [vmem:[#allocation5 + $0x15c8] sm:$0xff] }
  0x47   : > { %v554_v31 = vld [vmem:[#allocation5 + $0x900] sm:$0xff]  ;;  %1041 = vmatpush.msra.mxu0 %v362_v30  ;;  %v5194_v30 = vld [vmem:[%s5151_s15 + $0x50] sm:$0xff] }
  0x48   : > { %v734_v32 = vld [vmem:[#allocation5 + $0xea0] sm:$0xff]  ;;  %1106 = vmatpush.msra.mxu1 %v554_v31  ;;  %v5197_v31 = vld [vmem:[%s5151_s15 + $0x58] sm:$0xff] }
  0x49   : > { %v926_v33 = vld [vmem:[#allocation5 + $0x14a0] sm:$0xff]  ;;  %1172 = vmatpush.msra.mxu2 %v734_v32  ;;  %v387_v32 = vld [vmem:[#allocation5 + $0x3c8] sm:$0xff] }
  0x4a   : > { %v350_v34 = vld [vmem:[#allocation5 + $0x2a0] sm:$0xff]  ;;  %1237 = vmatpush.msra.mxu3 %v926_v33  ;;  %v579_v33 = vld [vmem:[#allocation5 + $0x9c8] sm:$0xff] }
  0x4b   : > { %v542_v35 = vld [vmem:[#allocation5 + $0x8a0] sm:$0xff]  ;;  %1042 = vmatpush.msra.mxu0 %v350_v34 }
  0x4c   : > { %v722_v36 = vld [vmem:[#allocation5 + $0xe40] sm:$0xff]  ;;  %1107 = vmatpush.msra.mxu1 %v542_v35  ;;  %v5205_v35 = vld [vmem:[%s5151_s15 + $0x48] sm:$0xff] }
  0x4d   : > { %v914_v37 = vld [vmem:[#allocation5 + $0x1440] sm:$0xff]  ;;  %1173 = vmatpush.msra.mxu2 %v722_v36  ;;  %v759_v36 = vld [vmem:[#allocation5 + $0xf68] sm:$0xff] }
  0x4e   : > { %v338_v38 = vld [vmem:[#allocation5 + $0x240] sm:$0xff]  ;;  %1238 = vmatpush.msra.mxu3 %v914_v37  ;;  %v951_v37 = vld [vmem:[#allocation5 + $0x1568] sm:$0xff] }
  0x4f   : > { %v530_v39 = vld [vmem:[#allocation5 + $0x840] sm:$0xff]  ;;  %1043 = vmatpush.msra.mxu0 %v338_v38  ;;  %v375_v38 = vld [vmem:[#allocation5 + $0x368] sm:$0xff] }
  0x50   : > { %v710_v40 = vld [vmem:[#allocation5 + $0xde0] sm:$0xff]  ;;  %1108 = vmatpush.msra.mxu1 %v530_v39  ;;  %v567_v39 = vld [vmem:[#allocation5 + $0x968] sm:$0xff] }
  0x51   : > { %v902_v41 = vld [vmem:[#allocation5 + $0x13e0] sm:$0xff]  ;;  %1174 = vmatpush.msra.mxu2 %v710_v40  ;;  %v5210_v40 = vld [vmem:[%s5151_s15 + $0x70] sm:$0xff] }
  0x52   : > { %v326_v42 = vld [vmem:[#allocation5 + $0x1e0] sm:$0xff]  ;;  %1239 = vmatpush.msra.mxu3 %v902_v41  ;;  %v5213_v41 = vld [vmem:[%s5151_s15 + $0x78] sm:$0xff] }
  0x53   : > { %v518_v43 = vld [vmem:[#allocation5 + $0x7e0] sm:$0xff]  ;;  %1044 = vmatpush.msra.mxu0 %v326_v42 }
  0x54   : > { %v698_v44 = vld [vmem:[#allocation5 + $0xd80] sm:$0xff]  ;;  %1109 = vmatpush.msra.mxu1 %v518_v43  ;;  %v5221_v43 = vld [vmem:[%s5151_s15 + $0x68] sm:$0xff] }
  0x55   : > { %v890_v45 = vld [vmem:[#allocation5 + $0x1380] sm:$0xff]  ;;  %1175 = vmatpush.msra.mxu2 %v698_v44  ;;  %v747_v44 = vld [vmem:[#allocation5 + $0xf08] sm:$0xff] }
  0x56   : > { %v314_v46 = vld [vmem:[#allocation5 + $0x180] sm:$0xff]  ;;  %1240 = vmatpush.msra.mxu3 %v890_v45  ;;  %v939_v45 = vld [vmem:[#allocation5 + $0x1508] sm:$0xff] }
  0x57   : > { %v506_v47 = vld [vmem:[#allocation5 + $0x780] sm:$0xff]  ;;  %1045 = vmatpush.msra.mxu0 %v314_v46  ;;  %v363_v46 = vld [vmem:[#allocation5 + $0x308] sm:$0xff] }
  0x58   : > { %v686_v48 = vld [vmem:[#allocation5 + $0xd20] sm:$0xff]  ;;  %1110 = vmatpush.msra.mxu1 %v506_v47  ;;  %v555_v47 = vld [vmem:[#allocation5 + $0x908] sm:$0xff] }
  0x59   : > { %v878_v49 = vld [vmem:[#allocation5 + $0x1320] sm:$0xff]  ;;  %1176 = vmatpush.msra.mxu2 %v686_v48  ;;  %v5226_v48 = vld [vmem:[%s5151_s15 + $0x90] sm:$0xff] }
  0x5a   : > { %v302_v50 = vld [vmem:[#allocation5 + $0x120] sm:$0xff]  ;;  %1241 = vmatpush.msra.mxu3 %v878_v49  ;;  %v5229_v49 = vld [vmem:[%s5151_s15 + $0x98] sm:$0xff] }
  0x5b   : > { %v494_v51 = vld [vmem:[#allocation5 + $0x720] sm:$0xff]  ;;  %1046 = vmatpush.msra.mxu0 %v302_v50 }
  0x5c   : > { %v674_v52 = vld [vmem:[#allocation5 + $0xcc0] sm:$0xff]  ;;  %1111 = vmatpush.msra.mxu1 %v494_v51  ;;  %v5237_v51 = vld [vmem:[%s5151_s15 + $0x88] sm:$0xff] }
  0x5d   : > { %v866_v53 = vld [vmem:[#allocation5 + $0x12c0] sm:$0xff]  ;;  %1177 = vmatpush.msra.mxu2 %v674_v52  ;;  %v735_v52 = vld [vmem:[#allocation5 + $0xea8] sm:$0xff] }
  0x5e   : > { %v290_v54 = vld [vmem:[#allocation5 + $0xc0] sm:$0xff]  ;;  %1242 = vmatpush.msra.mxu3 %v866_v53  ;;  %v927_v53 = vld [vmem:[#allocation5 + $0x14a8] sm:$0xff] }
  0x5f   : > { %v482_v55 = vld [vmem:[#allocation5 + $0x6c0] sm:$0xff]  ;;  %1047 = vmatpush.msra.mxu0 %v290_v54  ;;  %v351_v54 = vld [vmem:[#allocation5 + $0x2a8] sm:$0xff] }
  0x60   : > { %v662_v56 = vld [vmem:[#allocation5 + $0xc60] sm:$0xff]  ;;  %1112 = vmatpush.msra.mxu1 %v482_v55  ;;  %v543_v55 = vld [vmem:[#allocation5 + $0x8a8] sm:$0xff] }
  0x61   : > { %v854_v57 = vld [vmem:[#allocation5 + $0x1260] sm:$0xff]  ;;  %1178 = vmatpush.msra.mxu2 %v662_v56  ;;  %v5242_v56 = vld [vmem:[%s5151_s15 + $0xb0] sm:$0xff] }
  0x62   : > { %v278_v58 = vld [vmem:[#allocation5 + $0x60] sm:$0xff]  ;;  %1243 = vmatpush.msra.mxu3 %v854_v57  ;;  %v5245_v57 = vld [vmem:[%s5151_s15 + $0xb8] sm:$0xff] }
  0x63   : > { %v470_v59 = vld [vmem:[#allocation5 + $0x660] sm:$0xff]  ;;  %1048 = vmatpush.msra.mxu0 %v278_v58 }
  0x64   : > { %v650_v60 = vld [vmem:[#allocation5 + $0xc00] sm:$0xff]  ;;  %1113 = vmatpush.msra.mxu1 %v470_v59  ;;  %v5253_v59 = vld [vmem:[%s5151_s15 + $0xa8] sm:$0xff] }
  0x65   : > { %v842_v61 = vld [vmem:[#allocation5 + $0x1200] sm:$0xff]  ;;  %1179 = vmatpush.msra.mxu2 %v650_v60  ;;  %v723_v60 = vld [vmem:[#allocation5 + $0xe48] sm:$0xff] }
  0x66   : > { %1244 = vmatpush.msra.mxu3 %v842_v61  ;;  %v266_v2 = vld [vmem:[#allocation5] sm:$0xff]  ;;  %1180 = vmatmul.f32.vlgmr.msra.gmra.mxu2 %v5162_v62  ;;  %v915_v61 = vld [vmem:[#allocation5 + $0x1448] sm:$0xff] }
  0x67   : > { %v458_v3 = vld [vmem:[#allocation5 + $0x600] sm:$0xff]  ;;  %1245 = vmatmul.f32.vlgmr.msra.gmra.mxu3 %v5165_v63  ;;  %1424 = vmatpush.msrb.mxu2 %v831_v0  ;;  %v339_v0 = vld [vmem:[#allocation5 + $0x248] sm:$0xff] }
  0x68   : > { %v5170_v4 = vld [vmem:[%s5151_s15] sm:$0xff]  ;;  %1489 = vmatpush.msrb.mxu3 %v1023_v1  ;;  %1049 = vmatpush.msra.mxu0 %v266_v2  ;;  %v531_v1 = vld [vmem:[#allocation5 + $0x848] sm:$0xff]  ;;  %v5258_v2 = vld [vmem:[%s5151_s15 + $0xd0] sm:$0xff] }
  0x69   : > { %1114 = vmatpush.msra.mxu1 %v458_v3  ;;  %1050 = vmatmul.f32.vlgmr.msra.gmra.mxu0 %v5170_v4  ;;  %v5186_v20 = vld [vmem:[%s5151_s15 + $0x20] sm:$0xff]  ;;  %v5261_v3 = vld [vmem:[%s5151_s15 + $0xd8] sm:$0xff] }
  0x6a   : > { %1115 = vmatmul.f32.vlgmr.msra.gmra.mxu1 %v5173_v5  ;;  %1294 = vmatpush.msrb.mxu0 %v447_v6  ;;  %v5200_v34 = vld [vmem:[%s5151_s15 + $0x40] sm:$0xff] }
  0x6b   : > { %1359 = vmatpush.msrb.mxu1 %v639_v7  ;;  %1425 = vmatpush.msrb.mxu2 %v819_v8  ;;  %v5216_v42 = vld [vmem:[%s5151_s15 + $0x60] sm:$0xff]  ;;  %v5269_v7 = vld [vmem:[%s5151_s15 + $0xc8] sm:$0xff] }
  0x6c   : > { %1490 = vmatpush.msrb.mxu3 %v1011_v9  ;;  %1295 = vmatpush.msrb.mxu0 %v435_v10  ;;  %v5232_v50 = vld [vmem:[%s5151_s15 + $0x80] sm:$0xff]  ;;  %v711_v8 = vld [vmem:[#allocation5 + $0xde8] sm:$0xff] }
  0x6d   : > { %1360 = vmatpush.msrb.mxu1 %v627_v11  ;;  %1426 = vmatpush.msrb.mxu2 %v807_v12  ;;  %v5248_v58 = vld [vmem:[%s5151_s15 + $0xa0] sm:$0xff]  ;;  %v903_v9 = vld [vmem:[#allocation5 + $0x13e8] sm:$0xff]  ;;  %v5274_v12 = vld [vmem:[%s5151_s15 + $0xf0] sm:$0xff] }
  0x6e   : > { %1491 = vmatpush.msrb.mxu3 %v999_v13  ;;  %1183 = vmatmul.f32.gmra.mxu2 %v5178_v14  ;;  %v5264_v6 = vld [vmem:[%s5151_s15 + $0xc0] sm:$0xff]  ;;  %v327_v10 = vld [vmem:[#allocation5 + $0x1e8] sm:$0xff]  ;;  %v5277_v13 = vld [vmem:[%s5151_s15 + $0xf8] sm:$0xff] }
  0x6f   : > { %1248 = vmatmul.f32.gmra.mxu3 %v5181_v15  ;;  %1296 = vmatpush.msrb.mxu0 %v423_v16  ;;  %v519_v11 = vld [vmem:[#allocation5 + $0x7e8] sm:$0xff]  ;;  %v5280_v16 = vld [vmem:[%s5151_s15 + $0xe0] sm:$0xff] }
  0x70   : > { %1361 = vmatpush.msrb.mxu1 %v615_v17  ;;  %1427 = vmatpush.msrb.mxu2 %v795_v18  ;;  %v5285_v17 = vld [vmem:[%s5151_s15 + $0xe8] sm:$0xff] }
  0x71   : > { %1492 = vmatpush.msrb.mxu3 %v987_v19  ;;  %1053 = vmatmul.f32.gmra.mxu0 %v5186_v20  ;;  %v699_v18 = vld [vmem:[#allocation5 + $0xd88] sm:$0xff] }
  0x72   : > { %1118 = vmatmul.f32.gmra.mxu1 %v5189_v21  ;;  %1297 = vmatpush.msrb.mxu0 %v411_v22  ;;  %v891_v19 = vld [vmem:[#allocation5 + $0x1388] sm:$0xff] }
  0x73   : > { %1362 = vmatpush.msrb.mxu1 %v603_v23  ;;  %1428 = vmatpush.msrb.mxu2 %v783_v24  ;;  %v315_v22 = vld [vmem:[#allocation5 + $0x188] sm:$0xff]  ;;  %v5290_v24 = vld [vmem:[%s5151_s15 + $0x110] sm:$0xff] }
  0x74   : > { %1493 = vmatpush.msrb.mxu3 %v975_v25  ;;  %1298 = vmatpush.msrb.mxu0 %v399_v26  ;;  %v507_v23 = vld [vmem:[#allocation5 + $0x788] sm:$0xff]  ;;  %v5293_v25 = vld [vmem:[%s5151_s15 + $0x118] sm:$0xff]  ;;  %v5296_v26 = vld [vmem:[%s5151_s15 + $0x100] sm:$0xff] }
  0x75   : > { %1363 = vmatpush.msrb.mxu1 %v591_v27  ;;  %1429 = vmatpush.msrb.mxu2 %v771_v28  ;;  %v5301_v27 = vld [vmem:[%s5151_s15 + $0x108] sm:$0xff] }
  0x76   : > { %1494 = vmatpush.msrb.mxu3 %v963_v29  ;;  %1186 = vmatmul.f32.gmra.mxu2 %v5194_v30  ;;  %v687_v28 = vld [vmem:[#allocation5 + $0xd28] sm:$0xff] }
  0x77   : > { %1251 = vmatmul.f32.gmra.mxu3 %v5197_v31  ;;  %1299 = vmatpush.msrb.mxu0 %v387_v32  ;;  %v879_v29 = vld [vmem:[#allocation5 + $0x1328] sm:$0xff] }
  0x78   : > { %1364 = vmatpush.msrb.mxu1 %v579_v33  ;;  %1430 = vmatpush.msrb.mxu2 %v759_v36  ;;  %v303_v32 = vld [vmem:[#allocation5 + $0x128] sm:$0xff]  ;;  %v5306_v36 = vld [vmem:[%s5151_s15 + $0x130] sm:$0xff] }
  0x79   : > { %1495 = vmatpush.msrb.mxu3 %v951_v37  ;;  %1056 = vmatmul.f32.gmra.mxu0 %v5200_v34  ;;  %v495_v33 = vld [vmem:[#allocation5 + $0x728] sm:$0xff]  ;;  %v5309_v37 = vld [vmem:[%s5151_s15 + $0x138] sm:$0xff] }
  0x7a   : > { %1121 = vmatmul.f32.gmra.mxu1 %v5205_v35  ;;  %1300 = vmatpush.msrb.mxu0 %v375_v38  ;;  %v5312_v38 = vld [vmem:[%s5151_s15 + $0x120] sm:$0xff] }
  0x7b   : > { %1365 = vmatpush.msrb.mxu1 %v567_v39  ;;  %1431 = vmatpush.msrb.mxu2 %v747_v44  ;;  %v5317_v39 = vld [vmem:[%s5151_s15 + $0x128] sm:$0xff] }
  0x7c   : > { %1496 = vmatpush.msrb.mxu3 %v939_v45  ;;  %1301 = vmatpush.msrb.mxu0 %v363_v46  ;;  %v675_v44 = vld [vmem:[#allocation5 + $0xcc8] sm:$0xff] }
  0x7d   : > { %1366 = vmatpush.msrb.mxu1 %v555_v47  ;;  %1432 = vmatpush.msrb.mxu2 %v735_v52  ;;  %v867_v45 = vld [vmem:[#allocation5 + $0x12c8] sm:$0xff]  ;;  %v5322_v52 = vld [vmem:[%s5151_s15 + $0x150] sm:$0xff] }
  0x7e   : > { %1189 = vmatmul.f32.gmra.mxu2 %v5210_v40  ;;  %1497 = vmatpush.msrb.mxu3 %v927_v53  ;;  %v291_v46 = vld [vmem:[#allocation5 + $0xc8] sm:$0xff]  ;;  %v5325_v53 = vld [vmem:[%s5151_s15 + $0x158] sm:$0xff] }
  0x7f   : > { %1254 = vmatmul.f32.gmra.mxu3 %v5213_v41  ;;  %1302 = vmatpush.msrb.mxu0 %v351_v54  ;;  %v483_v47 = vld [vmem:[#allocation5 + $0x6c8] sm:$0xff]  ;;  %v5328_v54 = vld [vmem:[%s5151_s15 + $0x140] sm:$0xff] }
  0x80   : > { %1367 = vmatpush.msrb.mxu1 %v543_v55  ;;  %1433 = vmatpush.msrb.mxu2 %v723_v60  ;;  %v5333_v55 = vld [vmem:[%s5151_s15 + $0x148] sm:$0xff] }
  0x81   : > { %1059 = vmatmul.f32.gmra.mxu0 %v5216_v42  ;;  %1498 = vmatpush.msrb.mxu3 %v915_v61  ;;  %v663_v60 = vld [vmem:[#allocation5 + $0xc68] sm:$0xff] }
  0x82   : > { %1124 = vmatmul.f32.gmra.mxu1 %v5221_v43  ;;  %1303 = vmatpush.msrb.mxu0 %v339_v0  ;;  %v855_v61 = vld [vmem:[#allocation5 + $0x1268] sm:$0xff] }
  0x83   : > { %1368 = vmatpush.msrb.mxu1 %v531_v1  ;;  %1434 = vmatpush.msrb.mxu2 %v711_v8  ;;  %v279_v0 = vld [vmem:[#allocation5 + $0x68] sm:$0xff]  ;;  %v5338_v8 = vld [vmem:[%s5151_s15 + $0x170] sm:$0xff] }
  0x84   : > { %1499 = vmatpush.msrb.mxu3 %v903_v9  ;;  %1304 = vmatpush.msrb.mxu0 %v327_v10  ;;  %v471_v1 = vld [vmem:[#allocation5 + $0x668] sm:$0xff]  ;;  %v5341_v9 = vld [vmem:[%s5151_s15 + $0x178] sm:$0xff]  ;;  %v5344_v10 = vld [vmem:[%s5151_s15 + $0x160] sm:$0xff] }
  0x85   : > { %1369 = vmatpush.msrb.mxu1 %v519_v11  ;;  %1435 = vmatpush.msrb.mxu2 %v699_v18  ;;  %v5349_v11 = vld [vmem:[%s5151_s15 + $0x168] sm:$0xff] }
  0x86   : > { %1192 = vmatmul.f32.gmra.mxu2 %v5226_v48  ;;  %1500 = vmatpush.msrb.mxu3 %v891_v19  ;;  %v651_v18 = vld [vmem:[#allocation5 + $0xc08] sm:$0xff] }
  0x87   : > { %1257 = vmatmul.f32.gmra.mxu3 %v5229_v49  ;;  %1305 = vmatpush.msrb.mxu0 %v315_v22  ;;  %v843_v19 = vld [vmem:[#allocation5 + $0x1208] sm:$0xff] }
  0x88   : > { %1370 = vmatpush.msrb.mxu1 %v507_v23  ;;  %1436 = vmatpush.msrb.mxu2 %v687_v28  ;;  %v267_v22 = vld [vmem:[#allocation5 + $0x8] sm:$0xff]  ;;  %v5354_v28 = vld [vmem:[%s5151_s15 + $0x190] sm:$0xff] }
  0x89   : > { %1062 = vmatmul.f32.gmra.mxu0 %v5232_v50  ;;  %1501 = vmatpush.msrb.mxu3 %v879_v29  ;;  %v459_v23 = vld [vmem:[#allocation5 + $0x608] sm:$0xff]  ;;  %v5357_v29 = vld [vmem:[%s5151_s15 + $0x198] sm:$0xff] }
  0x8a   : > { %1127 = vmatmul.f32.gmra.mxu1 %v5237_v51  ;;  %1306 = vmatpush.msrb.mxu0 %v303_v32  ;;  %v5362_v32 = vld [vmem:[%s5151_s15 + $0x180] sm:$0xff] }
  0x8b   : > { %1371 = vmatpush.msrb.mxu1 %v495_v33  ;;  %1437 = vmatpush.msrb.mxu2 %v675_v44  ;;  %v5365_v33 = vld [vmem:[%s5151_s15 + $0x188] sm:$0xff]  ;;  %v832_v44 = vld [vmem:[#allocation5 + $0x11b0] sm:$0xff] }
  0x8c   : > { %1502 = vmatpush.msrb.mxu3 %v867_v45  ;;  %1307 = vmatpush.msrb.mxu0 %v291_v46  ;;  %v1024_v45 = vld [vmem:[#allocation5 + $0x17b0] sm:$0xff] }
  0x8d   : > { %1372 = vmatpush.msrb.mxu1 %v483_v47  ;;  %1438 = vmatpush.msrb.mxu2 %v663_v60  ;;  %v448_v46 = vld [vmem:[#allocation5 + $0x5b0] sm:$0xff] }
  0x8e   : > { %1195 = vmatmul.f32.gmra.mxu2 %v5242_v56  ;;  %1503 = vmatpush.msrb.mxu3 %v855_v61  ;;  %v640_v47 = vld [vmem:[#allocation5 + $0xbb0] sm:$0xff]  ;;  %v5373_v61 = vld [vmem:[%s5151_s15 + $0x1b8] sm:$0xff] }
  0x8f   : > { %1260 = vmatmul.f32.gmra.mxu3 %v5245_v57  ;;  %1308 = vmatpush.msrb.mxu0 %v279_v0  ;;  %v5370_v60 = vld [vmem:[%s5151_s15 + $0x1b0] sm:$0xff]  ;;  %v5378_v0 = vld [vmem:[%s5151_s15 + $0x1a0] sm:$0xff] }
  0x90   : > { %1373 = vmatpush.msrb.mxu1 %v471_v1  ;;  %1439 = vmatpush.msrb.mxu2 %v651_v18  ;;  %7399 = vst [vmem:[#allocation11_spill] sm:$0xff] %v5378_v0  ;;  %v5381_v1 = vld [vmem:[%s5151_s15 + $0x1a8] sm:$0xff]  ;;  %v820_v18 = vld [vmem:[#allocation5 + $0x1150] sm:$0xff] }
  0x91   : > { %1065 = vmatmul.f32.gmra.mxu0 %v5248_v58  ;;  %1504 = vmatpush.msrb.mxu3 %v843_v19  ;;  %7400 = vst [vmem:[#allocation12_spill] sm:$0xff] %v5381_v1  ;;  %v1012_v19 = vld [vmem:[#allocation5 + $0x1750] sm:$0xff] }
  0x92   : > { %1130 = vmatmul.f32.gmra.mxu1 %v5253_v59  ;;  %1309 = vmatpush.msrb.mxu0 %v267_v22  ;;  %v436_v22 = vld [vmem:[#allocation5 + $0x550] sm:$0xff] }
  0x93   : > { %1374 = vmatpush.msrb.mxu1 %v459_v23  ;;  %1684 = vmatpush.msra.mxu2 %v832_v44  ;;  %v628_v23 = vld [vmem:[#allocation5 + $0xb50] sm:$0xff] }
  0x94   : > { %1749 = vmatpush.msra.mxu3 %v1024_v45  ;;  %1554 = vmatpush.msra.mxu0 %v448_v46  ;;  %v5386_v44 = vld [vmem:[%s5151_s15 + $0x1d0] sm:$0xff]  ;;  %v5389_v45 = vld [vmem:[%s5151_s15 + $0x1d8] sm:$0xff]  ;;  %v5394_v46 = vld [vmem:[%s5151_s15 + $0x1c0] sm:$0xff] }
  0x95   : > { %1619 = vmatpush.msra.mxu1 %v640_v47  ;;  %1685 = vmatpush.msra.mxu2 %v820_v18  ;;  %7401 = vst [vmem:[#allocation13_spill] sm:$0xff] %v5386_v44  ;;  %v5397_v47 = vld [vmem:[%s5151_s15 + $0x1c8] sm:$0xff]  ;;  %v808_v18 = vld [vmem:[#allocation5 + $0x10f0] sm:$0xff] }
  0x96   : > { %1198 = vmatmul.f32.gmra.mxu2 %v5258_v2  ;;  %1750 = vmatpush.msra.mxu3 %v1012_v19  ;;  %7402 = vst [vmem:[#allocation14_spill] sm:$0xff] %v5389_v45  ;;  %v1000_v19 = vld [vmem:[#allocation5 + $0x16f0] sm:$0xff] }
  0x97   : > { %1263 = vmatmul.f32.gmra.mxu3 %v5261_v3  ;;  %1555 = vmatpush.msra.mxu0 %v436_v22  ;;  %7403 = vst [vmem:[#allocation15_spill] sm:$0xff] %v5394_v46  ;;  %v424_v22 = vld [vmem:[#allocation5 + $0x4f0] sm:$0xff] }
  0x98   : > { %1620 = vmatpush.msra.mxu1 %v628_v23  ;;  %7404 = vst [vmem:[#allocation16_spill] sm:$0xff] %v5397_v47  ;;  %1686 = vmatpush.msra.mxu2 %v808_v18  ;;  %v616_v23 = vld [vmem:[#allocation5 + $0xaf0] sm:$0xff]  ;;  %v5413_v18 = vld [vmem:[%s5151_s15 + $0x1e8] sm:$0xff] }
  0x99   : > { %1068 = vmatmul.f32.gmra.mxu0 %v5264_v6  ;;  %1751 = vmatpush.msra.mxu3 %v1000_v19  ;;  %7408 = vst [vmem:[#allocation20_spill] sm:$0xff] %v5413_v18  ;;  %v796_v19 = vld [vmem:[#allocation5 + $0x1090] sm:$0xff] }
  0x9a   : > { %1133 = vmatmul.f32.gmra.mxu1 %v5269_v7  ;;  %1556 = vmatpush.msra.mxu0 %v424_v22  ;;  %v604_v22 = vld [vmem:[#allocation5 + $0xa90] sm:$0xff] }
  0x9b   : > { %1621 = vmatpush.msra.mxu1 %v616_v23  ;;  %1687 = vmatpush.msra.mxu2 %v796_v19  ;;  %v976_v19 = vld [vmem:[#allocation5 + $0x1630] sm:$0xff] }
  0x9d   : > { %1622 = vmatpush.msra.mxu1 %v604_v22  ;;  %v400_v22 = vld [vmem:[#allocation5 + $0x430] sm:$0xff] }
  0x9e   : > { %1201 = vmatmul.f32.gmra.mxu2 %v5274_v12 }
  0x9f   : > { %1266 = vmatmul.f32.gmra.mxu3 %v5277_v13 }
  0xa1   : > { %1071 = vmatmul.f32.gmra.mxu0 %v5280_v16 }
  0xa2   : > { %1136 = vmatmul.f32.gmra.mxu1 %v5285_v17 }
  0xa6   : > { %1204 = vmatmul.f32.gmra.mxu2 %v5290_v24 }
  0xa7   : > { %1269 = vmatmul.f32.gmra.mxu3 %v5293_v25 }
  0xa9   : > { %1074 = vmatmul.f32.gmra.mxu0 %v5296_v26 }
  0xaa   : > { %1139 = vmatmul.f32.gmra.mxu1 %v5301_v27 }
  0xae   : > { %1207 = vmatmul.f32.gmra.mxu2 %v5306_v36 }
  0xaf   : > { %1272 = vmatmul.f32.gmra.mxu3 %v5309_v37 }
  0xb1   : > { %1077 = vmatmul.f32.gmra.mxu0 %v5312_v38 }
  0xb2   : > { %1142 = vmatmul.f32.gmra.mxu1 %v5317_v39 }
  0xb6   : > { %1210 = vmatmul.f32.gmra.mxu2 %v5322_v52 }
  0xb7   : > { %1275 = vmatmul.f32.gmra.mxu3 %v5325_v53 }
  0xb9   : > { %1080 = vmatmul.f32.gmra.mxu0 %v5328_v54 }
  0xba   : > { %1145 = vmatmul.f32.gmra.mxu1 %v5333_v55 }
  0xbe   : > { %1213 = vmatmul.f32.gmra.mxu2 %v5338_v8 }
  0xbf   : > { %1278 = vmatmul.f32.gmra.mxu3 %v5341_v9 }
  0xc1   : > { %1083 = vmatmul.f32.gmra.mxu0 %v5344_v10 }
  0xc2   : > { %1148 = vmatmul.f32.gmra.mxu1 %v5349_v11 }
  0xc6   : > { %1216 = vmatmul.f32.gmra.mxu2 %v5354_v28 }
  0xc7   : > { %1281 = vmatmul.f32.gmra.mxu3 %v5357_v29 }
  0xc9   : > { %1086 = vmatmul.f32.gmra.mxu0 %v5362_v32 }
  0xca   : > { %1151 = vmatmul.f32.gmra.mxu1 %v5365_v33 }
  0xce   : > { %1219 = vmatmul.f32.gmra.mxu2 %v5370_v60 }
  0xcf   : > { %1284 = vmatmul.f32.gmra.mxu3 %v5373_v61 }
  0xd1   : > { %1089 = vmatmul.f32.gmra.mxu0 %v5378_v0 }
  0xd2   : > { %1154 = vmatmul.f32.gmra.mxu1 %v5381_v1  ;;  %v5402_v1 = vld [vmem:[%s5151_s15 + $0x1f0] sm:$0xff] }
  0xd3   : > { %7405 = vst [vmem:[#allocation17_spill] sm:$0xff] %v5402_v1 }
  0xd6   : > { %1222 = vmatmul.f32.gmra.mxu2 %v5386_v44  ;;  %v5405_v44 = vld [vmem:[%s5151_s15 + $0x1f8] sm:$0xff] }
  0xd7   : > { %1287 = vmatmul.f32.gmra.mxu3 %v5389_v45  ;;  %7406 = vst [vmem:[#allocation18_spill] sm:$0xff] %v5405_v44  ;;  %v5410_v45 = vld [vmem:[%s5151_s15 + $0x1e0] sm:$0xff] }
  0xd8   : > { %7407 = vst [vmem:[#allocation19_spill] sm:$0xff] %v5410_v45 }
  0xd9   : > { %1092 = vmatmul.f32.gmra.mxu0 %v5394_v46  ;;  %v412_v46 = vld [vmem:[#allocation5 + $0x490] sm:$0xff] }
  0xda   : > { %1157 = vmatmul.f32.gmra.mxu1 %v5397_v47  ;;  %v988_v47 = vld [vmem:[#allocation5 + $0x1690] sm:$0xff]  ;;  %1557 = vmatpush.msra.mxu0 %v412_v46 }
  0xdb   : > { %1752 = vmatpush.msra.mxu3 %v988_v47 }
  0xdc   : > { %1558 = vmatpush.msra.mxu0 %v400_v22 }
  0xdd   : > { %1753 = vmatpush.msra.mxu3 %v976_v19  ;;  %v580_v19 = vld [vmem:[#allocation5 + $0x9d0] sm:$0xff] }
  0xde   : > { %1225 = vmatmul.f32.gmra.mxu2 %v5402_v1  ;;  %v784_v1 = vld [vmem:[#allocation5 + $0x1030] sm:$0xff] }
  0xdf   : > { %1290 = vmatmul.f32.gmra.mxu3 %v5405_v44  ;;  %1688 = vmatpush.msra.mxu2 %v784_v1 }
  0xe1   : > { %1095 = vmatmul.f32.gmra.mxu0 %v5410_v45  ;;  %v592_v45 = vld [vmem:[#allocation5 + $0xa30] sm:$0xff] }
  0xe2   : > { %1160 = vmatmul.f32.gmra.mxu1 %v5413_v18 }
  0xe3   : > { %1623 = vmatpush.msra.mxu1 %v592_v45 }
  0xe5   : > { %1624 = vmatpush.msra.mxu1 %v580_v19  ;;  %v556_v19 = vld [vmem:[#allocation5 + $0x910] sm:$0xff] }
  0xe6   : > { %1440 = vmatmul.f32.vlgmr.msrb.gmra.mxu2 %v5162_v62  ;;  %v1051_v23 = vpop.f32.mrf.mxu0 }
  0xe7   : > { %v1116_v44 = vpop.f32.mrf.mxu1  ;;  %1505 = vmatmul.f32.vlgmr.msrb.gmra.mxu3 %v5165_v63 }
  0xe8   : > { %v1117_v0 = vadd.f32 %v1116_v44, %v1051_v23  ;;  %v388_v23 = vld [vmem:[#allocation5 + $0x3d0] sm:$0xff] }
  0xe9   : > { %v1181_v47 = vpop.f32.mrf.mxu2  ;;  %1310 = vmatmul.f32.vlgmr.msrb.gmra.mxu0 %v5170_v4  ;;  %v772_v4 = vld [vmem:[#allocation5 + $0xfd0] sm:$0xff] }
  0xea   : > { %1375 = vmatmul.f32.vlgmr.msrb.gmra.mxu1 %v5173_v5  ;;  %v1246_v18 = vpop.f32.mrf.mxu3  ;;  %v1182_v46 = vadd.f32 %v1181_v47, %v1117_v0  ;;  %1689 = vmatpush.msra.mxu2 %v772_v4  ;;  %v964_v0 = vld [vmem:[#allocation5 + $0x15d0] sm:$0xff] }
  0xeb   : > { %1754 = vmatpush.msra.mxu3 %v964_v0  ;;  %1559 = vmatpush.msra.mxu0 %v388_v23  ;;  %v568_v4 = vld [vmem:[#allocation5 + $0x970] sm:$0xff] }
  0xec   : > { %v1247_v62 = vadd.f32 %v1246_v18, %v1182_v46  ;;  %v760_v46 = vld [vmem:[#allocation5 + $0xf70] sm:$0xff]  ;;  %1625 = vmatpush.msra.mxu1 %v568_v4 }
  0xed   : > { %1690 = vmatpush.msra.mxu2 %v760_v46  ;;  %v748_v0 = vld [vmem:[#allocation5 + $0xf10] sm:$0xff] }
  0xee   : > { %4154 = vst [vmem:[%s5422_s19] sm:$0xff] %v1247_v62  ;;  %1443 = vmatmul.f32.gmra.mxu2 %v5178_v14  ;;  %v1054_v63 = vpop.f32.mrf.mxu0  ;;  %v364_v23 = vld [vmem:[#allocation5 + $0x310] sm:$0xff]  ;;  %1626 = vmatpush.msra.mxu1 %v556_v19 }
  0xef   : > { %v1119_v1 = vpop.f32.mrf.mxu1  ;;  %1508 = vmatmul.f32.gmra.mxu3 %v5181_v15  ;;  %1691 = vmatpush.msra.mxu2 %v748_v0 }
  0xf0   : > { %v1120_v5 = vadd.f32 %v1119_v1, %v1054_v63  ;;  %v376_v1 = vld [vmem:[#allocation5 + $0x370] sm:$0xff] }
  0xf1   : > { %v1184_v44 = vpop.f32.mrf.mxu2  ;;  %1313 = vmatmul.f32.gmra.mxu0 %v5186_v20  ;;  %v952_v20 = vld [vmem:[#allocation5 + $0x1570] sm:$0xff] }
  0xf2   : > { %1378 = vmatmul.f32.gmra.mxu1 %v5189_v21  ;;  %v1249_v45 = vpop.f32.mrf.mxu3  ;;  %v1185_v18 = vadd.f32 %v1184_v44, %v1120_v5  ;;  %1755 = vmatpush.msra.mxu3 %v952_v20  ;;  %v352_v20 = vld [vmem:[#allocation5 + $0x2b0] sm:$0xff] }
  0xf3   : > { %1560 = vmatpush.msra.mxu0 %v376_v1 }
  0xf4   : > { %v1250_v14 = vadd.f32 %v1249_v45, %v1185_v18 }
  0xf5   : > { %1561 = vmatpush.msra.mxu0 %v364_v23  ;;  %v520_v23 = vld [vmem:[#allocation5 + $0x7f0] sm:$0xff] }
  0xf6   : > { %4166 = vst [vmem:[%s5422_s19 + $0x60] sm:$0xff] %v1250_v14  ;;  %1446 = vmatmul.f32.gmra.mxu2 %v5194_v30  ;;  %v1057_v15 = vpop.f32.mrf.mxu0 }
  0xf7   : > { %v1122_v47 = vpop.f32.mrf.mxu1  ;;  %1511 = vmatmul.f32.gmra.mxu3 %v5197_v31  ;;  %1562 = vmatpush.msra.mxu0 %v352_v20 }
  0xf8   : > { %v1123_v22 = vadd.f32 %v1122_v47, %v1057_v15  ;;  %v736_v15 = vld [vmem:[#allocation5 + $0xeb0] sm:$0xff] }
  0xf9   : > { %v1187_v21 = vpop.f32.mrf.mxu2  ;;  %1316 = vmatmul.f32.gmra.mxu0 %v5200_v34  ;;  %v940_v34 = vld [vmem:[#allocation5 + $0x1510] sm:$0xff]  ;;  %1692 = vmatpush.msra.mxu2 %v736_v15 }
  0xfa   : > { %1381 = vmatmul.f32.gmra.mxu1 %v5205_v35  ;;  %v1252_v62 = vpop.f32.mrf.mxu3  ;;  %v1188_v63 = vadd.f32 %v1187_v21, %v1123_v22  ;;  %1756 = vmatpush.msra.mxu3 %v940_v34  ;;  %v544_v21 = vld [vmem:[#allocation5 + $0x8b0] sm:$0xff] }
  0xfb   : > { %1627 = vmatpush.msra.mxu1 %v544_v21 }
  0xfc   : > { %v1253_v30 = vadd.f32 %v1252_v62, %v1188_v63  ;;  %v724_v63 = vld [vmem:[#allocation5 + $0xe50] sm:$0xff] }
  0xfd   : > { %1693 = vmatpush.msra.mxu2 %v724_v63  ;;  %v676_v63 = vld [vmem:[#allocation5 + $0xcd0] sm:$0xff] }
  0xfe   : > { %4178 = vst [vmem:[%s5422_s19 + $0xc0] sm:$0xff] %v1253_v30  ;;  %1449 = vmatmul.f32.gmra.mxu2 %v5210_v40  ;;  %v1060_v31 = vpop.f32.mrf.mxu0 }
  0xff   : > { %v1125_v5 = vpop.f32.mrf.mxu1  ;;  %1514 = vmatmul.f32.gmra.mxu3 %v5213_v41 }
 0x100   : > { %v1126_v44 = vadd.f32 %v1125_v5, %v1060_v31  ;;  %v340_v31 = vld [vmem:[#allocation5 + $0x250] sm:$0xff] }
 0x101   : > { %v1190_v35 = vpop.f32.mrf.mxu2  ;;  %1319 = vmatmul.f32.gmra.mxu0 %v5216_v42  ;;  %v928_v42 = vld [vmem:[#allocation5 + $0x14b0] sm:$0xff] }
 0x102   : > { %1384 = vmatmul.f32.gmra.mxu1 %v5221_v43  ;;  %v1255_v45 = vpop.f32.mrf.mxu3  ;;  %v1191_v18 = vadd.f32 %v1190_v35, %v1126_v44  ;;  %1757 = vmatpush.msra.mxu3 %v928_v42  ;;  %v532_v5 = vld [vmem:[#allocation5 + $0x850] sm:$0xff] }
 0x103   : > { %1563 = vmatpush.msra.mxu0 %v340_v31  ;;  %1628 = vmatpush.msra.mxu1 %v532_v5  ;;  %v712_v44 = vld [vmem:[#allocation5 + $0xdf0] sm:$0xff] }
 0x104   : > { %v1256_v40 = vadd.f32 %v1255_v45, %v1191_v18  ;;  %1694 = vmatpush.msra.mxu2 %v712_v44  ;;  %v328_v18 = vld [vmem:[#allocation5 + $0x1f0] sm:$0xff] }
 0x105   : > { %1564 = vmatpush.msra.mxu0 %v328_v18  ;;  %1629 = vmatpush.msra.mxu1 %v520_v23  ;;  %v508_v42 = vld [vmem:[#allocation5 + $0x790] sm:$0xff] }
 0x106   : > { %4190 = vst [vmem:[%s5422_s19 + $0x120] sm:$0xff] %v1256_v40  ;;  %1452 = vmatmul.f32.gmra.mxu2 %v5226_v48  ;;  %v1063_v41 = vpop.f32.mrf.mxu0  ;;  %v700_v40 = vld [vmem:[#allocation5 + $0xd90] sm:$0xff] }
 0x107   : > { %v1128_v14 = vpop.f32.mrf.mxu1  ;;  %1517 = vmatmul.f32.gmra.mxu3 %v5229_v49  ;;  %1695 = vmatpush.msra.mxu2 %v700_v40  ;;  %v664_v5 = vld [vmem:[#allocation5 + $0xc70] sm:$0xff] }
 0x108   : > { %v1129_v47 = vadd.f32 %v1128_v14, %v1063_v41  ;;  %1630 = vmatpush.msra.mxu1 %v508_v42  ;;  %v280_v44 = vld [vmem:[#allocation5 + $0x70] sm:$0xff] }
 0x109   : > { %v1193_v43 = vpop.f32.mrf.mxu2  ;;  %1322 = vmatmul.f32.gmra.mxu0 %v5232_v50  ;;  %v916_v50 = vld [vmem:[#allocation5 + $0x1450] sm:$0xff] }
 0x10a   : > { %1387 = vmatmul.f32.gmra.mxu1 %v5237_v51  ;;  %v1258_v46 = vpop.f32.mrf.mxu3  ;;  %v1194_v22 = vadd.f32 %v1193_v43, %v1129_v47  ;;  %1758 = vmatpush.msra.mxu3 %v916_v50  ;;  %v316_v47 = vld [vmem:[#allocation5 + $0x190] sm:$0xff] }
 0x10b   : > { %1565 = vmatpush.msra.mxu0 %v316_v47  ;;  %v268_v23 = vld [vmem:[#allocation5 + $0x10] sm:$0xff]  ;;  %v821_v47 = vld [vmem:[#allocation5 + $0x1158] sm:$0xff] }
 0x10c   : > { %v1259_v48 = vadd.f32 %v1258_v46, %v1194_v22  ;;  %v688_v46 = vld [vmem:[#allocation5 + $0xd30] sm:$0xff] }
 0x10d   : > { %1696 = vmatpush.msra.mxu2 %v688_v46 }
 0x10e   : > { %4202 = vst [vmem:[%s5422_s19 + $0x180] sm:$0xff] %v1259_v48  ;;  %1455 = vmatmul.f32.gmra.mxu2 %v5242_v56  ;;  %v1066_v49 = vpop.f32.mrf.mxu0  ;;  %v304_v48 = vld [vmem:[#allocation5 + $0x130] sm:$0xff] }
 0x10f   : > { %v1131_v62 = vpop.f32.mrf.mxu1  ;;  %1520 = vmatmul.f32.gmra.mxu3 %v5245_v57  ;;  %1566 = vmatpush.msra.mxu0 %v304_v48  ;;  %v809_v48 = vld [vmem:[#allocation5 + $0x10f8] sm:$0xff] }
 0x110   : > { %v1132_v1 = vadd.f32 %v1131_v62, %v1066_v49  ;;  %v496_v49 = vld [vmem:[#allocation5 + $0x730] sm:$0xff]  ;;  %1697 = vmatpush.msra.mxu2 %v676_v63  ;;  %v7414_v63 = vld [vmem:[#allocation16_spill] sm:$0xff] }
 0x111   : > { %v1196_v51 = vpop.f32.mrf.mxu2  ;;  %1325 = vmatmul.f32.gmra.mxu0 %v5248_v58  ;;  %v904_v58 = vld [vmem:[#allocation5 + $0x13f0] sm:$0xff]  ;;  %1631 = vmatpush.msra.mxu1 %v496_v49 }
 0x112   : > { %1390 = vmatmul.f32.gmra.mxu1 %v5253_v59  ;;  %v1261_v4 = vpop.f32.mrf.mxu3  ;;  %v1197_v30 = vadd.f32 %v1196_v51, %v1132_v1  ;;  %1759 = vmatpush.msra.mxu3 %v904_v58 }
 0x113   : > { %1698 = vmatpush.msra.mxu2 %v664_v5 }
 0x114   : > { %v1262_v56 = vadd.f32 %v1261_v4, %v1197_v30  ;;  %v292_v4 = vld [vmem:[#allocation5 + $0xd0] sm:$0xff] }
 0x115   : > { %v484_v30 = vld [vmem:[#allocation5 + $0x6d0] sm:$0xff]  ;;  %1567 = vmatpush.msra.mxu0 %v292_v4 }
 0x116   : > { %4214 = vst [vmem:[%s5422_s19 + $0x1e0] sm:$0xff] %v1262_v56  ;;  %1458 = vmatmul.f32.gmra.mxu2 %v5258_v2  ;;  %v1069_v57 = vpop.f32.mrf.mxu0  ;;  %1632 = vmatpush.msra.mxu1 %v484_v30  ;;  %v7415_v4 = vld [vmem:[#allocation17_spill] sm:$0xff] }
 0x117   : > { %v1134_v0 = vpop.f32.mrf.mxu1  ;;  %1523 = vmatmul.f32.gmra.mxu3 %v5261_v3  ;;  %1568 = vmatpush.msra.mxu0 %v280_v44 }
 0x118   : > { %v1135_v34 = vadd.f32 %v1134_v0, %v1069_v57 }
 0x119   : > { %v1199_v59 = vpop.f32.mrf.mxu2  ;;  %1328 = vmatmul.f32.gmra.mxu0 %v5264_v6  ;;  %v892_v6 = vld [vmem:[#allocation5 + $0x1390] sm:$0xff] }
 0x11a   : > { %1393 = vmatmul.f32.gmra.mxu1 %v5269_v7  ;;  %v1264_v35 = vpop.f32.mrf.mxu3  ;;  %v1200_v45 = vadd.f32 %v1199_v59, %v1135_v34  ;;  %1760 = vmatpush.msra.mxu3 %v892_v6  ;;  %v472_v34 = vld [vmem:[#allocation5 + $0x670] sm:$0xff] }
 0x11b   : > { %1633 = vmatpush.msra.mxu1 %v472_v34  ;;  %v652_v59 = vld [vmem:[#allocation5 + $0xc10] sm:$0xff]  ;;  %1569 = vmatpush.msra.mxu0 %v268_v23  ;;  %v413_v34 = vld [vmem:[#allocation5 + $0x498] sm:$0xff] }
 0x11c   : > { %v1265_v2 = vadd.f32 %v1264_v35, %v1200_v45  ;;  %1699 = vmatpush.msra.mxu2 %v652_v59 }
 0x11e   : > { %4226 = vst [vmem:[%s5422_s19 + $0x240] sm:$0xff] %v1265_v2  ;;  %1461 = vmatmul.f32.gmra.mxu2 %v5274_v12  ;;  %v1072_v3 = vpop.f32.mrf.mxu0  ;;  %v460_v2 = vld [vmem:[#allocation5 + $0x610] sm:$0xff] }
 0x11f   : > { %v1137_v19 = vpop.f32.mrf.mxu1  ;;  %1526 = vmatmul.f32.gmra.mxu3 %v5277_v13  ;;  %1634 = vmatpush.msra.mxu1 %v460_v2  ;;  %v5509_v2 = vld [vmem:[%s5151_s15] sm:$0xff] }
 0x120   : > { %v1138_v41 = vadd.f32 %v1137_v19, %v1072_v3  ;;  %v833_v19 = vld [vmem:[#allocation5 + $0x11b8] sm:$0xff] }
 0x121   : > { %v1202_v7 = vpop.f32.mrf.mxu2  ;;  %1331 = vmatmul.f32.gmra.mxu0 %v5280_v16  ;;  %v880_v16 = vld [vmem:[#allocation5 + $0x1330] sm:$0xff]  ;;  %1944 = vmatpush.msrb.mxu2 %v833_v19  ;;  %v401_v19 = vld [vmem:[#allocation5 + $0x438] sm:$0xff] }
 0x122   : > { %1396 = vmatmul.f32.gmra.mxu1 %v5285_v17  ;;  %v1267_v14 = vpop.f32.mrf.mxu3  ;;  %v1203_v15 = vadd.f32 %v1202_v7, %v1138_v41  ;;  %1761 = vmatpush.msra.mxu3 %v880_v16  ;;  %v449_v7 = vld [vmem:[#allocation5 + $0x5b8] sm:$0xff] }
 0x123   : > { %1814 = vmatpush.msrb.mxu0 %v449_v7  ;;  %1945 = vmatpush.msrb.mxu2 %v821_v47  ;;  %v629_v16 = vld [vmem:[#allocation5 + $0xb58] sm:$0xff]  ;;  %v5526_v47 = vld [vmem:[%s5151_s15 + $0x20] sm:$0xff] }
 0x124   : > { %v1268_v12 = vadd.f32 %v1267_v14, %v1203_v15  ;;  %v641_v14 = vld [vmem:[#allocation5 + $0xbb8] sm:$0xff] }
 0x125   : > { %1879 = vmatpush.msrb.mxu1 %v641_v14  ;;  %1946 = vmatpush.msrb.mxu2 %v809_v48  ;;  %v5522_v7 = vld [vmem:[%s5151_s15 + $0x38] sm:$0xff]  ;;  %v5543_v48 = vld [vmem:[%s5151_s15 + $0x40] sm:$0xff] }
 0x126   : > { %4238 = vst [vmem:[%s5422_s19 + $0x2a0] sm:$0xff] %v1268_v12  ;;  %1464 = vmatmul.f32.gmra.mxu2 %v5290_v24  ;;  %v1075_v13 = vpop.f32.mrf.mxu0  ;;  %v7409_v12 = vld [vmem:[#allocation11_spill] sm:$0xff]  ;;  %v773_v14 = vld [vmem:[#allocation5 + $0xfd8] sm:$0xff] }
 0x127   : > { %v1140_v43 = vpop.f32.mrf.mxu1  ;;  %1529 = vmatmul.f32.gmra.mxu3 %v5293_v25  ;;  %1880 = vmatpush.msrb.mxu1 %v629_v16 }
 0x128   : > { %v1141_v22 = vadd.f32 %v1140_v43, %v1075_v13  ;;  %v7410_v13 = vld [vmem:[#allocation12_spill] sm:$0xff] }
 0x129   : > { %v1205_v17 = vpop.f32.mrf.mxu2  ;;  %1334 = vmatmul.f32.gmra.mxu0 %v5296_v26  ;;  %v868_v26 = vld [vmem:[#allocation5 + $0x12d0] sm:$0xff] }
 0x12a   : > { %1399 = vmatmul.f32.gmra.mxu1 %v5301_v27  ;;  %v1270_v20 = vpop.f32.mrf.mxu3  ;;  %v1206_v21 = vadd.f32 %v1205_v17, %v1141_v22  ;;  %1762 = vmatpush.msra.mxu3 %v868_v26  ;;  %v437_v22 = vld [vmem:[#allocation5 + $0x558] sm:$0xff] }
 0x12b   : > { %1815 = vmatpush.msrb.mxu0 %v437_v22 }
 0x12c   : > { %v1271_v24 = vadd.f32 %v1270_v20, %v1206_v21  ;;  %v7412_v21 = vld [vmem:[#allocation14_spill] sm:$0xff] }
 0x12e   : > { %4250 = vst [vmem:[%s5422_s19 + $0x300] sm:$0xff] %v1271_v24  ;;  %1467 = vmatmul.f32.gmra.mxu2 %v5306_v36  ;;  %v1078_v25 = vpop.f32.mrf.mxu0  ;;  %v1001_v24 = vld [vmem:[#allocation5 + $0x16f8] sm:$0xff] }
 0x12f   : > { %v1143_v62 = vpop.f32.mrf.mxu1  ;;  %1532 = vmatmul.f32.gmra.mxu3 %v5309_v37 }
 0x130   : > { %v1144_v1 = vadd.f32 %v1143_v62, %v1078_v25  ;;  %v7413_v62 = vld [vmem:[#allocation15_spill] sm:$0xff] }
 0x131   : > { %v1208_v27 = vpop.f32.mrf.mxu2  ;;  %1337 = vmatmul.f32.gmra.mxu0 %v5312_v38  ;;  %v856_v38 = vld [vmem:[#allocation5 + $0x1270] sm:$0xff] }
 0x132   : > { %1402 = vmatmul.f32.gmra.mxu1 %v5317_v39  ;;  %v1273_v50 = vpop.f32.mrf.mxu3  ;;  %v1209_v51 = vadd.f32 %v1208_v27, %v1144_v1  ;;  %1763 = vmatpush.msra.mxu3 %v856_v38  ;;  %v425_v27 = vld [vmem:[#allocation5 + $0x4f8] sm:$0xff] }
 0x133   : > { %1816 = vmatpush.msrb.mxu0 %v425_v27 }
 0x134   : > { %v1274_v36 = vadd.f32 %v1273_v50, %v1209_v51  ;;  %v617_v50 = vld [vmem:[#allocation5 + $0xaf8] sm:$0xff] }
 0x135   : > { %1881 = vmatpush.msrb.mxu1 %v617_v50  ;;  %1817 = vmatpush.msrb.mxu0 %v413_v34 }
 0x136   : > { %4262 = vst [vmem:[%s5422_s19 + $0x360] sm:$0xff] %v1274_v36  ;;  %1470 = vmatmul.f32.gmra.mxu2 %v5322_v52  ;;  %v1081_v37 = vpop.f32.mrf.mxu0 }
 0x137   : > { %v1146_v31 = vpop.f32.mrf.mxu1  ;;  %1535 = vmatmul.f32.gmra.mxu3 %v5325_v53  ;;  %1818 = vmatpush.msrb.mxu0 %v401_v19  ;;  %v353_v19 = vld [vmem:[#allocation5 + $0x2b8] sm:$0xff] }
 0x138   : > { %v1147_v56 = vadd.f32 %v1146_v31, %v1081_v37  ;;  %v7416_v37 = vld [vmem:[#allocation18_spill] sm:$0xff] }
 0x139   : > { %v1211_v39 = vpop.f32.mrf.mxu2  ;;  %1340 = vmatmul.f32.gmra.mxu0 %v5328_v54  ;;  %v844_v54 = vld [vmem:[#allocation5 + $0x1210] sm:$0xff]  ;;  %v797_v31 = vld [vmem:[#allocation5 + $0x1098] sm:$0xff] }
 0x13a   : > { %1405 = vmatmul.f32.gmra.mxu1 %v5333_v55  ;;  %v1276_v57 = vpop.f32.mrf.mxu3  ;;  %v1212_v0 = vadd.f32 %v1211_v39, %v1147_v56  ;;  %1764 = vmatpush.msra.mxu3 %v844_v54  ;;  %v989_v56 = vld [vmem:[#allocation5 + $0x1698] sm:$0xff]  ;;  %v7417_v39 = vld [vmem:[#allocation19_spill] sm:$0xff] }
 0x13b   : > { %1947 = vmatpush.msrb.mxu2 %v797_v31  ;;  %v5505_v54 = vld [vmem:[%s5151_s15 + $0x18] sm:$0xff]  ;;  %v5560_v31 = vld [vmem:[%s5151_s15 + $0x60] sm:$0xff] }
 0x13c   : > { %v1277_v52 = vadd.f32 %v1276_v57, %v1212_v0  ;;  %v7418_v57 = vld [vmem:[#allocation20_spill] sm:$0xff] }
 0x13e   : > { %4274 = vst [vmem:[%s5422_s19 + $0x3c0] sm:$0xff] %v1277_v52  ;;  %1473 = vmatmul.f32.gmra.mxu2 %v5338_v8  ;;  %v1084_v53 = vpop.f32.mrf.mxu0  ;;  %v605_v52 = vld [vmem:[#allocation5 + $0xa98] sm:$0xff] }
 0x13f   : > { %v1149_v58 = vpop.f32.mrf.mxu1  ;;  %1538 = vmatmul.f32.gmra.mxu3 %v5341_v9  ;;  %1882 = vmatpush.msrb.mxu1 %v605_v52 }
 0x140   : > { %v1150_v35 = vadd.f32 %v1149_v58, %v1084_v53  ;;  %v5501_v58 = vld [vmem:[%s5151_s15 + $0x10] sm:$0xff] }
 0x141   : > { %v1214_v55 = vpop.f32.mrf.mxu2  ;;  %1343 = vmatmul.f32.gmra.mxu0 %v5344_v10  ;;  %v1025_v10 = vld [vmem:[#allocation5 + $0x17b8] sm:$0xff] }
 0x142   : > { %1408 = vmatmul.f32.gmra.mxu1 %v5349_v11  ;;  %v1279_v45 = vpop.f32.mrf.mxu3  ;;  %v1215_v18 = vadd.f32 %v1214_v55, %v1150_v35  ;;  %2009 = vmatpush.msrb.mxu3 %v1025_v10  ;;  %v785_v55 = vld [vmem:[#allocation5 + $0x1038] sm:$0xff] }
 0x143   : > { %1948 = vmatpush.msrb.mxu2 %v785_v55  ;;  %v929_v55 = vld [vmem:[#allocation5 + $0x14b8] sm:$0xff] }
 0x144   : > { %v1280_v8 = vadd.f32 %v1279_v45, %v1215_v18  ;;  %v977_v18 = vld [vmem:[#allocation5 + $0x1638] sm:$0xff] }
 0x145   : > { %1949 = vmatpush.msrb.mxu2 %v773_v14 }
 0x146   : > { %4286 = vst [vmem:[%s5422_s19 + $0x420] sm:$0xff] %v1280_v8  ;;  %1476 = vmatmul.f32.gmra.mxu2 %v5354_v28  ;;  %v1087_v9 = vpop.f32.mrf.mxu0  ;;  %v5513_v8 = vld [vmem:[%s5151_s15 + $0x8] sm:$0xff] }
 0x147   : > { %v1152_v3 = vpop.f32.mrf.mxu1  ;;  %1541 = vmatmul.f32.gmra.mxu3 %v5357_v29 }
 0x148   : > { %v1153_v40 = vadd.f32 %v1152_v3, %v1087_v9 }
 0x149   : > { %v1217_v11 = vpop.f32.mrf.mxu2  ;;  %1346 = vmatmul.f32.gmra.mxu0 %v5362_v32  ;;  %v1013_v32 = vld [vmem:[#allocation5 + $0x1758] sm:$0xff] }
 0x14a   : > { %1411 = vmatmul.f32.gmra.mxu1 %v5365_v33  ;;  %v1282_v41 = vpop.f32.mrf.mxu3  ;;  %v1218_v6 = vadd.f32 %v1217_v11, %v1153_v40  ;;  %2010 = vmatpush.msrb.mxu3 %v1013_v32  ;;  %v593_v40 = vld [vmem:[#allocation5 + $0xa38] sm:$0xff]  ;;  %v5518_v11 = vld [vmem:[%s5151_s15 + $0x30] sm:$0xff] }
 0x14b   : > { %1883 = vmatpush.msrb.mxu1 %v593_v40  ;;  %v545_v40 = vld [vmem:[#allocation5 + $0x8b8] sm:$0xff] }
 0x14c   : > { %v1283_v28 = vadd.f32 %v1282_v41, %v1218_v6  ;;  %2011 = vmatpush.msrb.mxu3 %v1001_v24 }
 0x14e   : > { %4298 = vst [vmem:[%s5422_s19 + $0x480] sm:$0xff] %v1283_v28  ;;  %1479 = vmatmul.f32.gmra.mxu2 %v5370_v60  ;;  %v1090_v29 = vpop.f32.mrf.mxu0  ;;  %2012 = vmatpush.msrb.mxu3 %v989_v56 }
 0x14f   : > { %v1155_v15 = vpop.f32.mrf.mxu1  ;;  %1544 = vmatmul.f32.gmra.mxu3 %v5373_v61  ;;  %v7411_v61 = vld [vmem:[#allocation13_spill] sm:$0xff] }
 0x150   : > { %v1156_v42 = vadd.f32 %v1155_v15, %v1090_v29  ;;  %2013 = vmatpush.msrb.mxu3 %v977_v18  ;;  %v965_v29 = vld [vmem:[#allocation5 + $0x15d8] sm:$0xff]  ;;  %v5577_v18 = vld [vmem:[%s5151_s15 + $0x80] sm:$0xff] }
 0x151   : > { %v1220_v33 = vpop.f32.mrf.mxu2  ;;  %1349 = vmatmul.f32.gmra.mxu0 %v7409_v12  ;;  %v389_v12 = vld [vmem:[#allocation5 + $0x3d8] sm:$0xff] }
 0x152   : > { %1414 = vmatmul.f32.gmra.mxu1 %v7410_v13  ;;  %v1285_v43 = vpop.f32.mrf.mxu3  ;;  %v1221_v46 = vadd.f32 %v1220_v33, %v1156_v42  ;;  %2014 = vmatpush.msrb.mxu3 %v965_v29  ;;  %v5530_v42 = vld [vmem:[%s5151_s15 + $0x28] sm:$0xff]  ;;  %v581_v13 = vld [vmem:[#allocation5 + $0x9d8] sm:$0xff] }
 0x153   : > { %1819 = vmatpush.msrb.mxu0 %v389_v12  ;;  %1884 = vmatpush.msrb.mxu1 %v581_v13  ;;  %v725_v29 = vld [vmem:[#allocation5 + $0xe58] sm:$0xff]  ;;  %v5594_v12 = vld [vmem:[%s5151_s15 + $0xa0] sm:$0xff]  ;;  %v5598_v13 = vld [vmem:[%s5151_s15 + $0xa8] sm:$0xff] }
 0x154   : > { %v1286_v60 = vadd.f32 %v1285_v43, %v1221_v46  ;;  %v5535_v46 = vld [vmem:[%s5151_s15 + $0x50] sm:$0xff] }
 0x156   : > { %4310 = vst [vmem:[%s5422_s19 + $0x4e0] sm:$0xff] %v1286_v60  ;;  %1482 = vmatmul.f32.gmra.mxu2 %v7411_v61  ;;  %v1093_v17 = vpop.f32.mrf.mxu0  ;;  %v5539_v60 = vld [vmem:[%s5151_s15 + $0x58] sm:$0xff] }
 0x157   : > { %v1158_v20 = vpop.f32.mrf.mxu1  ;;  %1547 = vmatmul.f32.gmra.mxu3 %v7412_v21  ;;  %v761_v61 = vld [vmem:[#allocation5 + $0xf78] sm:$0xff] }
 0x158   : > { %v1159_v49 = vadd.f32 %v1158_v20, %v1093_v17  ;;  %1950 = vmatpush.msrb.mxu2 %v761_v61  ;;  %v953_v20 = vld [vmem:[#allocation5 + $0x1578] sm:$0xff] }
 0x159   : > { %v1223_v25 = vpop.f32.mrf.mxu2  ;;  %1352 = vmatmul.f32.gmra.mxu0 %v7413_v62  ;;  %2015 = vmatpush.msrb.mxu3 %v953_v20  ;;  %v377_v62 = vld [vmem:[#allocation5 + $0x378] sm:$0xff]  ;;  %v5603_v20 = vld [vmem:[%s5151_s15 + $0xd0] sm:$0xff] }
 0x15a   : > { %1417 = vmatmul.f32.gmra.mxu1 %v7414_v63  ;;  %v1288_v1 = vpop.f32.mrf.mxu3  ;;  %v1224_v26 = vadd.f32 %v1223_v25, %v1159_v49  ;;  %v5547_v49 = vld [vmem:[%s5151_s15 + $0x48] sm:$0xff]  ;;  %v569_v63 = vld [vmem:[#allocation5 + $0x978] sm:$0xff]  ;;  %1820 = vmatpush.msrb.mxu0 %v377_v62 }
 0x15b   : > { %1885 = vmatpush.msrb.mxu1 %v569_v63  ;;  %v533_v61 = vld [vmem:[#allocation5 + $0x858] sm:$0xff] }
 0x15c   : > { %v1289_v51 = vadd.f32 %v1288_v1, %v1224_v26  ;;  %v5552_v26 = vld [vmem:[%s5151_s15 + $0x70] sm:$0xff]  ;;  %v713_v62 = vld [vmem:[#allocation5 + $0xdf8] sm:$0xff] }
 0x15e   : > { %4322 = vst [vmem:[%s5422_s19 + $0x540] sm:$0xff] %v1289_v51  ;;  %1485 = vmatmul.f32.gmra.mxu2 %v7415_v4  ;;  %v1096_v30 = vpop.f32.mrf.mxu0  ;;  %v5556_v51 = vld [vmem:[%s5151_s15 + $0x78] sm:$0xff] }
 0x15f   : > { %v1161_v36 = vpop.f32.mrf.mxu1  ;;  %1550 = vmatmul.f32.gmra.mxu3 %v7416_v37  ;;  %v749_v4 = vld [vmem:[#allocation5 + $0xf18] sm:$0xff] }
 0x160   : > { %v1162_v5 = vadd.f32 %v1161_v36, %v1096_v30  ;;  %1951 = vmatpush.msrb.mxu2 %v749_v4  ;;  %v941_v36 = vld [vmem:[#allocation5 + $0x1518] sm:$0xff]  ;;  %v5615_v4 = vld [vmem:[%s5151_s15 + $0xc8] sm:$0xff] }
 0x161   : > { %v1226_v38 = vpop.f32.mrf.mxu2  ;;  %1355 = vmatmul.f32.gmra.mxu0 %v7417_v39  ;;  %2016 = vmatpush.msrb.mxu3 %v941_v36  ;;  %v365_v39 = vld [vmem:[#allocation5 + $0x318] sm:$0xff] }
 0x162   : > { %1420 = vmatmul.f32.gmra.mxu1 %v7418_v57  ;;  %v1291_v0 = vpop.f32.mrf.mxu3  ;;  %v1227_v44 = vadd.f32 %v1226_v38, %v1162_v5  ;;  %v5564_v5 = vld [vmem:[%s5151_s15 + $0x68] sm:$0xff]  ;;  %v557_v57 = vld [vmem:[#allocation5 + $0x918] sm:$0xff]  ;;  %1821 = vmatpush.msrb.mxu0 %v365_v39  ;;  %v5620_v39 = vld [vmem:[%s5151_s15 + $0xf0] sm:$0xff] }
 0x163   : > { %1886 = vmatpush.msrb.mxu1 %v557_v57  ;;  %2017 = vmatpush.msrb.mxu3 %v929_v55 }
 0x164   : > { %v1292_v53 = vadd.f32 %v1291_v0, %v1227_v44  ;;  %v5569_v44 = vld [vmem:[%s5151_s15 + $0x90] sm:$0xff]  ;;  %1822 = vmatpush.msrb.mxu0 %v353_v19 }
 0x165   : > { %1887 = vmatpush.msrb.mxu1 %v545_v40  ;;  %v317_v40 = vld [vmem:[#allocation5 + $0x198] sm:$0xff] }
 0x166   : > { %4334 = vst [vmem:[%s5422_s19 + $0x5a0] sm:$0xff] %v1292_v53  ;;  %1700 = vmatmul.f32.vlgmr.msra.gmra.mxu2 %v5501_v58  ;;  %v1311_v59 = vpop.f32.mrf.mxu0  ;;  %v5573_v53 = vld [vmem:[%s5151_s15 + $0x98] sm:$0xff] }
 0x167   : > { %v1376_v35 = vpop.f32.mrf.mxu1  ;;  %1765 = vmatmul.f32.vlgmr.msra.gmra.mxu3 %v5505_v54  ;;  %1888 = vmatpush.msrb.mxu1 %v533_v61  ;;  %v5645_v61 = vld [vmem:[%s5151_s15 + $0x100] sm:$0xff] }
 0x168   : > { %v1377_v45 = vadd.f32 %v1376_v35, %v1311_v59  ;;  %v737_v59 = vld [vmem:[#allocation5 + $0xeb8] sm:$0xff] }
 0x169   : > { %v1441_v23 = vpop.f32.mrf.mxu2  ;;  %1570 = vmatmul.f32.vlgmr.msra.gmra.mxu0 %v5509_v2  ;;  %1952 = vmatpush.msrb.mxu2 %v737_v59 }
 0x16a   : > { %1635 = vmatmul.f32.vlgmr.msra.gmra.mxu1 %v5513_v8  ;;  %v1506_v9 = vpop.f32.mrf.mxu3  ;;  %v1442_v3 = vadd.f32 %v1441_v23, %v1377_v45  ;;  %v5581_v23 = vld [vmem:[%s5151_s15 + $0x88] sm:$0xff] }
 0x16b   : > { %1953 = vmatpush.msrb.mxu2 %v725_v29 }
 0x16c   : > { %v1507_v10 = vadd.f32 %v1506_v9, %v1442_v3 }
 0x16d   : > { %1954 = vmatpush.msrb.mxu2 %v713_v62  ;;  %v305_v62 = vld [vmem:[#allocation5 + $0x138] sm:$0xff] }
 0x16e   : > { %4155 = vst [vmem:[%s5422_s19 + $0x8] sm:$0xff] %v1507_v10  ;;  %1703 = vmatmul.f32.gmra.mxu2 %v5518_v11  ;;  %v1314_v41 = vpop.f32.mrf.mxu0 }
 0x16f   : > { %v1379_v6 = vpop.f32.mrf.mxu1  ;;  %1768 = vmatmul.f32.gmra.mxu3 %v5522_v7 }
 0x170   : > { %v1380_v28 = vadd.f32 %v1379_v6, %v1314_v41  ;;  %v5586_v41 = vld [vmem:[%s5151_s15 + $0xb0] sm:$0xff] }
 0x171   : > { %v1444_v15 = vpop.f32.mrf.mxu2  ;;  %1573 = vmatmul.f32.gmra.mxu0 %v5526_v47 }
 0x172   : > { %1638 = vmatmul.f32.gmra.mxu1 %v5530_v42  ;;  %v1509_v32 = vpop.f32.mrf.mxu3  ;;  %v1445_v33 = vadd.f32 %v1444_v15, %v1380_v28  ;;  %v5590_v28 = vld [vmem:[%s5151_s15 + $0xb8] sm:$0xff] }
 0x174   : > { %v1510_v43 = vadd.f32 %v1509_v32, %v1445_v33  ;;  %v917_v32 = vld [vmem:[#allocation5 + $0x1458] sm:$0xff] }
 0x175   : > { %2018 = vmatpush.msrb.mxu3 %v917_v32  ;;  %v5641_v32 = vld [vmem:[%s5151_s15 + $0x118] sm:$0xff] }
 0x176   : > { %4167 = vst [vmem:[%s5422_s19 + $0x68] sm:$0xff] %v1510_v43  ;;  %1706 = vmatmul.f32.gmra.mxu2 %v5535_v46  ;;  %v1317_v22 = vpop.f32.mrf.mxu0 }
 0x177   : > { %v1382_v16 = vpop.f32.mrf.mxu1  ;;  %1771 = vmatmul.f32.gmra.mxu3 %v5539_v60 }
 0x178   : > { %v1383_v17 = vadd.f32 %v1382_v16, %v1317_v22  ;;  %v341_v16 = vld [vmem:[#allocation5 + $0x258] sm:$0xff] }
 0x179   : > { %v1447_v21 = vpop.f32.mrf.mxu2  ;;  %1576 = vmatmul.f32.gmra.mxu0 %v5543_v48 }
 0x17a   : > { %1641 = vmatmul.f32.gmra.mxu1 %v5547_v49  ;;  %v1512_v24 = vpop.f32.mrf.mxu3  ;;  %v1448_v25 = vadd.f32 %v1447_v21, %v1383_v17  ;;  %1823 = vmatpush.msrb.mxu0 %v341_v16 }
 0x17c   : > { %v1513_v1 = vadd.f32 %v1512_v24, %v1448_v25  ;;  %v5607_v25 = vld [vmem:[%s5151_s15 + $0xd8] sm:$0xff] }
 0x17e   : > { %4179 = vst [vmem:[%s5422_s19 + $0xc8] sm:$0xff] %v1513_v1  ;;  %1709 = vmatmul.f32.gmra.mxu2 %v5552_v26  ;;  %v1320_v27 = vpop.f32.mrf.mxu0  ;;  %v905_v1 = vld [vmem:[#allocation5 + $0x13f8] sm:$0xff] }
 0x17f   : > { %v1385_v50 = vpop.f32.mrf.mxu1  ;;  %1774 = vmatmul.f32.gmra.mxu3 %v5556_v51 }
 0x180   : > { %v1386_v30 = vadd.f32 %v1385_v50, %v1320_v27  ;;  %2019 = vmatpush.msrb.mxu3 %v905_v1  ;;  %v5611_v50 = vld [vmem:[%s5151_s15 + $0xc0] sm:$0xff] }
 0x181   : > { %v1450_v37 = vpop.f32.mrf.mxu2  ;;  %1579 = vmatmul.f32.gmra.mxu0 %v5560_v31 }
 0x182   : > { %1644 = vmatmul.f32.gmra.mxu1 %v5564_v5  ;;  %v1515_v56 = vpop.f32.mrf.mxu3  ;;  %v1451_v38 = vadd.f32 %v1450_v37, %v1386_v30  ;;  %v329_v37 = vld [vmem:[#allocation5 + $0x1f8] sm:$0xff] }
 0x183   : > { %1824 = vmatpush.msrb.mxu0 %v329_v37  ;;  %v5658_v37 = vld [vmem:[%s5151_s15 + $0x138] sm:$0xff] }
 0x184   : > { %v1516_v0 = vadd.f32 %v1515_v56, %v1451_v38  ;;  %v521_v56 = vld [vmem:[#allocation5 + $0x7f8] sm:$0xff] }
 0x185   : > { %1889 = vmatpush.msrb.mxu1 %v521_v56  ;;  %1825 = vmatpush.msrb.mxu0 %v317_v40  ;;  %v677_v56 = vld [vmem:[#allocation5 + $0xcd8] sm:$0xff] }
 0x186   : > { %4191 = vst [vmem:[%s5422_s19 + $0x128] sm:$0xff] %v1516_v0  ;;  %1712 = vmatmul.f32.gmra.mxu2 %v5569_v44  ;;  %v1323_v34 = vpop.f32.mrf.mxu0 }
 0x187   : > { %v1388_v52 = vpop.f32.mrf.mxu1  ;;  %1777 = vmatmul.f32.gmra.mxu3 %v5573_v53  ;;  %1826 = vmatpush.msrb.mxu0 %v305_v62 }
 0x188   : > { %v1389_v35 = vadd.f32 %v1388_v52, %v1323_v34  ;;  %v5624_v34 = vld [vmem:[%s5151_s15 + $0xf8] sm:$0xff] }
 0x189   : > { %v1453_v45 = vpop.f32.mrf.mxu2  ;;  %1582 = vmatmul.f32.gmra.mxu0 %v5577_v18  ;;  %v701_v52 = vld [vmem:[#allocation5 + $0xd98] sm:$0xff] }
 0x18a   : > { %1647 = vmatmul.f32.gmra.mxu1 %v5581_v23  ;;  %v1518_v9 = vpop.f32.mrf.mxu3  ;;  %v1454_v3 = vadd.f32 %v1453_v45, %v1389_v35  ;;  %1955 = vmatpush.msrb.mxu2 %v701_v52  ;;  %v893_v35 = vld [vmem:[#allocation5 + $0x1398] sm:$0xff]  ;;  %v5628_v45 = vld [vmem:[%s5151_s15 + $0xe0] sm:$0xff] }
 0x18b   : > { %2020 = vmatpush.msrb.mxu3 %v893_v35  ;;  %v5662_v52 = vld [vmem:[%s5151_s15 + $0x120] sm:$0xff] }
 0x18c   : > { %v1519_v10 = vadd.f32 %v1518_v9, %v1454_v3  ;;  %v5632_v9 = vld [vmem:[%s5151_s15 + $0xe8] sm:$0xff] }
 0x18e   : > { %4203 = vst [vmem:[%s5422_s19 + $0x188] sm:$0xff] %v1519_v10  ;;  %1715 = vmatmul.f32.gmra.mxu2 %v5586_v41  ;;  %v1326_v6 = vpop.f32.mrf.mxu0  ;;  %v509_v10 = vld [vmem:[#allocation5 + $0x798] sm:$0xff] }
 0x18f   : > { %v1391_v14 = vpop.f32.mrf.mxu1  ;;  %1780 = vmatmul.f32.gmra.mxu3 %v5590_v28  ;;  %1890 = vmatpush.msrb.mxu1 %v509_v10  ;;  %v5671_v10 = vld [vmem:[%s5151_s15 + $0x150] sm:$0xff] }
 0x190   : > { %v1392_v15 = vadd.f32 %v1391_v14, %v1326_v6  ;;  %v5637_v14 = vld [vmem:[%s5151_s15 + $0x110] sm:$0xff] }
 0x191   : > { %v1456_v33 = vpop.f32.mrf.mxu2  ;;  %1585 = vmatmul.f32.gmra.mxu0 %v5594_v12 }
 0x192   : > { %1650 = vmatmul.f32.gmra.mxu1 %v5598_v13  ;;  %v1521_v43 = vpop.f32.mrf.mxu3  ;;  %v1457_v22 = vadd.f32 %v1456_v33, %v1392_v15  ;;  %v689_v33 = vld [vmem:[#allocation5 + $0xd38] sm:$0xff] }
 0x193   : > { %1956 = vmatpush.msrb.mxu2 %v689_v33  ;;  %v665_v33 = vld [vmem:[#allocation5 + $0xc78] sm:$0xff] }
 0x194   : > { %v1522_v17 = vadd.f32 %v1521_v43, %v1457_v22  ;;  %v881_v22 = vld [vmem:[#allocation5 + $0x1338] sm:$0xff] }
 0x195   : > { %2021 = vmatpush.msrb.mxu3 %v881_v22  ;;  %1957 = vmatpush.msrb.mxu2 %v677_v56  ;;  %v857_v22 = vld [vmem:[#allocation5 + $0x1278] sm:$0xff]  ;;  %v5688_v56 = vld [vmem:[%s5151_s15 + $0x170] sm:$0xff] }
 0x196   : > { %4215 = vst [vmem:[%s5422_s19 + $0x1e8] sm:$0xff] %v1522_v17  ;;  %1718 = vmatmul.f32.gmra.mxu2 %v5603_v20  ;;  %v1329_v21 = vpop.f32.mrf.mxu0  ;;  %v5649_v17 = vld [vmem:[%s5151_s15 + $0x108] sm:$0xff] }
 0x197   : > { %v1394_v24 = vpop.f32.mrf.mxu1  ;;  %1783 = vmatmul.f32.gmra.mxu3 %v5607_v25  ;;  %1958 = vmatpush.msrb.mxu2 %v665_v33 }
 0x198   : > { %v1395_v63 = vadd.f32 %v1394_v24, %v1329_v21 }
 0x199   : > { %v1459_v27 = vpop.f32.mrf.mxu2  ;;  %1588 = vmatmul.f32.gmra.mxu0 %v5611_v50 }
 0x19a   : > { %1653 = vmatmul.f32.gmra.mxu1 %v5615_v4  ;;  %v1524_v30 = vpop.f32.mrf.mxu3  ;;  %v1460_v36 = vadd.f32 %v1459_v27, %v1395_v63  ;;  %v497_v63 = vld [vmem:[#allocation5 + $0x738] sm:$0xff]  ;;  %v5654_v27 = vld [vmem:[%s5151_s15 + $0x130] sm:$0xff] }
 0x19b   : > { %1891 = vmatpush.msrb.mxu1 %v497_v63 }
 0x19c   : > { %v1525_v38 = vadd.f32 %v1524_v30, %v1460_v36 }
 0x19e   : > { %4227 = vst [vmem:[%s5422_s19 + $0x248] sm:$0xff] %v1525_v38  ;;  %1721 = vmatmul.f32.gmra.mxu2 %v5620_v39  ;;  %v1332_v57 = vpop.f32.mrf.mxu0 }
 0x19f   : > { %v1397_v0 = vpop.f32.mrf.mxu1  ;;  %1786 = vmatmul.f32.gmra.mxu3 %v5624_v34 }
 0x1a0   : > { %v1398_v59 = vadd.f32 %v1397_v0, %v1332_v57  ;;  %v869_v57 = vld [vmem:[#allocation5 + $0x12d8] sm:$0xff] }
 0x1a1   : > { %v1462_v55 = vpop.f32.mrf.mxu2  ;;  %1591 = vmatmul.f32.gmra.mxu0 %v5628_v45  ;;  %2022 = vmatpush.msrb.mxu3 %v869_v57 }
 0x1a2   : > { %1656 = vmatmul.f32.gmra.mxu1 %v5632_v9  ;;  %v1527_v3 = vpop.f32.mrf.mxu3  ;;  %v1463_v19 = vadd.f32 %v1462_v55, %v1398_v59  ;;  %v5666_v59 = vld [vmem:[%s5151_s15 + $0x128] sm:$0xff] }
 0x1a3   : > { %2023 = vmatpush.msrb.mxu3 %v857_v22  ;;  %v461_v22 = vld [vmem:[#allocation5 + $0x618] sm:$0xff] }
 0x1a4   : > { %v1528_v6 = vadd.f32 %v1527_v3, %v1463_v19  ;;  %v293_v3 = vld [vmem:[#allocation5 + $0xd8] sm:$0xff] }
 0x1a5   : > { %v485_v19 = vld [vmem:[#allocation5 + $0x6d8] sm:$0xff]  ;;  %1827 = vmatpush.msrb.mxu0 %v293_v3 }
 0x1a6   : > { %4239 = vst [vmem:[%s5422_s19 + $0x2a8] sm:$0xff] %v1528_v6  ;;  %1724 = vmatmul.f32.gmra.mxu2 %v5637_v14  ;;  %v1335_v29 = vpop.f32.mrf.mxu0  ;;  %1892 = vmatpush.msrb.mxu1 %v485_v19  ;;  %v845_v3 = vld [vmem:[#allocation5 + $0x1218] sm:$0xff] }
 0x1a7   : > { %v1400_v15 = vpop.f32.mrf.mxu1  ;;  %1789 = vmatmul.f32.gmra.mxu3 %v5641_v32 }
 0x1a8   : > { %v1401_v43 = vadd.f32 %v1400_v15, %v1335_v29  ;;  %v5675_v15 = vld [vmem:[%s5151_s15 + $0x158] sm:$0xff]  ;;  %2024 = vmatpush.msrb.mxu3 %v845_v3  ;;  %v5717_v3 = vld [vmem:[%s5151_s15 + $0x188] sm:$0xff] }
 0x1a9   : > { %v1465_v16 = vpop.f32.mrf.mxu2  ;;  %1594 = vmatmul.f32.gmra.mxu0 %v5645_v61  ;;  %7419 = vst [vmem:[#allocation11_spill] sm:$0xff] %v5717_v3 }
 0x1aa   : > { %1659 = vmatmul.f32.gmra.mxu1 %v5649_v17  ;;  %v1530_v21 = vpop.f32.mrf.mxu3  ;;  %v1466_v24 = vadd.f32 %v1465_v16, %v1401_v43 }
 0x1ac   : > { %v1531_v1 = vadd.f32 %v1530_v21, %v1466_v24  ;;  %v5679_v21 = vld [vmem:[%s5151_s15 + $0x140] sm:$0xff]  ;;  %v5683_v24 = vld [vmem:[%s5151_s15 + $0x148] sm:$0xff] }
 0x1ae   : > { %4251 = vst [vmem:[%s5422_s19 + $0x308] sm:$0xff] %v1531_v1  ;;  %1727 = vmatmul.f32.gmra.mxu2 %v5654_v27  ;;  %v1338_v30 = vpop.f32.mrf.mxu0  ;;  %v281_v1 = vld [vmem:[#allocation5 + $0x78] sm:$0xff] }
 0x1af   : > { %v1403_v36 = vpop.f32.mrf.mxu1  ;;  %1792 = vmatmul.f32.gmra.mxu3 %v5658_v37  ;;  %1828 = vmatpush.msrb.mxu0 %v281_v1 }
 0x1b0   : > { %v1404_v38 = vadd.f32 %v1403_v36, %v1338_v30  ;;  %v473_v30 = vld [vmem:[#allocation5 + $0x678] sm:$0xff] }
 0x1b1   : > { %v1468_v0 = vpop.f32.mrf.mxu2  ;;  %1597 = vmatmul.f32.gmra.mxu0 %v5662_v52  ;;  %1893 = vmatpush.msrb.mxu1 %v473_v30  ;;  %v5709_v30 = vld [vmem:[%s5151_s15 + $0x198] sm:$0xff] }
 0x1b2   : > { %1662 = vmatmul.f32.gmra.mxu1 %v5666_v59  ;;  %v1533_v35 = vpop.f32.mrf.mxu3  ;;  %v1469_v55 = vadd.f32 %v1468_v0, %v1404_v38  ;;  %v5692_v0 = vld [vmem:[%s5151_s15 + $0x178] sm:$0xff] }
 0x1b3   : > { %1894 = vmatpush.msrb.mxu1 %v461_v22 }
 0x1b4   : > { %v1534_v40 = vadd.f32 %v1533_v35, %v1469_v55  ;;  %v653_v35 = vld [vmem:[#allocation5 + $0xc18] sm:$0xff] }
 0x1b5   : > { %1959 = vmatpush.msrb.mxu2 %v653_v35 }
 0x1b6   : > { %4263 = vst [vmem:[%s5422_s19 + $0x368] sm:$0xff] %v1534_v40  ;;  %1730 = vmatmul.f32.gmra.mxu2 %v5671_v10  ;;  %v1341_v6 = vpop.f32.mrf.mxu0  ;;  %v5696_v40 = vld [vmem:[%s5151_s15 + $0x160] sm:$0xff] }
 0x1b7   : > { %v1406_v29 = vpop.f32.mrf.mxu1  ;;  %1795 = vmatmul.f32.gmra.mxu3 %v5675_v15 }
 0x1b8   : > { %v1407_v43 = vadd.f32 %v1406_v29, %v1341_v6  ;;  %v5700_v6 = vld [vmem:[%s5151_s15 + $0x168] sm:$0xff] }
 0x1b9   : > { %v1471_v16 = vpop.f32.mrf.mxu2  ;;  %1600 = vmatmul.f32.gmra.mxu0 %v5679_v21 }
 0x1ba   : > { %1665 = vmatmul.f32.gmra.mxu1 %v5683_v24  ;;  %v1536_v62 = vpop.f32.mrf.mxu3  ;;  %v1472_v63 = vadd.f32 %v1471_v16, %v1407_v43  ;;  %v269_v43 = vld [vmem:[#allocation5 + $0x18] sm:$0xff] }
 0x1bb   : > { %1829 = vmatpush.msrb.mxu0 %v269_v43  ;;  %v642_v43 = vld [vmem:[#allocation5 + $0xbc0] sm:$0xff] }
 0x1bc   : > { %v1537_v36 = vadd.f32 %v1536_v62, %v1472_v63  ;;  %v5705_v62 = vld [vmem:[%s5151_s15 + $0x190] sm:$0xff]  ;;  %2139 = vmatpush.msra.mxu1 %v642_v43 }
 0x1be   : > { %4275 = vst [vmem:[%s5422_s19 + $0x3c8] sm:$0xff] %v1537_v36  ;;  %1733 = vmatmul.f32.gmra.mxu2 %v5688_v56  ;;  %v1344_v38 = vpop.f32.mrf.mxu0  ;;  %v834_v36 = vld [vmem:[#allocation5 + $0x11c0] sm:$0xff] }
 0x1bf   : > { %v1409_v57 = vpop.f32.mrf.mxu1  ;;  %1798 = vmatmul.f32.gmra.mxu3 %v5692_v0  ;;  %2204 = vmatpush.msra.mxu2 %v834_v36  ;;  %v5726_v36 = vld [vmem:[%s5151_s15 + $0x1b8] sm:$0xff] }
 0x1c0   : > { %v1410_v55 = vadd.f32 %v1409_v57, %v1344_v38  ;;  %v1026_v57 = vld [vmem:[#allocation5 + $0x17c0] sm:$0xff]  ;;  %7421 = vst [vmem:[#allocation13_spill] sm:$0xff] %v5726_v36 }
 0x1c1   : > { %v1474_v19 = vpop.f32.mrf.mxu2  ;;  %1603 = vmatmul.f32.gmra.mxu0 %v5696_v40  ;;  %2269 = vmatpush.msra.mxu3 %v1026_v57  ;;  %v822_v57 = vld [vmem:[#allocation5 + $0x1160] sm:$0xff] }
 0x1c2   : > { %1668 = vmatmul.f32.gmra.mxu1 %v5700_v6  ;;  %v1539_v29 = vpop.f32.mrf.mxu3  ;;  %v1475_v33 = vadd.f32 %v1474_v19, %v1410_v55  ;;  %v5713_v55 = vld [vmem:[%s5151_s15 + $0x180] sm:$0xff]  ;;  %2205 = vmatpush.msra.mxu2 %v822_v57 }
 0x1c4   : > { %v1540_v16 = vadd.f32 %v1539_v29, %v1475_v33  ;;  %v450_v33 = vld [vmem:[#allocation5 + $0x5c0] sm:$0xff] }
 0x1c5   : > { %2074 = vmatpush.msra.mxu0 %v450_v33  ;;  %v5734_v33 = vld [vmem:[%s5151_s15 + $0x1a8] sm:$0xff] }
 0x1c6   : > { %4287 = vst [vmem:[%s5422_s19 + $0x428] sm:$0xff] %v1540_v16  ;;  %1736 = vmatmul.f32.gmra.mxu2 %v5705_v62  ;;  %v1347_v63 = vpop.f32.mrf.mxu0  ;;  %v5722_v16 = vld [vmem:[%s5151_s15 + $0x1b0] sm:$0xff] }
 0x1c7   : > { %v1412_v1 = vpop.f32.mrf.mxu1  ;;  %1801 = vmatmul.f32.gmra.mxu3 %v5709_v30  ;;  %7420 = vst [vmem:[#allocation12_spill] sm:$0xff] %v5722_v16 }
 0x1c8   : > { %v1413_v38 = vadd.f32 %v1412_v1, %v1347_v63  ;;  %7423 = vst [vmem:[#allocation15_spill] sm:$0xff] %v5734_v33 }
 0x1c9   : > { %v1477_v35 = vpop.f32.mrf.mxu2  ;;  %1606 = vmatmul.f32.gmra.mxu0 %v5713_v55 }
 0x1ca   : > { %1671 = vmatmul.f32.gmra.mxu1 %v5717_v3  ;;  %v1542_v19 = vpop.f32.mrf.mxu3  ;;  %v1478_v29 = vadd.f32 %v1477_v35, %v1413_v38  ;;  %v1014_v35 = vld [vmem:[#allocation5 + $0x1760] sm:$0xff] }
 0x1cb   : > { %2270 = vmatpush.msra.mxu3 %v1014_v35  ;;  %v606_v3 = vld [vmem:[#allocation5 + $0xaa0] sm:$0xff] }
 0x1cc   : > { %v1543_v22 = vadd.f32 %v1542_v19, %v1478_v29  ;;  %v5730_v29 = vld [vmem:[%s5151_s15 + $0x1a0] sm:$0xff] }
 0x1cd   : > { %7422 = vst [vmem:[#allocation14_spill] sm:$0xff] %v5730_v29 }
 0x1ce   : > { %4299 = vst [vmem:[%s5422_s19 + $0x488] sm:$0xff] %v1543_v22  ;;  %1739 = vmatmul.f32.gmra.mxu2 %v5722_v16  ;;  %v1350_v63 = vpop.f32.mrf.mxu0  ;;  %v630_v16 = vld [vmem:[#allocation5 + $0xb60] sm:$0xff] }
 0x1cf   : > { %v1415_v1 = vpop.f32.mrf.mxu1  ;;  %1804 = vmatmul.f32.gmra.mxu3 %v5726_v36  ;;  %v438_v36 = vld [vmem:[#allocation5 + $0x560] sm:$0xff]  ;;  %2140 = vmatpush.msra.mxu1 %v630_v16 }
 0x1d0   : > { %v1416_v38 = vadd.f32 %v1415_v1, %v1350_v63  ;;  %2075 = vmatpush.msra.mxu0 %v438_v36  ;;  %v5739_v1 = vld [vmem:[%s5151_s15 + $0x1d0] sm:$0xff]  ;;  %v1002_v36 = vld [vmem:[#allocation5 + $0x1700] sm:$0xff] }
 0x1d1   : > { %v1480_v19 = vpop.f32.mrf.mxu2  ;;  %1609 = vmatmul.f32.gmra.mxu0 %v5730_v29  ;;  %7424 = vst [vmem:[#allocation16_spill] sm:$0xff] %v5739_v1  ;;  %v5743_v29 = vld [vmem:[%s5151_s15 + $0x1d8] sm:$0xff]  ;;  %2271 = vmatpush.msra.mxu3 %v1002_v36 }
 0x1d2   : > { %1674 = vmatmul.f32.gmra.mxu1 %v5734_v33  ;;  %v1545_v43 = vpop.f32.mrf.mxu3  ;;  %v1481_v22 = vadd.f32 %v1480_v19, %v1416_v38  ;;  %7425 = vst [vmem:[#allocation17_spill] sm:$0xff] %v5743_v29  ;;  %v810_v33 = vld [vmem:[#allocation5 + $0x1100] sm:$0xff] }
 0x1d3   : > { %2206 = vmatpush.msra.mxu2 %v810_v33  ;;  %v5747_v19 = vld [vmem:[%s5151_s15 + $0x1c0] sm:$0xff] }
 0x1d4   : > { %v1546_v63 = vadd.f32 %v1545_v43, %v1481_v22  ;;  %7426 = vst [vmem:[#allocation18_spill] sm:$0xff] %v5747_v19  ;;  %v5751_v43 = vld [vmem:[%s5151_s15 + $0x1c8] sm:$0xff] }
 0x1d5   : > { %7427 = vst [vmem:[#allocation19_spill] sm:$0xff] %v5751_v43 }
 0x1d6   : > { %4311 = vst [vmem:[%s5422_s19 + $0x4e8] sm:$0xff] %v1546_v63  ;;  %1742 = vmatmul.f32.gmra.mxu2 %v5739_v1  ;;  %v1353_v57 = vpop.f32.mrf.mxu0  ;;  %v618_v1 = vld [vmem:[#allocation5 + $0xb00] sm:$0xff] }
 0x1d7   : > { %v1418_v35 = vpop.f32.mrf.mxu1  ;;  %1807 = vmatmul.f32.gmra.mxu3 %v5743_v29  ;;  %v426_v29 = vld [vmem:[#allocation5 + $0x500] sm:$0xff]  ;;  %2141 = vmatpush.msra.mxu1 %v618_v1 }
 0x1d8   : > { %v1419_v38 = vadd.f32 %v1418_v35, %v1353_v57  ;;  %2076 = vmatpush.msra.mxu0 %v426_v29  ;;  %v5756_v57 = vld [vmem:[%s5151_s15 + $0x1f0] sm:$0xff]  ;;  %v990_v29 = vld [vmem:[#allocation5 + $0x16a0] sm:$0xff] }
 0x1d9   : > { %v1483_v16 = vpop.f32.mrf.mxu2  ;;  %1612 = vmatmul.f32.gmra.mxu0 %v5747_v19  ;;  %7428 = vst [vmem:[#allocation20_spill] sm:$0xff] %v5756_v57  ;;  %v5760_v19 = vld [vmem:[%s5151_s15 + $0x1f8] sm:$0xff]  ;;  %2272 = vmatpush.msra.mxu3 %v990_v29  ;;  %v786_v29 = vld [vmem:[#allocation5 + $0x1040] sm:$0xff] }
 0x1da   : > { %1677 = vmatmul.f32.gmra.mxu1 %v5751_v43  ;;  %v1548_v22 = vpop.f32.mrf.mxu3  ;;  %v1484_v63 = vadd.f32 %v1483_v16, %v1419_v38  ;;  %7429 = vst [vmem:[#allocation21_spill] sm:$0xff] %v5760_v19  ;;  %v798_v43 = vld [vmem:[#allocation5 + $0x10a0] sm:$0xff] }
 0x1db   : > { %2207 = vmatpush.msra.mxu2 %v798_v43  ;;  %v5764_v16 = vld [vmem:[%s5151_s15 + $0x1e0] sm:$0xff]  ;;  %2142 = vmatpush.msra.mxu1 %v606_v3 }
 0x1dc   : > { %v1549_v33 = vadd.f32 %v1548_v22, %v1484_v63  ;;  %7430 = vst [vmem:[#allocation22_spill] sm:$0xff] %v5764_v16  ;;  %v5768_v22 = vld [vmem:[%s5151_s15 + $0x1e8] sm:$0xff] }
 0x1dd   : > { %7431 = vst [vmem:[#allocation23_spill] sm:$0xff] %v5768_v22  ;;  %2208 = vmatpush.msra.mxu2 %v786_v29  ;;  %v762_v29 = vld [vmem:[#allocation5 + $0xf80] sm:$0xff] }
 0x1de   : > { %4323 = vst [vmem:[%s5422_s19 + $0x548] sm:$0xff] %v1549_v33  ;;  %1745 = vmatmul.f32.gmra.mxu2 %v5756_v57  ;;  %v1356_v35 = vpop.f32.mrf.mxu0  ;;  %v414_v57 = vld [vmem:[#allocation5 + $0x4a0] sm:$0xff] }
 0x1df   : > { %v1421_v36 = vpop.f32.mrf.mxu1  ;;  %1810 = vmatmul.f32.gmra.mxu3 %v5760_v19  ;;  %2077 = vmatpush.msra.mxu0 %v414_v57  ;;  %v978_v19 = vld [vmem:[#allocation5 + $0x1640] sm:$0xff] }
 0x1e0   : > { %v1422_v38 = vadd.f32 %v1421_v36, %v1356_v35  ;;  %2273 = vmatpush.msra.mxu3 %v978_v19  ;;  %v774_v19 = vld [vmem:[#allocation5 + $0xfe0] sm:$0xff] }
 0x1e1   : > { %v1486_v1 = vpop.f32.mrf.mxu2  ;;  %1615 = vmatmul.f32.gmra.mxu0 %v5764_v16  ;;  %2209 = vmatpush.msra.mxu2 %v774_v19 }
 0x1e2   : > { %1680 = vmatmul.f32.gmra.mxu1 %v5768_v22  ;;  %v1551_v63 = vpop.f32.mrf.mxu3  ;;  %v1487_v33 = vadd.f32 %v1486_v1, %v1422_v38  ;;  %v402_v38 = vld [vmem:[#allocation5 + $0x440] sm:$0xff] }
 0x1e3   : > { %v594_v1 = vld [vmem:[#allocation5 + $0xa40] sm:$0xff]  ;;  %2078 = vmatpush.msra.mxu0 %v402_v38  ;;  %2210 = vmatpush.msra.mxu2 %v762_v29 }
 0x1e4   : > { %v1552_v35 = vadd.f32 %v1551_v63, %v1487_v33  ;;  %2143 = vmatpush.msra.mxu1 %v594_v1  ;;  %v378_v1 = vld [vmem:[#allocation5 + $0x380] sm:$0xff] }
 0x1e5   : > { %v546_v29 = vld [vmem:[#allocation5 + $0x8c0] sm:$0xff] }
 0x1e6   : > { %4335 = vst [vmem:[%s5422_s19 + $0x5a8] sm:$0xff] %v1552_v35  ;;  %1960 = vmatmul.f32.vlgmr.msrb.gmra.mxu2 %v5501_v58  ;;  %v1571_v43 = vpop.f32.mrf.mxu0  ;;  %v390_v35 = vld [vmem:[#allocation5 + $0x3e0] sm:$0xff] }
 0x1e7   : > { %v1636_v36 = vpop.f32.mrf.mxu1  ;;  %2025 = vmatmul.f32.vlgmr.msrb.gmra.mxu3 %v5505_v54  ;;  %2079 = vmatpush.msra.mxu0 %v390_v35  ;;  %v738_v35 = vld [vmem:[#allocation5 + $0xec0] sm:$0xff] }
 0x1e8   : > { %v1637_v16 = vadd.f32 %v1636_v36, %v1571_v43  ;;  %v582_v43 = vld [vmem:[#allocation5 + $0x9e0] sm:$0xff] }
 0x1e9   : > { %v1701_v22 = vpop.f32.mrf.mxu2  ;;  %1830 = vmatmul.f32.vlgmr.msrb.gmra.mxu0 %v5509_v2  ;;  %v966_v2 = vld [vmem:[#allocation5 + $0x15e0] sm:$0xff]  ;;  %2144 = vmatpush.msra.mxu1 %v582_v43 }
 0x1ea   : > { %1895 = vmatmul.f32.vlgmr.msrb.gmra.mxu1 %v5513_v8  ;;  %v1766_v3 = vpop.f32.mrf.mxu3  ;;  %v1702_v57 = vadd.f32 %v1701_v22, %v1637_v16  ;;  %2274 = vmatpush.msra.mxu3 %v966_v2 }
 0x1eb   : > { %2080 = vmatpush.msra.mxu0 %v378_v1  ;;  %v342_v1 = vld [vmem:[#allocation5 + $0x260] sm:$0xff] }
 0x1ec   : > { %v1767_v58 = vadd.f32 %v1766_v3, %v1702_v57 }
 0x1ee   : > { %4156 = vst [vmem:[%s5422_s19 + $0x10] sm:$0xff] %v1767_v58  ;;  %1963 = vmatmul.f32.gmra.mxu2 %v5518_v11  ;;  %v1574_v54 = vpop.f32.mrf.mxu0  ;;  %v570_v58 = vld [vmem:[#allocation5 + $0x980] sm:$0xff] }
 0x1ef   : > { %v1639_v63 = vpop.f32.mrf.mxu1  ;;  %2028 = vmatmul.f32.gmra.mxu3 %v5522_v7  ;;  %2145 = vmatpush.msra.mxu1 %v570_v58  ;;  %v534_v58 = vld [vmem:[#allocation5 + $0x860] sm:$0xff] }
 0x1f0   : > { %v1640_v33 = vadd.f32 %v1639_v63, %v1574_v54  ;;  %v750_v63 = vld [vmem:[#allocation5 + $0xf20] sm:$0xff] }
 0x1f1   : > { %v1704_v8 = vpop.f32.mrf.mxu2  ;;  %1833 = vmatmul.f32.gmra.mxu0 %v5526_v47  ;;  %v954_v47 = vld [vmem:[#allocation5 + $0x1580] sm:$0xff]  ;;  %2211 = vmatpush.msra.mxu2 %v750_v63 }
 0x1f2   : > { %1898 = vmatmul.f32.gmra.mxu1 %v5530_v42  ;;  %v1769_v16 = vpop.f32.mrf.mxu3  ;;  %v1705_v22 = vadd.f32 %v1704_v8, %v1640_v33  ;;  %2275 = vmatpush.msra.mxu3 %v954_v47  ;;  %v366_v8 = vld [vmem:[#allocation5 + $0x320] sm:$0xff] }
 0x1f3   : > { %2081 = vmatpush.msra.mxu0 %v366_v8  ;;  %2212 = vmatpush.msra.mxu2 %v738_v35  ;;  %v726_v47 = vld [vmem:[#allocation5 + $0xe60] sm:$0xff] }
 0x1f4   : > { %v1770_v11 = vadd.f32 %v1769_v16, %v1705_v22  ;;  %v558_v16 = vld [vmem:[#allocation5 + $0x920] sm:$0xff] }
 0x1f5   : > { %2146 = vmatpush.msra.mxu1 %v558_v16  ;;  %2213 = vmatpush.msra.mxu2 %v726_v47 }
 0x1f6   : > { %4168 = vst [vmem:[%s5422_s19 + $0x70] sm:$0xff] %v1770_v11  ;;  %1966 = vmatmul.f32.gmra.mxu2 %v5535_v46  ;;  %v1577_v7 = vpop.f32.mrf.mxu0 }
 0x1f7   : > { %v1642_v36 = vpop.f32.mrf.mxu1  ;;  %2031 = vmatmul.f32.gmra.mxu3 %v5539_v60  ;;  %2147 = vmatpush.msra.mxu1 %v546_v29 }
 0x1f8   : > { %v1643_v3 = vadd.f32 %v1642_v36, %v1577_v7  ;;  %v354_v36 = vld [vmem:[#allocation5 + $0x2c0] sm:$0xff] }
 0x1f9   : > { %v1707_v42 = vpop.f32.mrf.mxu2  ;;  %1836 = vmatmul.f32.gmra.mxu0 %v5543_v48  ;;  %v942_v48 = vld [vmem:[#allocation5 + $0x1520] sm:$0xff]  ;;  %2148 = vmatpush.msra.mxu1 %v534_v58 }
 0x1fa   : > { %1901 = vmatmul.f32.gmra.mxu1 %v5547_v49  ;;  %v1772_v57 = vpop.f32.mrf.mxu3  ;;  %v1708_v38 = vadd.f32 %v1707_v42, %v1643_v3  ;;  %2276 = vmatpush.msra.mxu3 %v942_v48  ;;  %v330_v48 = vld [vmem:[#allocation5 + $0x200] sm:$0xff] }
 0x1fb   : > { %2082 = vmatpush.msra.mxu0 %v354_v36  ;;  %v498_v36 = vld [vmem:[#allocation5 + $0x740] sm:$0xff] }
 0x1fc   : > { %v1773_v46 = vadd.f32 %v1772_v57, %v1708_v38 }
 0x1fd   : > { %2083 = vmatpush.msra.mxu0 %v342_v1 }
 0x1fe   : > { %4180 = vst [vmem:[%s5422_s19 + $0xd0] sm:$0xff] %v1773_v46  ;;  %1969 = vmatmul.f32.gmra.mxu2 %v5552_v26  ;;  %v1580_v60 = vpop.f32.mrf.mxu0 }
 0x1ff   : > { %v1645_v54 = vpop.f32.mrf.mxu1  ;;  %2034 = vmatmul.f32.gmra.mxu3 %v5556_v51  ;;  %2084 = vmatpush.msra.mxu0 %v330_v48 }
 0x200   : > { %v1646_v19 = vadd.f32 %v1645_v54, %v1580_v60  ;;  %v714_v60 = vld [vmem:[#allocation5 + $0xe00] sm:$0xff] }
 0x201   : > { %v1710_v49 = vpop.f32.mrf.mxu2  ;;  %1839 = vmatmul.f32.gmra.mxu0 %v5560_v31  ;;  %v930_v31 = vld [vmem:[#allocation5 + $0x14c0] sm:$0xff]  ;;  %2214 = vmatpush.msra.mxu2 %v714_v60 }
 0x202   : > { %1904 = vmatmul.f32.gmra.mxu1 %v5564_v5  ;;  %v1775_v33 = vpop.f32.mrf.mxu3  ;;  %v1711_v2 = vadd.f32 %v1710_v49, %v1646_v19  ;;  %2277 = vmatpush.msra.mxu3 %v930_v31  ;;  %v522_v49 = vld [vmem:[#allocation5 + $0x800] sm:$0xff] }
 0x203   : > { %2149 = vmatpush.msra.mxu1 %v522_v49  ;;  %v654_v60 = vld [vmem:[#allocation5 + $0xc20] sm:$0xff]  ;;  %v835_v49 = vld [vmem:[#allocation5 + $0x11c8] sm:$0xff] }
 0x204   : > { %v1776_v26 = vadd.f32 %v1775_v33, %v1711_v2  ;;  %v702_v2 = vld [vmem:[#allocation5 + $0xda0] sm:$0xff] }
 0x205   : > { %2215 = vmatpush.msra.mxu2 %v702_v2 }
 0x206   : > { %4192 = vst [vmem:[%s5422_s19 + $0x130] sm:$0xff] %v1776_v26  ;;  %1972 = vmatmul.f32.gmra.mxu2 %v5569_v44  ;;  %v1583_v51 = vpop.f32.mrf.mxu0 }
 0x207   : > { %v1648_v22 = vpop.f32.mrf.mxu1  ;;  %2037 = vmatmul.f32.gmra.mxu3 %v5573_v53 }
 0x208   : > { %v1649_v43 = vadd.f32 %v1648_v22, %v1583_v51  ;;  %v318_v51 = vld [vmem:[#allocation5 + $0x1a0] sm:$0xff] }
 0x209   : > { %v1713_v5 = vpop.f32.mrf.mxu2  ;;  %1842 = vmatmul.f32.gmra.mxu0 %v5577_v18  ;;  %v918_v18 = vld [vmem:[#allocation5 + $0x1460] sm:$0xff] }
 0x20a   : > { %1907 = vmatmul.f32.gmra.mxu1 %v5581_v23  ;;  %v1778_v11 = vpop.f32.mrf.mxu3  ;;  %v1714_v7 = vadd.f32 %v1713_v5, %v1649_v43  ;;  %2278 = vmatpush.msra.mxu3 %v918_v18  ;;  %v510_v22 = vld [vmem:[#allocation5 + $0x7a0] sm:$0xff] }
 0x20b   : > { %2085 = vmatpush.msra.mxu0 %v318_v51  ;;  %2150 = vmatpush.msra.mxu1 %v510_v22  ;;  %v690_v43 = vld [vmem:[#allocation5 + $0xd40] sm:$0xff]  ;;  %v823_v51 = vld [vmem:[#allocation5 + $0x1168] sm:$0xff] }
 0x20c   : > { %v1779_v44 = vadd.f32 %v1778_v11, %v1714_v7  ;;  %2216 = vmatpush.msra.mxu2 %v690_v43  ;;  %v306_v7 = vld [vmem:[#allocation5 + $0x140] sm:$0xff] }
 0x20d   : > { %2086 = vmatpush.msra.mxu0 %v306_v7  ;;  %2151 = vmatpush.msra.mxu1 %v498_v36  ;;  %v486_v18 = vld [vmem:[#allocation5 + $0x6e0] sm:$0xff] }
 0x20e   : > { %4204 = vst [vmem:[%s5422_s19 + $0x190] sm:$0xff] %v1779_v44  ;;  %1975 = vmatmul.f32.gmra.mxu2 %v5586_v41  ;;  %v1586_v53 = vpop.f32.mrf.mxu0  ;;  %v678_v44 = vld [vmem:[#allocation5 + $0xce0] sm:$0xff] }
 0x20f   : > { %v1651_v3 = vpop.f32.mrf.mxu1  ;;  %2040 = vmatmul.f32.gmra.mxu3 %v5590_v28  ;;  %2217 = vmatpush.msra.mxu2 %v678_v44  ;;  %v1003_v44 = vld [vmem:[#allocation5 + $0x1708] sm:$0xff] }
 0x210   : > { %v1652_v42 = vadd.f32 %v1651_v3, %v1586_v53  ;;  %2152 = vmatpush.msra.mxu1 %v486_v18  ;;  %v619_v18 = vld [vmem:[#allocation5 + $0xb08] sm:$0xff] }
 0x211   : > { %v1716_v23 = vpop.f32.mrf.mxu2  ;;  %1845 = vmatmul.f32.gmra.mxu0 %v5594_v12  ;;  %v906_v12 = vld [vmem:[#allocation5 + $0x1400] sm:$0xff] }
 0x212   : > { %1910 = vmatmul.f32.gmra.mxu1 %v5598_v13  ;;  %v1781_v57 = vpop.f32.mrf.mxu3  ;;  %v1717_v38 = vadd.f32 %v1716_v23, %v1652_v42  ;;  %2279 = vmatpush.msra.mxu3 %v906_v12  ;;  %v294_v42 = vld [vmem:[#allocation5 + $0xe0] sm:$0xff] }
 0x213   : > { %2087 = vmatpush.msra.mxu0 %v294_v42  ;;  %v427_v42 = vld [vmem:[#allocation5 + $0x508] sm:$0xff] }
 0x214   : > { %v1782_v41 = vadd.f32 %v1781_v57, %v1717_v38  ;;  %v666_v57 = vld [vmem:[#allocation5 + $0xc80] sm:$0xff] }
 0x215   : > { %2218 = vmatpush.msra.mxu2 %v666_v57 }
 0x216   : > { %4216 = vst [vmem:[%s5422_s19 + $0x1f0] sm:$0xff] %v1782_v41  ;;  %1978 = vmatmul.f32.gmra.mxu2 %v5603_v20  ;;  %v1589_v28 = vpop.f32.mrf.mxu0  ;;  %v282_v41 = vld [vmem:[#allocation5 + $0x80] sm:$0xff] }
 0x217   : > { %v1654_v46 = vpop.f32.mrf.mxu1  ;;  %2043 = vmatmul.f32.gmra.mxu3 %v5607_v25  ;;  %2088 = vmatpush.msra.mxu0 %v282_v41  ;;  %v7443_v41 = vld [vmem:[#allocation22_spill] sm:$0xff] }
 0x218   : > { %v1655_v54 = vadd.f32 %v1654_v46, %v1589_v28  ;;  %v474_v28 = vld [vmem:[#allocation5 + $0x680] sm:$0xff]  ;;  %2219 = vmatpush.msra.mxu2 %v654_v60  ;;  %v607_v60 = vld [vmem:[#allocation5 + $0xaa8] sm:$0xff] }
 0x219   : > { %v1719_v13 = vpop.f32.mrf.mxu2  ;;  %1848 = vmatmul.f32.gmra.mxu0 %v5611_v50  ;;  %v894_v50 = vld [vmem:[#allocation5 + $0x13a0] sm:$0xff]  ;;  %2153 = vmatpush.msra.mxu1 %v474_v28 }
 0x21a   : > { %1913 = vmatmul.f32.gmra.mxu1 %v5615_v4  ;;  %v1784_v63 = vpop.f32.mrf.mxu3  ;;  %v1720_v19 = vadd.f32 %v1719_v13, %v1655_v54  ;;  %2280 = vmatpush.msra.mxu3 %v894_v50  ;;  %v643_v50 = vld [vmem:[#allocation5 + $0xbc8] sm:$0xff]  ;;  %v7444_v28 = vld [vmem:[#allocation23_spill] sm:$0xff] }
 0x21b   : > { %2464 = vmatpush.msrb.mxu2 %v835_v49  ;;  %v5865_v49 = vld [vmem:[%s5151_s15 + $0x8] sm:$0xff] }
 0x21c   : > { %v1785_v20 = vadd.f32 %v1784_v63, %v1720_v19  ;;  %v270_v63 = vld [vmem:[#allocation5 + $0x20] sm:$0xff] }
 0x21d   : > { %v462_v19 = vld [vmem:[#allocation5 + $0x620] sm:$0xff]  ;;  %2089 = vmatpush.msra.mxu0 %v270_v63  ;;  %2465 = vmatpush.msrb.mxu2 %v823_v51  ;;  %v787_v63 = vld [vmem:[#allocation5 + $0x1048] sm:$0xff] }
 0x21e   : > { %4228 = vst [vmem:[%s5422_s19 + $0x250] sm:$0xff] %v1785_v20  ;;  %1981 = vmatmul.f32.gmra.mxu2 %v5620_v39  ;;  %v1592_v25 = vpop.f32.mrf.mxu0  ;;  %2154 = vmatpush.msra.mxu1 %v462_v19  ;;  %v5878_v51 = vld [vmem:[%s5151_s15 + $0x20] sm:$0xff] }
 0x21f   : > { %v1657_v33 = vpop.f32.mrf.mxu1  ;;  %2046 = vmatmul.f32.gmra.mxu3 %v5624_v34 }
 0x220   : > { %v1658_v8 = vadd.f32 %v1657_v33, %v1592_v25  ;;  %v7432_v25 = vld [vmem:[#allocation11_spill] sm:$0xff]  ;;  %2399 = vmatpush.msrb.mxu1 %v643_v50 }
 0x221   : > { %v1722_v4 = vpop.f32.mrf.mxu2  ;;  %1851 = vmatmul.f32.gmra.mxu0 %v5628_v45  ;;  %v882_v45 = vld [vmem:[#allocation5 + $0x1340] sm:$0xff] }
 0x222   : > { %1916 = vmatmul.f32.gmra.mxu1 %v5632_v9  ;;  %v1787_v16 = vpop.f32.mrf.mxu3  ;;  %v1723_v26 = vadd.f32 %v1722_v4, %v1658_v8  ;;  %2281 = vmatpush.msra.mxu3 %v882_v45  ;;  %v451_v8 = vld [vmem:[#allocation5 + $0x5c8] sm:$0xff] }
 0x223   : > { %2334 = vmatpush.msrb.mxu0 %v451_v8  ;;  %v439_v45 = vld [vmem:[#allocation5 + $0x568] sm:$0xff] }
 0x224   : > { %v1788_v39 = vadd.f32 %v1787_v16, %v1723_v26  ;;  %v7434_v26 = vld [vmem:[#allocation13_spill] sm:$0xff] }
 0x225   : > { %2335 = vmatpush.msrb.mxu0 %v439_v45 }
 0x226   : > { %4240 = vst [vmem:[%s5422_s19 + $0x2b0] sm:$0xff] %v1788_v39  ;;  %1984 = vmatmul.f32.gmra.mxu2 %v5637_v14  ;;  %v1595_v34 = vpop.f32.mrf.mxu0 }
 0x227   : > { %v1660_v35 = vpop.f32.mrf.mxu1  ;;  %2049 = vmatmul.f32.gmra.mxu3 %v5641_v32  ;;  %2336 = vmatpush.msrb.mxu0 %v427_v42 }
 0x228   : > { %v1661_v31 = vadd.f32 %v1660_v35, %v1595_v34  ;;  %v7435_v34 = vld [vmem:[#allocation14_spill] sm:$0xff]  ;;  %v7436_v35 = vld [vmem:[#allocation15_spill] sm:$0xff] }
 0x229   : > { %v1725_v9 = vpop.f32.mrf.mxu2  ;;  %1854 = vmatmul.f32.gmra.mxu0 %v5645_v61  ;;  %v870_v61 = vld [vmem:[#allocation5 + $0x12e0] sm:$0xff] }
 0x22a   : > { %1919 = vmatmul.f32.gmra.mxu1 %v5649_v17  ;;  %v1790_v5 = vpop.f32.mrf.mxu3  ;;  %v1726_v11 = vadd.f32 %v1725_v9, %v1661_v31  ;;  %2282 = vmatpush.msra.mxu3 %v870_v61  ;;  %v631_v9 = vld [vmem:[#allocation5 + $0xb68] sm:$0xff]  ;;  %v7439_v61 = vld [vmem:[#allocation18_spill] sm:$0xff] }
 0x22b   : > { %2400 = vmatpush.msrb.mxu1 %v631_v9 }
 0x22c   : > { %v1791_v14 = vadd.f32 %v1790_v5, %v1726_v11  ;;  %v7437_v11 = vld [vmem:[#allocation16_spill] sm:$0xff] }
 0x22d   : > { %2401 = vmatpush.msrb.mxu1 %v619_v18 }
 0x22e   : > { %4252 = vst [vmem:[%s5422_s19 + $0x310] sm:$0xff] %v1791_v14  ;;  %1987 = vmatmul.f32.gmra.mxu2 %v5654_v27  ;;  %v1598_v32 = vpop.f32.mrf.mxu0  ;;  %v7438_v14 = vld [vmem:[#allocation17_spill] sm:$0xff] }
 0x22f   : > { %v1663_v29 = vpop.f32.mrf.mxu1  ;;  %2052 = vmatmul.f32.gmra.mxu3 %v5658_v37  ;;  %2402 = vmatpush.msrb.mxu1 %v607_v60 }
 0x230   : > { %v1664_v53 = vadd.f32 %v1663_v29, %v1598_v32  ;;  %v811_v32 = vld [vmem:[#allocation5 + $0x1108] sm:$0xff] }
 0x231   : > { %v1728_v17 = vpop.f32.mrf.mxu2  ;;  %1857 = vmatmul.f32.gmra.mxu0 %v5662_v52  ;;  %v858_v52 = vld [vmem:[#allocation5 + $0x1280] sm:$0xff]  ;;  %2466 = vmatpush.msrb.mxu2 %v811_v32 }
 0x232   : > { %1922 = vmatmul.f32.gmra.mxu1 %v5666_v59  ;;  %v1793_v3 = vpop.f32.mrf.mxu3  ;;  %v1729_v47 = vadd.f32 %v1728_v17, %v1664_v53  ;;  %2283 = vmatpush.msra.mxu3 %v858_v52  ;;  %v7440_v17 = vld [vmem:[#allocation19_spill] sm:$0xff]  ;;  %v799_v52 = vld [vmem:[#allocation5 + $0x10a8] sm:$0xff] }
 0x233   : > { %2467 = vmatpush.msrb.mxu2 %v799_v52  ;;  %v5895_v32 = vld [vmem:[%s5151_s15 + $0x40] sm:$0xff] }
 0x234   : > { %v1794_v27 = vadd.f32 %v1793_v3, %v1729_v47  ;;  %v5912_v52 = vld [vmem:[%s5151_s15 + $0x60] sm:$0xff] }
 0x235   : > { %2468 = vmatpush.msrb.mxu2 %v787_v63  ;;  %v931_v63 = vld [vmem:[#allocation5 + $0x14c8] sm:$0xff] }
 0x236   : > { %4264 = vst [vmem:[%s5422_s19 + $0x370] sm:$0xff] %v1794_v27  ;;  %1990 = vmatmul.f32.gmra.mxu2 %v5671_v10  ;;  %v1601_v37 = vpop.f32.mrf.mxu0 }
 0x237   : > { %v1666_v23 = vpop.f32.mrf.mxu1  ;;  %2055 = vmatmul.f32.gmra.mxu3 %v5675_v15 }
 0x238   : > { %v1667_v38 = vadd.f32 %v1666_v23, %v1601_v37  ;;  %v7441_v37 = vld [vmem:[#allocation20_spill] sm:$0xff] }
 0x239   : > { %v1731_v59 = vpop.f32.mrf.mxu2  ;;  %1860 = vmatmul.f32.gmra.mxu0 %v5679_v21  ;;  %v846_v21 = vld [vmem:[#allocation5 + $0x1220] sm:$0xff] }
 0x23a   : > { %1925 = vmatmul.f32.gmra.mxu1 %v5683_v24  ;;  %v1796_v1 = vpop.f32.mrf.mxu3  ;;  %v1732_v58 = vadd.f32 %v1731_v59, %v1667_v38  ;;  %2284 = vmatpush.msra.mxu3 %v846_v21  ;;  %v7442_v38 = vld [vmem:[#allocation21_spill] sm:$0xff] }
 0x23b   : > { %v5853_v21 = vld [vmem:[%s5151_s15 + $0x10] sm:$0xff] }
 0x23c   : > { %v1797_v10 = vadd.f32 %v1796_v1, %v1732_v58  ;;  %v991_v1 = vld [vmem:[#allocation5 + $0x16a8] sm:$0xff] }
 0x23e   : > { %4276 = vst [vmem:[%s5422_s19 + $0x3d0] sm:$0xff] %v1797_v10  ;;  %1993 = vmatmul.f32.gmra.mxu2 %v5688_v56  ;;  %v1604_v15 = vpop.f32.mrf.mxu0 }
 0x23f   : > { %v1669_v46 = vpop.f32.mrf.mxu1  ;;  %2058 = vmatmul.f32.gmra.mxu3 %v5692_v0 }
 0x240   : > { %v1670_v54 = vadd.f32 %v1669_v46, %v1604_v15  ;;  %v415_v46 = vld [vmem:[#allocation5 + $0x4a8] sm:$0xff] }
 0x241   : > { %v1734_v24 = vpop.f32.mrf.mxu2  ;;  %1863 = vmatmul.f32.gmra.mxu0 %v5696_v40  ;;  %v1027_v40 = vld [vmem:[#allocation5 + $0x17c8] sm:$0xff] }
 0x242   : > { %1928 = vmatmul.f32.gmra.mxu1 %v5700_v6  ;;  %v1799_v12 = vpop.f32.mrf.mxu3  ;;  %v1735_v13 = vadd.f32 %v1734_v24, %v1670_v54  ;;  %2529 = vmatpush.msrb.mxu3 %v1027_v40 }
 0x243   : > { %2337 = vmatpush.msrb.mxu0 %v415_v46 }
 0x244   : > { %v1800_v56 = vadd.f32 %v1799_v12, %v1735_v13  ;;  %v5857_v13 = vld [vmem:[%s5151_s15 + $0x18] sm:$0xff] }
 0x246   : > { %4288 = vst [vmem:[%s5422_s19 + $0x430] sm:$0xff] %v1800_v56  ;;  %1996 = vmatmul.f32.gmra.mxu2 %v5705_v62  ;;  %v1607_v0 = vpop.f32.mrf.mxu0  ;;  %v979_v56 = vld [vmem:[#allocation5 + $0x1648] sm:$0xff] }
 0x247   : > { %v1672_v48 = vpop.f32.mrf.mxu1  ;;  %2061 = vmatmul.f32.gmra.mxu3 %v5709_v30  ;;  %v7433_v30 = vld [vmem:[#allocation12_spill] sm:$0xff] }
 0x248   : > { %v1673_v20 = vadd.f32 %v1672_v48, %v1607_v0  ;;  %v5861_v48 = vld [vmem:[%s5151_s15] sm:$0xff] }
 0x249   : > { %v1737_v6 = vpop.f32.mrf.mxu2  ;;  %1866 = vmatmul.f32.gmra.mxu0 %v5713_v55  ;;  %v1015_v55 = vld [vmem:[#allocation5 + $0x1768] sm:$0xff] }
 0x24a   : > { %1931 = vmatmul.f32.gmra.mxu1 %v7432_v25  ;;  %v1802_v33 = vpop.f32.mrf.mxu3  ;;  %v1738_v2 = vadd.f32 %v1737_v6, %v1673_v20  ;;  %2530 = vmatpush.msrb.mxu3 %v1015_v55  ;;  %v403_v6 = vld [vmem:[#allocation5 + $0x448] sm:$0xff] }
 0x24b   : > { %v595_v25 = vld [vmem:[#allocation5 + $0xa48] sm:$0xff]  ;;  %2338 = vmatpush.msrb.mxu0 %v403_v6 }
 0x24c   : > { %v1803_v62 = vadd.f32 %v1802_v33, %v1738_v2  ;;  %2531 = vmatpush.msrb.mxu3 %v1003_v44  ;;  %2403 = vmatpush.msrb.mxu1 %v595_v25  ;;  %v5870_v2 = vld [vmem:[%s5151_s15 + $0x30] sm:$0xff]  ;;  %v355_v6 = vld [vmem:[#allocation5 + $0x2c8] sm:$0xff] }
 0x24d   : > { %v547_v25 = vld [vmem:[#allocation5 + $0x8c8] sm:$0xff] }
 0x24e   : > { %4300 = vst [vmem:[%s5422_s19 + $0x490] sm:$0xff] %v1803_v62  ;;  %1999 = vmatmul.f32.gmra.mxu2 %v7433_v30  ;;  %v1610_v4 = vpop.f32.mrf.mxu0  ;;  %2532 = vmatpush.msrb.mxu3 %v991_v1  ;;  %v5874_v62 = vld [vmem:[%s5151_s15 + $0x38] sm:$0xff]  ;;  %v775_v30 = vld [vmem:[#allocation5 + $0xfe8] sm:$0xff] }
 0x24f   : > { %v1675_v16 = vpop.f32.mrf.mxu1  ;;  %2064 = vmatmul.f32.gmra.mxu3 %v7434_v26  ;;  %2469 = vmatpush.msrb.mxu2 %v775_v30 }
 0x250   : > { %v1676_v22 = vadd.f32 %v1675_v16, %v1610_v4  ;;  %2533 = vmatpush.msrb.mxu3 %v979_v56  ;;  %v967_v16 = vld [vmem:[#allocation5 + $0x15e8] sm:$0xff]  ;;  %v5929_v56 = vld [vmem:[%s5151_s15 + $0x80] sm:$0xff] }
 0x251   : > { %v1740_v39 = vpop.f32.mrf.mxu2  ;;  %1869 = vmatmul.f32.gmra.mxu0 %v7435_v34  ;;  %v391_v34 = vld [vmem:[#allocation5 + $0x3e8] sm:$0xff] }
 0x252   : > { %1934 = vmatmul.f32.gmra.mxu1 %v7436_v35  ;;  %v1805_v43 = vpop.f32.mrf.mxu3  ;;  %v1741_v31 = vadd.f32 %v1740_v39, %v1676_v22  ;;  %2534 = vmatpush.msrb.mxu3 %v967_v16  ;;  %v5882_v22 = vld [vmem:[%s5151_s15 + $0x28] sm:$0xff] }
 0x253   : > { %v583_v35 = vld [vmem:[#allocation5 + $0x9e8] sm:$0xff]  ;;  %2339 = vmatpush.msrb.mxu0 %v391_v34  ;;  %v5946_v34 = vld [vmem:[%s5151_s15 + $0xa0] sm:$0xff] }
 0x254   : > { %v1806_v5 = vadd.f32 %v1805_v43, %v1741_v31  ;;  %2404 = vmatpush.msrb.mxu1 %v583_v35  ;;  %v5887_v31 = vld [vmem:[%s5151_s15 + $0x50] sm:$0xff]  ;;  %v727_v16 = vld [vmem:[#allocation5 + $0xe68] sm:$0xff] }
 0x255   : > { %v5950_v35 = vld [vmem:[%s5151_s15 + $0xa8] sm:$0xff] }
 0x256   : > { %4312 = vst [vmem:[%s5422_s19 + $0x4f0] sm:$0xff] %v1806_v5  ;;  %2002 = vmatmul.f32.gmra.mxu2 %v7437_v11  ;;  %v1613_v7 = vpop.f32.mrf.mxu0  ;;  %v5891_v5 = vld [vmem:[%s5151_s15 + $0x58] sm:$0xff]  ;;  %v763_v11 = vld [vmem:[#allocation5 + $0xf88] sm:$0xff] }
 0x257   : > { %v1678_v36 = vpop.f32.mrf.mxu1  ;;  %2067 = vmatmul.f32.gmra.mxu3 %v7438_v14  ;;  %2470 = vmatpush.msrb.mxu2 %v763_v11  ;;  %v535_v11 = vld [vmem:[#allocation5 + $0x868] sm:$0xff] }
 0x258   : > { %v1679_v29 = vadd.f32 %v1678_v36, %v1613_v7  ;;  %v955_v36 = vld [vmem:[#allocation5 + $0x1588] sm:$0xff] }
 0x259   : > { %v1743_v53 = vpop.f32.mrf.mxu2  ;;  %1872 = vmatmul.f32.gmra.mxu0 %v7439_v61  ;;  %2535 = vmatpush.msrb.mxu3 %v955_v36  ;;  %v379_v61 = vld [vmem:[#allocation5 + $0x388] sm:$0xff]  ;;  %v5955_v36 = vld [vmem:[%s5151_s15 + $0xd0] sm:$0xff] }
 0x25a   : > { %1937 = vmatmul.f32.gmra.mxu1 %v7440_v17  ;;  %v1808_v3 = vpop.f32.mrf.mxu3  ;;  %v1744_v47 = vadd.f32 %v1743_v53, %v1679_v29  ;;  %v5899_v29 = vld [vmem:[%s5151_s15 + $0x48] sm:$0xff]  ;;  %2340 = vmatpush.msrb.mxu0 %v379_v61 }
 0x25b   : > { %v571_v17 = vld [vmem:[#allocation5 + $0x988] sm:$0xff] }
 0x25c   : > { %v1809_v27 = vadd.f32 %v1808_v3, %v1744_v47  ;;  %2405 = vmatpush.msrb.mxu1 %v571_v17  ;;  %v5904_v47 = vld [vmem:[%s5151_s15 + $0x70] sm:$0xff]  ;;  %v715_v61 = vld [vmem:[#allocation5 + $0xe08] sm:$0xff] }
 0x25e   : > { %4324 = vst [vmem:[%s5422_s19 + $0x550] sm:$0xff] %v1809_v27  ;;  %2005 = vmatmul.f32.gmra.mxu2 %v7441_v37  ;;  %v1616_v23 = vpop.f32.mrf.mxu0  ;;  %v5908_v27 = vld [vmem:[%s5151_s15 + $0x78] sm:$0xff]  ;;  %v751_v37 = vld [vmem:[#allocation5 + $0xf28] sm:$0xff] }
 0x25f   : > { %v1681_v57 = vpop.f32.mrf.mxu1  ;;  %2070 = vmatmul.f32.gmra.mxu3 %v7442_v38  ;;  %2471 = vmatpush.msrb.mxu2 %v751_v37  ;;  %v5967_v37 = vld [vmem:[%s5151_s15 + $0xc8] sm:$0xff] }
 0x260   : > { %v1682_v59 = vadd.f32 %v1681_v57, %v1616_v23  ;;  %v943_v57 = vld [vmem:[#allocation5 + $0x1528] sm:$0xff] }
 0x261   : > { %v1746_v58 = vpop.f32.mrf.mxu2  ;;  %1875 = vmatmul.f32.gmra.mxu0 %v7443_v41  ;;  %2536 = vmatpush.msrb.mxu3 %v943_v57  ;;  %v367_v41 = vld [vmem:[#allocation5 + $0x328] sm:$0xff] }
 0x262   : > { %1940 = vmatmul.f32.gmra.mxu1 %v7444_v28  ;;  %v1811_v10 = vpop.f32.mrf.mxu3  ;;  %v1747_v15 = vadd.f32 %v1746_v58, %v1682_v59  ;;  %v5916_v59 = vld [vmem:[%s5151_s15 + $0x68] sm:$0xff]  ;;  %2341 = vmatpush.msrb.mxu0 %v367_v41  ;;  %v5972_v41 = vld [vmem:[%s5151_s15 + $0xf0] sm:$0xff] }
 0x263   : > { %v559_v28 = vld [vmem:[#allocation5 + $0x928] sm:$0xff]  ;;  %2537 = vmatpush.msrb.mxu3 %v931_v63 }
 0x264   : > { %v1812_v54 = vadd.f32 %v1811_v10, %v1747_v15  ;;  %2406 = vmatpush.msrb.mxu1 %v559_v28  ;;  %v5921_v15 = vld [vmem:[%s5151_s15 + $0x90] sm:$0xff]  ;;  %2342 = vmatpush.msrb.mxu0 %v355_v6 }
 0x266   : > { %4336 = vst [vmem:[%s5422_s19 + $0x5b0] sm:$0xff] %v1812_v54  ;;  %2220 = vmatmul.f32.vlgmr.msra.gmra.mxu2 %v5853_v21  ;;  %v1831_v24 = vpop.f32.mrf.mxu0  ;;  %v5925_v54 = vld [vmem:[%s5151_s15 + $0x98] sm:$0xff]  ;;  %2407 = vmatpush.msrb.mxu1 %v547_v25  ;;  %v319_v25 = vld [vmem:[#allocation5 + $0x1a8] sm:$0xff] }
 0x267   : > { %v1896_v12 = vpop.f32.mrf.mxu1  ;;  %2285 = vmatmul.f32.vlgmr.msra.gmra.mxu3 %v5857_v13 }
 0x268   : > { %v1897_v19 = vadd.f32 %v1896_v12, %v1831_v24  ;;  %v739_v24 = vld [vmem:[#allocation5 + $0xec8] sm:$0xff]  ;;  %2408 = vmatpush.msrb.mxu1 %v535_v11  ;;  %v5997_v11 = vld [vmem:[%s5151_s15 + $0x100] sm:$0xff] }
 0x269   : > { %v1961_v0 = vpop.f32.mrf.mxu2  ;;  %2090 = vmatmul.f32.vlgmr.msra.gmra.mxu0 %v5861_v48  ;;  %2472 = vmatpush.msrb.mxu2 %v739_v24 }
 0x26a   : > { %2155 = vmatmul.f32.vlgmr.msra.gmra.mxu1 %v5865_v49  ;;  %v2026_v20 = vpop.f32.mrf.mxu3  ;;  %v1962_v40 = vadd.f32 %v1961_v0, %v1897_v19  ;;  %v5933_v0 = vld [vmem:[%s5151_s15 + $0x88] sm:$0xff] }
 0x26b   : > { %2473 = vmatpush.msrb.mxu2 %v727_v16 }
 0x26c   : > { %v2027_v33 = vadd.f32 %v2026_v20, %v1962_v40 }
 0x26d   : > { %2474 = vmatpush.msrb.mxu2 %v715_v61  ;;  %v307_v61 = vld [vmem:[#allocation5 + $0x148] sm:$0xff] }
 0x26e   : > { %4157 = vst [vmem:[%s5422_s19 + $0x18] sm:$0xff] %v2027_v33  ;;  %2223 = vmatmul.f32.gmra.mxu2 %v5870_v2  ;;  %v1834_v8 = vpop.f32.mrf.mxu0 }
 0x26f   : > { %v1899_v50 = vpop.f32.mrf.mxu1  ;;  %2288 = vmatmul.f32.gmra.mxu3 %v5874_v62 }
 0x270   : > { %v1900_v4 = vadd.f32 %v1899_v50, %v1834_v8  ;;  %v5938_v8 = vld [vmem:[%s5151_s15 + $0xb0] sm:$0xff] }
 0x271   : > { %v1964_v26 = vpop.f32.mrf.mxu2  ;;  %2093 = vmatmul.f32.gmra.mxu0 %v5878_v51 }
 0x272   : > { %2158 = vmatmul.f32.gmra.mxu1 %v5882_v22  ;;  %v2029_v55 = vpop.f32.mrf.mxu3  ;;  %v1965_v39 = vadd.f32 %v1964_v26, %v1900_v4  ;;  %v5942_v4 = vld [vmem:[%s5151_s15 + $0xb8] sm:$0xff] }
 0x274   : > { %v2030_v43 = vadd.f32 %v2029_v55, %v1965_v39  ;;  %v919_v55 = vld [vmem:[#allocation5 + $0x1468] sm:$0xff] }
 0x275   : > { %2538 = vmatpush.msrb.mxu3 %v919_v55  ;;  %v5993_v55 = vld [vmem:[%s5151_s15 + $0x118] sm:$0xff] }
 0x276   : > { %4169 = vst [vmem:[%s5422_s19 + $0x78] sm:$0xff] %v2030_v43  ;;  %2226 = vmatmul.f32.gmra.mxu2 %v5887_v31  ;;  %v1837_v45 = vpop.f32.mrf.mxu0 }
 0x277   : > { %v1902_v9 = vpop.f32.mrf.mxu1  ;;  %2291 = vmatmul.f32.gmra.mxu3 %v5891_v5 }
 0x278   : > { %v1903_v7 = vadd.f32 %v1902_v9, %v1837_v45  ;;  %v343_v9 = vld [vmem:[#allocation5 + $0x268] sm:$0xff] }
 0x279   : > { %v1967_v14 = vpop.f32.mrf.mxu2  ;;  %2096 = vmatmul.f32.gmra.mxu0 %v5895_v32 }
 0x27a   : > { %2161 = vmatmul.f32.gmra.mxu1 %v5899_v29  ;;  %v2032_v44 = vpop.f32.mrf.mxu3  ;;  %v1968_v53 = vadd.f32 %v1967_v14, %v1903_v7  ;;  %2343 = vmatpush.msrb.mxu0 %v343_v9 }
 0x27c   : > { %v2033_v3 = vadd.f32 %v2032_v44, %v1968_v53  ;;  %v5959_v53 = vld [vmem:[%s5151_s15 + $0xd8] sm:$0xff] }
 0x27e   : > { %4181 = vst [vmem:[%s5422_s19 + $0xd8] sm:$0xff] %v2033_v3  ;;  %2229 = vmatmul.f32.gmra.mxu2 %v5904_v47  ;;  %v1840_v42 = vpop.f32.mrf.mxu0  ;;  %v907_v3 = vld [vmem:[#allocation5 + $0x1408] sm:$0xff] }
 0x27f   : > { %v1905_v18 = vpop.f32.mrf.mxu1  ;;  %2294 = vmatmul.f32.gmra.mxu3 %v5908_v27 }
 0x280   : > { %v1906_v23 = vadd.f32 %v1905_v18, %v1840_v42  ;;  %2539 = vmatpush.msrb.mxu3 %v907_v3  ;;  %v5963_v18 = vld [vmem:[%s5151_s15 + $0xc0] sm:$0xff] }
 0x281   : > { %v1970_v38 = vpop.f32.mrf.mxu2  ;;  %2099 = vmatmul.f32.gmra.mxu0 %v5912_v52 }
 0x282   : > { %2164 = vmatmul.f32.gmra.mxu1 %v5916_v59  ;;  %v2035_v1 = vpop.f32.mrf.mxu3  ;;  %v1971_v58 = vadd.f32 %v1970_v38, %v1906_v23  ;;  %v331_v38 = vld [vmem:[#allocation5 + $0x208] sm:$0xff] }
 0x283   : > { %2344 = vmatpush.msrb.mxu0 %v331_v38  ;;  %v6010_v38 = vld [vmem:[%s5151_s15 + $0x138] sm:$0xff] }
 0x284   : > { %v2036_v10 = vadd.f32 %v2035_v1, %v1971_v58  ;;  %v523_v1 = vld [vmem:[#allocation5 + $0x808] sm:$0xff] }
 0x285   : > { %2409 = vmatpush.msrb.mxu1 %v523_v1  ;;  %2345 = vmatpush.msrb.mxu0 %v319_v25  ;;  %v679_v1 = vld [vmem:[#allocation5 + $0xce8] sm:$0xff] }
 0x286   : > { %4193 = vst [vmem:[%s5422_s19 + $0x138] sm:$0xff] %v2036_v10  ;;  %2232 = vmatmul.f32.gmra.mxu2 %v5921_v15  ;;  %v1843_v46 = vpop.f32.mrf.mxu0 }
 0x287   : > { %v1908_v60 = vpop.f32.mrf.mxu1  ;;  %2297 = vmatmul.f32.gmra.mxu3 %v5925_v54  ;;  %2346 = vmatpush.msrb.mxu0 %v307_v61 }
 0x288   : > { %v1909_v12 = vadd.f32 %v1908_v60, %v1843_v46  ;;  %v5976_v46 = vld [vmem:[%s5151_s15 + $0xf8] sm:$0xff]  ;;  %v703_v60 = vld [vmem:[#allocation5 + $0xda8] sm:$0xff] }
 0x289   : > { %v1973_v19 = vpop.f32.mrf.mxu2  ;;  %2102 = vmatmul.f32.gmra.mxu0 %v5929_v56  ;;  %2475 = vmatpush.msrb.mxu2 %v703_v60  ;;  %v6014_v60 = vld [vmem:[%s5151_s15 + $0x120] sm:$0xff] }
 0x28a   : > { %2167 = vmatmul.f32.gmra.mxu1 %v5933_v0  ;;  %v2038_v20 = vpop.f32.mrf.mxu3  ;;  %v1974_v40 = vadd.f32 %v1973_v19, %v1909_v12  ;;  %v895_v12 = vld [vmem:[#allocation5 + $0x13a8] sm:$0xff]  ;;  %v5980_v19 = vld [vmem:[%s5151_s15 + $0xe0] sm:$0xff] }
 0x28b   : > { %2540 = vmatpush.msrb.mxu3 %v895_v12 }
 0x28c   : > { %v2039_v33 = vadd.f32 %v2038_v20, %v1974_v40  ;;  %v5984_v20 = vld [vmem:[%s5151_s15 + $0xe8] sm:$0xff] }
 0x28e   : > { %4205 = vst [vmem:[%s5422_s19 + $0x198] sm:$0xff] %v2039_v33  ;;  %2235 = vmatmul.f32.gmra.mxu2 %v5938_v8  ;;  %v1846_v50 = vpop.f32.mrf.mxu0  ;;  %v511_v33 = vld [vmem:[#allocation5 + $0x7a8] sm:$0xff] }
 0x28f   : > { %v1911_v30 = vpop.f32.mrf.mxu1  ;;  %2300 = vmatmul.f32.gmra.mxu3 %v5942_v4  ;;  %2410 = vmatpush.msrb.mxu1 %v511_v33  ;;  %v6023_v33 = vld [vmem:[%s5151_s15 + $0x150] sm:$0xff] }
 0x290   : > { %v1912_v26 = vadd.f32 %v1911_v30, %v1846_v50  ;;  %v5989_v30 = vld [vmem:[%s5151_s15 + $0x110] sm:$0xff] }
 0x291   : > { %v1976_v39 = vpop.f32.mrf.mxu2  ;;  %2105 = vmatmul.f32.gmra.mxu0 %v5946_v34 }
 0x292   : > { %2170 = vmatmul.f32.gmra.mxu1 %v5950_v35  ;;  %v2041_v43 = vpop.f32.mrf.mxu3  ;;  %v1977_v45 = vadd.f32 %v1976_v39, %v1912_v26  ;;  %v691_v39 = vld [vmem:[#allocation5 + $0xd48] sm:$0xff] }
 0x293   : > { %2476 = vmatpush.msrb.mxu2 %v691_v39  ;;  %v667_v39 = vld [vmem:[#allocation5 + $0xc88] sm:$0xff] }
 0x294   : > { %v2042_v7 = vadd.f32 %v2041_v43, %v1977_v45  ;;  %v883_v45 = vld [vmem:[#allocation5 + $0x1348] sm:$0xff] }
 0x295   : > { %2541 = vmatpush.msrb.mxu3 %v883_v45  ;;  %2477 = vmatpush.msrb.mxu2 %v679_v1  ;;  %v859_v45 = vld [vmem:[#allocation5 + $0x1288] sm:$0xff]  ;;  %v6040_v1 = vld [vmem:[%s5151_s15 + $0x170] sm:$0xff] }
 0x296   : > { %4217 = vst [vmem:[%s5422_s19 + $0x1f8] sm:$0xff] %v2042_v7  ;;  %2238 = vmatmul.f32.gmra.mxu2 %v5955_v36  ;;  %v1849_v14 = vpop.f32.mrf.mxu0  ;;  %v6001_v7 = vld [vmem:[%s5151_s15 + $0x108] sm:$0xff] }
 0x297   : > { %v1914_v44 = vpop.f32.mrf.mxu1  ;;  %2303 = vmatmul.f32.gmra.mxu3 %v5959_v53  ;;  %2478 = vmatpush.msrb.mxu2 %v667_v39 }
 0x298   : > { %v1915_v17 = vadd.f32 %v1914_v44, %v1849_v14 }
 0x299   : > { %v1979_v42 = vpop.f32.mrf.mxu2  ;;  %2108 = vmatmul.f32.gmra.mxu0 %v5963_v18 }
 0x29a   : > { %2173 = vmatmul.f32.gmra.mxu1 %v5967_v37  ;;  %v2044_v23 = vpop.f32.mrf.mxu3  ;;  %v1980_v57 = vadd.f32 %v1979_v42, %v1915_v17  ;;  %v499_v17 = vld [vmem:[#allocation5 + $0x748] sm:$0xff]  ;;  %v6006_v42 = vld [vmem:[%s5151_s15 + $0x130] sm:$0xff] }
 0x29b   : > { %2411 = vmatpush.msrb.mxu1 %v499_v17 }
 0x29c   : > { %v2045_v58 = vadd.f32 %v2044_v23, %v1980_v57 }
 0x29e   : > { %4229 = vst [vmem:[%s5422_s19 + $0x258] sm:$0xff] %v2045_v58  ;;  %2241 = vmatmul.f32.gmra.mxu2 %v5972_v41  ;;  %v1852_v28 = vpop.f32.mrf.mxu0 }
 0x29f   : > { %v1917_v10 = vpop.f32.mrf.mxu1  ;;  %2306 = vmatmul.f32.gmra.mxu3 %v5976_v46 }
 0x2a0   : > { %v1918_v24 = vadd.f32 %v1917_v10, %v1852_v28  ;;  %v871_v28 = vld [vmem:[#allocation5 + $0x12e8] sm:$0xff] }
 0x2a1   : > { %v1982_v63 = vpop.f32.mrf.mxu2  ;;  %2111 = vmatmul.f32.gmra.mxu0 %v5980_v19  ;;  %2542 = vmatpush.msrb.mxu3 %v871_v28 }
 0x2a2   : > { %2176 = vmatmul.f32.gmra.mxu1 %v5984_v20  ;;  %v2047_v40 = vpop.f32.mrf.mxu3  ;;  %v1983_v6 = vadd.f32 %v1982_v63, %v1918_v24  ;;  %v6018_v24 = vld [vmem:[%s5151_s15 + $0x128] sm:$0xff] }
 0x2a3   : > { %2543 = vmatpush.msrb.mxu3 %v859_v45  ;;  %v463_v45 = vld [vmem:[#allocation5 + $0x628] sm:$0xff] }
 0x2a4   : > { %v2048_v50 = vadd.f32 %v2047_v40, %v1983_v6  ;;  %v295_v40 = vld [vmem:[#allocation5 + $0xe8] sm:$0xff] }
 0x2a5   : > { %v487_v6 = vld [vmem:[#allocation5 + $0x6e8] sm:$0xff]  ;;  %2347 = vmatpush.msrb.mxu0 %v295_v40 }
 0x2a6   : > { %4241 = vst [vmem:[%s5422_s19 + $0x2b8] sm:$0xff] %v2048_v50  ;;  %2244 = vmatmul.f32.gmra.mxu2 %v5989_v30  ;;  %v1855_v16 = vpop.f32.mrf.mxu0  ;;  %2412 = vmatpush.msrb.mxu1 %v487_v6  ;;  %v847_v40 = vld [vmem:[#allocation5 + $0x1228] sm:$0xff] }
 0x2a7   : > { %v1920_v26 = vpop.f32.mrf.mxu1  ;;  %2309 = vmatmul.f32.gmra.mxu3 %v5993_v55 }
 0x2a8   : > { %v1921_v43 = vadd.f32 %v1920_v26, %v1855_v16  ;;  %v6027_v26 = vld [vmem:[%s5151_s15 + $0x158] sm:$0xff]  ;;  %2544 = vmatpush.msrb.mxu3 %v847_v40  ;;  %v6069_v40 = vld [vmem:[%s5151_s15 + $0x188] sm:$0xff] }
 0x2a9   : > { %v1985_v9 = vpop.f32.mrf.mxu2  ;;  %2114 = vmatmul.f32.gmra.mxu0 %v5997_v11  ;;  %7445 = vst [vmem:[#allocation11_spill] sm:$0xff] %v6069_v40 }
 0x2aa   : > { %2179 = vmatmul.f32.gmra.mxu1 %v6001_v7  ;;  %v2050_v14 = vpop.f32.mrf.mxu3  ;;  %v1986_v44 = vadd.f32 %v1985_v9, %v1921_v43 }
 0x2ac   : > { %v2051_v3 = vadd.f32 %v2050_v14, %v1986_v44  ;;  %v6031_v14 = vld [vmem:[%s5151_s15 + $0x140] sm:$0xff]  ;;  %v6035_v44 = vld [vmem:[%s5151_s15 + $0x148] sm:$0xff] }
 0x2ae   : > { %4253 = vst [vmem:[%s5422_s19 + $0x318] sm:$0xff] %v2051_v3  ;;  %2247 = vmatmul.f32.gmra.mxu2 %v6006_v42  ;;  %v1858_v23 = vpop.f32.mrf.mxu0  ;;  %v283_v3 = vld [vmem:[#allocation5 + $0x88] sm:$0xff] }
 0x2af   : > { %v1923_v57 = vpop.f32.mrf.mxu1  ;;  %2312 = vmatmul.f32.gmra.mxu3 %v6010_v38  ;;  %2348 = vmatpush.msrb.mxu0 %v283_v3 }
 0x2b0   : > { %v1924_v58 = vadd.f32 %v1923_v57, %v1858_v23  ;;  %v475_v23 = vld [vmem:[#allocation5 + $0x688] sm:$0xff] }
 0x2b1   : > { %v1988_v10 = vpop.f32.mrf.mxu2  ;;  %2117 = vmatmul.f32.gmra.mxu0 %v6014_v60  ;;  %2413 = vmatpush.msrb.mxu1 %v475_v23  ;;  %v6061_v23 = vld [vmem:[%s5151_s15 + $0x198] sm:$0xff] }
 0x2b2   : > { %2182 = vmatmul.f32.gmra.mxu1 %v6018_v24  ;;  %v2053_v12 = vpop.f32.mrf.mxu3  ;;  %v1989_v63 = vadd.f32 %v1988_v10, %v1924_v58  ;;  %v6044_v10 = vld [vmem:[%s5151_s15 + $0x178] sm:$0xff] }
 0x2b3   : > { %2414 = vmatpush.msrb.mxu1 %v463_v45 }
 0x2b4   : > { %v2054_v25 = vadd.f32 %v2053_v12, %v1989_v63  ;;  %v655_v12 = vld [vmem:[#allocation5 + $0xc28] sm:$0xff] }
 0x2b5   : > { %2479 = vmatpush.msrb.mxu2 %v655_v12 }
 0x2b6   : > { %4265 = vst [vmem:[%s5422_s19 + $0x378] sm:$0xff] %v2054_v25  ;;  %2250 = vmatmul.f32.gmra.mxu2 %v6023_v33  ;;  %v1861_v50 = vpop.f32.mrf.mxu0  ;;  %v6048_v25 = vld [vmem:[%s5151_s15 + $0x160] sm:$0xff] }
 0x2b7   : > { %v1926_v16 = vpop.f32.mrf.mxu1  ;;  %2315 = vmatmul.f32.gmra.mxu3 %v6027_v26 }
 0x2b8   : > { %v1927_v43 = vadd.f32 %v1926_v16, %v1861_v50  ;;  %v6052_v50 = vld [vmem:[%s5151_s15 + $0x168] sm:$0xff] }
 0x2b9   : > { %v1991_v9 = vpop.f32.mrf.mxu2  ;;  %2120 = vmatmul.f32.gmra.mxu0 %v6031_v14 }
 0x2ba   : > { %2185 = vmatmul.f32.gmra.mxu1 %v6035_v44  ;;  %v2056_v61 = vpop.f32.mrf.mxu3  ;;  %v1992_v17 = vadd.f32 %v1991_v9, %v1927_v43  ;;  %v271_v43 = vld [vmem:[#allocation5 + $0x28] sm:$0xff] }
 0x2bb   : > { %2349 = vmatpush.msrb.mxu0 %v271_v43  ;;  %v644_v43 = vld [vmem:[#allocation5 + $0xbd0] sm:$0xff] }
 0x2bc   : > { %v2057_v57 = vadd.f32 %v2056_v61, %v1992_v17  ;;  %v6057_v61 = vld [vmem:[%s5151_s15 + $0x190] sm:$0xff]  ;;  %2659 = vmatpush.msra.mxu1 %v644_v43 }
 0x2be   : > { %4277 = vst [vmem:[%s5422_s19 + $0x3d8] sm:$0xff] %v2057_v57  ;;  %2253 = vmatmul.f32.gmra.mxu2 %v6040_v1  ;;  %v1864_v58 = vpop.f32.mrf.mxu0  ;;  %v836_v57 = vld [vmem:[#allocation5 + $0x11d0] sm:$0xff] }
 0x2bf   : > { %v1929_v28 = vpop.f32.mrf.mxu1  ;;  %2318 = vmatmul.f32.gmra.mxu3 %v6044_v10  ;;  %2724 = vmatpush.msra.mxu2 %v836_v57  ;;  %v6078_v57 = vld [vmem:[%s5151_s15 + $0x1b8] sm:$0xff] }
 0x2c0   : > { %v1930_v63 = vadd.f32 %v1929_v28, %v1864_v58  ;;  %v1028_v28 = vld [vmem:[#allocation5 + $0x17d0] sm:$0xff]  ;;  %7447 = vst [vmem:[#allocation13_spill] sm:$0xff] %v6078_v57 }
 0x2c1   : > { %v1994_v6 = vpop.f32.mrf.mxu2  ;;  %2123 = vmatmul.f32.gmra.mxu0 %v6048_v25  ;;  %2789 = vmatpush.msra.mxu3 %v1028_v28  ;;  %v824_v28 = vld [vmem:[#allocation5 + $0x1170] sm:$0xff] }
 0x2c2   : > { %2188 = vmatmul.f32.gmra.mxu1 %v6052_v50  ;;  %v2059_v16 = vpop.f32.mrf.mxu3  ;;  %v1995_v39 = vadd.f32 %v1994_v6, %v1930_v63  ;;  %v6065_v63 = vld [vmem:[%s5151_s15 + $0x180] sm:$0xff]  ;;  %2725 = vmatpush.msra.mxu2 %v824_v28 }
 0x2c4   : > { %v2060_v9 = vadd.f32 %v2059_v16, %v1995_v39  ;;  %v452_v39 = vld [vmem:[#allocation5 + $0x5d0] sm:$0xff] }
 0x2c5   : > { %2594 = vmatpush.msra.mxu0 %v452_v39  ;;  %v6086_v39 = vld [vmem:[%s5151_s15 + $0x1a8] sm:$0xff] }
 0x2c6   : > { %4289 = vst [vmem:[%s5422_s19 + $0x438] sm:$0xff] %v2060_v9  ;;  %2256 = vmatmul.f32.gmra.mxu2 %v6057_v61  ;;  %v1867_v17 = vpop.f32.mrf.mxu0  ;;  %v6074_v9 = vld [vmem:[%s5151_s15 + $0x1b0] sm:$0xff] }
 0x2c7   : > { %v1932_v3 = vpop.f32.mrf.mxu1  ;;  %2321 = vmatmul.f32.gmra.mxu3 %v6061_v23  ;;  %7446 = vst [vmem:[#allocation12_spill] sm:$0xff] %v6074_v9 }
 0x2c8   : > { %v1933_v58 = vadd.f32 %v1932_v3, %v1867_v17  ;;  %7449 = vst [vmem:[#allocation15_spill] sm:$0xff] %v6086_v39 }
 0x2c9   : > { %v1997_v12 = vpop.f32.mrf.mxu2  ;;  %2126 = vmatmul.f32.gmra.mxu0 %v6065_v63 }
 0x2ca   : > { %2191 = vmatmul.f32.gmra.mxu1 %v6069_v40  ;;  %v2062_v6 = vpop.f32.mrf.mxu3  ;;  %v1998_v16 = vadd.f32 %v1997_v12, %v1933_v58  ;;  %v1016_v12 = vld [vmem:[#allocation5 + $0x1770] sm:$0xff] }
 0x2cb   : > { %2790 = vmatpush.msra.mxu3 %v1016_v12  ;;  %v608_v40 = vld [vmem:[#allocation5 + $0xab0] sm:$0xff] }
 0x2cc   : > { %v2063_v45 = vadd.f32 %v2062_v6, %v1998_v16  ;;  %v6082_v16 = vld [vmem:[%s5151_s15 + $0x1a0] sm:$0xff] }
 0x2cd   : > { %7448 = vst [vmem:[#allocation14_spill] sm:$0xff] %v6082_v16 }
 0x2ce   : > { %4301 = vst [vmem:[%s5422_s19 + $0x498] sm:$0xff] %v2063_v45  ;;  %2259 = vmatmul.f32.gmra.mxu2 %v6074_v9  ;;  %v1870_v17 = vpop.f32.mrf.mxu0  ;;  %v632_v9 = vld [vmem:[#allocation5 + $0xb70] sm:$0xff] }
 0x2cf   : > { %v1935_v3 = vpop.f32.mrf.mxu1  ;;  %2324 = vmatmul.f32.gmra.mxu3 %v6078_v57  ;;  %v440_v57 = vld [vmem:[#allocation5 + $0x570] sm:$0xff]  ;;  %2660 = vmatpush.msra.mxu1 %v632_v9 }
 0x2d0   : > { %v1936_v58 = vadd.f32 %v1935_v3, %v1870_v17  ;;  %2595 = vmatpush.msra.mxu0 %v440_v57  ;;  %v6091_v3 = vld [vmem:[%s5151_s15 + $0x1d0] sm:$0xff] }
 0x2d1   : > { %v2000_v6 = vpop.f32.mrf.mxu2  ;;  %2129 = vmatmul.f32.gmra.mxu0 %v6082_v16  ;;  %7450 = vst [vmem:[#allocation16_spill] sm:$0xff] %v6091_v3  ;;  %v6095_v16 = vld [vmem:[%s5151_s15 + $0x1d8] sm:$0xff]  ;;  %v1004_v57 = vld [vmem:[#allocation5 + $0x1710] sm:$0xff] }
 0x2d2   : > { %2194 = vmatmul.f32.gmra.mxu1 %v6086_v39  ;;  %v2065_v43 = vpop.f32.mrf.mxu3  ;;  %v2001_v45 = vadd.f32 %v2000_v6, %v1936_v58  ;;  %7451 = vst [vmem:[#allocation17_spill] sm:$0xff] %v6095_v16  ;;  %v812_v39 = vld [vmem:[#allocation5 + $0x1110] sm:$0xff]  ;;  %2791 = vmatpush.msra.mxu3 %v1004_v57  ;;  %v6099_v6 = vld [vmem:[%s5151_s15 + $0x1c0] sm:$0xff] }
 0x2d3   : > { %2726 = vmatpush.msra.mxu2 %v812_v39  ;;  %7452 = vst [vmem:[#allocation18_spill] sm:$0xff] %v6099_v6 }
 0x2d4   : > { %v2066_v17 = vadd.f32 %v2065_v43, %v2001_v45  ;;  %v6103_v43 = vld [vmem:[%s5151_s15 + $0x1c8] sm:$0xff] }
 0x2d5   : > { %7453 = vst [vmem:[#allocation19_spill] sm:$0xff] %v6103_v43 }
 0x2d6   : > { %4313 = vst [vmem:[%s5422_s19 + $0x4f8] sm:$0xff] %v2066_v17  ;;  %2262 = vmatmul.f32.gmra.mxu2 %v6091_v3  ;;  %v1873_v28 = vpop.f32.mrf.mxu0  ;;  %v620_v3 = vld [vmem:[#allocation5 + $0xb10] sm:$0xff] }
 0x2d7   : > { %v1938_v12 = vpop.f32.mrf.mxu1  ;;  %2327 = vmatmul.f32.gmra.mxu3 %v6095_v16  ;;  %v428_v16 = vld [vmem:[#allocation5 + $0x510] sm:$0xff]  ;;  %2661 = vmatpush.msra.mxu1 %v620_v3 }
 0x2d8   : > { %v1939_v58 = vadd.f32 %v1938_v12, %v1873_v28  ;;  %2596 = vmatpush.msra.mxu0 %v428_v16  ;;  %v6108_v28 = vld [vmem:[%s5151_s15 + $0x1f0] sm:$0xff] }
 0x2d9   : > { %v2003_v9 = vpop.f32.mrf.mxu2  ;;  %2132 = vmatmul.f32.gmra.mxu0 %v6099_v6  ;;  %7454 = vst [vmem:[#allocation20_spill] sm:$0xff] %v6108_v28  ;;  %v6112_v6 = vld [vmem:[%s5151_s15 + $0x1f8] sm:$0xff]  ;;  %v992_v16 = vld [vmem:[#allocation5 + $0x16b0] sm:$0xff]  ;;  %2662 = vmatpush.msra.mxu1 %v608_v40 }
 0x2da   : > { %2197 = vmatmul.f32.gmra.mxu1 %v6103_v43  ;;  %v2068_v45 = vpop.f32.mrf.mxu3  ;;  %v2004_v17 = vadd.f32 %v2003_v9, %v1939_v58  ;;  %7455 = vst [vmem:[#allocation21_spill] sm:$0xff] %v6112_v6  ;;  %v800_v43 = vld [vmem:[#allocation5 + $0x10b0] sm:$0xff]  ;;  %2792 = vmatpush.msra.mxu3 %v992_v16  ;;  %v6116_v9 = vld [vmem:[%s5151_s15 + $0x1e0] sm:$0xff] }
 0x2db   : > { %2727 = vmatpush.msra.mxu2 %v800_v43  ;;  %7456 = vst [vmem:[#allocation22_spill] sm:$0xff] %v6116_v9  ;;  %v788_v16 = vld [vmem:[#allocation5 + $0x1050] sm:$0xff] }
 0x2dc   : > { %v2069_v39 = vadd.f32 %v2068_v45, %v2004_v17  ;;  %v6120_v45 = vld [vmem:[%s5151_s15 + $0x1e8] sm:$0xff] }
 0x2dd   : > { %7457 = vst [vmem:[#allocation23_spill] sm:$0xff] %v6120_v45  ;;  %2728 = vmatpush.msra.mxu2 %v788_v16  ;;  %v764_v16 = vld [vmem:[#allocation5 + $0xf90] sm:$0xff] }
 0x2de   : > { %4325 = vst [vmem:[%s5422_s19 + $0x558] sm:$0xff] %v2069_v39  ;;  %2265 = vmatmul.f32.gmra.mxu2 %v6108_v28  ;;  %v1876_v12 = vpop.f32.mrf.mxu0  ;;  %v416_v28 = vld [vmem:[#allocation5 + $0x4b0] sm:$0xff] }
 0x2df   : > { %v1941_v57 = vpop.f32.mrf.mxu1  ;;  %2330 = vmatmul.f32.gmra.mxu3 %v6112_v6  ;;  %2597 = vmatpush.msra.mxu0 %v416_v28  ;;  %v980_v6 = vld [vmem:[#allocation5 + $0x1650] sm:$0xff] }
 0x2e0   : > { %v1942_v58 = vadd.f32 %v1941_v57, %v1876_v12  ;;  %2793 = vmatpush.msra.mxu3 %v980_v6  ;;  %v776_v6 = vld [vmem:[#allocation5 + $0xff0] sm:$0xff] }
 0x2e1   : > { %v2006_v3 = vpop.f32.mrf.mxu2  ;;  %2135 = vmatmul.f32.gmra.mxu0 %v6116_v9  ;;  %2729 = vmatpush.msra.mxu2 %v776_v6 }
 0x2e2   : > { %2200 = vmatmul.f32.gmra.mxu1 %v6120_v45  ;;  %v2071_v17 = vpop.f32.mrf.mxu3  ;;  %v2007_v39 = vadd.f32 %v2006_v3, %v1942_v58  ;;  %v404_v58 = vld [vmem:[#allocation5 + $0x450] sm:$0xff] }
 0x2e3   : > { %v596_v3 = vld [vmem:[#allocation5 + $0xa50] sm:$0xff]  ;;  %2598 = vmatpush.msra.mxu0 %v404_v58  ;;  %2730 = vmatpush.msra.mxu2 %v764_v16 }
 0x2e4   : > { %v2072_v12 = vadd.f32 %v2071_v17, %v2007_v39  ;;  %2663 = vmatpush.msra.mxu1 %v596_v3  ;;  %v380_v3 = vld [vmem:[#allocation5 + $0x390] sm:$0xff] }
 0x2e5   : > { %v548_v16 = vld [vmem:[#allocation5 + $0x8d0] sm:$0xff] }
 0x2e6   : > { %4337 = vst [vmem:[%s5422_s19 + $0x5b8] sm:$0xff] %v2072_v12  ;;  %2480 = vmatmul.f32.vlgmr.msrb.gmra.mxu2 %v5853_v21  ;;  %v2091_v43 = vpop.f32.mrf.mxu0  ;;  %v392_v12 = vld [vmem:[#allocation5 + $0x3f0] sm:$0xff] }
 0x2e7   : > { %v2156_v57 = vpop.f32.mrf.mxu1  ;;  %2545 = vmatmul.f32.vlgmr.msrb.gmra.mxu3 %v5857_v13  ;;  %2599 = vmatpush.msra.mxu0 %v392_v12  ;;  %v740_v12 = vld [vmem:[#allocation5 + $0xed0] sm:$0xff] }
 0x2e8   : > { %v2157_v9 = vadd.f32 %v2156_v57, %v2091_v43  ;;  %v584_v43 = vld [vmem:[#allocation5 + $0x9f0] sm:$0xff] }
 0x2e9   : > { %v2221_v45 = vpop.f32.mrf.mxu2  ;;  %2350 = vmatmul.f32.vlgmr.msrb.gmra.mxu0 %v5861_v48  ;;  %v968_v48 = vld [vmem:[#allocation5 + $0x15f0] sm:$0xff]  ;;  %2664 = vmatpush.msra.mxu1 %v584_v43 }
 0x2ea   : > { %2415 = vmatmul.f32.vlgmr.msrb.gmra.mxu1 %v5865_v49  ;;  %v2286_v40 = vpop.f32.mrf.mxu3  ;;  %v2222_v28 = vadd.f32 %v2221_v45, %v2157_v9  ;;  %2794 = vmatpush.msra.mxu3 %v968_v48 }
 0x2eb   : > { %2600 = vmatpush.msra.mxu0 %v380_v3  ;;  %v344_v3 = vld [vmem:[#allocation5 + $0x270] sm:$0xff] }
 0x2ec   : > { %v2287_v21 = vadd.f32 %v2286_v40, %v2222_v28 }
 0x2ee   : > { %4158 = vst [vmem:[%s5422_s19 + $0x20] sm:$0xff] %v2287_v21  ;;  %2483 = vmatmul.f32.gmra.mxu2 %v5870_v2  ;;  %v2094_v13 = vpop.f32.mrf.mxu0  ;;  %v572_v21 = vld [vmem:[#allocation5 + $0x990] sm:$0xff] }
 0x2ef   : > { %v2159_v17 = vpop.f32.mrf.mxu1  ;;  %2548 = vmatmul.f32.gmra.mxu3 %v5874_v62  ;;  %2665 = vmatpush.msra.mxu1 %v572_v21  ;;  %v536_v21 = vld [vmem:[#allocation5 + $0x870] sm:$0xff] }
 0x2f0   : > { %v2160_v39 = vadd.f32 %v2159_v17, %v2094_v13  ;;  %v752_v17 = vld [vmem:[#allocation5 + $0xf30] sm:$0xff] }
 0x2f1   : > { %v2224_v49 = vpop.f32.mrf.mxu2  ;;  %2353 = vmatmul.f32.gmra.mxu0 %v5878_v51  ;;  %v956_v51 = vld [vmem:[#allocation5 + $0x1590] sm:$0xff]  ;;  %2731 = vmatpush.msra.mxu2 %v752_v17 }
 0x2f2   : > { %2418 = vmatmul.f32.gmra.mxu1 %v5882_v22  ;;  %v2289_v9 = vpop.f32.mrf.mxu3  ;;  %v2225_v45 = vadd.f32 %v2224_v49, %v2160_v39  ;;  %2795 = vmatpush.msra.mxu3 %v956_v51  ;;  %v368_v49 = vld [vmem:[#allocation5 + $0x330] sm:$0xff] }
 0x2f3   : > { %2601 = vmatpush.msra.mxu0 %v368_v49  ;;  %2732 = vmatpush.msra.mxu2 %v740_v12  ;;  %v728_v51 = vld [vmem:[#allocation5 + $0xe70] sm:$0xff] }
 0x2f4   : > { %v2290_v2 = vadd.f32 %v2289_v9, %v2225_v45  ;;  %v560_v9 = vld [vmem:[#allocation5 + $0x930] sm:$0xff] }
 0x2f5   : > { %2666 = vmatpush.msra.mxu1 %v560_v9  ;;  %2733 = vmatpush.msra.mxu2 %v728_v51 }
 0x2f6   : > { %4170 = vst [vmem:[%s5422_s19 + $0x80] sm:$0xff] %v2290_v2  ;;  %2486 = vmatmul.f32.gmra.mxu2 %v5887_v31  ;;  %v2097_v62 = vpop.f32.mrf.mxu0 }
 0x2f7   : > { %v2162_v57 = vpop.f32.mrf.mxu1  ;;  %2551 = vmatmul.f32.gmra.mxu3 %v5891_v5  ;;  %2667 = vmatpush.msra.mxu1 %v548_v16 }
 0x2f8   : > { %v2163_v40 = vadd.f32 %v2162_v57, %v2097_v62  ;;  %v356_v57 = vld [vmem:[#allocation5 + $0x2d0] sm:$0xff] }
 0x2f9   : > { %v2227_v22 = vpop.f32.mrf.mxu2  ;;  %2356 = vmatmul.f32.gmra.mxu0 %v5895_v32  ;;  %v944_v32 = vld [vmem:[#allocation5 + $0x1530] sm:$0xff]  ;;  %2668 = vmatpush.msra.mxu1 %v536_v21 }
 0x2fa   : > { %2421 = vmatmul.f32.gmra.mxu1 %v5899_v29  ;;  %v2292_v28 = vpop.f32.mrf.mxu3  ;;  %v2228_v58 = vadd.f32 %v2227_v22, %v2163_v40  ;;  %2796 = vmatpush.msra.mxu3 %v944_v32  ;;  %v332_v32 = vld [vmem:[#allocation5 + $0x210] sm:$0xff] }
 0x2fb   : > { %2602 = vmatpush.msra.mxu0 %v356_v57  ;;  %v500_v57 = vld [vmem:[#allocation5 + $0x750] sm:$0xff] }
 0x2fc   : > { %v2293_v31 = vadd.f32 %v2292_v28, %v2228_v58 }
 0x2fd   : > { %2603 = vmatpush.msra.mxu0 %v344_v3 }
 0x2fe   : > { %4182 = vst [vmem:[%s5422_s19 + $0xe0] sm:$0xff] %v2293_v31  ;;  %2489 = vmatmul.f32.gmra.mxu2 %v5904_v47  ;;  %v2100_v5 = vpop.f32.mrf.mxu0 }
 0x2ff   : > { %v2165_v13 = vpop.f32.mrf.mxu1  ;;  %2554 = vmatmul.f32.gmra.mxu3 %v5908_v27  ;;  %2604 = vmatpush.msra.mxu0 %v332_v32 }
 0x300   : > { %v2166_v6 = vadd.f32 %v2165_v13, %v2100_v5  ;;  %v716_v5 = vld [vmem:[#allocation5 + $0xe10] sm:$0xff] }
 0x301   : > { %v2230_v29 = vpop.f32.mrf.mxu2  ;;  %2359 = vmatmul.f32.gmra.mxu0 %v5912_v52  ;;  %v932_v52 = vld [vmem:[#allocation5 + $0x14d0] sm:$0xff]  ;;  %2734 = vmatpush.msra.mxu2 %v716_v5 }
 0x302   : > { %2424 = vmatmul.f32.gmra.mxu1 %v5916_v59  ;;  %v2295_v39 = vpop.f32.mrf.mxu3  ;;  %v2231_v48 = vadd.f32 %v2230_v29, %v2166_v6  ;;  %2797 = vmatpush.msra.mxu3 %v932_v52  ;;  %v524_v29 = vld [vmem:[#allocation5 + $0x810] sm:$0xff] }
 0x303   : > { %2669 = vmatpush.msra.mxu1 %v524_v29  ;;  %v656_v5 = vld [vmem:[#allocation5 + $0xc30] sm:$0xff]  ;;  %v837_v29 = vld [vmem:[#allocation5 + $0x11d8] sm:$0xff] }
 0x304   : > { %v2296_v47 = vadd.f32 %v2295_v39, %v2231_v48  ;;  %v704_v48 = vld [vmem:[#allocation5 + $0xdb0] sm:$0xff] }
 0x305   : > { %2735 = vmatpush.msra.mxu2 %v704_v48 }
 0x306   : > { %4194 = vst [vmem:[%s5422_s19 + $0x140] sm:$0xff] %v2296_v47  ;;  %2492 = vmatmul.f32.gmra.mxu2 %v5921_v15  ;;  %v2103_v27 = vpop.f32.mrf.mxu0 }
 0x307   : > { %v2168_v45 = vpop.f32.mrf.mxu1  ;;  %2557 = vmatmul.f32.gmra.mxu3 %v5925_v54 }
 0x308   : > { %v2169_v43 = vadd.f32 %v2168_v45, %v2103_v27  ;;  %v320_v27 = vld [vmem:[#allocation5 + $0x1b0] sm:$0xff] }
 0x309   : > { %v2233_v59 = vpop.f32.mrf.mxu2  ;;  %2362 = vmatmul.f32.gmra.mxu0 %v5929_v56  ;;  %v920_v56 = vld [vmem:[#allocation5 + $0x1470] sm:$0xff] }
 0x30a   : > { %2427 = vmatmul.f32.gmra.mxu1 %v5933_v0  ;;  %v2298_v2 = vpop.f32.mrf.mxu3  ;;  %v2234_v62 = vadd.f32 %v2233_v59, %v2169_v43  ;;  %2798 = vmatpush.msra.mxu3 %v920_v56  ;;  %v512_v45 = vld [vmem:[#allocation5 + $0x7b0] sm:$0xff] }
 0x30b   : > { %2605 = vmatpush.msra.mxu0 %v320_v27  ;;  %2670 = vmatpush.msra.mxu1 %v512_v45  ;;  %v692_v43 = vld [vmem:[#allocation5 + $0xd50] sm:$0xff]  ;;  %v825_v27 = vld [vmem:[#allocation5 + $0x1178] sm:$0xff] }
 0x30c   : > { %v2299_v15 = vadd.f32 %v2298_v2, %v2234_v62  ;;  %2736 = vmatpush.msra.mxu2 %v692_v43  ;;  %v308_v62 = vld [vmem:[#allocation5 + $0x150] sm:$0xff] }
 0x30d   : > { %2606 = vmatpush.msra.mxu0 %v308_v62  ;;  %2671 = vmatpush.msra.mxu1 %v500_v57  ;;  %v488_v56 = vld [vmem:[#allocation5 + $0x6f0] sm:$0xff] }
 0x30e   : > { %4206 = vst [vmem:[%s5422_s19 + $0x1a0] sm:$0xff] %v2299_v15  ;;  %2495 = vmatmul.f32.gmra.mxu2 %v5938_v8  ;;  %v2106_v54 = vpop.f32.mrf.mxu0  ;;  %v680_v15 = vld [vmem:[#allocation5 + $0xcf0] sm:$0xff] }
 0x30f   : > { %v2171_v40 = vpop.f32.mrf.mxu1  ;;  %2560 = vmatmul.f32.gmra.mxu3 %v5942_v4  ;;  %2737 = vmatpush.msra.mxu2 %v680_v15  ;;  %v1005_v15 = vld [vmem:[#allocation5 + $0x1718] sm:$0xff] }
 0x310   : > { %v2172_v22 = vadd.f32 %v2171_v40, %v2106_v54  ;;  %2672 = vmatpush.msra.mxu1 %v488_v56  ;;  %v621_v56 = vld [vmem:[#allocation5 + $0xb18] sm:$0xff] }
 0x311   : > { %v2236_v0 = vpop.f32.mrf.mxu2  ;;  %2365 = vmatmul.f32.gmra.mxu0 %v5946_v34  ;;  %v908_v34 = vld [vmem:[#allocation5 + $0x1410] sm:$0xff] }
 0x312   : > { %2430 = vmatmul.f32.gmra.mxu1 %v5950_v35  ;;  %v2301_v28 = vpop.f32.mrf.mxu3  ;;  %v2237_v58 = vadd.f32 %v2236_v0, %v2172_v22  ;;  %2799 = vmatpush.msra.mxu3 %v908_v34  ;;  %v296_v22 = vld [vmem:[#allocation5 + $0xf0] sm:$0xff] }
 0x313   : > { %2607 = vmatpush.msra.mxu0 %v296_v22  ;;  %v429_v22 = vld [vmem:[#allocation5 + $0x518] sm:$0xff] }
 0x314   : > { %v2302_v8 = vadd.f32 %v2301_v28, %v2237_v58  ;;  %v668_v28 = vld [vmem:[#allocation5 + $0xc90] sm:$0xff] }
 0x315   : > { %2738 = vmatpush.msra.mxu2 %v668_v28 }
 0x316   : > { %4218 = vst [vmem:[%s5422_s19 + $0x200] sm:$0xff] %v2302_v8  ;;  %2498 = vmatmul.f32.gmra.mxu2 %v5955_v36  ;;  %v2109_v4 = vpop.f32.mrf.mxu0  ;;  %v284_v8 = vld [vmem:[#allocation5 + $0x90] sm:$0xff] }
 0x317   : > { %v2174_v31 = vpop.f32.mrf.mxu1  ;;  %2563 = vmatmul.f32.gmra.mxu3 %v5959_v53  ;;  %2608 = vmatpush.msra.mxu0 %v284_v8  ;;  %v7469_v8 = vld [vmem:[#allocation22_spill] sm:$0xff] }
 0x318   : > { %v2175_v13 = vadd.f32 %v2174_v31, %v2109_v4  ;;  %v476_v4 = vld [vmem:[#allocation5 + $0x690] sm:$0xff]  ;;  %2739 = vmatpush.msra.mxu2 %v656_v5  ;;  %v609_v5 = vld [vmem:[#allocation5 + $0xab8] sm:$0xff] }
 0x319   : > { %v2239_v35 = vpop.f32.mrf.mxu2  ;;  %2368 = vmatmul.f32.gmra.mxu0 %v5963_v18  ;;  %v896_v18 = vld [vmem:[#allocation5 + $0x13b0] sm:$0xff]  ;;  %2673 = vmatpush.msra.mxu1 %v476_v4  ;;  %v7470_v4 = vld [vmem:[#allocation23_spill] sm:$0xff] }
 0x31a   : > { %2433 = vmatmul.f32.gmra.mxu1 %v5967_v37  ;;  %v2304_v17 = vpop.f32.mrf.mxu3  ;;  %v2240_v6 = vadd.f32 %v2239_v35, %v2175_v13  ;;  %2800 = vmatpush.msra.mxu3 %v896_v18  ;;  %v645_v18 = vld [vmem:[#allocation5 + $0xbd8] sm:$0xff] }
 0x31b   : > { %2984 = vmatpush.msrb.mxu2 %v837_v29  ;;  %v6217_v29 = vld [vmem:[%s5151_s15 + $0x8] sm:$0xff] }
 0x31c   : > { %v2305_v36 = vadd.f32 %v2304_v17, %v2240_v6  ;;  %v272_v17 = vld [vmem:[#allocation5 + $0x30] sm:$0xff] }
 0x31d   : > { %v464_v6 = vld [vmem:[#allocation5 + $0x630] sm:$0xff]  ;;  %2609 = vmatpush.msra.mxu0 %v272_v17  ;;  %2985 = vmatpush.msrb.mxu2 %v825_v27  ;;  %v789_v17 = vld [vmem:[#allocation5 + $0x1058] sm:$0xff]  ;;  %v6230_v27 = vld [vmem:[%s5151_s15 + $0x20] sm:$0xff] }
 0x31e   : > { %4230 = vst [vmem:[%s5422_s19 + $0x260] sm:$0xff] %v2305_v36  ;;  %2501 = vmatmul.f32.gmra.mxu2 %v5972_v41  ;;  %v2112_v53 = vpop.f32.mrf.mxu0  ;;  %2674 = vmatpush.msra.mxu1 %v464_v6 }
 0x31f   : > { %v2177_v39 = vpop.f32.mrf.mxu1  ;;  %2566 = vmatmul.f32.gmra.mxu3 %v5976_v46 }
 0x320   : > { %v2178_v49 = vadd.f32 %v2177_v39, %v2112_v53  ;;  %v7458_v53 = vld [vmem:[#allocation11_spill] sm:$0xff]  ;;  %2919 = vmatpush.msrb.mxu1 %v645_v18 }
 0x321   : > { %v2242_v37 = vpop.f32.mrf.mxu2  ;;  %2371 = vmatmul.f32.gmra.mxu0 %v5980_v19  ;;  %v884_v19 = vld [vmem:[#allocation5 + $0x1350] sm:$0xff] }
 0x322   : > { %2436 = vmatmul.f32.gmra.mxu1 %v5984_v20  ;;  %v2307_v9 = vpop.f32.mrf.mxu3  ;;  %v2243_v47 = vadd.f32 %v2242_v37, %v2178_v49  ;;  %2801 = vmatpush.msra.mxu3 %v884_v19  ;;  %v453_v49 = vld [vmem:[#allocation5 + $0x5d8] sm:$0xff] }
 0x323   : > { %2854 = vmatpush.msrb.mxu0 %v453_v49  ;;  %v441_v19 = vld [vmem:[#allocation5 + $0x578] sm:$0xff] }
 0x324   : > { %v2308_v41 = vadd.f32 %v2307_v9, %v2243_v47  ;;  %v7460_v47 = vld [vmem:[#allocation13_spill] sm:$0xff] }
 0x325   : > { %2855 = vmatpush.msrb.mxu0 %v441_v19 }
 0x326   : > { %4242 = vst [vmem:[%s5422_s19 + $0x2c0] sm:$0xff] %v2308_v41  ;;  %2504 = vmatmul.f32.gmra.mxu2 %v5989_v30  ;;  %v2115_v46 = vpop.f32.mrf.mxu0 }
 0x327   : > { %v2180_v12 = vpop.f32.mrf.mxu1  ;;  %2569 = vmatmul.f32.gmra.mxu3 %v5993_v55  ;;  %2856 = vmatpush.msrb.mxu0 %v429_v22 }
 0x328   : > { %v2181_v52 = vadd.f32 %v2180_v12, %v2115_v46  ;;  %v7461_v46 = vld [vmem:[#allocation14_spill] sm:$0xff]  ;;  %v7462_v12 = vld [vmem:[#allocation15_spill] sm:$0xff] }
 0x329   : > { %v2245_v20 = vpop.f32.mrf.mxu2  ;;  %2374 = vmatmul.f32.gmra.mxu0 %v5997_v11  ;;  %v872_v11 = vld [vmem:[#allocation5 + $0x12f0] sm:$0xff] }
 0x32a   : > { %2439 = vmatmul.f32.gmra.mxu1 %v6001_v7  ;;  %v2310_v59 = vpop.f32.mrf.mxu3  ;;  %v2246_v2 = vadd.f32 %v2245_v20, %v2181_v52  ;;  %2802 = vmatpush.msra.mxu3 %v872_v11  ;;  %v633_v20 = vld [vmem:[#allocation5 + $0xb78] sm:$0xff] }
 0x32b   : > { %2920 = vmatpush.msrb.mxu1 %v633_v20  ;;  %v7465_v11 = vld [vmem:[#allocation18_spill] sm:$0xff] }
 0x32c   : > { %v2311_v30 = vadd.f32 %v2310_v59, %v2246_v2  ;;  %v7463_v2 = vld [vmem:[#allocation16_spill] sm:$0xff] }
 0x32d   : > { %2921 = vmatpush.msrb.mxu1 %v621_v56 }
 0x32e   : > { %4254 = vst [vmem:[%s5422_s19 + $0x320] sm:$0xff] %v2311_v30  ;;  %2507 = vmatmul.f32.gmra.mxu2 %v6006_v42  ;;  %v2118_v55 = vpop.f32.mrf.mxu0  ;;  %v7464_v30 = vld [vmem:[#allocation17_spill] sm:$0xff] }
 0x32f   : > { %v2183_v16 = vpop.f32.mrf.mxu1  ;;  %2572 = vmatmul.f32.gmra.mxu3 %v6010_v38  ;;  %2922 = vmatpush.msrb.mxu1 %v609_v5 }
 0x330   : > { %v2184_v54 = vadd.f32 %v2183_v16, %v2118_v55  ;;  %v813_v55 = vld [vmem:[#allocation5 + $0x1118] sm:$0xff] }
 0x331   : > { %v2248_v7 = vpop.f32.mrf.mxu2  ;;  %2377 = vmatmul.f32.gmra.mxu0 %v6014_v60  ;;  %v860_v60 = vld [vmem:[#allocation5 + $0x1290] sm:$0xff]  ;;  %2986 = vmatpush.msrb.mxu2 %v813_v55  ;;  %v6247_v55 = vld [vmem:[%s5151_s15 + $0x40] sm:$0xff] }
 0x332   : > { %2442 = vmatmul.f32.gmra.mxu1 %v6018_v24  ;;  %v2313_v40 = vpop.f32.mrf.mxu3  ;;  %v2249_v51 = vadd.f32 %v2248_v7, %v2184_v54  ;;  %2803 = vmatpush.msra.mxu3 %v860_v60  ;;  %v7466_v7 = vld [vmem:[#allocation19_spill] sm:$0xff]  ;;  %v801_v60 = vld [vmem:[#allocation5 + $0x10b8] sm:$0xff] }
 0x333   : > { %2987 = vmatpush.msrb.mxu2 %v801_v60  ;;  %v6264_v60 = vld [vmem:[%s5151_s15 + $0x60] sm:$0xff] }
 0x334   : > { %v2314_v42 = vadd.f32 %v2313_v40, %v2249_v51 }
 0x335   : > { %2988 = vmatpush.msrb.mxu2 %v789_v17  ;;  %v933_v17 = vld [vmem:[#allocation5 + $0x14d8] sm:$0xff] }
 0x336   : > { %4266 = vst [vmem:[%s5422_s19 + $0x380] sm:$0xff] %v2314_v42  ;;  %2510 = vmatmul.f32.gmra.mxu2 %v6023_v33  ;;  %v2121_v38 = vpop.f32.mrf.mxu0 }
 0x337   : > { %v2186_v0 = vpop.f32.mrf.mxu1  ;;  %2575 = vmatmul.f32.gmra.mxu3 %v6027_v26 }
 0x338   : > { %v2187_v58 = vadd.f32 %v2186_v0, %v2121_v38  ;;  %v7467_v38 = vld [vmem:[#allocation20_spill] sm:$0xff] }
 0x339   : > { %v2251_v24 = vpop.f32.mrf.mxu2  ;;  %2380 = vmatmul.f32.gmra.mxu0 %v6031_v14  ;;  %v848_v14 = vld [vmem:[#allocation5 + $0x1230] sm:$0xff] }
 0x33a   : > { %2445 = vmatmul.f32.gmra.mxu1 %v6035_v44  ;;  %v2316_v3 = vpop.f32.mrf.mxu3  ;;  %v2252_v21 = vadd.f32 %v2251_v24, %v2187_v58  ;;  %2804 = vmatpush.msra.mxu3 %v848_v14  ;;  %v7468_v58 = vld [vmem:[#allocation21_spill] sm:$0xff] }
 0x33b   : > { %v6205_v14 = vld [vmem:[%s5151_s15 + $0x10] sm:$0xff] }
 0x33c   : > { %v2317_v33 = vadd.f32 %v2316_v3, %v2252_v21  ;;  %v993_v3 = vld [vmem:[#allocation5 + $0x16b8] sm:$0xff] }
 0x33e   : > { %4278 = vst [vmem:[%s5422_s19 + $0x3e0] sm:$0xff] %v2317_v33  ;;  %2513 = vmatmul.f32.gmra.mxu2 %v6040_v1  ;;  %v2124_v26 = vpop.f32.mrf.mxu0 }
 0x33f   : > { %v2189_v31 = vpop.f32.mrf.mxu1  ;;  %2578 = vmatmul.f32.gmra.mxu3 %v6044_v10 }
 0x340   : > { %v2190_v13 = vadd.f32 %v2189_v31, %v2124_v26  ;;  %v417_v31 = vld [vmem:[#allocation5 + $0x4b8] sm:$0xff] }
 0x341   : > { %v2254_v44 = vpop.f32.mrf.mxu2  ;;  %2383 = vmatmul.f32.gmra.mxu0 %v6048_v25  ;;  %v1029_v25 = vld [vmem:[#allocation5 + $0x17d8] sm:$0xff] }
 0x342   : > { %2448 = vmatmul.f32.gmra.mxu1 %v6052_v50  ;;  %v2319_v34 = vpop.f32.mrf.mxu3  ;;  %v2255_v35 = vadd.f32 %v2254_v44, %v2190_v13  ;;  %3049 = vmatpush.msrb.mxu3 %v1029_v25 }
 0x343   : > { %2857 = vmatpush.msrb.mxu0 %v417_v31 }
 0x344   : > { %v2320_v1 = vadd.f32 %v2319_v34, %v2255_v35  ;;  %v6209_v35 = vld [vmem:[%s5151_s15 + $0x18] sm:$0xff] }
 0x346   : > { %4290 = vst [vmem:[%s5422_s19 + $0x440] sm:$0xff] %v2320_v1  ;;  %2516 = vmatmul.f32.gmra.mxu2 %v6057_v61  ;;  %v2127_v10 = vpop.f32.mrf.mxu0  ;;  %v981_v1 = vld [vmem:[#allocation5 + $0x1658] sm:$0xff] }
 0x347   : > { %v2192_v32 = vpop.f32.mrf.mxu1  ;;  %2581 = vmatmul.f32.gmra.mxu3 %v6061_v23  ;;  %v7459_v23 = vld [vmem:[#allocation12_spill] sm:$0xff] }
 0x348   : > { %v2193_v36 = vadd.f32 %v2192_v32, %v2127_v10  ;;  %v6213_v32 = vld [vmem:[%s5151_s15] sm:$0xff] }
 0x349   : > { %v2257_v50 = vpop.f32.mrf.mxu2  ;;  %2386 = vmatmul.f32.gmra.mxu0 %v6065_v63  ;;  %v1017_v63 = vld [vmem:[#allocation5 + $0x1778] sm:$0xff] }
 0x34a   : > { %2451 = vmatmul.f32.gmra.mxu1 %v7458_v53  ;;  %v2322_v39 = vpop.f32.mrf.mxu3  ;;  %v2258_v48 = vadd.f32 %v2257_v50, %v2193_v36  ;;  %3050 = vmatpush.msrb.mxu3 %v1017_v63  ;;  %v405_v50 = vld [vmem:[#allocation5 + $0x458] sm:$0xff] }
 0x34b   : > { %v597_v53 = vld [vmem:[#allocation5 + $0xa58] sm:$0xff]  ;;  %2858 = vmatpush.msrb.mxu0 %v405_v50 }
 0x34c   : > { %v2323_v61 = vadd.f32 %v2322_v39, %v2258_v48  ;;  %3051 = vmatpush.msrb.mxu3 %v1005_v15  ;;  %2923 = vmatpush.msrb.mxu1 %v597_v53  ;;  %v6222_v48 = vld [vmem:[%s5151_s15 + $0x30] sm:$0xff]  ;;  %v357_v50 = vld [vmem:[#allocation5 + $0x2d8] sm:$0xff] }
 0x34d   : > { %v549_v53 = vld [vmem:[#allocation5 + $0x8d8] sm:$0xff] }
 0x34e   : > { %4302 = vst [vmem:[%s5422_s19 + $0x4a0] sm:$0xff] %v2323_v61  ;;  %2519 = vmatmul.f32.gmra.mxu2 %v7459_v23  ;;  %v2130_v37 = vpop.f32.mrf.mxu0  ;;  %3052 = vmatpush.msrb.mxu3 %v993_v3  ;;  %v6226_v61 = vld [vmem:[%s5151_s15 + $0x38] sm:$0xff] }
 0x34f   : > { %v2195_v9 = vpop.f32.mrf.mxu1  ;;  %2584 = vmatmul.f32.gmra.mxu3 %v7460_v47  ;;  %v777_v23 = vld [vmem:[#allocation5 + $0xff8] sm:$0xff] }
 0x350   : > { %v2196_v45 = vadd.f32 %v2195_v9, %v2130_v37  ;;  %3053 = vmatpush.msrb.mxu3 %v981_v1  ;;  %2989 = vmatpush.msrb.mxu2 %v777_v23  ;;  %v969_v9 = vld [vmem:[#allocation5 + $0x15f8] sm:$0xff]  ;;  %v6281_v1 = vld [vmem:[%s5151_s15 + $0x80] sm:$0xff] }
 0x351   : > { %v2260_v41 = vpop.f32.mrf.mxu2  ;;  %2389 = vmatmul.f32.gmra.mxu0 %v7461_v46  ;;  %v393_v46 = vld [vmem:[#allocation5 + $0x3f8] sm:$0xff] }
 0x352   : > { %2454 = vmatmul.f32.gmra.mxu1 %v7462_v12  ;;  %v2325_v43 = vpop.f32.mrf.mxu3  ;;  %v2261_v52 = vadd.f32 %v2260_v41, %v2196_v45  ;;  %3054 = vmatpush.msrb.mxu3 %v969_v9  ;;  %v6234_v45 = vld [vmem:[%s5151_s15 + $0x28] sm:$0xff]  ;;  %v585_v12 = vld [vmem:[#allocation5 + $0x9f8] sm:$0xff] }
 0x353   : > { %2859 = vmatpush.msrb.mxu0 %v393_v46  ;;  %2924 = vmatpush.msrb.mxu1 %v585_v12  ;;  %v729_v9 = vld [vmem:[#allocation5 + $0xe78] sm:$0xff]  ;;  %v6298_v46 = vld [vmem:[%s5151_s15 + $0xa0] sm:$0xff]  ;;  %v6302_v12 = vld [vmem:[%s5151_s15 + $0xa8] sm:$0xff] }
 0x354   : > { %v2326_v59 = vadd.f32 %v2325_v43, %v2261_v52  ;;  %v6239_v52 = vld [vmem:[%s5151_s15 + $0x50] sm:$0xff] }
 0x356   : > { %4314 = vst [vmem:[%s5422_s19 + $0x500] sm:$0xff] %v2326_v59  ;;  %2522 = vmatmul.f32.gmra.mxu2 %v7463_v2  ;;  %v2133_v62 = vpop.f32.mrf.mxu0  ;;  %v6243_v59 = vld [vmem:[%s5151_s15 + $0x58] sm:$0xff] }
 0x357   : > { %v2198_v57 = vpop.f32.mrf.mxu1  ;;  %2587 = vmatmul.f32.gmra.mxu3 %v7464_v30  ;;  %v765_v2 = vld [vmem:[#allocation5 + $0xf98] sm:$0xff] }
 0x358   : > { %v2199_v16 = vadd.f32 %v2198_v57, %v2133_v62  ;;  %2990 = vmatpush.msrb.mxu2 %v765_v2  ;;  %v957_v57 = vld [vmem:[#allocation5 + $0x1598] sm:$0xff] }
 0x359   : > { %v2263_v54 = vpop.f32.mrf.mxu2  ;;  %2392 = vmatmul.f32.gmra.mxu0 %v7465_v11  ;;  %3055 = vmatpush.msrb.mxu3 %v957_v57  ;;  %v381_v11 = vld [vmem:[#allocation5 + $0x398] sm:$0xff]  ;;  %v6307_v57 = vld [vmem:[%s5151_s15 + $0xd0] sm:$0xff] }
 0x35a   : > { %2457 = vmatmul.f32.gmra.mxu1 %v7466_v7  ;;  %v2328_v40 = vpop.f32.mrf.mxu3  ;;  %v2264_v51 = vadd.f32 %v2263_v54, %v2199_v16  ;;  %v6251_v16 = vld [vmem:[%s5151_s15 + $0x48] sm:$0xff]  ;;  %v573_v7 = vld [vmem:[#allocation5 + $0x998] sm:$0xff]  ;;  %2860 = vmatpush.msrb.mxu0 %v381_v11 }
 0x35b   : > { %2925 = vmatpush.msrb.mxu1 %v573_v7  ;;  %v537_v2 = vld [vmem:[#allocation5 + $0x878] sm:$0xff] }
 0x35c   : > { %v2329_v42 = vadd.f32 %v2328_v40, %v2264_v51  ;;  %v6256_v51 = vld [vmem:[%s5151_s15 + $0x70] sm:$0xff]  ;;  %v717_v11 = vld [vmem:[#allocation5 + $0xe18] sm:$0xff] }
 0x35e   : > { %4326 = vst [vmem:[%s5422_s19 + $0x560] sm:$0xff] %v2329_v42  ;;  %2525 = vmatmul.f32.gmra.mxu2 %v7467_v38  ;;  %v2136_v0 = vpop.f32.mrf.mxu0  ;;  %v6260_v42 = vld [vmem:[%s5151_s15 + $0x78] sm:$0xff] }
 0x35f   : > { %v2201_v28 = vpop.f32.mrf.mxu1  ;;  %2590 = vmatmul.f32.gmra.mxu3 %v7468_v58  ;;  %v753_v38 = vld [vmem:[#allocation5 + $0xf38] sm:$0xff] }
 0x360   : > { %v2202_v24 = vadd.f32 %v2201_v28, %v2136_v0  ;;  %2991 = vmatpush.msrb.mxu2 %v753_v38  ;;  %v945_v28 = vld [vmem:[#allocation5 + $0x1538] sm:$0xff]  ;;  %v6319_v38 = vld [vmem:[%s5151_s15 + $0xc8] sm:$0xff] }
 0x361   : > { %v2266_v21 = vpop.f32.mrf.mxu2  ;;  %2395 = vmatmul.f32.gmra.mxu0 %v7469_v8  ;;  %3056 = vmatpush.msrb.mxu3 %v945_v28  ;;  %v369_v8 = vld [vmem:[#allocation5 + $0x338] sm:$0xff] }
 0x362   : > { %2460 = vmatmul.f32.gmra.mxu1 %v7470_v4  ;;  %v2331_v33 = vpop.f32.mrf.mxu3  ;;  %v2267_v26 = vadd.f32 %v2266_v21, %v2202_v24  ;;  %v6268_v24 = vld [vmem:[%s5151_s15 + $0x68] sm:$0xff]  ;;  %v561_v4 = vld [vmem:[#allocation5 + $0x938] sm:$0xff]  ;;  %2861 = vmatpush.msrb.mxu0 %v369_v8  ;;  %v6324_v8 = vld [vmem:[%s5151_s15 + $0xf0] sm:$0xff] }
 0x363   : > { %2926 = vmatpush.msrb.mxu1 %v561_v4  ;;  %3057 = vmatpush.msrb.mxu3 %v933_v17 }
 0x364   : > { %v2332_v13 = vadd.f32 %v2331_v33, %v2267_v26  ;;  %v6273_v26 = vld [vmem:[%s5151_s15 + $0x90] sm:$0xff]  ;;  %2862 = vmatpush.msrb.mxu0 %v357_v50 }
 0x365   : > { %2927 = vmatpush.msrb.mxu1 %v549_v53  ;;  %v321_v53 = vld [vmem:[#allocation5 + $0x1b8] sm:$0xff] }
 0x366   : > { %4338 = vst [vmem:[%s5422_s19 + $0x5c0] sm:$0xff] %v2332_v13  ;;  %2740 = vmatmul.f32.vlgmr.msra.gmra.mxu2 %v6205_v14  ;;  %v2351_v44 = vpop.f32.mrf.mxu0  ;;  %v6277_v13 = vld [vmem:[%s5151_s15 + $0x98] sm:$0xff] }
 0x367   : > { %v2416_v34 = vpop.f32.mrf.mxu1  ;;  %2805 = vmatmul.f32.vlgmr.msra.gmra.mxu3 %v6209_v35  ;;  %2928 = vmatpush.msrb.mxu1 %v537_v2  ;;  %v6349_v2 = vld [vmem:[%s5151_s15 + $0x100] sm:$0xff] }
 0x368   : > { %v2417_v6 = vadd.f32 %v2416_v34, %v2351_v44  ;;  %v741_v44 = vld [vmem:[#allocation5 + $0xed8] sm:$0xff] }
 0x369   : > { %v2481_v10 = vpop.f32.mrf.mxu2  ;;  %2610 = vmatmul.f32.vlgmr.msra.gmra.mxu0 %v6213_v32  ;;  %2992 = vmatpush.msrb.mxu2 %v741_v44 }
 0x36a   : > { %2675 = vmatmul.f32.vlgmr.msra.gmra.mxu1 %v6217_v29  ;;  %v2546_v36 = vpop.f32.mrf.mxu3  ;;  %v2482_v25 = vadd.f32 %v2481_v10, %v2417_v6  ;;  %v6285_v10 = vld [vmem:[%s5151_s15 + $0x88] sm:$0xff] }
 0x36b   : > { %2993 = vmatpush.msrb.mxu2 %v729_v9 }
 0x36c   : > { %v2547_v39 = vadd.f32 %v2546_v36, %v2482_v25 }
 0x36d   : > { %2994 = vmatpush.msrb.mxu2 %v717_v11  ;;  %v309_v11 = vld [vmem:[#allocation5 + $0x158] sm:$0xff] }
 0x36e   : > { %4159 = vst [vmem:[%s5422_s19 + $0x28] sm:$0xff] %v2547_v39  ;;  %2743 = vmatmul.f32.gmra.mxu2 %v6222_v48  ;;  %v2354_v49 = vpop.f32.mrf.mxu0 }
 0x36f   : > { %v2419_v18 = vpop.f32.mrf.mxu1  ;;  %2808 = vmatmul.f32.gmra.mxu3 %v6226_v61 }
 0x370   : > { %v2420_v37 = vadd.f32 %v2419_v18, %v2354_v49  ;;  %v6290_v49 = vld [vmem:[%s5151_s15 + $0xb0] sm:$0xff] }
 0x371   : > { %v2484_v47 = vpop.f32.mrf.mxu2  ;;  %2613 = vmatmul.f32.gmra.mxu0 %v6230_v27 }
 0x372   : > { %2678 = vmatmul.f32.gmra.mxu1 %v6234_v45  ;;  %v2549_v63 = vpop.f32.mrf.mxu3  ;;  %v2485_v41 = vadd.f32 %v2484_v47, %v2420_v37  ;;  %v6294_v37 = vld [vmem:[%s5151_s15 + $0xb8] sm:$0xff] }
 0x374   : > { %v2550_v43 = vadd.f32 %v2549_v63, %v2485_v41  ;;  %v921_v63 = vld [vmem:[#allocation5 + $0x1478] sm:$0xff] }
 0x375   : > { %3058 = vmatpush.msrb.mxu3 %v921_v63  ;;  %v6345_v63 = vld [vmem:[%s5151_s15 + $0x118] sm:$0xff] }
 0x376   : > { %4171 = vst [vmem:[%s5422_s19 + $0x88] sm:$0xff] %v2550_v43  ;;  %2746 = vmatmul.f32.gmra.mxu2 %v6239_v52  ;;  %v2357_v19 = vpop.f32.mrf.mxu0 }
 0x377   : > { %v2422_v20 = vpop.f32.mrf.mxu1  ;;  %2811 = vmatmul.f32.gmra.mxu3 %v6243_v59 }
 0x378   : > { %v2423_v62 = vadd.f32 %v2422_v20, %v2357_v19  ;;  %v345_v20 = vld [vmem:[#allocation5 + $0x278] sm:$0xff] }
 0x379   : > { %v2487_v30 = vpop.f32.mrf.mxu2  ;;  %2616 = vmatmul.f32.gmra.mxu0 %v6247_v55 }
 0x37a   : > { %2681 = vmatmul.f32.gmra.mxu1 %v6251_v16  ;;  %v2552_v15 = vpop.f32.mrf.mxu3  ;;  %v2488_v54 = vadd.f32 %v2487_v30, %v2423_v62  ;;  %2863 = vmatpush.msrb.mxu0 %v345_v20 }
 0x37c   : > { %v2553_v40 = vadd.f32 %v2552_v15, %v2488_v54  ;;  %v6311_v54 = vld [vmem:[%s5151_s15 + $0xd8] sm:$0xff] }
 0x37e   : > { %4183 = vst [vmem:[%s5422_s19 + $0xe8] sm:$0xff] %v2553_v40  ;;  %2749 = vmatmul.f32.gmra.mxu2 %v6256_v51  ;;  %v2360_v22 = vpop.f32.mrf.mxu0  ;;  %v909_v40 = vld [vmem:[#allocation5 + $0x1418] sm:$0xff] }
 0x37f   : > { %v2425_v56 = vpop.f32.mrf.mxu1  ;;  %2814 = vmatmul.f32.gmra.mxu3 %v6260_v42 }
 0x380   : > { %v2426_v0 = vadd.f32 %v2425_v56, %v2360_v22  ;;  %3059 = vmatpush.msrb.mxu3 %v909_v40  ;;  %v6315_v56 = vld [vmem:[%s5151_s15 + $0xc0] sm:$0xff] }
 0x381   : > { %v2490_v58 = vpop.f32.mrf.mxu2  ;;  %2619 = vmatmul.f32.gmra.mxu0 %v6264_v60 }
 0x382   : > { %2684 = vmatmul.f32.gmra.mxu1 %v6268_v24  ;;  %v2555_v3 = vpop.f32.mrf.mxu3  ;;  %v2491_v21 = vadd.f32 %v2490_v58, %v2426_v0  ;;  %v333_v58 = vld [vmem:[#allocation5 + $0x218] sm:$0xff] }
 0x383   : > { %2864 = vmatpush.msrb.mxu0 %v333_v58  ;;  %v6362_v58 = vld [vmem:[%s5151_s15 + $0x138] sm:$0xff] }
 0x384   : > { %v2556_v33 = vadd.f32 %v2555_v3, %v2491_v21  ;;  %v525_v3 = vld [vmem:[#allocation5 + $0x818] sm:$0xff] }
 0x385   : > { %2929 = vmatpush.msrb.mxu1 %v525_v3  ;;  %2865 = vmatpush.msrb.mxu0 %v321_v53  ;;  %v681_v3 = vld [vmem:[#allocation5 + $0xcf8] sm:$0xff] }
 0x386   : > { %4195 = vst [vmem:[%s5422_s19 + $0x148] sm:$0xff] %v2556_v33  ;;  %2752 = vmatmul.f32.gmra.mxu2 %v6273_v26  ;;  %v2363_v31 = vpop.f32.mrf.mxu0 }
 0x387   : > { %v2428_v5 = vpop.f32.mrf.mxu1  ;;  %2817 = vmatmul.f32.gmra.mxu3 %v6277_v13  ;;  %2866 = vmatpush.msrb.mxu0 %v309_v11 }
 0x388   : > { %v2429_v34 = vadd.f32 %v2428_v5, %v2363_v31  ;;  %v6328_v31 = vld [vmem:[%s5151_s15 + $0xf8] sm:$0xff] }
 0x389   : > { %v2493_v6 = vpop.f32.mrf.mxu2  ;;  %2622 = vmatmul.f32.gmra.mxu0 %v6281_v1  ;;  %v705_v5 = vld [vmem:[#allocation5 + $0xdb8] sm:$0xff] }
 0x38a   : > { %2687 = vmatmul.f32.gmra.mxu1 %v6285_v10  ;;  %v2558_v36 = vpop.f32.mrf.mxu3  ;;  %v2494_v25 = vadd.f32 %v2493_v6, %v2429_v34  ;;  %2995 = vmatpush.msrb.mxu2 %v705_v5  ;;  %v897_v34 = vld [vmem:[#allocation5 + $0x13b8] sm:$0xff]  ;;  %v6332_v6 = vld [vmem:[%s5151_s15 + $0xe0] sm:$0xff] }
 0x38b   : > { %3060 = vmatpush.msrb.mxu3 %v897_v34  ;;  %v6366_v5 = vld [vmem:[%s5151_s15 + $0x120] sm:$0xff] }
 0x38c   : > { %v2559_v39 = vadd.f32 %v2558_v36, %v2494_v25  ;;  %v6336_v36 = vld [vmem:[%s5151_s15 + $0xe8] sm:$0xff] }
 0x38e   : > { %4207 = vst [vmem:[%s5422_s19 + $0x1a8] sm:$0xff] %v2559_v39  ;;  %2755 = vmatmul.f32.gmra.mxu2 %v6290_v49  ;;  %v2366_v18 = vpop.f32.mrf.mxu0  ;;  %v513_v39 = vld [vmem:[#allocation5 + $0x7b8] sm:$0xff] }
 0x38f   : > { %v2431_v23 = vpop.f32.mrf.mxu1  ;;  %2820 = vmatmul.f32.gmra.mxu3 %v6294_v37  ;;  %2930 = vmatpush.msrb.mxu1 %v513_v39  ;;  %v6375_v39 = vld [vmem:[%s5151_s15 + $0x150] sm:$0xff] }
 0x390   : > { %v2432_v47 = vadd.f32 %v2431_v23, %v2366_v18  ;;  %v6341_v23 = vld [vmem:[%s5151_s15 + $0x110] sm:$0xff] }
 0x391   : > { %v2496_v41 = vpop.f32.mrf.mxu2  ;;  %2625 = vmatmul.f32.gmra.mxu0 %v6298_v46 }
 0x392   : > { %2690 = vmatmul.f32.gmra.mxu1 %v6302_v12  ;;  %v2561_v43 = vpop.f32.mrf.mxu3  ;;  %v2497_v19 = vadd.f32 %v2496_v41, %v2432_v47  ;;  %v693_v41 = vld [vmem:[#allocation5 + $0xd58] sm:$0xff] }
 0x393   : > { %2996 = vmatpush.msrb.mxu2 %v693_v41  ;;  %v669_v41 = vld [vmem:[#allocation5 + $0xc98] sm:$0xff] }
 0x394   : > { %v2562_v62 = vadd.f32 %v2561_v43, %v2497_v19  ;;  %v885_v19 = vld [vmem:[#allocation5 + $0x1358] sm:$0xff] }
 0x395   : > { %3061 = vmatpush.msrb.mxu3 %v885_v19  ;;  %2997 = vmatpush.msrb.mxu2 %v681_v3  ;;  %v861_v19 = vld [vmem:[#allocation5 + $0x1298] sm:$0xff]  ;;  %v6392_v3 = vld [vmem:[%s5151_s15 + $0x170] sm:$0xff] }
 0x396   : > { %4219 = vst [vmem:[%s5422_s19 + $0x208] sm:$0xff] %v2562_v62  ;;  %2758 = vmatmul.f32.gmra.mxu2 %v6307_v57  ;;  %v2369_v30 = vpop.f32.mrf.mxu0  ;;  %v6353_v62 = vld [vmem:[%s5151_s15 + $0x108] sm:$0xff] }
 0x397   : > { %v2434_v15 = vpop.f32.mrf.mxu1  ;;  %2823 = vmatmul.f32.gmra.mxu3 %v6311_v54  ;;  %2998 = vmatpush.msrb.mxu2 %v669_v41 }
 0x398   : > { %v2435_v7 = vadd.f32 %v2434_v15, %v2369_v30 }
 0x399   : > { %v2499_v22 = vpop.f32.mrf.mxu2  ;;  %2628 = vmatmul.f32.gmra.mxu0 %v6315_v56 }
 0x39a   : > { %2693 = vmatmul.f32.gmra.mxu1 %v6319_v38  ;;  %v2564_v0 = vpop.f32.mrf.mxu3  ;;  %v2500_v28 = vadd.f32 %v2499_v22, %v2435_v7  ;;  %v501_v7 = vld [vmem:[#allocation5 + $0x758] sm:$0xff]  ;;  %v6358_v22 = vld [vmem:[%s5151_s15 + $0x130] sm:$0xff] }
 0x39b   : > { %2931 = vmatpush.msrb.mxu1 %v501_v7 }
 0x39c   : > { %v2565_v21 = vadd.f32 %v2564_v0, %v2500_v28 }
 0x39e   : > { %4231 = vst [vmem:[%s5422_s19 + $0x268] sm:$0xff] %v2565_v21  ;;  %2761 = vmatmul.f32.gmra.mxu2 %v6324_v8  ;;  %v2372_v4 = vpop.f32.mrf.mxu0 }
 0x39f   : > { %v2437_v33 = vpop.f32.mrf.mxu1  ;;  %2826 = vmatmul.f32.gmra.mxu3 %v6328_v31 }
 0x3a0   : > { %v2438_v44 = vadd.f32 %v2437_v33, %v2372_v4  ;;  %v873_v4 = vld [vmem:[#allocation5 + $0x12f8] sm:$0xff] }
 0x3a1   : > { %v2502_v17 = vpop.f32.mrf.mxu2  ;;  %2631 = vmatmul.f32.gmra.mxu0 %v6332_v6  ;;  %3062 = vmatpush.msrb.mxu3 %v873_v4 }
 0x3a2   : > { %2696 = vmatmul.f32.gmra.mxu1 %v6336_v36  ;;  %v2567_v25 = vpop.f32.mrf.mxu3  ;;  %v2503_v50 = vadd.f32 %v2502_v17, %v2438_v44  ;;  %v6370_v44 = vld [vmem:[%s5151_s15 + $0x128] sm:$0xff] }
 0x3a3   : > { %3063 = vmatpush.msrb.mxu3 %v861_v19  ;;  %v465_v19 = vld [vmem:[#allocation5 + $0x638] sm:$0xff] }
 0x3a4   : > { %v2568_v18 = vadd.f32 %v2567_v25, %v2503_v50  ;;  %v297_v25 = vld [vmem:[#allocation5 + $0xf8] sm:$0xff] }
 0x3a5   : > { %v489_v50 = vld [vmem:[#allocation5 + $0x6f8] sm:$0xff]  ;;  %2867 = vmatpush.msrb.mxu0 %v297_v25 }
 0x3a6   : > { %4243 = vst [vmem:[%s5422_s19 + $0x2c8] sm:$0xff] %v2568_v18  ;;  %2764 = vmatmul.f32.gmra.mxu2 %v6341_v23  ;;  %v2375_v9 = vpop.f32.mrf.mxu0  ;;  %2932 = vmatpush.msrb.mxu1 %v489_v50  ;;  %v849_v25 = vld [vmem:[#allocation5 + $0x1238] sm:$0xff] }
 0x3a7   : > { %v2440_v47 = vpop.f32.mrf.mxu1  ;;  %2829 = vmatmul.f32.gmra.mxu3 %v6345_v63 }
 0x3a8   : > { %v2441_v43 = vadd.f32 %v2440_v47, %v2375_v9  ;;  %v6379_v47 = vld [vmem:[%s5151_s15 + $0x158] sm:$0xff]  ;;  %3064 = vmatpush.msrb.mxu3 %v849_v25  ;;  %v6421_v25 = vld [vmem:[%s5151_s15 + $0x188] sm:$0xff] }
 0x3a9   : > { %v2505_v20 = vpop.f32.mrf.mxu2  ;;  %2634 = vmatmul.f32.gmra.mxu0 %v6349_v2  ;;  %7471 = vst [vmem:[#allocation11_spill] sm:$0xff] %v6421_v25 }
 0x3aa   : > { %2699 = vmatmul.f32.gmra.mxu1 %v6353_v62  ;;  %v2570_v30 = vpop.f32.mrf.mxu3  ;;  %v2506_v15 = vadd.f32 %v2505_v20, %v2441_v43 }
 0x3ac   : > { %v2571_v40 = vadd.f32 %v2570_v30, %v2506_v15  ;;  %v6383_v30 = vld [vmem:[%s5151_s15 + $0x140] sm:$0xff]  ;;  %v6387_v15 = vld [vmem:[%s5151_s15 + $0x148] sm:$0xff] }
 0x3ae   : > { %4255 = vst [vmem:[%s5422_s19 + $0x328] sm:$0xff] %v2571_v40  ;;  %2767 = vmatmul.f32.gmra.mxu2 %v6358_v22  ;;  %v2378_v0 = vpop.f32.mrf.mxu0  ;;  %v285_v40 = vld [vmem:[#allocation5 + $0x98] sm:$0xff] }
 0x3af   : > { %v2443_v28 = vpop.f32.mrf.mxu1  ;;  %2832 = vmatmul.f32.gmra.mxu3 %v6362_v58  ;;  %2868 = vmatpush.msrb.mxu0 %v285_v40 }
 0x3b0   : > { %v2444_v21 = vadd.f32 %v2443_v28, %v2378_v0  ;;  %v477_v0 = vld [vmem:[#allocation5 + $0x698] sm:$0xff] }
 0x3b1   : > { %v2508_v33 = vpop.f32.mrf.mxu2  ;;  %2637 = vmatmul.f32.gmra.mxu0 %v6366_v5  ;;  %2933 = vmatpush.msrb.mxu1 %v477_v0  ;;  %v6413_v0 = vld [vmem:[%s5151_s15 + $0x198] sm:$0xff] }
 0x3b2   : > { %2702 = vmatmul.f32.gmra.mxu1 %v6370_v44  ;;  %v2573_v34 = vpop.f32.mrf.mxu3  ;;  %v2509_v17 = vadd.f32 %v2508_v33, %v2444_v21  ;;  %v6396_v33 = vld [vmem:[%s5151_s15 + $0x178] sm:$0xff] }
 0x3b3   : > { %2934 = vmatpush.msrb.mxu1 %v465_v19 }
 0x3b4   : > { %v2574_v53 = vadd.f32 %v2573_v34, %v2509_v17  ;;  %v657_v34 = vld [vmem:[#allocation5 + $0xc38] sm:$0xff] }
 0x3b5   : > { %2999 = vmatpush.msrb.mxu2 %v657_v34 }
 0x3b6   : > { %4267 = vst [vmem:[%s5422_s19 + $0x388] sm:$0xff] %v2574_v53  ;;  %2770 = vmatmul.f32.gmra.mxu2 %v6375_v39  ;;  %v2381_v18 = vpop.f32.mrf.mxu0  ;;  %v6400_v53 = vld [vmem:[%s5151_s15 + $0x160] sm:$0xff] }
 0x3b7   : > { %v2446_v9 = vpop.f32.mrf.mxu1  ;;  %2835 = vmatmul.f32.gmra.mxu3 %v6379_v47 }
 0x3b8   : > { %v2447_v43 = vadd.f32 %v2446_v9, %v2381_v18  ;;  %v6404_v18 = vld [vmem:[%s5151_s15 + $0x168] sm:$0xff] }
 0x3b9   : > { %v2511_v20 = vpop.f32.mrf.mxu2  ;;  %2640 = vmatmul.f32.gmra.mxu0 %v6383_v30 }
 0x3ba   : > { %2705 = vmatmul.f32.gmra.mxu1 %v6387_v15  ;;  %v2576_v11 = vpop.f32.mrf.mxu3  ;;  %v2512_v7 = vadd.f32 %v2511_v20, %v2447_v43  ;;  %v273_v43 = vld [vmem:[#allocation5 + $0x38] sm:$0xff] }
 0x3bb   : > { %2869 = vmatpush.msrb.mxu0 %v273_v43  ;;  %v646_v43 = vld [vmem:[#allocation5 + $0xbe0] sm:$0xff] }
 0x3bc   : > { %v2577_v28 = vadd.f32 %v2576_v11, %v2512_v7  ;;  %v6409_v11 = vld [vmem:[%s5151_s15 + $0x190] sm:$0xff]  ;;  %3179 = vmatpush.msra.mxu1 %v646_v43 }
 0x3be   : > { %4279 = vst [vmem:[%s5422_s19 + $0x3e8] sm:$0xff] %v2577_v28  ;;  %2773 = vmatmul.f32.gmra.mxu2 %v6392_v3  ;;  %v2384_v21 = vpop.f32.mrf.mxu0  ;;  %v838_v28 = vld [vmem:[#allocation5 + $0x11e0] sm:$0xff] }
 0x3bf   : > { %v2449_v4 = vpop.f32.mrf.mxu1  ;;  %2838 = vmatmul.f32.gmra.mxu3 %v6396_v33  ;;  %3244 = vmatpush.msra.mxu2 %v838_v28  ;;  %v6430_v28 = vld [vmem:[%s5151_s15 + $0x1b8] sm:$0xff] }
 0x3c0   : > { %v2450_v17 = vadd.f32 %v2449_v4, %v2384_v21  ;;  %v1030_v4 = vld [vmem:[#allocation5 + $0x17e0] sm:$0xff]  ;;  %7473 = vst [vmem:[#allocation13_spill] sm:$0xff] %v6430_v28 }
 0x3c1   : > { %v2514_v50 = vpop.f32.mrf.mxu2  ;;  %2643 = vmatmul.f32.gmra.mxu0 %v6400_v53  ;;  %3309 = vmatpush.msra.mxu3 %v1030_v4  ;;  %v826_v4 = vld [vmem:[#allocation5 + $0x1180] sm:$0xff] }
 0x3c2   : > { %2708 = vmatmul.f32.gmra.mxu1 %v6404_v18  ;;  %v2579_v9 = vpop.f32.mrf.mxu3  ;;  %v2515_v41 = vadd.f32 %v2514_v50, %v2450_v17  ;;  %v6417_v17 = vld [vmem:[%s5151_s15 + $0x180] sm:$0xff]  ;;  %3245 = vmatpush.msra.mxu2 %v826_v4 }
 0x3c4   : > { %v2580_v20 = vadd.f32 %v2579_v9, %v2515_v41  ;;  %v454_v41 = vld [vmem:[#allocation5 + $0x5e0] sm:$0xff] }
 0x3c5   : > { %3114 = vmatpush.msra.mxu0 %v454_v41  ;;  %v6438_v41 = vld [vmem:[%s5151_s15 + $0x1a8] sm:$0xff] }
 0x3c6   : > { %4291 = vst [vmem:[%s5422_s19 + $0x448] sm:$0xff] %v2580_v20  ;;  %2776 = vmatmul.f32.gmra.mxu2 %v6409_v11  ;;  %v2387_v7 = vpop.f32.mrf.mxu0  ;;  %v6426_v20 = vld [vmem:[%s5151_s15 + $0x1b0] sm:$0xff] }
 0x3c7   : > { %v2452_v40 = vpop.f32.mrf.mxu1  ;;  %2841 = vmatmul.f32.gmra.mxu3 %v6413_v0  ;;  %7472 = vst [vmem:[#allocation12_spill] sm:$0xff] %v6426_v20 }
 0x3c8   : > { %v2453_v21 = vadd.f32 %v2452_v40, %v2387_v7  ;;  %7475 = vst [vmem:[#allocation15_spill] sm:$0xff] %v6438_v41 }
 0x3c9   : > { %v2517_v34 = vpop.f32.mrf.mxu2  ;;  %2646 = vmatmul.f32.gmra.mxu0 %v6417_v17 }
 0x3ca   : > { %2711 = vmatmul.f32.gmra.mxu1 %v6421_v25  ;;  %v2582_v50 = vpop.f32.mrf.mxu3  ;;  %v2518_v9 = vadd.f32 %v2517_v34, %v2453_v21  ;;  %v1018_v34 = vld [vmem:[#allocation5 + $0x1780] sm:$0xff] }
 0x3cb   : > { %3310 = vmatpush.msra.mxu3 %v1018_v34  ;;  %v610_v25 = vld [vmem:[#allocation5 + $0xac0] sm:$0xff] }
 0x3cc   : > { %v2583_v19 = vadd.f32 %v2582_v50, %v2518_v9  ;;  %v6434_v9 = vld [vmem:[%s5151_s15 + $0x1a0] sm:$0xff] }
 0x3cd   : > { %7474 = vst [vmem:[#allocation14_spill] sm:$0xff] %v6434_v9 }
 0x3ce   : > { %4303 = vst [vmem:[%s5422_s19 + $0x4a8] sm:$0xff] %v2583_v19  ;;  %2779 = vmatmul.f32.gmra.mxu2 %v6426_v20  ;;  %v2390_v7 = vpop.f32.mrf.mxu0  ;;  %v634_v20 = vld [vmem:[#allocation5 + $0xb80] sm:$0xff] }
 0x3cf   : > { %v2455_v40 = vpop.f32.mrf.mxu1  ;;  %2844 = vmatmul.f32.gmra.mxu3 %v6430_v28  ;;  %v442_v28 = vld [vmem:[#allocation5 + $0x580] sm:$0xff]  ;;  %3180 = vmatpush.msra.mxu1 %v634_v20 }
 0x3d0   : > { %v2456_v21 = vadd.f32 %v2455_v40, %v2390_v7  ;;  %3115 = vmatpush.msra.mxu0 %v442_v28  ;;  %v6443_v40 = vld [vmem:[%s5151_s15 + $0x1d0] sm:$0xff]  ;;  %v1006_v28 = vld [vmem:[#allocation5 + $0x1720] sm:$0xff] }
 0x3d1   : > { %v2520_v50 = vpop.f32.mrf.mxu2  ;;  %2649 = vmatmul.f32.gmra.mxu0 %v6434_v9  ;;  %7476 = vst [vmem:[#allocation16_spill] sm:$0xff] %v6443_v40  ;;  %v6447_v9 = vld [vmem:[%s5151_s15 + $0x1d8] sm:$0xff]  ;;  %3311 = vmatpush.msra.mxu3 %v1006_v28 }
 0x3d2   : > { %2714 = vmatmul.f32.gmra.mxu1 %v6438_v41  ;;  %v2585_v43 = vpop.f32.mrf.mxu3  ;;  %v2521_v19 = vadd.f32 %v2520_v50, %v2456_v21  ;;  %7477 = vst [vmem:[#allocation17_spill] sm:$0xff] %v6447_v9  ;;  %v814_v41 = vld [vmem:[#allocation5 + $0x1120] sm:$0xff] }
 0x3d3   : > { %3246 = vmatpush.msra.mxu2 %v814_v41  ;;  %v6451_v50 = vld [vmem:[%s5151_s15 + $0x1c0] sm:$0xff] }
 0x3d4   : > { %v2586_v7 = vadd.f32 %v2585_v43, %v2521_v19  ;;  %7478 = vst [vmem:[#allocation18_spill] sm:$0xff] %v6451_v50  ;;  %v6455_v43 = vld [vmem:[%s5151_s15 + $0x1c8] sm:$0xff] }
 0x3d5   : > { %7479 = vst [vmem:[#allocation19_spill] sm:$0xff] %v6455_v43 }
 0x3d6   : > { %4315 = vst [vmem:[%s5422_s19 + $0x508] sm:$0xff] %v2586_v7  ;;  %2782 = vmatmul.f32.gmra.mxu2 %v6443_v40  ;;  %v2393_v4 = vpop.f32.mrf.mxu0  ;;  %v622_v40 = vld [vmem:[#allocation5 + $0xb20] sm:$0xff] }
 0x3d7   : > { %v2458_v34 = vpop.f32.mrf.mxu1  ;;  %2847 = vmatmul.f32.gmra.mxu3 %v6447_v9  ;;  %v430_v9 = vld [vmem:[#allocation5 + $0x520] sm:$0xff]  ;;  %3181 = vmatpush.msra.mxu1 %v622_v40 }
 0x3d8   : > { %v2459_v21 = vadd.f32 %v2458_v34, %v2393_v4  ;;  %3116 = vmatpush.msra.mxu0 %v430_v9  ;;  %v6460_v4 = vld [vmem:[%s5151_s15 + $0x1f0] sm:$0xff]  ;;  %v994_v9 = vld [vmem:[#allocation5 + $0x16c0] sm:$0xff] }
 0x3d9   : > { %v2523_v20 = vpop.f32.mrf.mxu2  ;;  %2652 = vmatmul.f32.gmra.mxu0 %v6451_v50  ;;  %7480 = vst [vmem:[#allocation20_spill] sm:$0xff] %v6460_v4  ;;  %v6464_v50 = vld [vmem:[%s5151_s15 + $0x1f8] sm:$0xff]  ;;  %3312 = vmatpush.msra.mxu3 %v994_v9  ;;  %v790_v9 = vld [vmem:[#allocation5 + $0x1060] sm:$0xff] }
 0x3da   : > { %2717 = vmatmul.f32.gmra.mxu1 %v6455_v43  ;;  %v2588_v19 = vpop.f32.mrf.mxu3  ;;  %v2524_v7 = vadd.f32 %v2523_v20, %v2459_v21  ;;  %7481 = vst [vmem:[#allocation21_spill] sm:$0xff] %v6464_v50  ;;  %v802_v43 = vld [vmem:[#allocation5 + $0x10c0] sm:$0xff] }
 0x3db   : > { %3247 = vmatpush.msra.mxu2 %v802_v43  ;;  %v6468_v20 = vld [vmem:[%s5151_s15 + $0x1e0] sm:$0xff]  ;;  %3182 = vmatpush.msra.mxu1 %v610_v25 }
 0x3dc   : > { %v2589_v41 = vadd.f32 %v2588_v19, %v2524_v7  ;;  %7482 = vst [vmem:[#allocation22_spill] sm:$0xff] %v6468_v20  ;;  %v6472_v19 = vld [vmem:[%s5151_s15 + $0x1e8] sm:$0xff] }
 0x3dd   : > { %7483 = vst [vmem:[#allocation23_spill] sm:$0xff] %v6472_v19  ;;  %3248 = vmatpush.msra.mxu2 %v790_v9  ;;  %v766_v9 = vld [vmem:[#allocation5 + $0xfa0] sm:$0xff] }
 0x3de   : > { %4327 = vst [vmem:[%s5422_s19 + $0x568] sm:$0xff] %v2589_v41  ;;  %2785 = vmatmul.f32.gmra.mxu2 %v6460_v4  ;;  %v2396_v34 = vpop.f32.mrf.mxu0  ;;  %v418_v4 = vld [vmem:[#allocation5 + $0x4c0] sm:$0xff] }
 0x3df   : > { %v2461_v28 = vpop.f32.mrf.mxu1  ;;  %2850 = vmatmul.f32.gmra.mxu3 %v6464_v50  ;;  %3117 = vmatpush.msra.mxu0 %v418_v4  ;;  %v982_v50 = vld [vmem:[#allocation5 + $0x1660] sm:$0xff] }
 0x3e0   : > { %v2462_v21 = vadd.f32 %v2461_v28, %v2396_v34  ;;  %3313 = vmatpush.msra.mxu3 %v982_v50  ;;  %v778_v50 = vld [vmem:[#allocation5 + $0x1000] sm:$0xff] }
 0x3e1   : > { %v2526_v40 = vpop.f32.mrf.mxu2  ;;  %2655 = vmatmul.f32.gmra.mxu0 %v6468_v20  ;;  %3249 = vmatpush.msra.mxu2 %v778_v50 }
 0x3e2   : > { %2720 = vmatmul.f32.gmra.mxu1 %v6472_v19  ;;  %v2591_v7 = vpop.f32.mrf.mxu3  ;;  %v2527_v41 = vadd.f32 %v2526_v40, %v2462_v21  ;;  %v406_v21 = vld [vmem:[#allocation5 + $0x460] sm:$0xff] }
 0x3e3   : > { %v598_v40 = vld [vmem:[#allocation5 + $0xa60] sm:$0xff]  ;;  %3118 = vmatpush.msra.mxu0 %v406_v21  ;;  %3250 = vmatpush.msra.mxu2 %v766_v9 }
 0x3e4   : > { %v2592_v34 = vadd.f32 %v2591_v7, %v2527_v41  ;;  %3183 = vmatpush.msra.mxu1 %v598_v40  ;;  %v382_v40 = vld [vmem:[#allocation5 + $0x3a0] sm:$0xff] }
 0x3e5   : > { %v550_v9 = vld [vmem:[#allocation5 + $0x8e0] sm:$0xff] }
 0x3e6   : > { %4339 = vst [vmem:[%s5422_s19 + $0x5c8] sm:$0xff] %v2592_v34  ;;  %3000 = vmatmul.f32.vlgmr.msrb.gmra.mxu2 %v6205_v14  ;;  %v2611_v43 = vpop.f32.mrf.mxu0  ;;  %v394_v34 = vld [vmem:[#allocation5 + $0x400] sm:$0xff] }
 0x3e7   : > { %v2676_v28 = vpop.f32.mrf.mxu1  ;;  %3065 = vmatmul.f32.vlgmr.msrb.gmra.mxu3 %v6209_v35  ;;  %3119 = vmatpush.msra.mxu0 %v394_v34  ;;  %v742_v34 = vld [vmem:[#allocation5 + $0xee0] sm:$0xff] }
 0x3e8   : > { %v2677_v20 = vadd.f32 %v2676_v28, %v2611_v43  ;;  %v586_v43 = vld [vmem:[#allocation5 + $0xa00] sm:$0xff] }
 0x3e9   : > { %v2741_v19 = vpop.f32.mrf.mxu2  ;;  %2870 = vmatmul.f32.vlgmr.msrb.gmra.mxu0 %v6213_v32  ;;  %v970_v32 = vld [vmem:[#allocation5 + $0x1600] sm:$0xff]  ;;  %3184 = vmatpush.msra.mxu1 %v586_v43 }
 0x3ea   : > { %2935 = vmatmul.f32.vlgmr.msrb.gmra.mxu1 %v6217_v29  ;;  %v2806_v25 = vpop.f32.mrf.mxu3  ;;  %v2742_v4 = vadd.f32 %v2741_v19, %v2677_v20  ;;  %3314 = vmatpush.msra.mxu3 %v970_v32 }
 0x3eb   : > { %3120 = vmatpush.msra.mxu0 %v382_v40  ;;  %v346_v40 = vld [vmem:[#allocation5 + $0x280] sm:$0xff] }
 0x3ec   : > { %v2807_v14 = vadd.f32 %v2806_v25, %v2742_v4 }
 0x3ee   : > { %4160 = vst [vmem:[%s5422_s19 + $0x30] sm:$0xff] %v2807_v14  ;;  %3003 = vmatmul.f32.gmra.mxu2 %v6222_v48  ;;  %v2614_v35 = vpop.f32.mrf.mxu0  ;;  %v574_v14 = vld [vmem:[#allocation5 + $0x9a0] sm:$0xff] }
 0x3ef   : > { %v2679_v7 = vpop.f32.mrf.mxu1  ;;  %3068 = vmatmul.f32.gmra.mxu3 %v6226_v61  ;;  %3185 = vmatpush.msra.mxu1 %v574_v14  ;;  %v538_v14 = vld [vmem:[#allocation5 + $0x880] sm:$0xff] }
 0x3f0   : > { %v2680_v41 = vadd.f32 %v2679_v7, %v2614_v35  ;;  %v754_v7 = vld [vmem:[#allocation5 + $0xf40] sm:$0xff] }
 0x3f1   : > { %v2744_v29 = vpop.f32.mrf.mxu2  ;;  %2873 = vmatmul.f32.gmra.mxu0 %v6230_v27  ;;  %v958_v27 = vld [vmem:[#allocation5 + $0x15a0] sm:$0xff]  ;;  %3251 = vmatpush.msra.mxu2 %v754_v7 }
 0x3f2   : > { %2938 = vmatmul.f32.gmra.mxu1 %v6234_v45  ;;  %v2809_v20 = vpop.f32.mrf.mxu3  ;;  %v2745_v19 = vadd.f32 %v2744_v29, %v2680_v41  ;;  %3315 = vmatpush.msra.mxu3 %v958_v27  ;;  %v370_v29 = vld [vmem:[#allocation5 + $0x340] sm:$0xff] }
 0x3f3   : > { %3121 = vmatpush.msra.mxu0 %v370_v29  ;;  %3252 = vmatpush.msra.mxu2 %v742_v34  ;;  %v730_v27 = vld [vmem:[#allocation5 + $0xe80] sm:$0xff] }
 0x3f4   : > { %v2810_v48 = vadd.f32 %v2809_v20, %v2745_v19  ;;  %v562_v20 = vld [vmem:[#allocation5 + $0x940] sm:$0xff] }
 0x3f5   : > { %3186 = vmatpush.msra.mxu1 %v562_v20  ;;  %3253 = vmatpush.msra.mxu2 %v730_v27 }
 0x3f6   : > { %4172 = vst [vmem:[%s5422_s19 + $0x90] sm:$0xff] %v2810_v48  ;;  %3006 = vmatmul.f32.gmra.mxu2 %v6239_v52  ;;  %v2617_v61 = vpop.f32.mrf.mxu0 }
 0x3f7   : > { %v2682_v28 = vpop.f32.mrf.mxu1  ;;  %3071 = vmatmul.f32.gmra.mxu3 %v6243_v59  ;;  %3187 = vmatpush.msra.mxu1 %v550_v9 }
 0x3f8   : > { %v2683_v25 = vadd.f32 %v2682_v28, %v2617_v61  ;;  %v358_v28 = vld [vmem:[#allocation5 + $0x2e0] sm:$0xff] }
 0x3f9   : > { %v2747_v45 = vpop.f32.mrf.mxu2  ;;  %2876 = vmatmul.f32.gmra.mxu0 %v6247_v55  ;;  %v946_v55 = vld [vmem:[#allocation5 + $0x1540] sm:$0xff]  ;;  %3188 = vmatpush.msra.mxu1 %v538_v14 }
 0x3fa   : > { %2941 = vmatmul.f32.gmra.mxu1 %v6251_v16  ;;  %v2812_v4 = vpop.f32.mrf.mxu3  ;;  %v2748_v21 = vadd.f32 %v2747_v45, %v2683_v25  ;;  %3316 = vmatpush.msra.mxu3 %v946_v55  ;;  %v334_v55 = vld [vmem:[#allocation5 + $0x220] sm:$0xff] }
 0x3fb   : > { %3122 = vmatpush.msra.mxu0 %v358_v28  ;;  %v502_v28 = vld [vmem:[#allocation5 + $0x760] sm:$0xff] }
 0x3fc   : > { %v2813_v52 = vadd.f32 %v2812_v4, %v2748_v21 }
 0x3fd   : > { %3123 = vmatpush.msra.mxu0 %v346_v40 }
 0x3fe   : > { %4184 = vst [vmem:[%s5422_s19 + $0xf0] sm:$0xff] %v2813_v52  ;;  %3009 = vmatmul.f32.gmra.mxu2 %v6256_v51  ;;  %v2620_v59 = vpop.f32.mrf.mxu0 }
 0x3ff   : > { %v2685_v35 = vpop.f32.mrf.mxu1  ;;  %3074 = vmatmul.f32.gmra.mxu3 %v6260_v42  ;;  %3124 = vmatpush.msra.mxu0 %v334_v55 }
 0x400   : > { %v2686_v50 = vadd.f32 %v2685_v35, %v2620_v59  ;;  %v718_v59 = vld [vmem:[#allocation5 + $0xe20] sm:$0xff] }
 0x401   : > { %v2750_v16 = vpop.f32.mrf.mxu2  ;;  %2879 = vmatmul.f32.gmra.mxu0 %v6264_v60  ;;  %v934_v60 = vld [vmem:[#allocation5 + $0x14e0] sm:$0xff]  ;;  %3254 = vmatpush.msra.mxu2 %v718_v59 }
 0x402   : > { %2944 = vmatmul.f32.gmra.mxu1 %v6268_v24  ;;  %v2815_v41 = vpop.f32.mrf.mxu3  ;;  %v2751_v32 = vadd.f32 %v2750_v16, %v2686_v50  ;;  %3317 = vmatpush.msra.mxu3 %v934_v60  ;;  %v526_v16 = vld [vmem:[#allocation5 + $0x820] sm:$0xff] }
 0x403   : > { %3189 = vmatpush.msra.mxu1 %v526_v16  ;;  %v658_v59 = vld [vmem:[#allocation5 + $0xc40] sm:$0xff]  ;;  %v839_v16 = vld [vmem:[#allocation5 + $0x11e8] sm:$0xff] }
 0x404   : > { %v2816_v51 = vadd.f32 %v2815_v41, %v2751_v32  ;;  %v706_v32 = vld [vmem:[#allocation5 + $0xdc0] sm:$0xff] }
 0x405   : > { %3255 = vmatpush.msra.mxu2 %v706_v32 }
 0x406   : > { %4196 = vst [vmem:[%s5422_s19 + $0x150] sm:$0xff] %v2816_v51  ;;  %3012 = vmatmul.f32.gmra.mxu2 %v6273_v26  ;;  %v2623_v42 = vpop.f32.mrf.mxu0 }
 0x407   : > { %v2688_v19 = vpop.f32.mrf.mxu1  ;;  %3077 = vmatmul.f32.gmra.mxu3 %v6277_v13 }
 0x408   : > { %v2689_v43 = vadd.f32 %v2688_v19, %v2623_v42  ;;  %v322_v42 = vld [vmem:[#allocation5 + $0x1c0] sm:$0xff] }
 0x409   : > { %v2753_v24 = vpop.f32.mrf.mxu2  ;;  %2882 = vmatmul.f32.gmra.mxu0 %v6281_v1  ;;  %v922_v1 = vld [vmem:[#allocation5 + $0x1480] sm:$0xff] }
 0x40a   : > { %2947 = vmatmul.f32.gmra.mxu1 %v6285_v10  ;;  %v2818_v48 = vpop.f32.mrf.mxu3  ;;  %v2754_v61 = vadd.f32 %v2753_v24, %v2689_v43  ;;  %3318 = vmatpush.msra.mxu3 %v922_v1  ;;  %v514_v19 = vld [vmem:[#allocation5 + $0x7c0] sm:$0xff] }
 0x40b   : > { %3125 = vmatpush.msra.mxu0 %v322_v42  ;;  %3190 = vmatpush.msra.mxu1 %v514_v19  ;;  %v694_v43 = vld [vmem:[#allocation5 + $0xd60] sm:$0xff]  ;;  %v827_v42 = vld [vmem:[#allocation5 + $0x1188] sm:$0xff] }
 0x40c   : > { %v2819_v26 = vadd.f32 %v2818_v48, %v2754_v61  ;;  %3256 = vmatpush.msra.mxu2 %v694_v43  ;;  %v310_v61 = vld [vmem:[#allocation5 + $0x160] sm:$0xff] }
 0x40d   : > { %3126 = vmatpush.msra.mxu0 %v310_v61  ;;  %3191 = vmatpush.msra.mxu1 %v502_v28  ;;  %v490_v1 = vld [vmem:[#allocation5 + $0x700] sm:$0xff] }
 0x40e   : > { %4208 = vst [vmem:[%s5422_s19 + $0x1b0] sm:$0xff] %v2819_v26  ;;  %3015 = vmatmul.f32.gmra.mxu2 %v6290_v49  ;;  %v2626_v13 = vpop.f32.mrf.mxu0  ;;  %v682_v26 = vld [vmem:[#allocation5 + $0xd00] sm:$0xff] }
 0x40f   : > { %v2691_v25 = vpop.f32.mrf.mxu1  ;;  %3080 = vmatmul.f32.gmra.mxu3 %v6294_v37  ;;  %3257 = vmatpush.msra.mxu2 %v682_v26  ;;  %v1007_v26 = vld [vmem:[#allocation5 + $0x1728] sm:$0xff] }
 0x410   : > { %v2692_v45 = vadd.f32 %v2691_v25, %v2626_v13  ;;  %3192 = vmatpush.msra.mxu1 %v490_v1  ;;  %v623_v1 = vld [vmem:[#allocation5 + $0xb28] sm:$0xff] }
 0x411   : > { %v2756_v10 = vpop.f32.mrf.mxu2  ;;  %2885 = vmatmul.f32.gmra.mxu0 %v6298_v46  ;;  %v910_v46 = vld [vmem:[#allocation5 + $0x1420] sm:$0xff] }
 0x412   : > { %2950 = vmatmul.f32.gmra.mxu1 %v6302_v12  ;;  %v2821_v4 = vpop.f32.mrf.mxu3  ;;  %v2757_v21 = vadd.f32 %v2756_v10, %v2692_v45  ;;  %3319 = vmatpush.msra.mxu3 %v910_v46  ;;  %v298_v45 = vld [vmem:[#allocation5 + $0x100] sm:$0xff] }
 0x413   : > { %3127 = vmatpush.msra.mxu0 %v298_v45  ;;  %v431_v45 = vld [vmem:[#allocation5 + $0x528] sm:$0xff] }
 0x414   : > { %v2822_v49 = vadd.f32 %v2821_v4, %v2757_v21  ;;  %v670_v4 = vld [vmem:[#allocation5 + $0xca0] sm:$0xff] }
 0x415   : > { %3258 = vmatpush.msra.mxu2 %v670_v4 }
 0x416   : > { %4220 = vst [vmem:[%s5422_s19 + $0x210] sm:$0xff] %v2822_v49  ;;  %3018 = vmatmul.f32.gmra.mxu2 %v6307_v57  ;;  %v2629_v37 = vpop.f32.mrf.mxu0  ;;  %v286_v49 = vld [vmem:[#allocation5 + $0xa0] sm:$0xff] }
 0x417   : > { %v2694_v52 = vpop.f32.mrf.mxu1  ;;  %3083 = vmatmul.f32.gmra.mxu3 %v6311_v54  ;;  %3128 = vmatpush.msra.mxu0 %v286_v49  ;;  %v7495_v49 = vld [vmem:[#allocation22_spill] sm:$0xff] }
 0x418   : > { %v2695_v35 = vadd.f32 %v2694_v52, %v2629_v37  ;;  %v478_v37 = vld [vmem:[#allocation5 + $0x6a0] sm:$0xff]  ;;  %3259 = vmatpush.msra.mxu2 %v658_v59  ;;  %v611_v59 = vld [vmem:[#allocation5 + $0xac8] sm:$0xff] }
 0x419   : > { %v2759_v12 = vpop.f32.mrf.mxu2  ;;  %2888 = vmatmul.f32.gmra.mxu0 %v6315_v56  ;;  %v898_v56 = vld [vmem:[#allocation5 + $0x13c0] sm:$0xff]  ;;  %3193 = vmatpush.msra.mxu1 %v478_v37 }
 0x41a   : > { %2953 = vmatmul.f32.gmra.mxu1 %v6319_v38  ;;  %v2824_v7 = vpop.f32.mrf.mxu3  ;;  %v2760_v50 = vadd.f32 %v2759_v12, %v2695_v35  ;;  %3320 = vmatpush.msra.mxu3 %v898_v56  ;;  %v647_v56 = vld [vmem:[#allocation5 + $0xbe8] sm:$0xff]  ;;  %v7496_v37 = vld [vmem:[#allocation23_spill] sm:$0xff] }
 0x41b   : > { %3504 = vmatpush.msrb.mxu2 %v839_v16  ;;  %v6569_v16 = vld [vmem:[%s5151_s15 + $0x8] sm:$0xff] }
 0x41c   : > { %v2825_v57 = vadd.f32 %v2824_v7, %v2760_v50  ;;  %v274_v7 = vld [vmem:[#allocation5 + $0x40] sm:$0xff] }
 0x41d   : > { %v466_v50 = vld [vmem:[#allocation5 + $0x640] sm:$0xff]  ;;  %3129 = vmatpush.msra.mxu0 %v274_v7  ;;  %3505 = vmatpush.msrb.mxu2 %v827_v42  ;;  %v791_v7 = vld [vmem:[#allocation5 + $0x1068] sm:$0xff] }
 0x41e   : > { %4232 = vst [vmem:[%s5422_s19 + $0x270] sm:$0xff] %v2825_v57  ;;  %3021 = vmatmul.f32.gmra.mxu2 %v6324_v8  ;;  %v2632_v54 = vpop.f32.mrf.mxu0  ;;  %3194 = vmatpush.msra.mxu1 %v466_v50  ;;  %v6582_v42 = vld [vmem:[%s5151_s15 + $0x20] sm:$0xff] }
 0x41f   : > { %v2697_v41 = vpop.f32.mrf.mxu1  ;;  %3086 = vmatmul.f32.gmra.mxu3 %v6328_v31 }
 0x420   : > { %v2698_v29 = vadd.f32 %v2697_v41, %v2632_v54  ;;  %v7484_v54 = vld [vmem:[#allocation11_spill] sm:$0xff]  ;;  %3439 = vmatpush.msrb.mxu1 %v647_v56 }
 0x421   : > { %v2762_v38 = vpop.f32.mrf.mxu2  ;;  %2891 = vmatmul.f32.gmra.mxu0 %v6332_v6  ;;  %v886_v6 = vld [vmem:[#allocation5 + $0x1360] sm:$0xff] }
 0x422   : > { %2956 = vmatmul.f32.gmra.mxu1 %v6336_v36  ;;  %v2827_v20 = vpop.f32.mrf.mxu3  ;;  %v2763_v51 = vadd.f32 %v2762_v38, %v2698_v29  ;;  %3321 = vmatpush.msra.mxu3 %v886_v6  ;;  %v455_v29 = vld [vmem:[#allocation5 + $0x5e8] sm:$0xff] }
 0x423   : > { %3374 = vmatpush.msrb.mxu0 %v455_v29  ;;  %v443_v6 = vld [vmem:[#allocation5 + $0x588] sm:$0xff] }
 0x424   : > { %v2828_v8 = vadd.f32 %v2827_v20, %v2763_v51  ;;  %v7486_v51 = vld [vmem:[#allocation13_spill] sm:$0xff] }
 0x425   : > { %3375 = vmatpush.msrb.mxu0 %v443_v6 }
 0x426   : > { %4244 = vst [vmem:[%s5422_s19 + $0x2d0] sm:$0xff] %v2828_v8  ;;  %3024 = vmatmul.f32.gmra.mxu2 %v6341_v23  ;;  %v2635_v31 = vpop.f32.mrf.mxu0 }
 0x427   : > { %v2700_v34 = vpop.f32.mrf.mxu1  ;;  %3089 = vmatmul.f32.gmra.mxu3 %v6345_v63  ;;  %3376 = vmatpush.msrb.mxu0 %v431_v45 }
 0x428   : > { %v2701_v60 = vadd.f32 %v2700_v34, %v2635_v31  ;;  %v7487_v31 = vld [vmem:[#allocation14_spill] sm:$0xff]  ;;  %v7488_v34 = vld [vmem:[#allocation15_spill] sm:$0xff] }
 0x429   : > { %v2765_v36 = vpop.f32.mrf.mxu2  ;;  %2894 = vmatmul.f32.gmra.mxu0 %v6349_v2  ;;  %v874_v2 = vld [vmem:[#allocation5 + $0x1300] sm:$0xff] }
 0x42a   : > { %2959 = vmatmul.f32.gmra.mxu1 %v6353_v62  ;;  %v2830_v24 = vpop.f32.mrf.mxu3  ;;  %v2766_v48 = vadd.f32 %v2765_v36, %v2701_v60  ;;  %3322 = vmatpush.msra.mxu3 %v874_v2  ;;  %v635_v36 = vld [vmem:[#allocation5 + $0xb88] sm:$0xff]  ;;  %v7491_v2 = vld [vmem:[#allocation18_spill] sm:$0xff] }
 0x42b   : > { %3440 = vmatpush.msrb.mxu1 %v635_v36 }
 0x42c   : > { %v2831_v23 = vadd.f32 %v2830_v24, %v2766_v48  ;;  %v7489_v48 = vld [vmem:[#allocation16_spill] sm:$0xff] }
 0x42d   : > { %3441 = vmatpush.msrb.mxu1 %v623_v1 }
 0x42e   : > { %4256 = vst [vmem:[%s5422_s19 + $0x330] sm:$0xff] %v2831_v23  ;;  %3027 = vmatmul.f32.gmra.mxu2 %v6358_v22  ;;  %v2638_v63 = vpop.f32.mrf.mxu0  ;;  %v7490_v23 = vld [vmem:[#allocation17_spill] sm:$0xff] }
 0x42f   : > { %v2703_v9 = vpop.f32.mrf.mxu1  ;;  %3092 = vmatmul.f32.gmra.mxu3 %v6362_v58  ;;  %3442 = vmatpush.msrb.mxu1 %v611_v59 }
 0x430   : > { %v2704_v13 = vadd.f32 %v2703_v9, %v2638_v63  ;;  %v815_v63 = vld [vmem:[#allocation5 + $0x1128] sm:$0xff] }
 0x431   : > { %v2768_v62 = vpop.f32.mrf.mxu2  ;;  %2897 = vmatmul.f32.gmra.mxu0 %v6366_v5  ;;  %v862_v5 = vld [vmem:[#allocation5 + $0x12a0] sm:$0xff]  ;;  %3506 = vmatpush.msrb.mxu2 %v815_v63 }
 0x432   : > { %2962 = vmatmul.f32.gmra.mxu1 %v6370_v44  ;;  %v2833_v25 = vpop.f32.mrf.mxu3  ;;  %v2769_v27 = vadd.f32 %v2768_v62, %v2704_v13  ;;  %3323 = vmatpush.msra.mxu3 %v862_v5  ;;  %v7492_v62 = vld [vmem:[#allocation19_spill] sm:$0xff]  ;;  %v803_v5 = vld [vmem:[#allocation5 + $0x10c8] sm:$0xff] }
 0x433   : > { %3507 = vmatpush.msrb.mxu2 %v803_v5  ;;  %v6599_v63 = vld [vmem:[%s5151_s15 + $0x40] sm:$0xff] }
 0x434   : > { %v2834_v22 = vadd.f32 %v2833_v25, %v2769_v27  ;;  %v6616_v5 = vld [vmem:[%s5151_s15 + $0x60] sm:$0xff] }
 0x435   : > { %3508 = vmatpush.msrb.mxu2 %v791_v7  ;;  %v935_v7 = vld [vmem:[#allocation5 + $0x14e8] sm:$0xff] }
 0x436   : > { %4268 = vst [vmem:[%s5422_s19 + $0x390] sm:$0xff] %v2834_v22  ;;  %3030 = vmatmul.f32.gmra.mxu2 %v6375_v39  ;;  %v2641_v58 = vpop.f32.mrf.mxu0 }
 0x437   : > { %v2706_v10 = vpop.f32.mrf.mxu1  ;;  %3095 = vmatmul.f32.gmra.mxu3 %v6379_v47 }
 0x438   : > { %v2707_v21 = vadd.f32 %v2706_v10, %v2641_v58  ;;  %v7493_v58 = vld [vmem:[#allocation20_spill] sm:$0xff] }
 0x439   : > { %v2771_v44 = vpop.f32.mrf.mxu2  ;;  %2900 = vmatmul.f32.gmra.mxu0 %v6383_v30  ;;  %v850_v30 = vld [vmem:[#allocation5 + $0x1240] sm:$0xff] }
 0x43a   : > { %2965 = vmatmul.f32.gmra.mxu1 %v6387_v15  ;;  %v2836_v40 = vpop.f32.mrf.mxu3  ;;  %v2772_v14 = vadd.f32 %v2771_v44, %v2707_v21  ;;  %3324 = vmatpush.msra.mxu3 %v850_v30  ;;  %v7494_v21 = vld [vmem:[#allocation21_spill] sm:$0xff] }
 0x43b   : > { %v6557_v30 = vld [vmem:[%s5151_s15 + $0x10] sm:$0xff] }
 0x43c   : > { %v2837_v39 = vadd.f32 %v2836_v40, %v2772_v14  ;;  %v995_v40 = vld [vmem:[#allocation5 + $0x16c8] sm:$0xff] }
 0x43e   : > { %4280 = vst [vmem:[%s5422_s19 + $0x3f0] sm:$0xff] %v2837_v39  ;;  %3033 = vmatmul.f32.gmra.mxu2 %v6392_v3  ;;  %v2644_v47 = vpop.f32.mrf.mxu0 }
 0x43f   : > { %v2709_v52 = vpop.f32.mrf.mxu1  ;;  %3098 = vmatmul.f32.gmra.mxu3 %v6396_v33 }
 0x440   : > { %v2710_v35 = vadd.f32 %v2709_v52, %v2644_v47  ;;  %v419_v52 = vld [vmem:[#allocation5 + $0x4c8] sm:$0xff] }
 0x441   : > { %v2774_v15 = vpop.f32.mrf.mxu2  ;;  %2903 = vmatmul.f32.gmra.mxu0 %v6400_v53  ;;  %v1031_v53 = vld [vmem:[#allocation5 + $0x17e8] sm:$0xff] }
 0x442   : > { %2968 = vmatmul.f32.gmra.mxu1 %v6404_v18  ;;  %v2839_v46 = vpop.f32.mrf.mxu3  ;;  %v2775_v12 = vadd.f32 %v2774_v15, %v2710_v35  ;;  %3569 = vmatpush.msrb.mxu3 %v1031_v53 }
 0x443   : > { %3377 = vmatpush.msrb.mxu0 %v419_v52 }
 0x444   : > { %v2840_v3 = vadd.f32 %v2839_v46, %v2775_v12  ;;  %v6561_v12 = vld [vmem:[%s5151_s15 + $0x18] sm:$0xff] }
 0x446   : > { %4292 = vst [vmem:[%s5422_s19 + $0x450] sm:$0xff] %v2840_v3  ;;  %3036 = vmatmul.f32.gmra.mxu2 %v6409_v11  ;;  %v2647_v33 = vpop.f32.mrf.mxu0  ;;  %v983_v3 = vld [vmem:[#allocation5 + $0x1668] sm:$0xff] }
 0x447   : > { %v2712_v55 = vpop.f32.mrf.mxu1  ;;  %3101 = vmatmul.f32.gmra.mxu3 %v6413_v0  ;;  %v7485_v0 = vld [vmem:[#allocation12_spill] sm:$0xff] }
 0x448   : > { %v2713_v57 = vadd.f32 %v2712_v55, %v2647_v33  ;;  %v6565_v55 = vld [vmem:[%s5151_s15] sm:$0xff] }
 0x449   : > { %v2777_v18 = vpop.f32.mrf.mxu2  ;;  %2906 = vmatmul.f32.gmra.mxu0 %v6417_v17  ;;  %v1019_v17 = vld [vmem:[#allocation5 + $0x1788] sm:$0xff] }
 0x44a   : > { %2971 = vmatmul.f32.gmra.mxu1 %v7484_v54  ;;  %v2842_v41 = vpop.f32.mrf.mxu3  ;;  %v2778_v32 = vadd.f32 %v2777_v18, %v2713_v57  ;;  %3570 = vmatpush.msrb.mxu3 %v1019_v17  ;;  %v407_v18 = vld [vmem:[#allocation5 + $0x468] sm:$0xff] }
 0x44b   : > { %v599_v54 = vld [vmem:[#allocation5 + $0xa68] sm:$0xff]  ;;  %3378 = vmatpush.msrb.mxu0 %v407_v18 }
 0x44c   : > { %v2843_v11 = vadd.f32 %v2842_v41, %v2778_v32  ;;  %3571 = vmatpush.msrb.mxu3 %v1007_v26  ;;  %3443 = vmatpush.msrb.mxu1 %v599_v54  ;;  %v6574_v32 = vld [vmem:[%s5151_s15 + $0x30] sm:$0xff]  ;;  %v359_v18 = vld [vmem:[#allocation5 + $0x2e8] sm:$0xff] }
 0x44d   : > { %v551_v54 = vld [vmem:[#allocation5 + $0x8e8] sm:$0xff] }
 0x44e   : > { %4304 = vst [vmem:[%s5422_s19 + $0x4b0] sm:$0xff] %v2843_v11  ;;  %3039 = vmatmul.f32.gmra.mxu2 %v7485_v0  ;;  %v2650_v38 = vpop.f32.mrf.mxu0  ;;  %3572 = vmatpush.msrb.mxu3 %v995_v40  ;;  %v6578_v11 = vld [vmem:[%s5151_s15 + $0x38] sm:$0xff]  ;;  %v779_v0 = vld [vmem:[#allocation5 + $0x1008] sm:$0xff] }
 0x44f   : > { %v2715_v20 = vpop.f32.mrf.mxu1  ;;  %3104 = vmatmul.f32.gmra.mxu3 %v7486_v51  ;;  %3509 = vmatpush.msrb.mxu2 %v779_v0 }
 0x450   : > { %v2716_v19 = vadd.f32 %v2715_v20, %v2650_v38  ;;  %3573 = vmatpush.msrb.mxu3 %v983_v3  ;;  %v971_v20 = vld [vmem:[#allocation5 + $0x1608] sm:$0xff]  ;;  %v6633_v3 = vld [vmem:[%s5151_s15 + $0x80] sm:$0xff] }
 0x451   : > { %v2780_v8 = vpop.f32.mrf.mxu2  ;;  %2909 = vmatmul.f32.gmra.mxu0 %v7487_v31  ;;  %v395_v31 = vld [vmem:[#allocation5 + $0x408] sm:$0xff] }
 0x452   : > { %2974 = vmatmul.f32.gmra.mxu1 %v7488_v34  ;;  %v2845_v43 = vpop.f32.mrf.mxu3  ;;  %v2781_v60 = vadd.f32 %v2780_v8, %v2716_v19  ;;  %3574 = vmatpush.msrb.mxu3 %v971_v20  ;;  %v6586_v19 = vld [vmem:[%s5151_s15 + $0x28] sm:$0xff] }
 0x453   : > { %v587_v34 = vld [vmem:[#allocation5 + $0xa08] sm:$0xff]  ;;  %3379 = vmatpush.msrb.mxu0 %v395_v31  ;;  %v6650_v31 = vld [vmem:[%s5151_s15 + $0xa0] sm:$0xff] }
 0x454   : > { %v2846_v24 = vadd.f32 %v2845_v43, %v2781_v60  ;;  %3444 = vmatpush.msrb.mxu1 %v587_v34  ;;  %v6591_v60 = vld [vmem:[%s5151_s15 + $0x50] sm:$0xff]  ;;  %v731_v20 = vld [vmem:[#allocation5 + $0xe88] sm:$0xff] }
 0x455   : > { %v6654_v34 = vld [vmem:[%s5151_s15 + $0xa8] sm:$0xff] }
 0x456   : > { %4316 = vst [vmem:[%s5422_s19 + $0x510] sm:$0xff] %v2846_v24  ;;  %3042 = vmatmul.f32.gmra.mxu2 %v7489_v48  ;;  %v2653_v61 = vpop.f32.mrf.mxu0  ;;  %v6595_v24 = vld [vmem:[%s5151_s15 + $0x58] sm:$0xff]  ;;  %v767_v48 = vld [vmem:[#allocation5 + $0xfa8] sm:$0xff] }
 0x457   : > { %v2718_v28 = vpop.f32.mrf.mxu1  ;;  %3107 = vmatmul.f32.gmra.mxu3 %v7490_v23  ;;  %3510 = vmatpush.msrb.mxu2 %v767_v48  ;;  %v539_v48 = vld [vmem:[#allocation5 + $0x888] sm:$0xff] }
 0x458   : > { %v2719_v9 = vadd.f32 %v2718_v28, %v2653_v61  ;;  %v959_v28 = vld [vmem:[#allocation5 + $0x15a8] sm:$0xff] }
 0x459   : > { %v2783_v13 = vpop.f32.mrf.mxu2  ;;  %2912 = vmatmul.f32.gmra.mxu0 %v7491_v2  ;;  %3575 = vmatpush.msrb.mxu3 %v959_v28  ;;  %v383_v2 = vld [vmem:[#allocation5 + $0x3a8] sm:$0xff]  ;;  %v6659_v28 = vld [vmem:[%s5151_s15 + $0xd0] sm:$0xff] }
 0x45a   : > { %2977 = vmatmul.f32.gmra.mxu1 %v7492_v62  ;;  %v2848_v25 = vpop.f32.mrf.mxu3  ;;  %v2784_v27 = vadd.f32 %v2783_v13, %v2719_v9  ;;  %v6603_v9 = vld [vmem:[%s5151_s15 + $0x48] sm:$0xff]  ;;  %3380 = vmatpush.msrb.mxu0 %v383_v2 }
 0x45b   : > { %v575_v62 = vld [vmem:[#allocation5 + $0x9a8] sm:$0xff] }
 0x45c   : > { %v2849_v22 = vadd.f32 %v2848_v25, %v2784_v27  ;;  %3445 = vmatpush.msrb.mxu1 %v575_v62  ;;  %v6608_v27 = vld [vmem:[%s5151_s15 + $0x70] sm:$0xff]  ;;  %v719_v2 = vld [vmem:[#allocation5 + $0xe28] sm:$0xff] }
 0x45e   : > { %4328 = vst [vmem:[%s5422_s19 + $0x570] sm:$0xff] %v2849_v22  ;;  %3045 = vmatmul.f32.gmra.mxu2 %v7493_v58  ;;  %v2656_v10 = vpop.f32.mrf.mxu0  ;;  %v6612_v22 = vld [vmem:[%s5151_s15 + $0x78] sm:$0xff]  ;;  %v755_v58 = vld [vmem:[#allocation5 + $0xf48] sm:$0xff] }
 0x45f   : > { %v2721_v4 = vpop.f32.mrf.mxu1  ;;  %3110 = vmatmul.f32.gmra.mxu3 %v7494_v21  ;;  %3511 = vmatpush.msrb.mxu2 %v755_v58  ;;  %v6671_v58 = vld [vmem:[%s5151_s15 + $0xc8] sm:$0xff] }
 0x460   : > { %v2722_v44 = vadd.f32 %v2721_v4, %v2656_v10  ;;  %v947_v4 = vld [vmem:[#allocation5 + $0x1548] sm:$0xff] }
 0x461   : > { %v2786_v14 = vpop.f32.mrf.mxu2  ;;  %2915 = vmatmul.f32.gmra.mxu0 %v7495_v49  ;;  %3576 = vmatpush.msrb.mxu3 %v947_v4  ;;  %v371_v49 = vld [vmem:[#allocation5 + $0x348] sm:$0xff] }
 0x462   : > { %2980 = vmatmul.f32.gmra.mxu1 %v7496_v37  ;;  %v2851_v39 = vpop.f32.mrf.mxu3  ;;  %v2787_v47 = vadd.f32 %v2786_v14, %v2722_v44  ;;  %v6620_v44 = vld [vmem:[%s5151_s15 + $0x68] sm:$0xff]  ;;  %3381 = vmatpush.msrb.mxu0 %v371_v49  ;;  %v6676_v49 = vld [vmem:[%s5151_s15 + $0xf0] sm:$0xff] }
 0x463   : > { %v563_v37 = vld [vmem:[#allocation5 + $0x948] sm:$0xff]  ;;  %3577 = vmatpush.msrb.mxu3 %v935_v7 }
 0x464   : > { %v2852_v35 = vadd.f32 %v2851_v39, %v2787_v47  ;;  %3446 = vmatpush.msrb.mxu1 %v563_v37  ;;  %v6625_v47 = vld [vmem:[%s5151_s15 + $0x90] sm:$0xff]  ;;  %3382 = vmatpush.msrb.mxu0 %v359_v18 }
 0x466   : > { %4340 = vst [vmem:[%s5422_s19 + $0x5d0] sm:$0xff] %v2852_v35  ;;  %3260 = vmatmul.f32.vlgmr.msra.gmra.mxu2 %v6557_v30  ;;  %v2871_v15 = vpop.f32.mrf.mxu0  ;;  %v6629_v35 = vld [vmem:[%s5151_s15 + $0x98] sm:$0xff]  ;;  %3447 = vmatpush.msrb.mxu1 %v551_v54  ;;  %v323_v54 = vld [vmem:[#allocation5 + $0x1c8] sm:$0xff] }
 0x467   : > { %v2936_v46 = vpop.f32.mrf.mxu1  ;;  %3325 = vmatmul.f32.vlgmr.msra.gmra.mxu3 %v6561_v12 }
 0x468   : > { %v2937_v50 = vadd.f32 %v2936_v46, %v2871_v15  ;;  %v743_v15 = vld [vmem:[#allocation5 + $0xee8] sm:$0xff]  ;;  %3448 = vmatpush.msrb.mxu1 %v539_v48  ;;  %v6701_v48 = vld [vmem:[%s5151_s15 + $0x100] sm:$0xff] }
 0x469   : > { %v3001_v33 = vpop.f32.mrf.mxu2  ;;  %3130 = vmatmul.f32.vlgmr.msra.gmra.mxu0 %v6565_v55  ;;  %3512 = vmatpush.msrb.mxu2 %v743_v15 }
 0x46a   : > { %3195 = vmatmul.f32.vlgmr.msra.gmra.mxu1 %v6569_v16  ;;  %v3066_v57 = vpop.f32.mrf.mxu3  ;;  %v3002_v53 = vadd.f32 %v3001_v33, %v2937_v50  ;;  %v6637_v33 = vld [vmem:[%s5151_s15 + $0x88] sm:$0xff] }
 0x46b   : > { %3513 = vmatpush.msrb.mxu2 %v731_v20 }
 0x46c   : > { %v3067_v41 = vadd.f32 %v3066_v57, %v3002_v53 }
 0x46d   : > { %3514 = vmatpush.msrb.mxu2 %v719_v2  ;;  %v311_v2 = vld [vmem:[#allocation5 + $0x168] sm:$0xff] }
 0x46e   : > { %4161 = vst [vmem:[%s5422_s19 + $0x38] sm:$0xff] %v3067_v41  ;;  %3263 = vmatmul.f32.gmra.mxu2 %v6574_v32  ;;  %v2874_v29 = vpop.f32.mrf.mxu0 }
 0x46f   : > { %v2939_v56 = vpop.f32.mrf.mxu1  ;;  %3328 = vmatmul.f32.gmra.mxu3 %v6578_v11 }
 0x470   : > { %v2940_v38 = vadd.f32 %v2939_v56, %v2874_v29  ;;  %v6642_v29 = vld [vmem:[%s5151_s15 + $0xb0] sm:$0xff] }
 0x471   : > { %v3004_v51 = vpop.f32.mrf.mxu2  ;;  %3133 = vmatmul.f32.gmra.mxu0 %v6582_v42 }
 0x472   : > { %3198 = vmatmul.f32.gmra.mxu1 %v6586_v19  ;;  %v3069_v17 = vpop.f32.mrf.mxu3  ;;  %v3005_v8 = vadd.f32 %v3004_v51, %v2940_v38  ;;  %v6646_v38 = vld [vmem:[%s5151_s15 + $0xb8] sm:$0xff] }
 0x474   : > { %v3070_v43 = vadd.f32 %v3069_v17, %v3005_v8  ;;  %v923_v17 = vld [vmem:[#allocation5 + $0x1488] sm:$0xff] }
 0x475   : > { %3578 = vmatpush.msrb.mxu3 %v923_v17  ;;  %v6697_v17 = vld [vmem:[%s5151_s15 + $0x118] sm:$0xff] }
 0x476   : > { %4173 = vst [vmem:[%s5422_s19 + $0x98] sm:$0xff] %v3070_v43  ;;  %3266 = vmatmul.f32.gmra.mxu2 %v6591_v60  ;;  %v2877_v6 = vpop.f32.mrf.mxu0 }
 0x477   : > { %v2942_v36 = vpop.f32.mrf.mxu1  ;;  %3331 = vmatmul.f32.gmra.mxu3 %v6595_v24 }
 0x478   : > { %v2943_v61 = vadd.f32 %v2942_v36, %v2877_v6  ;;  %v347_v36 = vld [vmem:[#allocation5 + $0x288] sm:$0xff] }
 0x479   : > { %v3007_v23 = vpop.f32.mrf.mxu2  ;;  %3136 = vmatmul.f32.gmra.mxu0 %v6599_v63 }
 0x47a   : > { %3201 = vmatmul.f32.gmra.mxu1 %v6603_v9  ;;  %v3072_v26 = vpop.f32.mrf.mxu3  ;;  %v3008_v13 = vadd.f32 %v3007_v23, %v2943_v61  ;;  %3383 = vmatpush.msrb.mxu0 %v347_v36 }
 0x47c   : > { %v3073_v25 = vadd.f32 %v3072_v26, %v3008_v13  ;;  %v6663_v13 = vld [vmem:[%s5151_s15 + $0xd8] sm:$0xff] }
 0x47e   : > { %4185 = vst [vmem:[%s5422_s19 + $0xf8] sm:$0xff] %v3073_v25  ;;  %3269 = vmatmul.f32.gmra.mxu2 %v6608_v27  ;;  %v2880_v45 = vpop.f32.mrf.mxu0  ;;  %v911_v25 = vld [vmem:[#allocation5 + $0x1428] sm:$0xff] }
 0x47f   : > { %v2945_v1 = vpop.f32.mrf.mxu1  ;;  %3334 = vmatmul.f32.gmra.mxu3 %v6612_v22 }
 0x480   : > { %v2946_v10 = vadd.f32 %v2945_v1, %v2880_v45  ;;  %3579 = vmatpush.msrb.mxu3 %v911_v25  ;;  %v6667_v1 = vld [vmem:[%s5151_s15 + $0xc0] sm:$0xff] }
 0x481   : > { %v3010_v21 = vpop.f32.mrf.mxu2  ;;  %3139 = vmatmul.f32.gmra.mxu0 %v6616_v5 }
 0x482   : > { %3204 = vmatmul.f32.gmra.mxu1 %v6620_v44  ;;  %v3075_v40 = vpop.f32.mrf.mxu3  ;;  %v3011_v14 = vadd.f32 %v3010_v21, %v2946_v10  ;;  %v335_v21 = vld [vmem:[#allocation5 + $0x228] sm:$0xff] }
 0x483   : > { %3384 = vmatpush.msrb.mxu0 %v335_v21  ;;  %v6714_v21 = vld [vmem:[%s5151_s15 + $0x138] sm:$0xff] }
 0x484   : > { %v3076_v39 = vadd.f32 %v3075_v40, %v3011_v14  ;;  %v527_v40 = vld [vmem:[#allocation5 + $0x828] sm:$0xff] }
 0x485   : > { %3449 = vmatpush.msrb.mxu1 %v527_v40  ;;  %3385 = vmatpush.msrb.mxu0 %v323_v54  ;;  %v683_v40 = vld [vmem:[#allocation5 + $0xd08] sm:$0xff] }
 0x486   : > { %4197 = vst [vmem:[%s5422_s19 + $0x158] sm:$0xff] %v3076_v39  ;;  %3272 = vmatmul.f32.gmra.mxu2 %v6625_v47  ;;  %v2883_v52 = vpop.f32.mrf.mxu0 }
 0x487   : > { %v2948_v59 = vpop.f32.mrf.mxu1  ;;  %3337 = vmatmul.f32.gmra.mxu3 %v6629_v35  ;;  %3386 = vmatpush.msrb.mxu0 %v311_v2 }
 0x488   : > { %v2949_v46 = vadd.f32 %v2948_v59, %v2883_v52  ;;  %v6680_v52 = vld [vmem:[%s5151_s15 + $0xf8] sm:$0xff]  ;;  %v707_v59 = vld [vmem:[#allocation5 + $0xdc8] sm:$0xff] }
 0x489   : > { %v3013_v50 = vpop.f32.mrf.mxu2  ;;  %3142 = vmatmul.f32.gmra.mxu0 %v6633_v3  ;;  %3515 = vmatpush.msrb.mxu2 %v707_v59  ;;  %v6718_v59 = vld [vmem:[%s5151_s15 + $0x120] sm:$0xff] }
 0x48a   : > { %3207 = vmatmul.f32.gmra.mxu1 %v6637_v33  ;;  %v3078_v57 = vpop.f32.mrf.mxu3  ;;  %v3014_v53 = vadd.f32 %v3013_v50, %v2949_v46  ;;  %v899_v46 = vld [vmem:[#allocation5 + $0x13c8] sm:$0xff]  ;;  %v6684_v50 = vld [vmem:[%s5151_s15 + $0xe0] sm:$0xff] }
 0x48b   : > { %3580 = vmatpush.msrb.mxu3 %v899_v46 }
 0x48c   : > { %v3079_v41 = vadd.f32 %v3078_v57, %v3014_v53  ;;  %v6688_v57 = vld [vmem:[%s5151_s15 + $0xe8] sm:$0xff] }
 0x48e   : > { %4209 = vst [vmem:[%s5422_s19 + $0x1b8] sm:$0xff] %v3079_v41  ;;  %3275 = vmatmul.f32.gmra.mxu2 %v6642_v29  ;;  %v2886_v56 = vpop.f32.mrf.mxu0  ;;  %v515_v41 = vld [vmem:[#allocation5 + $0x7c8] sm:$0xff] }
 0x48f   : > { %v2951_v0 = vpop.f32.mrf.mxu1  ;;  %3340 = vmatmul.f32.gmra.mxu3 %v6646_v38  ;;  %3450 = vmatpush.msrb.mxu1 %v515_v41  ;;  %v6727_v41 = vld [vmem:[%s5151_s15 + $0x150] sm:$0xff] }
 0x490   : > { %v2952_v51 = vadd.f32 %v2951_v0, %v2886_v56  ;;  %v6693_v0 = vld [vmem:[%s5151_s15 + $0x110] sm:$0xff] }
 0x491   : > { %v3016_v8 = vpop.f32.mrf.mxu2  ;;  %3145 = vmatmul.f32.gmra.mxu0 %v6650_v31 }
 0x492   : > { %3210 = vmatmul.f32.gmra.mxu1 %v6654_v34  ;;  %v3081_v43 = vpop.f32.mrf.mxu3  ;;  %v3017_v6 = vadd.f32 %v3016_v8, %v2952_v51  ;;  %v695_v8 = vld [vmem:[#allocation5 + $0xd68] sm:$0xff] }
 0x493   : > { %3516 = vmatpush.msrb.mxu2 %v695_v8  ;;  %v671_v8 = vld [vmem:[#allocation5 + $0xca8] sm:$0xff] }
 0x494   : > { %v3082_v61 = vadd.f32 %v3081_v43, %v3017_v6  ;;  %v887_v6 = vld [vmem:[#allocation5 + $0x1368] sm:$0xff] }
 0x495   : > { %3581 = vmatpush.msrb.mxu3 %v887_v6  ;;  %3517 = vmatpush.msrb.mxu2 %v683_v40  ;;  %v863_v6 = vld [vmem:[#allocation5 + $0x12a8] sm:$0xff]  ;;  %v6744_v40 = vld [vmem:[%s5151_s15 + $0x170] sm:$0xff] }
 0x496   : > { %4221 = vst [vmem:[%s5422_s19 + $0x218] sm:$0xff] %v3082_v61  ;;  %3278 = vmatmul.f32.gmra.mxu2 %v6659_v28  ;;  %v2889_v23 = vpop.f32.mrf.mxu0  ;;  %v6705_v61 = vld [vmem:[%s5151_s15 + $0x108] sm:$0xff] }
 0x497   : > { %v2954_v26 = vpop.f32.mrf.mxu1  ;;  %3343 = vmatmul.f32.gmra.mxu3 %v6663_v13  ;;  %3518 = vmatpush.msrb.mxu2 %v671_v8 }
 0x498   : > { %v2955_v62 = vadd.f32 %v2954_v26, %v2889_v23 }
 0x499   : > { %v3019_v45 = vpop.f32.mrf.mxu2  ;;  %3148 = vmatmul.f32.gmra.mxu0 %v6667_v1 }
 0x49a   : > { %3213 = vmatmul.f32.gmra.mxu1 %v6671_v58  ;;  %v3084_v10 = vpop.f32.mrf.mxu3  ;;  %v3020_v4 = vadd.f32 %v3019_v45, %v2955_v62  ;;  %v503_v62 = vld [vmem:[#allocation5 + $0x768] sm:$0xff]  ;;  %v6710_v45 = vld [vmem:[%s5151_s15 + $0x130] sm:$0xff] }
 0x49b   : > { %3451 = vmatpush.msrb.mxu1 %v503_v62 }
 0x49c   : > { %v3085_v14 = vadd.f32 %v3084_v10, %v3020_v4 }
 0x49e   : > { %4233 = vst [vmem:[%s5422_s19 + $0x278] sm:$0xff] %v3085_v14  ;;  %3281 = vmatmul.f32.gmra.mxu2 %v6676_v49  ;;  %v2892_v37 = vpop.f32.mrf.mxu0 }
 0x49f   : > { %v2957_v39 = vpop.f32.mrf.mxu1  ;;  %3346 = vmatmul.f32.gmra.mxu3 %v6680_v52 }
 0x4a0   : > { %v2958_v15 = vadd.f32 %v2957_v39, %v2892_v37  ;;  %v875_v37 = vld [vmem:[#allocation5 + $0x1308] sm:$0xff] }
 0x4a1   : > { %v3022_v7 = vpop.f32.mrf.mxu2  ;;  %3151 = vmatmul.f32.gmra.mxu0 %v6684_v50  ;;  %3582 = vmatpush.msrb.mxu3 %v875_v37 }
 0x4a2   : > { %3216 = vmatmul.f32.gmra.mxu1 %v6688_v57  ;;  %v3087_v53 = vpop.f32.mrf.mxu3  ;;  %v3023_v18 = vadd.f32 %v3022_v7, %v2958_v15  ;;  %v6722_v15 = vld [vmem:[%s5151_s15 + $0x128] sm:$0xff] }
 0x4a3   : > { %3583 = vmatpush.msrb.mxu3 %v863_v6  ;;  %v467_v6 = vld [vmem:[#allocation5 + $0x648] sm:$0xff] }
 0x4a4   : > { %v3088_v56 = vadd.f32 %v3087_v53, %v3023_v18  ;;  %v299_v53 = vld [vmem:[#allocation5 + $0x108] sm:$0xff] }
 0x4a5   : > { %v491_v18 = vld [vmem:[#allocation5 + $0x708] sm:$0xff]  ;;  %3387 = vmatpush.msrb.mxu0 %v299_v53 }
 0x4a6   : > { %4245 = vst [vmem:[%s5422_s19 + $0x2d8] sm:$0xff] %v3088_v56  ;;  %3284 = vmatmul.f32.gmra.mxu2 %v6693_v0  ;;  %v2895_v20 = vpop.f32.mrf.mxu0  ;;  %3452 = vmatpush.msrb.mxu1 %v491_v18  ;;  %v851_v53 = vld [vmem:[#allocation5 + $0x1248] sm:$0xff] }
 0x4a7   : > { %v2960_v51 = vpop.f32.mrf.mxu1  ;;  %3349 = vmatmul.f32.gmra.mxu3 %v6697_v17 }
 0x4a8   : > { %v2961_v43 = vadd.f32 %v2960_v51, %v2895_v20  ;;  %v6731_v51 = vld [vmem:[%s5151_s15 + $0x158] sm:$0xff]  ;;  %3584 = vmatpush.msrb.mxu3 %v851_v53  ;;  %v6773_v53 = vld [vmem:[%s5151_s15 + $0x188] sm:$0xff] }
 0x4a9   : > { %v3025_v36 = vpop.f32.mrf.mxu2  ;;  %3154 = vmatmul.f32.gmra.mxu0 %v6701_v48  ;;  %7497 = vst [vmem:[#allocation11_spill] sm:$0xff] %v6773_v53 }
 0x4aa   : > { %3219 = vmatmul.f32.gmra.mxu1 %v6705_v61  ;;  %v3090_v23 = vpop.f32.mrf.mxu3  ;;  %v3026_v26 = vadd.f32 %v3025_v36, %v2961_v43 }
 0x4ac   : > { %v3091_v25 = vadd.f32 %v3090_v23, %v3026_v26  ;;  %v6735_v23 = vld [vmem:[%s5151_s15 + $0x140] sm:$0xff]  ;;  %v6739_v26 = vld [vmem:[%s5151_s15 + $0x148] sm:$0xff] }
 0x4ae   : > { %4257 = vst [vmem:[%s5422_s19 + $0x338] sm:$0xff] %v3091_v25  ;;  %3287 = vmatmul.f32.gmra.mxu2 %v6710_v45  ;;  %v2898_v10 = vpop.f32.mrf.mxu0  ;;  %v287_v25 = vld [vmem:[#allocation5 + $0xa8] sm:$0xff] }
 0x4af   : > { %v2963_v4 = vpop.f32.mrf.mxu1  ;;  %3352 = vmatmul.f32.gmra.mxu3 %v6714_v21  ;;  %3388 = vmatpush.msrb.mxu0 %v287_v25 }
 0x4b0   : > { %v2964_v14 = vadd.f32 %v2963_v4, %v2898_v10  ;;  %v479_v10 = vld [vmem:[#allocation5 + $0x6a8] sm:$0xff] }
 0x4b1   : > { %v3028_v39 = vpop.f32.mrf.mxu2  ;;  %3157 = vmatmul.f32.gmra.mxu0 %v6718_v59  ;;  %3453 = vmatpush.msrb.mxu1 %v479_v10  ;;  %v6765_v10 = vld [vmem:[%s5151_s15 + $0x198] sm:$0xff] }
 0x4b2   : > { %3222 = vmatmul.f32.gmra.mxu1 %v6722_v15  ;;  %v3093_v46 = vpop.f32.mrf.mxu3  ;;  %v3029_v7 = vadd.f32 %v3028_v39, %v2964_v14  ;;  %v6748_v39 = vld [vmem:[%s5151_s15 + $0x178] sm:$0xff] }
 0x4b3   : > { %3454 = vmatpush.msrb.mxu1 %v467_v6 }
 0x4b4   : > { %v3094_v54 = vadd.f32 %v3093_v46, %v3029_v7  ;;  %v659_v46 = vld [vmem:[#allocation5 + $0xc48] sm:$0xff] }
 0x4b5   : > { %3519 = vmatpush.msrb.mxu2 %v659_v46 }
 0x4b6   : > { %4269 = vst [vmem:[%s5422_s19 + $0x398] sm:$0xff] %v3094_v54  ;;  %3290 = vmatmul.f32.gmra.mxu2 %v6727_v41  ;;  %v2901_v56 = vpop.f32.mrf.mxu0  ;;  %v6752_v54 = vld [vmem:[%s5151_s15 + $0x160] sm:$0xff] }
 0x4b7   : > { %v2966_v20 = vpop.f32.mrf.mxu1  ;;  %3355 = vmatmul.f32.gmra.mxu3 %v6731_v51 }
 0x4b8   : > { %v2967_v43 = vadd.f32 %v2966_v20, %v2901_v56  ;;  %v6756_v56 = vld [vmem:[%s5151_s15 + $0x168] sm:$0xff] }
 0x4b9   : > { %v3031_v36 = vpop.f32.mrf.mxu2  ;;  %3160 = vmatmul.f32.gmra.mxu0 %v6735_v23 }
 0x4ba   : > { %3225 = vmatmul.f32.gmra.mxu1 %v6739_v26  ;;  %v3096_v2 = vpop.f32.mrf.mxu3  ;;  %v3032_v62 = vadd.f32 %v3031_v36, %v2967_v43  ;;  %v275_v43 = vld [vmem:[#allocation5 + $0x48] sm:$0xff] }
 0x4bb   : > { %3389 = vmatpush.msrb.mxu0 %v275_v43  ;;  %v648_v43 = vld [vmem:[#allocation5 + $0xbf0] sm:$0xff] }
 0x4bc   : > { %v3097_v4 = vadd.f32 %v3096_v2, %v3032_v62  ;;  %v6761_v2 = vld [vmem:[%s5151_s15 + $0x190] sm:$0xff]  ;;  %3699 = vmatpush.msra.mxu1 %v648_v43 }
 0x4be   : > { %4281 = vst [vmem:[%s5422_s19 + $0x3f8] sm:$0xff] %v3097_v4  ;;  %3293 = vmatmul.f32.gmra.mxu2 %v6744_v40  ;;  %v2904_v14 = vpop.f32.mrf.mxu0  ;;  %v840_v4 = vld [vmem:[#allocation5 + $0x11f0] sm:$0xff] }
 0x4bf   : > { %v2969_v37 = vpop.f32.mrf.mxu1  ;;  %3358 = vmatmul.f32.gmra.mxu3 %v6748_v39  ;;  %3764 = vmatpush.msra.mxu2 %v840_v4  ;;  %v6782_v4 = vld [vmem:[%s5151_s15 + $0x1b8] sm:$0xff] }
 0x4c0   : > { %v2970_v7 = vadd.f32 %v2969_v37, %v2904_v14  ;;  %v1032_v37 = vld [vmem:[#allocation5 + $0x17f0] sm:$0xff]  ;;  %7499 = vst [vmem:[#allocation13_spill] sm:$0xff] %v6782_v4 }
 0x4c1   : > { %v3034_v18 = vpop.f32.mrf.mxu2  ;;  %3163 = vmatmul.f32.gmra.mxu0 %v6752_v54  ;;  %3829 = vmatpush.msra.mxu3 %v1032_v37  ;;  %v828_v37 = vld [vmem:[#allocation5 + $0x1190] sm:$0xff] }
 0x4c2   : > { %3228 = vmatmul.f32.gmra.mxu1 %v6756_v56  ;;  %v3099_v20 = vpop.f32.mrf.mxu3  ;;  %v3035_v8 = vadd.f32 %v3034_v18, %v2970_v7  ;;  %v6769_v7 = vld [vmem:[%s5151_s15 + $0x180] sm:$0xff]  ;;  %3765 = vmatpush.msra.mxu2 %v828_v37 }
 0x4c4   : > { %v3100_v36 = vadd.f32 %v3099_v20, %v3035_v8  ;;  %v456_v8 = vld [vmem:[#allocation5 + $0x5f0] sm:$0xff] }
 0x4c5   : > { %3634 = vmatpush.msra.mxu0 %v456_v8  ;;  %v6790_v8 = vld [vmem:[%s5151_s15 + $0x1a8] sm:$0xff] }
 0x4c6   : > { %4293 = vst [vmem:[%s5422_s19 + $0x458] sm:$0xff] %v3100_v36  ;;  %3296 = vmatmul.f32.gmra.mxu2 %v6761_v2  ;;  %v2907_v62 = vpop.f32.mrf.mxu0  ;;  %v6778_v36 = vld [vmem:[%s5151_s15 + $0x1b0] sm:$0xff] }
 0x4c7   : > { %v2972_v25 = vpop.f32.mrf.mxu1  ;;  %3361 = vmatmul.f32.gmra.mxu3 %v6765_v10  ;;  %7498 = vst [vmem:[#allocation12_spill] sm:$0xff] %v6778_v36 }
 0x4c8   : > { %v2973_v14 = vadd.f32 %v2972_v25, %v2907_v62  ;;  %7501 = vst [vmem:[#allocation15_spill] sm:$0xff] %v6790_v8 }
 0x4c9   : > { %v3037_v46 = vpop.f32.mrf.mxu2  ;;  %3166 = vmatmul.f32.gmra.mxu0 %v6769_v7 }
 0x4ca   : > { %3231 = vmatmul.f32.gmra.mxu1 %v6773_v53  ;;  %v3102_v18 = vpop.f32.mrf.mxu3  ;;  %v3038_v20 = vadd.f32 %v3037_v46, %v2973_v14  ;;  %v1020_v46 = vld [vmem:[#allocation5 + $0x1790] sm:$0xff] }
 0x4cb   : > { %3830 = vmatpush.msra.mxu3 %v1020_v46  ;;  %v612_v53 = vld [vmem:[#allocation5 + $0xad0] sm:$0xff] }
 0x4cc   : > { %v3103_v6 = vadd.f32 %v3102_v18, %v3038_v20  ;;  %v6786_v20 = vld [vmem:[%s5151_s15 + $0x1a0] sm:$0xff] }
 0x4cd   : > { %7500 = vst [vmem:[#allocation14_spill] sm:$0xff] %v6786_v20 }
 0x4ce   : > { %4305 = vst [vmem:[%s5422_s19 + $0x4b8] sm:$0xff] %v3103_v6  ;;  %3299 = vmatmul.f32.gmra.mxu2 %v6778_v36  ;;  %v2910_v62 = vpop.f32.mrf.mxu0  ;;  %v636_v36 = vld [vmem:[#allocation5 + $0xb90] sm:$0xff] }
 0x4cf   : > { %v2975_v25 = vpop.f32.mrf.mxu1  ;;  %3364 = vmatmul.f32.gmra.mxu3 %v6782_v4  ;;  %v444_v4 = vld [vmem:[#allocation5 + $0x590] sm:$0xff]  ;;  %3700 = vmatpush.msra.mxu1 %v636_v36 }
 0x4d0   : > { %v2976_v14 = vadd.f32 %v2975_v25, %v2910_v62  ;;  %3635 = vmatpush.msra.mxu0 %v444_v4  ;;  %v6795_v25 = vld [vmem:[%s5151_s15 + $0x1d0] sm:$0xff] }
 0x4d1   : > { %v3040_v18 = vpop.f32.mrf.mxu2  ;;  %3169 = vmatmul.f32.gmra.mxu0 %v6786_v20  ;;  %7502 = vst [vmem:[#allocation16_spill] sm:$0xff] %v6795_v25  ;;  %v6799_v20 = vld [vmem:[%s5151_s15 + $0x1d8] sm:$0xff]  ;;  %v1008_v4 = vld [vmem:[#allocation5 + $0x1730] sm:$0xff] }
 0x4d2   : > { %3234 = vmatmul.f32.gmra.mxu1 %v6790_v8  ;;  %v3105_v43 = vpop.f32.mrf.mxu3  ;;  %v3041_v6 = vadd.f32 %v3040_v18, %v2976_v14  ;;  %7503 = vst [vmem:[#allocation17_spill] sm:$0xff] %v6799_v20  ;;  %v816_v8 = vld [vmem:[#allocation5 + $0x1130] sm:$0xff]  ;;  %3831 = vmatpush.msra.mxu3 %v1008_v4  ;;  %v6803_v18 = vld [vmem:[%s5151_s15 + $0x1c0] sm:$0xff] }
 0x4d3   : > { %3766 = vmatpush.msra.mxu2 %v816_v8  ;;  %7504 = vst [vmem:[#allocation18_spill] sm:$0xff] %v6803_v18 }
 0x4d4   : > { %v3106_v62 = vadd.f32 %v3105_v43, %v3041_v6  ;;  %v6807_v43 = vld [vmem:[%s5151_s15 + $0x1c8] sm:$0xff] }
 0x4d5   : > { %7505 = vst [vmem:[#allocation19_spill] sm:$0xff] %v6807_v43 }
 0x4d6   : > { %4317 = vst [vmem:[%s5422_s19 + $0x518] sm:$0xff] %v3106_v62  ;;  %3302 = vmatmul.f32.gmra.mxu2 %v6795_v25  ;;  %v2913_v37 = vpop.f32.mrf.mxu0  ;;  %v624_v25 = vld [vmem:[#allocation5 + $0xb30] sm:$0xff] }
 0x4d7   : > { %v2978_v46 = vpop.f32.mrf.mxu1  ;;  %3367 = vmatmul.f32.gmra.mxu3 %v6799_v20  ;;  %v432_v20 = vld [vmem:[#allocation5 + $0x530] sm:$0xff]  ;;  %3701 = vmatpush.msra.mxu1 %v624_v25 }
 0x4d8   : > { %v2979_v14 = vadd.f32 %v2978_v46, %v2913_v37  ;;  %3636 = vmatpush.msra.mxu0 %v432_v20  ;;  %v6812_v37 = vld [vmem:[%s5151_s15 + $0x1f0] sm:$0xff] }
 0x4d9   : > { %v3043_v36 = vpop.f32.mrf.mxu2  ;;  %3172 = vmatmul.f32.gmra.mxu0 %v6803_v18  ;;  %7506 = vst [vmem:[#allocation20_spill] sm:$0xff] %v6812_v37  ;;  %v6816_v18 = vld [vmem:[%s5151_s15 + $0x1f8] sm:$0xff]  ;;  %v996_v20 = vld [vmem:[#allocation5 + $0x16d0] sm:$0xff]  ;;  %3702 = vmatpush.msra.mxu1 %v612_v53 }
 0x4da   : > { %3237 = vmatmul.f32.gmra.mxu1 %v6807_v43  ;;  %v3108_v6 = vpop.f32.mrf.mxu3  ;;  %v3044_v62 = vadd.f32 %v3043_v36, %v2979_v14  ;;  %7507 = vst [vmem:[#allocation21_spill] sm:$0xff] %v6816_v18  ;;  %v804_v43 = vld [vmem:[#allocation5 + $0x10d0] sm:$0xff]  ;;  %3832 = vmatpush.msra.mxu3 %v996_v20  ;;  %v6820_v36 = vld [vmem:[%s5151_s15 + $0x1e0] sm:$0xff] }
 0x4db   : > { %3767 = vmatpush.msra.mxu2 %v804_v43  ;;  %7508 = vst [vmem:[#allocation22_spill] sm:$0xff] %v6820_v36  ;;  %v792_v20 = vld [vmem:[#allocation5 + $0x1070] sm:$0xff] }
 0x4dc   : > { %v3109_v8 = vadd.f32 %v3108_v6, %v3044_v62  ;;  %v6824_v6 = vld [vmem:[%s5151_s15 + $0x1e8] sm:$0xff] }
 0x4dd   : > { %7509 = vst [vmem:[#allocation23_spill] sm:$0xff] %v6824_v6  ;;  %3768 = vmatpush.msra.mxu2 %v792_v20  ;;  %v768_v20 = vld [vmem:[#allocation5 + $0xfb0] sm:$0xff] }
 0x4de   : > { %4329 = vst [vmem:[%s5422_s19 + $0x578] sm:$0xff] %v3109_v8  ;;  %3305 = vmatmul.f32.gmra.mxu2 %v6812_v37  ;;  %v2916_v46 = vpop.f32.mrf.mxu0  ;;  %v420_v37 = vld [vmem:[#allocation5 + $0x4d0] sm:$0xff] }
 0x4df   : > { %v2981_v4 = vpop.f32.mrf.mxu1  ;;  %3370 = vmatmul.f32.gmra.mxu3 %v6816_v18  ;;  %3637 = vmatpush.msra.mxu0 %v420_v37  ;;  %v984_v18 = vld [vmem:[#allocation5 + $0x1670] sm:$0xff] }
 0x4e0   : > { %v2982_v14 = vadd.f32 %v2981_v4, %v2916_v46  ;;  %3833 = vmatpush.msra.mxu3 %v984_v18  ;;  %v780_v18 = vld [vmem:[#allocation5 + $0x1010] sm:$0xff] }
 0x4e1   : > { %v3046_v25 = vpop.f32.mrf.mxu2  ;;  %3175 = vmatmul.f32.gmra.mxu0 %v6820_v36  ;;  %3769 = vmatpush.msra.mxu2 %v780_v18 }
 0x4e2   : > { %3240 = vmatmul.f32.gmra.mxu1 %v6824_v6  ;;  %v3111_v62 = vpop.f32.mrf.mxu3  ;;  %v3047_v8 = vadd.f32 %v3046_v25, %v2982_v14  ;;  %v408_v14 = vld [vmem:[#allocation5 + $0x470] sm:$0xff] }
 0x4e3   : > { %v600_v25 = vld [vmem:[#allocation5 + $0xa70] sm:$0xff]  ;;  %3638 = vmatpush.msra.mxu0 %v408_v14  ;;  %3770 = vmatpush.msra.mxu2 %v768_v20 }
 0x4e4   : > { %v3112_v46 = vadd.f32 %v3111_v62, %v3047_v8  ;;  %3703 = vmatpush.msra.mxu1 %v600_v25  ;;  %v384_v25 = vld [vmem:[#allocation5 + $0x3b0] sm:$0xff] }
 0x4e5   : > { %v552_v20 = vld [vmem:[#allocation5 + $0x8f0] sm:$0xff] }
 0x4e6   : > { %4341 = vst [vmem:[%s5422_s19 + $0x5d8] sm:$0xff] %v3112_v46  ;;  %3520 = vmatmul.f32.vlgmr.msrb.gmra.mxu2 %v6557_v30  ;;  %v3131_v43 = vpop.f32.mrf.mxu0  ;;  %v396_v46 = vld [vmem:[#allocation5 + $0x410] sm:$0xff] }
 0x4e7   : > { %v3196_v4 = vpop.f32.mrf.mxu1  ;;  %3585 = vmatmul.f32.vlgmr.msrb.gmra.mxu3 %v6561_v12  ;;  %3639 = vmatpush.msra.mxu0 %v396_v46  ;;  %v744_v46 = vld [vmem:[#allocation5 + $0xef0] sm:$0xff] }
 0x4e8   : > { %v3197_v36 = vadd.f32 %v3196_v4, %v3131_v43  ;;  %v588_v43 = vld [vmem:[#allocation5 + $0xa10] sm:$0xff] }
 0x4e9   : > { %v3261_v6 = vpop.f32.mrf.mxu2  ;;  %3390 = vmatmul.f32.vlgmr.msrb.gmra.mxu0 %v6565_v55  ;;  %v972_v55 = vld [vmem:[#allocation5 + $0x1610] sm:$0xff]  ;;  %3704 = vmatpush.msra.mxu1 %v588_v43 }
 0x4ea   : > { %3455 = vmatmul.f32.vlgmr.msrb.gmra.mxu1 %v6569_v16  ;;  %v3326_v53 = vpop.f32.mrf.mxu3  ;;  %v3262_v37 = vadd.f32 %v3261_v6, %v3197_v36  ;;  %3834 = vmatpush.msra.mxu3 %v972_v55 }
 0x4eb   : > { %3640 = vmatpush.msra.mxu0 %v384_v25  ;;  %v348_v25 = vld [vmem:[#allocation5 + $0x290] sm:$0xff] }
 0x4ec   : > { %v3327_v30 = vadd.f32 %v3326_v53, %v3262_v37 }
 0x4ee   : > { %4162 = vst [vmem:[%s5422_s19 + $0x40] sm:$0xff] %v3327_v30  ;;  %3523 = vmatmul.f32.gmra.mxu2 %v6574_v32  ;;  %v3134_v12 = vpop.f32.mrf.mxu0  ;;  %v576_v30 = vld [vmem:[#allocation5 + $0x9b0] sm:$0xff] }
 0x4ef   : > { %v3199_v62 = vpop.f32.mrf.mxu1  ;;  %3588 = vmatmul.f32.gmra.mxu3 %v6578_v11  ;;  %3705 = vmatpush.msra.mxu1 %v576_v30  ;;  %v540_v30 = vld [vmem:[#allocation5 + $0x890] sm:$0xff] }
 0x4f0   : > { %v3200_v8 = vadd.f32 %v3199_v62, %v3134_v12  ;;  %v756_v62 = vld [vmem:[#allocation5 + $0xf50] sm:$0xff] }
 0x4f1   : > { %v3264_v16 = vpop.f32.mrf.mxu2  ;;  %3393 = vmatmul.f32.gmra.mxu0 %v6582_v42  ;;  %v960_v42 = vld [vmem:[#allocation5 + $0x15b0] sm:$0xff]  ;;  %3771 = vmatpush.msra.mxu2 %v756_v62 }
 0x4f2   : > { %3458 = vmatmul.f32.gmra.mxu1 %v6586_v19  ;;  %v3329_v36 = vpop.f32.mrf.mxu3  ;;  %v3265_v6 = vadd.f32 %v3264_v16, %v3200_v8  ;;  %3835 = vmatpush.msra.mxu3 %v960_v42  ;;  %v372_v16 = vld [vmem:[#allocation5 + $0x350] sm:$0xff] }
 0x4f3   : > { %3641 = vmatpush.msra.mxu0 %v372_v16  ;;  %3772 = vmatpush.msra.mxu2 %v744_v46  ;;  %v732_v42 = vld [vmem:[#allocation5 + $0xe90] sm:$0xff] }
 0x4f4   : > { %v3330_v32 = vadd.f32 %v3329_v36, %v3265_v6  ;;  %v564_v36 = vld [vmem:[#allocation5 + $0x950] sm:$0xff] }
 0x4f5   : > { %3706 = vmatpush.msra.mxu1 %v564_v36  ;;  %3773 = vmatpush.msra.mxu2 %v732_v42 }
 0x4f6   : > { %4174 = vst [vmem:[%s5422_s19 + $0xa0] sm:$0xff] %v3330_v32  ;;  %3526 = vmatmul.f32.gmra.mxu2 %v6591_v60  ;;  %v3137_v11 = vpop.f32.mrf.mxu0 }
 0x4f7   : > { %v3202_v4 = vpop.f32.mrf.mxu1  ;;  %3591 = vmatmul.f32.gmra.mxu3 %v6595_v24  ;;  %3707 = vmatpush.msra.mxu1 %v552_v20 }
 0x4f8   : > { %v3203_v53 = vadd.f32 %v3202_v4, %v3137_v11  ;;  %v360_v4 = vld [vmem:[#allocation5 + $0x2f0] sm:$0xff] }
 0x4f9   : > { %v3267_v19 = vpop.f32.mrf.mxu2  ;;  %3396 = vmatmul.f32.gmra.mxu0 %v6599_v63  ;;  %v948_v63 = vld [vmem:[#allocation5 + $0x1550] sm:$0xff]  ;;  %3708 = vmatpush.msra.mxu1 %v540_v30 }
 0x4fa   : > { %3461 = vmatmul.f32.gmra.mxu1 %v6603_v9  ;;  %v3332_v37 = vpop.f32.mrf.mxu3  ;;  %v3268_v14 = vadd.f32 %v3267_v19, %v3203_v53  ;;  %3836 = vmatpush.msra.mxu3 %v948_v63  ;;  %v336_v63 = vld [vmem:[#allocation5 + $0x230] sm:$0xff] }
 0x4fb   : > { %3642 = vmatpush.msra.mxu0 %v360_v4  ;;  %v504_v4 = vld [vmem:[#allocation5 + $0x770] sm:$0xff] }
 0x4fc   : > { %v3333_v60 = vadd.f32 %v3332_v37, %v3268_v14 }
 0x4fd   : > { %3643 = vmatpush.msra.mxu0 %v348_v25 }
 0x4fe   : > { %4186 = vst [vmem:[%s5422_s19 + $0x100] sm:$0xff] %v3333_v60  ;;  %3529 = vmatmul.f32.gmra.mxu2 %v6608_v27  ;;  %v3140_v24 = vpop.f32.mrf.mxu0 }
 0x4ff   : > { %v3205_v12 = vpop.f32.mrf.mxu1  ;;  %3594 = vmatmul.f32.gmra.mxu3 %v6612_v22  ;;  %3644 = vmatpush.msra.mxu0 %v336_v63 }
 0x500   : > { %v3206_v18 = vadd.f32 %v3205_v12, %v3140_v24  ;;  %v720_v24 = vld [vmem:[#allocation5 + $0xe30] sm:$0xff] }
 0x501   : > { %v3270_v9 = vpop.f32.mrf.mxu2  ;;  %3399 = vmatmul.f32.gmra.mxu0 %v6616_v5  ;;  %v936_v5 = vld [vmem:[#allocation5 + $0x14f0] sm:$0xff]  ;;  %3774 = vmatpush.msra.mxu2 %v720_v24 }
 0x502   : > { %3464 = vmatmul.f32.gmra.mxu1 %v6620_v44  ;;  %v3335_v8 = vpop.f32.mrf.mxu3  ;;  %v3271_v55 = vadd.f32 %v3270_v9, %v3206_v18  ;;  %3837 = vmatpush.msra.mxu3 %v936_v5  ;;  %v528_v9 = vld [vmem:[#allocation5 + $0x830] sm:$0xff] }
 0x503   : > { %3709 = vmatpush.msra.mxu1 %v528_v9  ;;  %v660_v24 = vld [vmem:[#allocation5 + $0xc50] sm:$0xff]  ;;  %v841_v9 = vld [vmem:[#allocation5 + $0x11f8] sm:$0xff] }
 0x504   : > { %v3336_v27 = vadd.f32 %v3335_v8, %v3271_v55  ;;  %v708_v55 = vld [vmem:[#allocation5 + $0xdd0] sm:$0xff] }
 0x505   : > { %3775 = vmatpush.msra.mxu2 %v708_v55 }
 0x506   : > { %4198 = vst [vmem:[%s5422_s19 + $0x160] sm:$0xff] %v3336_v27  ;;  %3532 = vmatmul.f32.gmra.mxu2 %v6625_v47  ;;  %v3143_v22 = vpop.f32.mrf.mxu0 }
 0x507   : > { %v3208_v6 = vpop.f32.mrf.mxu1  ;;  %3597 = vmatmul.f32.gmra.mxu3 %v6629_v35 }
 0x508   : > { %v3209_v43 = vadd.f32 %v3208_v6, %v3143_v22  ;;  %v324_v22 = vld [vmem:[#allocation5 + $0x1d0] sm:$0xff] }
 0x509   : > { %v3273_v44 = vpop.f32.mrf.mxu2  ;;  %3402 = vmatmul.f32.gmra.mxu0 %v6633_v3  ;;  %v924_v3 = vld [vmem:[#allocation5 + $0x1490] sm:$0xff] }
 0x50a   : > { %3467 = vmatmul.f32.gmra.mxu1 %v6637_v33  ;;  %v3338_v32 = vpop.f32.mrf.mxu3  ;;  %v3274_v11 = vadd.f32 %v3273_v44, %v3209_v43  ;;  %3838 = vmatpush.msra.mxu3 %v924_v3  ;;  %v516_v6 = vld [vmem:[#allocation5 + $0x7d0] sm:$0xff] }
 0x50b   : > { %3645 = vmatpush.msra.mxu0 %v324_v22  ;;  %3710 = vmatpush.msra.mxu1 %v516_v6  ;;  %v696_v43 = vld [vmem:[#allocation5 + $0xd70] sm:$0xff]  ;;  %v829_v22 = vld [vmem:[#allocation5 + $0x1198] sm:$0xff] }
 0x50c   : > { %v3339_v47 = vadd.f32 %v3338_v32, %v3274_v11  ;;  %3776 = vmatpush.msra.mxu2 %v696_v43  ;;  %v312_v11 = vld [vmem:[#allocation5 + $0x170] sm:$0xff] }
 0x50d   : > { %3646 = vmatpush.msra.mxu0 %v312_v11  ;;  %3711 = vmatpush.msra.mxu1 %v504_v4  ;;  %v492_v3 = vld [vmem:[#allocation5 + $0x710] sm:$0xff] }
 0x50e   : > { %4210 = vst [vmem:[%s5422_s19 + $0x1c0] sm:$0xff] %v3339_v47  ;;  %3535 = vmatmul.f32.gmra.mxu2 %v6642_v29  ;;  %v3146_v35 = vpop.f32.mrf.mxu0  ;;  %v684_v47 = vld [vmem:[#allocation5 + $0xd10] sm:$0xff] }
 0x50f   : > { %v3211_v53 = vpop.f32.mrf.mxu1  ;;  %3600 = vmatmul.f32.gmra.mxu3 %v6646_v38  ;;  %3777 = vmatpush.msra.mxu2 %v684_v47  ;;  %v1009_v47 = vld [vmem:[#allocation5 + $0x1738] sm:$0xff] }
 0x510   : > { %v3212_v19 = vadd.f32 %v3211_v53, %v3146_v35  ;;  %3712 = vmatpush.msra.mxu1 %v492_v3  ;;  %v625_v3 = vld [vmem:[#allocation5 + $0xb38] sm:$0xff] }
 0x511   : > { %v3276_v33 = vpop.f32.mrf.mxu2  ;;  %3405 = vmatmul.f32.gmra.mxu0 %v6650_v31  ;;  %v912_v31 = vld [vmem:[#allocation5 + $0x1430] sm:$0xff] }
 0x512   : > { %3470 = vmatmul.f32.gmra.mxu1 %v6654_v34  ;;  %v3341_v37 = vpop.f32.mrf.mxu3  ;;  %v3277_v14 = vadd.f32 %v3276_v33, %v3212_v19  ;;  %3839 = vmatpush.msra.mxu3 %v912_v31  ;;  %v300_v19 = vld [vmem:[#allocation5 + $0x110] sm:$0xff] }
 0x513   : > { %3647 = vmatpush.msra.mxu0 %v300_v19  ;;  %v433_v19 = vld [vmem:[#allocation5 + $0x538] sm:$0xff] }
 0x514   : > { %v3342_v29 = vadd.f32 %v3341_v37, %v3277_v14  ;;  %v672_v37 = vld [vmem:[#allocation5 + $0xcb0] sm:$0xff] }
 0x515   : > { %3778 = vmatpush.msra.mxu2 %v672_v37 }
 0x516   : > { %4222 = vst [vmem:[%s5422_s19 + $0x220] sm:$0xff] %v3342_v29  ;;  %3538 = vmatmul.f32.gmra.mxu2 %v6659_v28  ;;  %v3149_v38 = vpop.f32.mrf.mxu0  ;;  %v288_v29 = vld [vmem:[#allocation5 + $0xb0] sm:$0xff] }
 0x517   : > { %v3214_v60 = vpop.f32.mrf.mxu1  ;;  %3603 = vmatmul.f32.gmra.mxu3 %v6663_v13  ;;  %3648 = vmatpush.msra.mxu0 %v288_v29  ;;  %v7521_v29 = vld [vmem:[#allocation22_spill] sm:$0xff] }
 0x518   : > { %v3215_v12 = vadd.f32 %v3214_v60, %v3149_v38  ;;  %v480_v38 = vld [vmem:[#allocation5 + $0x6b0] sm:$0xff]  ;;  %3779 = vmatpush.msra.mxu2 %v660_v24  ;;  %v613_v24 = vld [vmem:[#allocation5 + $0xad8] sm:$0xff] }
 0x519   : > { %v3279_v34 = vpop.f32.mrf.mxu2  ;;  %3408 = vmatmul.f32.gmra.mxu0 %v6667_v1  ;;  %v900_v1 = vld [vmem:[#allocation5 + $0x13d0] sm:$0xff]  ;;  %3713 = vmatpush.msra.mxu1 %v480_v38  ;;  %v7522_v38 = vld [vmem:[#allocation23_spill] sm:$0xff] }
 0x51a   : > { %3473 = vmatmul.f32.gmra.mxu1 %v6671_v58  ;;  %v3344_v62 = vpop.f32.mrf.mxu3  ;;  %v3280_v18 = vadd.f32 %v3279_v34, %v3215_v12  ;;  %3840 = vmatpush.msra.mxu3 %v900_v1  ;;  %v649_v1 = vld [vmem:[#allocation5 + $0xbf8] sm:$0xff] }
 0x51b   : > { %4024 = vmatpush.msrb.mxu2 %v841_v9  ;;  %v6921_v9 = vld [vmem:[%s5151_s15 + $0x8] sm:$0xff] }
 0x51c   : > { %v3345_v28 = vadd.f32 %v3344_v62, %v3280_v18  ;;  %v276_v62 = vld [vmem:[#allocation5 + $0x50] sm:$0xff] }
 0x51d   : > { %v468_v18 = vld [vmem:[#allocation5 + $0x650] sm:$0xff]  ;;  %3649 = vmatpush.msra.mxu0 %v276_v62  ;;  %4025 = vmatpush.msrb.mxu2 %v829_v22  ;;  %v793_v62 = vld [vmem:[#allocation5 + $0x1078] sm:$0xff]  ;;  %v6934_v22 = vld [vmem:[%s5151_s15 + $0x20] sm:$0xff] }
 0x51e   : > { %4234 = vst [vmem:[%s5422_s19 + $0x280] sm:$0xff] %v3345_v28  ;;  %3541 = vmatmul.f32.gmra.mxu2 %v6676_v49  ;;  %v3152_v13 = vpop.f32.mrf.mxu0  ;;  %3714 = vmatpush.msra.mxu1 %v468_v18 }
 0x51f   : > { %v3217_v8 = vpop.f32.mrf.mxu1  ;;  %3606 = vmatmul.f32.gmra.mxu3 %v6680_v52 }
 0x520   : > { %v3218_v16 = vadd.f32 %v3217_v8, %v3152_v13  ;;  %v7510_v13 = vld [vmem:[#allocation11_spill] sm:$0xff]  ;;  %3959 = vmatpush.msrb.mxu1 %v649_v1 }
 0x521   : > { %v3282_v58 = vpop.f32.mrf.mxu2  ;;  %3411 = vmatmul.f32.gmra.mxu0 %v6684_v50  ;;  %v888_v50 = vld [vmem:[#allocation5 + $0x1370] sm:$0xff] }
 0x522   : > { %3476 = vmatmul.f32.gmra.mxu1 %v6688_v57  ;;  %v3347_v36 = vpop.f32.mrf.mxu3  ;;  %v3283_v27 = vadd.f32 %v3282_v58, %v3218_v16  ;;  %3841 = vmatpush.msra.mxu3 %v888_v50  ;;  %v457_v16 = vld [vmem:[#allocation5 + $0x5f8] sm:$0xff] }
 0x523   : > { %3894 = vmatpush.msrb.mxu0 %v457_v16  ;;  %v445_v50 = vld [vmem:[#allocation5 + $0x598] sm:$0xff] }
 0x524   : > { %v3348_v49 = vadd.f32 %v3347_v36, %v3283_v27  ;;  %v7512_v27 = vld [vmem:[#allocation13_spill] sm:$0xff] }
 0x525   : > { %3895 = vmatpush.msrb.mxu0 %v445_v50 }
 0x526   : > { %4246 = vst [vmem:[%s5422_s19 + $0x2e0] sm:$0xff] %v3348_v49  ;;  %3544 = vmatmul.f32.gmra.mxu2 %v6693_v0  ;;  %v3155_v52 = vpop.f32.mrf.mxu0 }
 0x527   : > { %v3220_v46 = vpop.f32.mrf.mxu1  ;;  %3609 = vmatmul.f32.gmra.mxu3 %v6697_v17  ;;  %3896 = vmatpush.msrb.mxu0 %v433_v19 }
 0x528   : > { %v3221_v5 = vadd.f32 %v3220_v46, %v3155_v52  ;;  %v7513_v52 = vld [vmem:[#allocation14_spill] sm:$0xff]  ;;  %v7514_v46 = vld [vmem:[#allocation15_spill] sm:$0xff] }
 0x529   : > { %v3285_v57 = vpop.f32.mrf.mxu2  ;;  %3414 = vmatmul.f32.gmra.mxu0 %v6701_v48  ;;  %v876_v48 = vld [vmem:[#allocation5 + $0x1310] sm:$0xff] }
 0x52a   : > { %3479 = vmatmul.f32.gmra.mxu1 %v6705_v61  ;;  %v3350_v44 = vpop.f32.mrf.mxu3  ;;  %v3286_v32 = vadd.f32 %v3285_v57, %v3221_v5  ;;  %3842 = vmatpush.msra.mxu3 %v876_v48  ;;  %v637_v57 = vld [vmem:[#allocation5 + $0xb98] sm:$0xff] }
 0x52b   : > { %3960 = vmatpush.msrb.mxu1 %v637_v57  ;;  %v7517_v48 = vld [vmem:[#allocation18_spill] sm:$0xff] }
 0x52c   : > { %v3351_v0 = vadd.f32 %v3350_v44, %v3286_v32  ;;  %v7515_v32 = vld [vmem:[#allocation16_spill] sm:$0xff] }
 0x52d   : > { %3961 = vmatpush.msrb.mxu1 %v625_v3 }
 0x52e   : > { %4258 = vst [vmem:[%s5422_s19 + $0x340] sm:$0xff] %v3351_v0  ;;  %3547 = vmatmul.f32.gmra.mxu2 %v6710_v45  ;;  %v3158_v17 = vpop.f32.mrf.mxu0  ;;  %v7516_v0 = vld [vmem:[#allocation17_spill] sm:$0xff] }
 0x52f   : > { %v3223_v20 = vpop.f32.mrf.mxu1  ;;  %3612 = vmatmul.f32.gmra.mxu3 %v6714_v21  ;;  %3962 = vmatpush.msrb.mxu1 %v613_v24 }
 0x530   : > { %v3224_v35 = vadd.f32 %v3223_v20, %v3158_v17  ;;  %v817_v17 = vld [vmem:[#allocation5 + $0x1138] sm:$0xff] }
 0x531   : > { %v3288_v61 = vpop.f32.mrf.mxu2  ;;  %3417 = vmatmul.f32.gmra.mxu0 %v6718_v59  ;;  %v864_v59 = vld [vmem:[#allocation5 + $0x12b0] sm:$0xff]  ;;  %4026 = vmatpush.msrb.mxu2 %v817_v17  ;;  %v6951_v17 = vld [vmem:[%s5151_s15 + $0x40] sm:$0xff] }
 0x532   : > { %3482 = vmatmul.f32.gmra.mxu1 %v6722_v15  ;;  %v3353_v53 = vpop.f32.mrf.mxu3  ;;  %v3289_v42 = vadd.f32 %v3288_v61, %v3224_v35  ;;  %3843 = vmatpush.msra.mxu3 %v864_v59  ;;  %v7518_v61 = vld [vmem:[#allocation19_spill] sm:$0xff]  ;;  %v805_v59 = vld [vmem:[#allocation5 + $0x10d8] sm:$0xff] }
 0x533   : > { %4027 = vmatpush.msrb.mxu2 %v805_v59  ;;  %v6968_v59 = vld [vmem:[%s5151_s15 + $0x60] sm:$0xff] }
 0x534   : > { %v3354_v45 = vadd.f32 %v3353_v53, %v3289_v42 }
 0x535   : > { %4028 = vmatpush.msrb.mxu2 %v793_v62  ;;  %v937_v62 = vld [vmem:[#allocation5 + $0x14f8] sm:$0xff] }
 0x536   : > { %4270 = vst [vmem:[%s5422_s19 + $0x3a0] sm:$0xff] %v3354_v45  ;;  %3550 = vmatmul.f32.gmra.mxu2 %v6727_v41  ;;  %v3161_v21 = vpop.f32.mrf.mxu0 }
 0x537   : > { %v3226_v33 = vpop.f32.mrf.mxu1  ;;  %3615 = vmatmul.f32.gmra.mxu3 %v6731_v51 }
 0x538   : > { %v3227_v14 = vadd.f32 %v3226_v33, %v3161_v21  ;;  %v7519_v21 = vld [vmem:[#allocation20_spill] sm:$0xff] }
 0x539   : > { %v3291_v15 = vpop.f32.mrf.mxu2  ;;  %3420 = vmatmul.f32.gmra.mxu0 %v6735_v23  ;;  %v852_v23 = vld [vmem:[#allocation5 + $0x1250] sm:$0xff] }
 0x53a   : > { %3485 = vmatmul.f32.gmra.mxu1 %v6739_v26  ;;  %v3356_v25 = vpop.f32.mrf.mxu3  ;;  %v3292_v30 = vadd.f32 %v3291_v15, %v3227_v14  ;;  %3844 = vmatpush.msra.mxu3 %v852_v23  ;;  %v7520_v14 = vld [vmem:[#allocation21_spill] sm:$0xff] }
 0x53b   : > { %v6909_v23 = vld [vmem:[%s5151_s15 + $0x10] sm:$0xff] }
 0x53c   : > { %v3357_v41 = vadd.f32 %v3356_v25, %v3292_v30  ;;  %v997_v25 = vld [vmem:[#allocation5 + $0x16d8] sm:$0xff] }
 0x53e   : > { %4282 = vst [vmem:[%s5422_s19 + $0x400] sm:$0xff] %v3357_v41  ;;  %3553 = vmatmul.f32.gmra.mxu2 %v6744_v40  ;;  %v3164_v51 = vpop.f32.mrf.mxu0 }
 0x53f   : > { %v3229_v60 = vpop.f32.mrf.mxu1  ;;  %3618 = vmatmul.f32.gmra.mxu3 %v6748_v39 }
 0x540   : > { %v3230_v12 = vadd.f32 %v3229_v60, %v3164_v51  ;;  %v421_v60 = vld [vmem:[#allocation5 + $0x4d8] sm:$0xff] }
 0x541   : > { %v3294_v26 = vpop.f32.mrf.mxu2  ;;  %3423 = vmatmul.f32.gmra.mxu0 %v6752_v54  ;;  %v1033_v54 = vld [vmem:[#allocation5 + $0x17f8] sm:$0xff] }
 0x542   : > { %3488 = vmatmul.f32.gmra.mxu1 %v6756_v56  ;;  %v3359_v31 = vpop.f32.mrf.mxu3  ;;  %v3295_v34 = vadd.f32 %v3294_v26, %v3230_v12  ;;  %4089 = vmatpush.msrb.mxu3 %v1033_v54 }
 0x543   : > { %3897 = vmatpush.msrb.mxu0 %v421_v60 }
 0x544   : > { %v3360_v40 = vadd.f32 %v3359_v31, %v3295_v34  ;;  %v6913_v34 = vld [vmem:[%s5151_s15 + $0x18] sm:$0xff] }
 0x546   : > { %4294 = vst [vmem:[%s5422_s19 + $0x460] sm:$0xff] %v3360_v40  ;;  %3556 = vmatmul.f32.gmra.mxu2 %v6761_v2  ;;  %v3167_v39 = vpop.f32.mrf.mxu0  ;;  %v985_v40 = vld [vmem:[#allocation5 + $0x1678] sm:$0xff] }
 0x547   : > { %v3232_v63 = vpop.f32.mrf.mxu1  ;;  %3621 = vmatmul.f32.gmra.mxu3 %v6765_v10  ;;  %v7511_v10 = vld [vmem:[#allocation12_spill] sm:$0xff] }
 0x548   : > { %v3233_v28 = vadd.f32 %v3232_v63, %v3167_v39  ;;  %v6917_v63 = vld [vmem:[%s5151_s15] sm:$0xff] }
 0x549   : > { %v3297_v56 = vpop.f32.mrf.mxu2  ;;  %3426 = vmatmul.f32.gmra.mxu0 %v6769_v7  ;;  %v1021_v7 = vld [vmem:[#allocation5 + $0x1798] sm:$0xff] }
 0x54a   : > { %3491 = vmatmul.f32.gmra.mxu1 %v7510_v13  ;;  %v3362_v8 = vpop.f32.mrf.mxu3  ;;  %v3298_v55 = vadd.f32 %v3297_v56, %v3233_v28  ;;  %4090 = vmatpush.msrb.mxu3 %v1021_v7  ;;  %v409_v56 = vld [vmem:[#allocation5 + $0x478] sm:$0xff] }
 0x54b   : > { %v601_v13 = vld [vmem:[#allocation5 + $0xa78] sm:$0xff]  ;;  %3898 = vmatpush.msrb.mxu0 %v409_v56 }
 0x54c   : > { %v3363_v2 = vadd.f32 %v3362_v8, %v3298_v55  ;;  %4091 = vmatpush.msrb.mxu3 %v1009_v47  ;;  %3963 = vmatpush.msrb.mxu1 %v601_v13  ;;  %v6926_v55 = vld [vmem:[%s5151_s15 + $0x30] sm:$0xff]  ;;  %v361_v56 = vld [vmem:[#allocation5 + $0x2f8] sm:$0xff] }
 0x54d   : > { %v553_v13 = vld [vmem:[#allocation5 + $0x8f8] sm:$0xff] }
 0x54e   : > { %4306 = vst [vmem:[%s5422_s19 + $0x4c0] sm:$0xff] %v3363_v2  ;;  %3559 = vmatmul.f32.gmra.mxu2 %v7511_v10  ;;  %v3170_v58 = vpop.f32.mrf.mxu0  ;;  %4092 = vmatpush.msrb.mxu3 %v997_v25  ;;  %v6930_v2 = vld [vmem:[%s5151_s15 + $0x38] sm:$0xff] }
 0x54f   : > { %v3235_v36 = vpop.f32.mrf.mxu1  ;;  %3624 = vmatmul.f32.gmra.mxu3 %v7512_v27  ;;  %v781_v10 = vld [vmem:[#allocation5 + $0x1018] sm:$0xff] }
 0x550   : > { %v3236_v6 = vadd.f32 %v3235_v36, %v3170_v58  ;;  %4093 = vmatpush.msrb.mxu3 %v985_v40  ;;  %4029 = vmatpush.msrb.mxu2 %v781_v10  ;;  %v973_v36 = vld [vmem:[#allocation5 + $0x1618] sm:$0xff]  ;;  %v6985_v40 = vld [vmem:[%s5151_s15 + $0x80] sm:$0xff] }
 0x551   : > { %v3300_v49 = vpop.f32.mrf.mxu2  ;;  %3429 = vmatmul.f32.gmra.mxu0 %v7513_v52  ;;  %v397_v52 = vld [vmem:[#allocation5 + $0x418] sm:$0xff] }
 0x552   : > { %3494 = vmatmul.f32.gmra.mxu1 %v7514_v46  ;;  %v3365_v43 = vpop.f32.mrf.mxu3  ;;  %v3301_v5 = vadd.f32 %v3300_v49, %v3236_v6  ;;  %4094 = vmatpush.msrb.mxu3 %v973_v36  ;;  %v6938_v6 = vld [vmem:[%s5151_s15 + $0x28] sm:$0xff]  ;;  %v589_v46 = vld [vmem:[#allocation5 + $0xa18] sm:$0xff] }
 0x553   : > { %3899 = vmatpush.msrb.mxu0 %v397_v52  ;;  %3964 = vmatpush.msrb.mxu1 %v589_v46  ;;  %v733_v36 = vld [vmem:[#allocation5 + $0xe98] sm:$0xff]  ;;  %v7002_v52 = vld [vmem:[%s5151_s15 + $0xa0] sm:$0xff]  ;;  %v7006_v46 = vld [vmem:[%s5151_s15 + $0xa8] sm:$0xff] }
 0x554   : > { %v3366_v44 = vadd.f32 %v3365_v43, %v3301_v5  ;;  %v6943_v5 = vld [vmem:[%s5151_s15 + $0x50] sm:$0xff] }
 0x556   : > { %4318 = vst [vmem:[%s5422_s19 + $0x520] sm:$0xff] %v3366_v44  ;;  %3562 = vmatmul.f32.gmra.mxu2 %v7515_v32  ;;  %v3173_v11 = vpop.f32.mrf.mxu0  ;;  %v6947_v44 = vld [vmem:[%s5151_s15 + $0x58] sm:$0xff] }
 0x557   : > { %v3238_v4 = vpop.f32.mrf.mxu1  ;;  %3627 = vmatmul.f32.gmra.mxu3 %v7516_v0  ;;  %v769_v32 = vld [vmem:[#allocation5 + $0xfb8] sm:$0xff] }
 0x558   : > { %v3239_v20 = vadd.f32 %v3238_v4, %v3173_v11  ;;  %4030 = vmatpush.msrb.mxu2 %v769_v32  ;;  %v961_v4 = vld [vmem:[#allocation5 + $0x15b8] sm:$0xff] }
 0x559   : > { %v3303_v35 = vpop.f32.mrf.mxu2  ;;  %3432 = vmatmul.f32.gmra.mxu0 %v7517_v48  ;;  %4095 = vmatpush.msrb.mxu3 %v961_v4  ;;  %v385_v48 = vld [vmem:[#allocation5 + $0x3b8] sm:$0xff]  ;;  %v7011_v4 = vld [vmem:[%s5151_s15 + $0xd0] sm:$0xff] }
 0x55a   : > { %3497 = vmatmul.f32.gmra.mxu1 %v7518_v61  ;;  %v3368_v53 = vpop.f32.mrf.mxu3  ;;  %v3304_v42 = vadd.f32 %v3303_v35, %v3239_v20  ;;  %v6955_v20 = vld [vmem:[%s5151_s15 + $0x48] sm:$0xff]  ;;  %v577_v61 = vld [vmem:[#allocation5 + $0x9b8] sm:$0xff]  ;;  %3900 = vmatpush.msrb.mxu0 %v385_v48 }
 0x55b   : > { %3965 = vmatpush.msrb.mxu1 %v577_v61  ;;  %v541_v32 = vld [vmem:[#allocation5 + $0x898] sm:$0xff] }
 0x55c   : > { %v3369_v45 = vadd.f32 %v3368_v53, %v3304_v42  ;;  %v6960_v42 = vld [vmem:[%s5151_s15 + $0x70] sm:$0xff]  ;;  %v721_v48 = vld [vmem:[#allocation5 + $0xe38] sm:$0xff] }
 0x55e   : > { %4330 = vst [vmem:[%s5422_s19 + $0x580] sm:$0xff] %v3369_v45  ;;  %3565 = vmatmul.f32.gmra.mxu2 %v7519_v21  ;;  %v3176_v33 = vpop.f32.mrf.mxu0  ;;  %v6964_v45 = vld [vmem:[%s5151_s15 + $0x78] sm:$0xff] }
 0x55f   : > { %v3241_v37 = vpop.f32.mrf.mxu1  ;;  %3630 = vmatmul.f32.gmra.mxu3 %v7520_v14  ;;  %v757_v21 = vld [vmem:[#allocation5 + $0xf58] sm:$0xff] }
 0x560   : > { %v3242_v15 = vadd.f32 %v3241_v37, %v3176_v33  ;;  %4031 = vmatpush.msrb.mxu2 %v757_v21  ;;  %v949_v37 = vld [vmem:[#allocation5 + $0x1558] sm:$0xff]  ;;  %v7023_v21 = vld [vmem:[%s5151_s15 + $0xc8] sm:$0xff] }
 0x561   : > { %v3306_v30 = vpop.f32.mrf.mxu2  ;;  %3435 = vmatmul.f32.gmra.mxu0 %v7521_v29  ;;  %4096 = vmatpush.msrb.mxu3 %v949_v37  ;;  %v373_v29 = vld [vmem:[#allocation5 + $0x358] sm:$0xff] }
 0x562   : > { %3500 = vmatmul.f32.gmra.mxu1 %v7522_v38  ;;  %v3371_v41 = vpop.f32.mrf.mxu3  ;;  %v3307_v51 = vadd.f32 %v3306_v30, %v3242_v15  ;;  %v6972_v15 = vld [vmem:[%s5151_s15 + $0x68] sm:$0xff]  ;;  %v565_v38 = vld [vmem:[#allocation5 + $0x958] sm:$0xff]  ;;  %3901 = vmatpush.msrb.mxu0 %v373_v29  ;;  %v7028_v29 = vld [vmem:[%s5151_s15 + $0xf0] sm:$0xff] }
 0x563   : > { %3966 = vmatpush.msrb.mxu1 %v565_v38  ;;  %4097 = vmatpush.msrb.mxu3 %v937_v62 }
 0x564   : > { %v3372_v12 = vadd.f32 %v3371_v41, %v3307_v51  ;;  %v6977_v51 = vld [vmem:[%s5151_s15 + $0x90] sm:$0xff]  ;;  %3902 = vmatpush.msrb.mxu0 %v361_v56 }
 0x565   : > { %3967 = vmatpush.msrb.mxu1 %v553_v13  ;;  %v325_v13 = vld [vmem:[#allocation5 + $0x1d8] sm:$0xff] }
 0x566   : > { %4342 = vst [vmem:[%s5422_s19 + $0x5e0] sm:$0xff] %v3372_v12  ;;  %3780 = vmatmul.f32.vlgmr.msra.gmra.mxu2 %v6909_v23  ;;  %v3391_v26 = vpop.f32.mrf.mxu0  ;;  %v6981_v12 = vld [vmem:[%s5151_s15 + $0x98] sm:$0xff] }
 0x567   : > { %v3456_v31 = vpop.f32.mrf.mxu1  ;;  %3845 = vmatmul.f32.vlgmr.msra.gmra.mxu3 %v6913_v34  ;;  %3968 = vmatpush.msrb.mxu1 %v541_v32  ;;  %v7053_v32 = vld [vmem:[%s5151_s15 + $0x100] sm:$0xff] }
 0x568   : > { %v3457_v18 = vadd.f32 %v3456_v31, %v3391_v26  ;;  %v745_v26 = vld [vmem:[#allocation5 + $0xef8] sm:$0xff] }
 0x569   : > { %v3521_v39 = vpop.f32.mrf.mxu2  ;;  %3650 = vmatmul.f32.vlgmr.msra.gmra.mxu0 %v6917_v63  ;;  %4032 = vmatpush.msrb.mxu2 %v745_v26 }
 0x56a   : > { %3715 = vmatmul.f32.vlgmr.msra.gmra.mxu1 %v6921_v9  ;;  %v3586_v28 = vpop.f32.mrf.mxu3  ;;  %v3522_v54 = vadd.f32 %v3521_v39, %v3457_v18  ;;  %v6989_v39 = vld [vmem:[%s5151_s15 + $0x88] sm:$0xff] }
 0x56b   : > { %4033 = vmatpush.msrb.mxu2 %v733_v36 }
 0x56c   : > { %v3587_v8 = vadd.f32 %v3586_v28, %v3522_v54 }
 0x56d   : > { %4034 = vmatpush.msrb.mxu2 %v721_v48  ;;  %v313_v48 = vld [vmem:[#allocation5 + $0x178] sm:$0xff] }
 0x56e   : > { %4163 = vst [vmem:[%s5422_s19 + $0x48] sm:$0xff] %v3587_v8  ;;  %3783 = vmatmul.f32.gmra.mxu2 %v6926_v55  ;;  %v3394_v16 = vpop.f32.mrf.mxu0 }
 0x56f   : > { %v3459_v1 = vpop.f32.mrf.mxu1  ;;  %3848 = vmatmul.f32.gmra.mxu3 %v6930_v2 }
 0x570   : > { %v3460_v58 = vadd.f32 %v3459_v1, %v3394_v16  ;;  %v6994_v16 = vld [vmem:[%s5151_s15 + $0xb0] sm:$0xff] }
 0x571   : > { %v3524_v27 = vpop.f32.mrf.mxu2  ;;  %3653 = vmatmul.f32.gmra.mxu0 %v6934_v22 }
 0x572   : > { %3718 = vmatmul.f32.gmra.mxu1 %v6938_v6  ;;  %v3589_v7 = vpop.f32.mrf.mxu3  ;;  %v3525_v49 = vadd.f32 %v3524_v27, %v3460_v58  ;;  %v6998_v58 = vld [vmem:[%s5151_s15 + $0xb8] sm:$0xff] }
 0x574   : > { %v3590_v43 = vadd.f32 %v3589_v7, %v3525_v49  ;;  %v925_v7 = vld [vmem:[#allocation5 + $0x1498] sm:$0xff] }
 0x575   : > { %4098 = vmatpush.msrb.mxu3 %v925_v7  ;;  %v7049_v7 = vld [vmem:[%s5151_s15 + $0x118] sm:$0xff] }
 0x576   : > { %4175 = vst [vmem:[%s5422_s19 + $0xa8] sm:$0xff] %v3590_v43  ;;  %3786 = vmatmul.f32.gmra.mxu2 %v6943_v5  ;;  %v3397_v50 = vpop.f32.mrf.mxu0 }
 0x577   : > { %v3462_v57 = vpop.f32.mrf.mxu1  ;;  %3851 = vmatmul.f32.gmra.mxu3 %v6947_v44 }
 0x578   : > { %v3463_v11 = vadd.f32 %v3462_v57, %v3397_v50  ;;  %v349_v57 = vld [vmem:[#allocation5 + $0x298] sm:$0xff] }
 0x579   : > { %v3527_v0 = vpop.f32.mrf.mxu2  ;;  %3656 = vmatmul.f32.gmra.mxu0 %v6951_v17 }
 0x57a   : > { %3721 = vmatmul.f32.gmra.mxu1 %v6955_v20  ;;  %v3592_v47 = vpop.f32.mrf.mxu3  ;;  %v3528_v35 = vadd.f32 %v3527_v0, %v3463_v11  ;;  %3903 = vmatpush.msrb.mxu0 %v349_v57 }
 0x57c   : > { %v3593_v53 = vadd.f32 %v3592_v47, %v3528_v35  ;;  %v7015_v35 = vld [vmem:[%s5151_s15 + $0xd8] sm:$0xff] }
 0x57e   : > { %4187 = vst [vmem:[%s5422_s19 + $0x108] sm:$0xff] %v3593_v53  ;;  %3789 = vmatmul.f32.gmra.mxu2 %v6960_v42  ;;  %v3400_v19 = vpop.f32.mrf.mxu0  ;;  %v913_v53 = vld [vmem:[#allocation5 + $0x1438] sm:$0xff] }
 0x57f   : > { %v3465_v3 = vpop.f32.mrf.mxu1  ;;  %3854 = vmatmul.f32.gmra.mxu3 %v6964_v45 }
 0x580   : > { %v3466_v33 = vadd.f32 %v3465_v3, %v3400_v19  ;;  %4099 = vmatpush.msrb.mxu3 %v913_v53  ;;  %v7019_v3 = vld [vmem:[%s5151_s15 + $0xc0] sm:$0xff] }
 0x581   : > { %v3530_v14 = vpop.f32.mrf.mxu2  ;;  %3659 = vmatmul.f32.gmra.mxu0 %v6968_v59 }
 0x582   : > { %3724 = vmatmul.f32.gmra.mxu1 %v6972_v15  ;;  %v3595_v25 = vpop.f32.mrf.mxu3  ;;  %v3531_v30 = vadd.f32 %v3530_v14, %v3466_v33  ;;  %v337_v14 = vld [vmem:[#allocation5 + $0x238] sm:$0xff] }
 0x583   : > { %3904 = vmatpush.msrb.mxu0 %v337_v14  ;;  %v7066_v14 = vld [vmem:[%s5151_s15 + $0x138] sm:$0xff] }
 0x584   : > { %v3596_v41 = vadd.f32 %v3595_v25, %v3531_v30  ;;  %v529_v25 = vld [vmem:[#allocation5 + $0x838] sm:$0xff] }
 0x585   : > { %3969 = vmatpush.msrb.mxu1 %v529_v25  ;;  %3905 = vmatpush.msrb.mxu0 %v325_v13  ;;  %v685_v25 = vld [vmem:[#allocation5 + $0xd18] sm:$0xff] }
 0x586   : > { %4199 = vst [vmem:[%s5422_s19 + $0x168] sm:$0xff] %v3596_v41  ;;  %3792 = vmatmul.f32.gmra.mxu2 %v6977_v51  ;;  %v3403_v60 = vpop.f32.mrf.mxu0 }
 0x587   : > { %v3468_v24 = vpop.f32.mrf.mxu1  ;;  %3857 = vmatmul.f32.gmra.mxu3 %v6981_v12  ;;  %3906 = vmatpush.msrb.mxu0 %v313_v48 }
 0x588   : > { %v3469_v31 = vadd.f32 %v3468_v24, %v3403_v60  ;;  %v7032_v60 = vld [vmem:[%s5151_s15 + $0xf8] sm:$0xff] }
 0x589   : > { %v3533_v18 = vpop.f32.mrf.mxu2  ;;  %3662 = vmatmul.f32.gmra.mxu0 %v6985_v40  ;;  %v709_v24 = vld [vmem:[#allocation5 + $0xdd8] sm:$0xff] }
 0x58a   : > { %3727 = vmatmul.f32.gmra.mxu1 %v6989_v39  ;;  %v3598_v28 = vpop.f32.mrf.mxu3  ;;  %v3534_v54 = vadd.f32 %v3533_v18, %v3469_v31  ;;  %4035 = vmatpush.msrb.mxu2 %v709_v24  ;;  %v901_v31 = vld [vmem:[#allocation5 + $0x13d8] sm:$0xff]  ;;  %v7036_v18 = vld [vmem:[%s5151_s15 + $0xe0] sm:$0xff] }
 0x58b   : > { %4100 = vmatpush.msrb.mxu3 %v901_v31  ;;  %v7070_v24 = vld [vmem:[%s5151_s15 + $0x120] sm:$0xff] }
 0x58c   : > { %v3599_v8 = vadd.f32 %v3598_v28, %v3534_v54  ;;  %v7040_v28 = vld [vmem:[%s5151_s15 + $0xe8] sm:$0xff] }
 0x58e   : > { %4211 = vst [vmem:[%s5422_s19 + $0x1c8] sm:$0xff] %v3599_v8  ;;  %3795 = vmatmul.f32.gmra.mxu2 %v6994_v16  ;;  %v3406_v1 = vpop.f32.mrf.mxu0  ;;  %v517_v8 = vld [vmem:[#allocation5 + $0x7d8] sm:$0xff] }
 0x58f   : > { %v3471_v10 = vpop.f32.mrf.mxu1  ;;  %3860 = vmatmul.f32.gmra.mxu3 %v6998_v58  ;;  %3970 = vmatpush.msrb.mxu1 %v517_v8  ;;  %v7079_v8 = vld [vmem:[%s5151_s15 + $0x150] sm:$0xff] }
 0x590   : > { %v3472_v27 = vadd.f32 %v3471_v10, %v3406_v1  ;;  %v7045_v10 = vld [vmem:[%s5151_s15 + $0x110] sm:$0xff] }
 0x591   : > { %v3536_v49 = vpop.f32.mrf.mxu2  ;;  %3665 = vmatmul.f32.gmra.mxu0 %v7002_v52 }
 0x592   : > { %3730 = vmatmul.f32.gmra.mxu1 %v7006_v46  ;;  %v3601_v43 = vpop.f32.mrf.mxu3  ;;  %v3537_v50 = vadd.f32 %v3536_v49, %v3472_v27  ;;  %v697_v49 = vld [vmem:[#allocation5 + $0xd78] sm:$0xff] }
 0x593   : > { %4036 = vmatpush.msrb.mxu2 %v697_v49  ;;  %v673_v49 = vld [vmem:[#allocation5 + $0xcb8] sm:$0xff] }
 0x594   : > { %v3602_v11 = vadd.f32 %v3601_v43, %v3537_v50  ;;  %v889_v50 = vld [vmem:[#allocation5 + $0x1378] sm:$0xff] }
 0x595   : > { %4101 = vmatpush.msrb.mxu3 %v889_v50  ;;  %4037 = vmatpush.msrb.mxu2 %v685_v25  ;;  %v865_v50 = vld [vmem:[#allocation5 + $0x12b8] sm:$0xff]  ;;  %v7096_v25 = vld [vmem:[%s5151_s15 + $0x170] sm:$0xff] }
 0x596   : > { %4223 = vst [vmem:[%s5422_s19 + $0x228] sm:$0xff] %v3602_v11  ;;  %3798 = vmatmul.f32.gmra.mxu2 %v7011_v4  ;;  %v3409_v0 = vpop.f32.mrf.mxu0  ;;  %v7057_v11 = vld [vmem:[%s5151_s15 + $0x108] sm:$0xff] }
 0x597   : > { %v3474_v47 = vpop.f32.mrf.mxu1  ;;  %3863 = vmatmul.f32.gmra.mxu3 %v7015_v35  ;;  %4038 = vmatpush.msrb.mxu2 %v673_v49 }
 0x598   : > { %v3475_v61 = vadd.f32 %v3474_v47, %v3409_v0 }
 0x599   : > { %v3539_v19 = vpop.f32.mrf.mxu2  ;;  %3668 = vmatmul.f32.gmra.mxu0 %v7019_v3 }
 0x59a   : > { %3733 = vmatmul.f32.gmra.mxu1 %v7023_v21  ;;  %v3604_v33 = vpop.f32.mrf.mxu3  ;;  %v3540_v37 = vadd.f32 %v3539_v19, %v3475_v61  ;;  %v505_v61 = vld [vmem:[#allocation5 + $0x778] sm:$0xff]  ;;  %v7062_v19 = vld [vmem:[%s5151_s15 + $0x130] sm:$0xff] }
 0x59b   : > { %3971 = vmatpush.msrb.mxu1 %v505_v61 }
 0x59c   : > { %v3605_v30 = vadd.f32 %v3604_v33, %v3540_v37 }
 0x59e   : > { %4235 = vst [vmem:[%s5422_s19 + $0x288] sm:$0xff] %v3605_v30  ;;  %3801 = vmatmul.f32.gmra.mxu2 %v7028_v29  ;;  %v3412_v38 = vpop.f32.mrf.mxu0 }
 0x59f   : > { %v3477_v41 = vpop.f32.mrf.mxu1  ;;  %3866 = vmatmul.f32.gmra.mxu3 %v7032_v60 }
 0x5a0   : > { %v3478_v26 = vadd.f32 %v3477_v41, %v3412_v38  ;;  %v877_v38 = vld [vmem:[#allocation5 + $0x1318] sm:$0xff] }
 0x5a1   : > { %v3542_v62 = vpop.f32.mrf.mxu2  ;;  %3671 = vmatmul.f32.gmra.mxu0 %v7036_v18  ;;  %4102 = vmatpush.msrb.mxu3 %v877_v38 }
 0x5a2   : > { %3736 = vmatmul.f32.gmra.mxu1 %v7040_v28  ;;  %v3607_v54 = vpop.f32.mrf.mxu3  ;;  %v3543_v56 = vadd.f32 %v3542_v62, %v3478_v26  ;;  %v7074_v26 = vld [vmem:[%s5151_s15 + $0x128] sm:$0xff] }
 0x5a3   : > { %4103 = vmatpush.msrb.mxu3 %v865_v50  ;;  %v469_v50 = vld [vmem:[#allocation5 + $0x658] sm:$0xff] }
 0x5a4   : > { %v3608_v1 = vadd.f32 %v3607_v54, %v3543_v56  ;;  %v301_v54 = vld [vmem:[#allocation5 + $0x118] sm:$0xff] }
 0x5a5   : > { %v493_v56 = vld [vmem:[#allocation5 + $0x718] sm:$0xff]  ;;  %3907 = vmatpush.msrb.mxu0 %v301_v54 }
 0x5a6   : > { %4247 = vst [vmem:[%s5422_s19 + $0x2e8] sm:$0xff] %v3608_v1  ;;  %3804 = vmatmul.f32.gmra.mxu2 %v7045_v10  ;;  %v3415_v36 = vpop.f32.mrf.mxu0  ;;  %3972 = vmatpush.msrb.mxu1 %v493_v56  ;;  %v853_v54 = vld [vmem:[#allocation5 + $0x1258] sm:$0xff] }
 0x5a7   : > { %v3480_v27 = vpop.f32.mrf.mxu1  ;;  %3869 = vmatmul.f32.gmra.mxu3 %v7049_v7 }
 0x5a8   : > { %v3481_v43 = vadd.f32 %v3480_v27, %v3415_v36  ;;  %v7083_v27 = vld [vmem:[%s5151_s15 + $0x158] sm:$0xff]  ;;  %4104 = vmatpush.msrb.mxu3 %v853_v54 }
 0x5a9   : > { %v3545_v57 = vpop.f32.mrf.mxu2  ;;  %3674 = vmatmul.f32.gmra.mxu0 %v7053_v32 }
 0x5aa   : > { %3739 = vmatmul.f32.gmra.mxu1 %v7057_v11  ;;  %v3610_v0 = vpop.f32.mrf.mxu3  ;;  %v3546_v47 = vadd.f32 %v3545_v57, %v3481_v43 }
 0x5ac   : > { %v3611_v53 = vadd.f32 %v3610_v0, %v3546_v47  ;;  %v7087_v0 = vld [vmem:[%s5151_s15 + $0x140] sm:$0xff]  ;;  %v7091_v47 = vld [vmem:[%s5151_s15 + $0x148] sm:$0xff] }
 0x5ae   : > { %4259 = vst [vmem:[%s5422_s19 + $0x348] sm:$0xff] %v3611_v53  ;;  %3807 = vmatmul.f32.gmra.mxu2 %v7062_v19  ;;  %v3418_v33 = vpop.f32.mrf.mxu0  ;;  %v289_v53 = vld [vmem:[#allocation5 + $0xb8] sm:$0xff] }
 0x5af   : > { %v3483_v37 = vpop.f32.mrf.mxu1  ;;  %3872 = vmatmul.f32.gmra.mxu3 %v7066_v14  ;;  %3908 = vmatpush.msrb.mxu0 %v289_v53 }
 0x5b0   : > { %v3484_v30 = vadd.f32 %v3483_v37, %v3418_v33  ;;  %v481_v33 = vld [vmem:[#allocation5 + $0x6b8] sm:$0xff] }
 0x5b1   : > { %v3548_v41 = vpop.f32.mrf.mxu2  ;;  %3677 = vmatmul.f32.gmra.mxu0 %v7070_v24  ;;  %3973 = vmatpush.msrb.mxu1 %v481_v33  ;;  %v7117_v33 = vld [vmem:[%s5151_s15 + $0x198] sm:$0xff] }
 0x5b2   : > { %3742 = vmatmul.f32.gmra.mxu1 %v7074_v26  ;;  %v3613_v31 = vpop.f32.mrf.mxu3  ;;  %v3549_v62 = vadd.f32 %v3548_v41, %v3484_v30  ;;  %v7100_v41 = vld [vmem:[%s5151_s15 + $0x178] sm:$0xff] }
 0x5b3   : > { %3974 = vmatpush.msrb.mxu1 %v469_v50  ;;  %v7134_v50 = vld [vmem:[%s5151_s15 + $0x1b8] sm:$0xff] }
 0x5b4   : > { %v3614_v13 = vadd.f32 %v3613_v31, %v3549_v62  ;;  %v661_v31 = vld [vmem:[#allocation5 + $0xc58] sm:$0xff]  ;;  %7525 = vst [vmem:[#allocation13_spill] sm:$0xff] %v7134_v50 }
 0x5b5   : > { %4039 = vmatpush.msrb.mxu2 %v661_v31  ;;  %v7125_v31 = vld [vmem:[%s5151_s15 + $0x188] sm:$0xff] }
 0x5b6   : > { %4271 = vst [vmem:[%s5422_s19 + $0x3a8] sm:$0xff] %v3614_v13  ;;  %3810 = vmatmul.f32.gmra.mxu2 %v7079_v8  ;;  %v3421_v1 = vpop.f32.mrf.mxu0  ;;  %v7104_v13 = vld [vmem:[%s5151_s15 + $0x160] sm:$0xff] }
 0x5b7   : > { %v3486_v36 = vpop.f32.mrf.mxu1  ;;  %3875 = vmatmul.f32.gmra.mxu3 %v7083_v27  ;;  %7523 = vst [vmem:[#allocation11_spill] sm:$0xff] %v7125_v31 }
 0x5b8   : > { %v3487_v43 = vadd.f32 %v3486_v36, %v3421_v1  ;;  %v7108_v1 = vld [vmem:[%s5151_s15 + $0x168] sm:$0xff] }
 0x5b9   : > { %v3551_v57 = vpop.f32.mrf.mxu2  ;;  %3680 = vmatmul.f32.gmra.mxu0 %v7087_v0 }
 0x5ba   : > { %3745 = vmatmul.f32.gmra.mxu1 %v7091_v47  ;;  %v3616_v48 = vpop.f32.mrf.mxu3  ;;  %v3552_v61 = vadd.f32 %v3551_v57, %v3487_v43  ;;  %v277_v43 = vld [vmem:[#allocation5 + $0x58] sm:$0xff] }
 0x5bb   : > { %3909 = vmatpush.msrb.mxu0 %v277_v43 }
 0x5bc   : > { %v3617_v37 = vadd.f32 %v3616_v48, %v3552_v61  ;;  %v7113_v48 = vld [vmem:[%s5151_s15 + $0x190] sm:$0xff] }
 0x5be   : > { %4283 = vst [vmem:[%s5422_s19 + $0x408] sm:$0xff] %v3617_v37  ;;  %3813 = vmatmul.f32.gmra.mxu2 %v7096_v25  ;;  %v3424_v30 = vpop.f32.mrf.mxu0 }
 0x5bf   : > { %v3489_v38 = vpop.f32.mrf.mxu1  ;;  %3878 = vmatmul.f32.gmra.mxu3 %v7100_v41 }
 0x5c0   : > { %v3490_v62 = vadd.f32 %v3489_v38, %v3424_v30  ;;  %v7121_v38 = vld [vmem:[%s5151_s15 + $0x180] sm:$0xff] }
 0x5c1   : > { %v3554_v56 = vpop.f32.mrf.mxu2  ;;  %3683 = vmatmul.f32.gmra.mxu0 %v7104_v13 }
 0x5c2   : > { %3748 = vmatmul.f32.gmra.mxu1 %v7108_v1  ;;  %v3619_v36 = vpop.f32.mrf.mxu3  ;;  %v3555_v49 = vadd.f32 %v3554_v56, %v3490_v62 }
 0x5c4   : > { %v3620_v57 = vadd.f32 %v3619_v36, %v3555_v49  ;;  %v7130_v36 = vld [vmem:[%s5151_s15 + $0x1b0] sm:$0xff] }
 0x5c5   : > { %7524 = vst [vmem:[#allocation12_spill] sm:$0xff] %v7130_v36 }
 0x5c6   : > { %4295 = vst [vmem:[%s5422_s19 + $0x468] sm:$0xff] %v3620_v57  ;;  %3816 = vmatmul.f32.gmra.mxu2 %v7113_v48  ;;  %v3427_v61 = vpop.f32.mrf.mxu0 }
 0x5c7   : > { %v3492_v53 = vpop.f32.mrf.mxu1  ;;  %3881 = vmatmul.f32.gmra.mxu3 %v7117_v33 }
 0x5c8   : > { %v3493_v37 = vadd.f32 %v3492_v53, %v3427_v61  ;;  %v7138_v53 = vld [vmem:[%s5151_s15 + $0x1a0] sm:$0xff] }
 0x5c9   : > { %v3557_v30 = vpop.f32.mrf.mxu2  ;;  %3686 = vmatmul.f32.gmra.mxu0 %v7121_v38  ;;  %7526 = vst [vmem:[#allocation14_spill] sm:$0xff] %v7138_v53 }
 0x5ca   : > { %3751 = vmatmul.f32.gmra.mxu1 %v7125_v31  ;;  %v3622_v62 = vpop.f32.mrf.mxu3  ;;  %v3558_v54 = vadd.f32 %v3557_v30, %v3493_v37  ;;  %v7142_v37 = vld [vmem:[%s5151_s15 + $0x1a8] sm:$0xff]  ;;  %v7172_v31 = vld [vmem:[%s5151_s15 + $0x1e0] sm:$0xff] }
 0x5cb   : > { %7527 = vst [vmem:[#allocation15_spill] sm:$0xff] %v7142_v37 }
 0x5cc   : > { %v3623_v56 = vadd.f32 %v3622_v62, %v3558_v54  ;;  %7533 = vst [vmem:[#allocation21_spill] sm:$0xff] %v7172_v31 }
 0x5ce   : > { %4307 = vst [vmem:[%s5422_s19 + $0x4c8] sm:$0xff] %v3623_v56  ;;  %3819 = vmatmul.f32.gmra.mxu2 %v7130_v36  ;;  %v3430_v49 = vpop.f32.mrf.mxu0  ;;  %v7147_v56 = vld [vmem:[%s5151_s15 + $0x1d0] sm:$0xff] }
 0x5cf   : > { %v3495_v43 = vpop.f32.mrf.mxu1  ;;  %3884 = vmatmul.f32.gmra.mxu3 %v7134_v50  ;;  %7528 = vst [vmem:[#allocation16_spill] sm:$0xff] %v7147_v56  ;;  %v7151_v50 = vld [vmem:[%s5151_s15 + $0x1d8] sm:$0xff] }
 0x5d0   : > { %v3496_v57 = vadd.f32 %v3495_v43, %v3430_v49  ;;  %7529 = vst [vmem:[#allocation17_spill] sm:$0xff] %v7151_v50 }
 0x5d1   : > { %v3560_v61 = vpop.f32.mrf.mxu2  ;;  %3689 = vmatmul.f32.gmra.mxu0 %v7138_v53 }
 0x5d2   : > { %3754 = vmatmul.f32.gmra.mxu1 %v7142_v37  ;;  %v3625_v30 = vpop.f32.mrf.mxu3  ;;  %v3561_v62 = vadd.f32 %v3560_v61, %v3496_v57  ;;  %v7155_v37 = vld [vmem:[%s5151_s15 + $0x1c0] sm:$0xff]  ;;  %v7159_v57 = vld [vmem:[%s5151_s15 + $0x1c8] sm:$0xff] }
 0x5d3   : > { %7530 = vst [vmem:[#allocation18_spill] sm:$0xff] %v7155_v37 }
 0x5d4   : > { %v3626_v54 = vadd.f32 %v3625_v30, %v3561_v62 }
 0x5d6   : > { %4319 = vst [vmem:[%s5422_s19 + $0x528] sm:$0xff] %v3626_v54  ;;  %3822 = vmatmul.f32.gmra.mxu2 %v7147_v56  ;;  %v3433_v49 = vpop.f32.mrf.mxu0  ;;  %v7164_v54 = vld [vmem:[%s5151_s15 + $0x1f0] sm:$0xff] }
 0x5d7   : > { %v3498_v43 = vpop.f32.mrf.mxu1  ;;  %3887 = vmatmul.f32.gmra.mxu3 %v7151_v50  ;;  %7531 = vst [vmem:[#allocation19_spill] sm:$0xff] %v7164_v54  ;;  %v7168_v50 = vld [vmem:[%s5151_s15 + $0x1f8] sm:$0xff] }
 0x5d8   : > { %v3499_v53 = vadd.f32 %v3498_v43, %v3433_v49  ;;  %7532 = vst [vmem:[#allocation20_spill] sm:$0xff] %v7168_v50 }
 0x5d9   : > { %v3563_v36 = vpop.f32.mrf.mxu2  ;;  %3692 = vmatmul.f32.gmra.mxu0 %v7155_v37 }
 0x5da   : > { %3757 = vmatmul.f32.gmra.mxu1 %v7159_v57  ;;  %v3628_v61 = vpop.f32.mrf.mxu3  ;;  %v3564_v30 = vadd.f32 %v3563_v36, %v3499_v53  ;;  %v7176_v36 = vld [vmem:[%s5151_s15 + $0x1e8] sm:$0xff] }
 0x5db   : > { %7534 = vst [vmem:[#allocation22_spill] sm:$0xff] %v7176_v36 }
 0x5dc   : > { %v3629_v62 = vadd.f32 %v3628_v61, %v3564_v30 }
 0x5de   : > { %4331 = vst [vmem:[%s5422_s19 + $0x588] sm:$0xff] %v3629_v62  ;;  %3825 = vmatmul.f32.gmra.mxu2 %v7164_v54  ;;  %v3436_v49 = vpop.f32.mrf.mxu0 }
 0x5df   : > { %v3501_v43 = vpop.f32.mrf.mxu1  ;;  %3890 = vmatmul.f32.gmra.mxu3 %v7168_v50 }
 0x5e0   : > { %v3502_v37 = vadd.f32 %v3501_v43, %v3436_v49 }
 0x5e1   : > { %v3566_v56 = vpop.f32.mrf.mxu2  ;;  %3695 = vmatmul.f32.gmra.mxu0 %v7172_v31 }
 0x5e2   : > { %3760 = vmatmul.f32.gmra.mxu1 %v7176_v36  ;;  %v3631_v53 = vpop.f32.mrf.mxu3  ;;  %v3567_v61 = vadd.f32 %v3566_v56, %v3502_v37 }
 0x5e4   : > { %v3632_v30 = vadd.f32 %v3631_v53, %v3567_v61 }
 0x5e6   : > { %4343 = vst [vmem:[%s5422_s19 + $0x5e8] sm:$0xff] %v3632_v30  ;;  %4040 = vmatmul.f32.vlgmr.msrb.gmra.mxu2 %v6909_v23  ;;  %v3651_v62 = vpop.f32.mrf.mxu0 }
 0x5e7   : > { %v3716_v54 = vpop.f32.mrf.mxu1  ;;  %4105 = vmatmul.f32.vlgmr.msrb.gmra.mxu3 %v6913_v34 }
 0x5e8   : > { %v3717_v49 = vadd.f32 %v3716_v54, %v3651_v62 }
 0x5e9   : > { %v3781_v43 = vpop.f32.mrf.mxu2  ;;  %3910 = vmatmul.f32.vlgmr.msrb.gmra.mxu0 %v6917_v63 }
 0x5ea   : > { %3975 = vmatmul.f32.vlgmr.msrb.gmra.mxu1 %v6921_v9  ;;  %v3846_v31 = vpop.f32.mrf.mxu3  ;;  %v3782_v36 = vadd.f32 %v3781_v43, %v3717_v49 }
 0x5ec   : > { %v3847_v50 = vadd.f32 %v3846_v31, %v3782_v36 }
 0x5ee   : > { %4164 = vst [vmem:[%s5422_s19 + $0x50] sm:$0xff] %v3847_v50  ;;  %4043 = vmatmul.f32.gmra.mxu2 %v6926_v55  ;;  %v3654_v37 = vpop.f32.mrf.mxu0 }
 0x5ef   : > { %v3719_v56 = vpop.f32.mrf.mxu1  ;;  %4108 = vmatmul.f32.gmra.mxu3 %v6930_v2 }
 0x5f0   : > { %v3720_v23 = vadd.f32 %v3719_v56, %v3654_v37 }
 0x5f1   : > { %v3784_v53 = vpop.f32.mrf.mxu2  ;;  %3913 = vmatmul.f32.gmra.mxu0 %v6934_v22 }
 0x5f2   : > { %3978 = vmatmul.f32.gmra.mxu1 %v6938_v6  ;;  %v3849_v34 = vpop.f32.mrf.mxu3  ;;  %v3785_v63 = vadd.f32 %v3784_v53, %v3720_v23 }
 0x5f4   : > { %v3850_v9 = vadd.f32 %v3849_v34, %v3785_v63 }
 0x5f6   : > { %4176 = vst [vmem:[%s5422_s19 + $0xb0] sm:$0xff] %v3850_v9  ;;  %4046 = vmatmul.f32.gmra.mxu2 %v6943_v5  ;;  %v3657_v31 = vpop.f32.mrf.mxu0 }
 0x5f7   : > { %v3722_v50 = vpop.f32.mrf.mxu1  ;;  %4111 = vmatmul.f32.gmra.mxu3 %v6947_v44 }
 0x5f8   : > { %v3723_v55 = vadd.f32 %v3722_v50, %v3657_v31 }
 0x5f9   : > { %v3787_v54 = vpop.f32.mrf.mxu2  ;;  %3916 = vmatmul.f32.gmra.mxu0 %v6951_v17 }
 0x5fa   : > { %3981 = vmatmul.f32.gmra.mxu1 %v6955_v20  ;;  %v3852_v2 = vpop.f32.mrf.mxu3  ;;  %v3788_v22 = vadd.f32 %v3787_v54, %v3723_v55 }
 0x5fc   : > { %v3853_v6 = vadd.f32 %v3852_v2, %v3788_v22 }
 0x5fe   : > { %4188 = vst [vmem:[%s5422_s19 + $0x110] sm:$0xff] %v3853_v6  ;;  %4049 = vmatmul.f32.gmra.mxu2 %v6960_v42  ;;  %v3660_v36 = vpop.f32.mrf.mxu0 }
 0x5ff   : > { %v3725_v61 = vpop.f32.mrf.mxu1  ;;  %4114 = vmatmul.f32.gmra.mxu3 %v6964_v45 }
 0x600   : > { %v3726_v5 = vadd.f32 %v3725_v61, %v3660_v36 }
 0x601   : > { %v3790_v30 = vpop.f32.mrf.mxu2  ;;  %3919 = vmatmul.f32.gmra.mxu0 %v6968_v59 }
 0x602   : > { %3984 = vmatmul.f32.gmra.mxu1 %v6972_v15  ;;  %v3855_v44 = vpop.f32.mrf.mxu3  ;;  %v3791_v17 = vadd.f32 %v3790_v30, %v3726_v5 }
 0x604   : > { %v3856_v20 = vadd.f32 %v3855_v44, %v3791_v17 }
 0x606   : > { %4200 = vst [vmem:[%s5422_s19 + $0x170] sm:$0xff] %v3856_v20  ;;  %4052 = vmatmul.f32.gmra.mxu2 %v6977_v51  ;;  %v3663_v62 = vpop.f32.mrf.mxu0 }
 0x607   : > { %v3728_v49 = vpop.f32.mrf.mxu1  ;;  %4117 = vmatmul.f32.gmra.mxu3 %v6981_v12 }
 0x608   : > { %v3729_v42 = vadd.f32 %v3728_v49, %v3663_v62 }
 0x609   : > { %v3793_v43 = vpop.f32.mrf.mxu2  ;;  %3922 = vmatmul.f32.gmra.mxu0 %v6985_v40 }
 0x60a   : > { %3987 = vmatmul.f32.gmra.mxu1 %v6989_v39  ;;  %v3858_v45 = vpop.f32.mrf.mxu3  ;;  %v3794_v59 = vadd.f32 %v3793_v43, %v3729_v42 }
 0x60c   : > { %v3859_v15 = vadd.f32 %v3858_v45, %v3794_v59  ;;  %v7536_v45 = vld [vmem:[#allocation12_spill] sm:$0xff] }
 0x60e   : > { %4212 = vst [vmem:[%s5422_s19 + $0x1d0] sm:$0xff] %v3859_v15  ;;  %4055 = vmatmul.f32.gmra.mxu2 %v6994_v16  ;;  %v3666_v37 = vpop.f32.mrf.mxu0 }
 0x60f   : > { %v3731_v56 = vpop.f32.mrf.mxu1  ;;  %4120 = vmatmul.f32.gmra.mxu3 %v6998_v58 }
 0x610   : > { %v3732_v51 = vadd.f32 %v3731_v56, %v3666_v37 }
 0x611   : > { %v3796_v23 = vpop.f32.mrf.mxu2  ;;  %3925 = vmatmul.f32.gmra.mxu0 %v7002_v52 }
 0x612   : > { %3990 = vmatmul.f32.gmra.mxu1 %v7006_v46  ;;  %v3861_v12 = vpop.f32.mrf.mxu3  ;;  %v3797_v40 = vadd.f32 %v3796_v23, %v3732_v51  ;;  %v7539_v51 = vld [vmem:[#allocation15_spill] sm:$0xff] }
 0x614   : > { %v3862_v39 = vadd.f32 %v3861_v12, %v3797_v40  ;;  %v7540_v40 = vld [vmem:[#allocation16_spill] sm:$0xff] }
 0x616   : > { %4224 = vst [vmem:[%s5422_s19 + $0x230] sm:$0xff] %v3862_v39  ;;  %4058 = vmatmul.f32.gmra.mxu2 %v7011_v4  ;;  %v3669_v53 = vpop.f32.mrf.mxu0 }
 0x617   : > { %v3734_v34 = vpop.f32.mrf.mxu1  ;;  %4123 = vmatmul.f32.gmra.mxu3 %v7015_v35 }
 0x618   : > { %v3735_v16 = vadd.f32 %v3734_v34, %v3669_v53  ;;  %v7541_v34 = vld [vmem:[#allocation17_spill] sm:$0xff] }
 0x619   : > { %v3799_v63 = vpop.f32.mrf.mxu2  ;;  %3928 = vmatmul.f32.gmra.mxu0 %v7019_v3 }
 0x61a   : > { %3993 = vmatmul.f32.gmra.mxu1 %v7023_v21  ;;  %v3864_v58 = vpop.f32.mrf.mxu3  ;;  %v3800_v52 = vadd.f32 %v3799_v63, %v3735_v16 }
 0x61c   : > { %v3865_v46 = vadd.f32 %v3864_v58, %v3800_v52  ;;  %v7542_v58 = vld [vmem:[#allocation18_spill] sm:$0xff] }
 0x61e   : > { %4236 = vst [vmem:[%s5422_s19 + $0x290] sm:$0xff] %v3865_v46  ;;  %4061 = vmatmul.f32.gmra.mxu2 %v7028_v29  ;;  %v3672_v9 = vpop.f32.mrf.mxu0 }
 0x61f   : > { %v3737_v31 = vpop.f32.mrf.mxu1  ;;  %4126 = vmatmul.f32.gmra.mxu3 %v7032_v60 }
 0x620   : > { %v3738_v4 = vadd.f32 %v3737_v31, %v3672_v9  ;;  %v7543_v31 = vld [vmem:[#allocation19_spill] sm:$0xff] }
 0x621   : > { %v3802_v50 = vpop.f32.mrf.mxu2  ;;  %3931 = vmatmul.f32.gmra.mxu0 %v7036_v18 }
 0x622   : > { %3996 = vmatmul.f32.gmra.mxu1 %v7040_v28  ;;  %v3867_v35 = vpop.f32.mrf.mxu3  ;;  %v3803_v3 = vadd.f32 %v3802_v50, %v3738_v4 }
 0x624   : > { %v3868_v21 = vadd.f32 %v3867_v35, %v3803_v3  ;;  %v7544_v35 = vld [vmem:[#allocation20_spill] sm:$0xff] }
 0x626   : > { %4248 = vst [vmem:[%s5422_s19 + $0x2f0] sm:$0xff] %v3868_v21  ;;  %4064 = vmatmul.f32.gmra.mxu2 %v7045_v10  ;;  %v3675_v55 = vpop.f32.mrf.mxu0 }
 0x627   : > { %v3740_v54 = vpop.f32.mrf.mxu1  ;;  %4129 = vmatmul.f32.gmra.mxu3 %v7049_v7 }
 0x628   : > { %v3741_v29 = vadd.f32 %v3740_v54, %v3675_v55  ;;  %v7545_v55 = vld [vmem:[#allocation21_spill] sm:$0xff]  ;;  %v7546_v54 = vld [vmem:[#allocation22_spill] sm:$0xff] }
 0x629   : > { %v3805_v2 = vpop.f32.mrf.mxu2  ;;  %3934 = vmatmul.f32.gmra.mxu0 %v7053_v32 }
 0x62a   : > { %3999 = vmatmul.f32.gmra.mxu1 %v7057_v11  ;;  %v3870_v60 = vpop.f32.mrf.mxu3  ;;  %v3806_v18 = vadd.f32 %v3805_v2, %v3741_v29 }
 0x62c   : > { %v3871_v28 = vadd.f32 %v3870_v60, %v3806_v18 }
 0x62e   : > { %4260 = vst [vmem:[%s5422_s19 + $0x350] sm:$0xff] %v3871_v28  ;;  %4067 = vmatmul.f32.gmra.mxu2 %v7062_v19  ;;  %v3678_v22 = vpop.f32.mrf.mxu0 }
 0x62f   : > { %v3743_v6 = vpop.f32.mrf.mxu1  ;;  %4132 = vmatmul.f32.gmra.mxu3 %v7066_v14 }
 0x630   : > { %v3744_v10 = vadd.f32 %v3743_v6, %v3678_v22 }
 0x631   : > { %v3808_v36 = vpop.f32.mrf.mxu2  ;;  %3937 = vmatmul.f32.gmra.mxu0 %v7070_v24 }
 0x632   : > { %4002 = vmatmul.f32.gmra.mxu1 %v7074_v26  ;;  %v3873_v7 = vpop.f32.mrf.mxu3  ;;  %v3809_v32 = vadd.f32 %v3808_v36, %v3744_v10 }
 0x634   : > { %v3874_v11 = vadd.f32 %v3873_v7, %v3809_v32 }
 0x636   : > { %4272 = vst [vmem:[%s5422_s19 + $0x3b0] sm:$0xff] %v3874_v11  ;;  %4070 = vmatmul.f32.gmra.mxu2 %v7079_v8  ;;  %v3681_v61 = vpop.f32.mrf.mxu0 }
 0x637   : > { %v3746_v5 = vpop.f32.mrf.mxu1  ;;  %4135 = vmatmul.f32.gmra.mxu3 %v7083_v27 }
 0x638   : > { %v3747_v19 = vadd.f32 %v3746_v5, %v3681_v61 }
 0x639   : > { %v3811_v30 = vpop.f32.mrf.mxu2  ;;  %3940 = vmatmul.f32.gmra.mxu0 %v7087_v0 }
 0x63a   : > { %4005 = vmatmul.f32.gmra.mxu1 %v7091_v47  ;;  %v3876_v14 = vpop.f32.mrf.mxu3  ;;  %v3812_v24 = vadd.f32 %v3811_v30, %v3747_v19 }
 0x63c   : > { %v3877_v26 = vadd.f32 %v3876_v14, %v3812_v24 }
 0x63e   : > { %4284 = vst [vmem:[%s5422_s19 + $0x410] sm:$0xff] %v3877_v26  ;;  %4073 = vmatmul.f32.gmra.mxu2 %v7096_v25  ;;  %v3684_v44 = vpop.f32.mrf.mxu0 }
 0x63f   : > { %v3749_v17 = vpop.f32.mrf.mxu1  ;;  %4138 = vmatmul.f32.gmra.mxu3 %v7100_v41  ;;  %v7535_v41 = vld [vmem:[#allocation11_spill] sm:$0xff] }
 0x640   : > { %v3750_v8 = vadd.f32 %v3749_v17, %v3684_v44 }
 0x641   : > { %v3814_v20 = vpop.f32.mrf.mxu2  ;;  %3943 = vmatmul.f32.gmra.mxu0 %v7104_v13 }
 0x642   : > { %4008 = vmatmul.f32.gmra.mxu1 %v7108_v1  ;;  %v3879_v27 = vpop.f32.mrf.mxu3  ;;  %v3815_v0 = vadd.f32 %v3814_v20, %v3750_v8 }
 0x644   : > { %v3880_v47 = vadd.f32 %v3879_v27, %v3815_v0 }
 0x646   : > { %4296 = vst [vmem:[%s5422_s19 + $0x470] sm:$0xff] %v3880_v47  ;;  %4076 = vmatmul.f32.gmra.mxu2 %v7113_v48  ;;  %v3687_v62 = vpop.f32.mrf.mxu0  ;;  %v7537_v48 = vld [vmem:[#allocation13_spill] sm:$0xff] }
 0x647   : > { %v3752_v49 = vpop.f32.mrf.mxu1  ;;  %4141 = vmatmul.f32.gmra.mxu3 %v7117_v33  ;;  %v7538_v33 = vld [vmem:[#allocation14_spill] sm:$0xff] }
 0x648   : > { %v3753_v25 = vadd.f32 %v3752_v49, %v3687_v62 }
 0x649   : > { %v3817_v42 = vpop.f32.mrf.mxu2  ;;  %3946 = vmatmul.f32.gmra.mxu0 %v7121_v38 }
 0x64a   : > { %4011 = vmatmul.f32.gmra.mxu1 %v7535_v41  ;;  %v3882_v13 = vpop.f32.mrf.mxu3  ;;  %v3818_v1 = vadd.f32 %v3817_v42, %v3753_v25 }
 0x64c   : > { %v3883_v43 = vadd.f32 %v3882_v13, %v3818_v1 }
 0x64e   : > { %4308 = vst [vmem:[%s5422_s19 + $0x4d0] sm:$0xff] %v3883_v43  ;;  %4079 = vmatmul.f32.gmra.mxu2 %v7536_v45  ;;  %v3690_v59 = vpop.f32.mrf.mxu0 }
 0x64f   : > { %v3755_v15 = vpop.f32.mrf.mxu1  ;;  %4144 = vmatmul.f32.gmra.mxu3 %v7537_v48 }
 0x650   : > { %v3756_v37 = vadd.f32 %v3755_v15, %v3690_v59 }
 0x651   : > { %v3820_v56 = vpop.f32.mrf.mxu2  ;;  %3949 = vmatmul.f32.gmra.mxu0 %v7538_v33 }
 0x652   : > { %4014 = vmatmul.f32.gmra.mxu1 %v7539_v51  ;;  %v3885_v38 = vpop.f32.mrf.mxu3  ;;  %v3821_v23 = vadd.f32 %v3820_v56, %v3756_v37 }
 0x654   : > { %v3886_v12 = vadd.f32 %v3885_v38, %v3821_v23 }
 0x656   : > { %4320 = vst [vmem:[%s5422_s19 + $0x530] sm:$0xff] %v3886_v12  ;;  %4082 = vmatmul.f32.gmra.mxu2 %v7540_v40  ;;  %v3693_v39 = vpop.f32.mrf.mxu0 }
 0x657   : > { %v3758_v53 = vpop.f32.mrf.mxu1  ;;  %4147 = vmatmul.f32.gmra.mxu3 %v7541_v34 }
 0x658   : > { %v3759_v16 = vadd.f32 %v3758_v53, %v3693_v39 }
 0x659   : > { %v3823_v63 = vpop.f32.mrf.mxu2  ;;  %3952 = vmatmul.f32.gmra.mxu0 %v7542_v58 }
 0x65a   : > { %4017 = vmatmul.f32.gmra.mxu1 %v7159_v57  ;;  %v3888_v52 = vpop.f32.mrf.mxu3  ;;  %v3824_v46 = vadd.f32 %v3823_v63, %v3759_v16 }
 0x65c   : > { %v3889_v9 = vadd.f32 %v3888_v52, %v3824_v46 }
 0x65e   : > { %4332 = vst [vmem:[%s5422_s19 + $0x590] sm:$0xff] %v3889_v9  ;;  %4085 = vmatmul.f32.gmra.mxu2 %v7543_v31  ;;  %v3696_v4 = vpop.f32.mrf.mxu0 }
 0x65f   : > { %v3761_v50 = vpop.f32.mrf.mxu1  ;;  %4150 = vmatmul.f32.gmra.mxu3 %v7544_v35 }
 0x660   : > { %v3762_v3 = vadd.f32 %v3761_v50, %v3696_v4 }
 0x661   : > { %v3826_v21 = vpop.f32.mrf.mxu2  ;;  %3955 = vmatmul.f32.gmra.mxu0 %v7545_v55 }
 0x662   : > { %4020 = vmatmul.f32.gmra.mxu1 %v7546_v54  ;;  %v3891_v29 = vpop.f32.mrf.mxu3  ;;  %v3827_v57 = vadd.f32 %v3826_v21, %v3762_v3 }
 0x664   : > { %v3892_v2 = vadd.f32 %v3891_v29, %v3827_v57 }
 0x666   : > { %4344 = vst [vmem:[%s5422_s19 + $0x5f0] sm:$0xff] %v3892_v2  ;;  %v3911_v60 = vpop.f32.mrf.mxu0 }
 0x667   : > { %v3976_v18 = vpop.f32.mrf.mxu1 }
 0x668   : > { %v3977_v28 = vadd.f32 %v3976_v18, %v3911_v60 }
 0x669   : > { %v4041_v22 = vpop.f32.mrf.mxu2 }
 0x66a   : > { %v4106_v6 = vpop.f32.mrf.mxu3  ;;  %v4042_v10 = vadd.f32 %v4041_v22, %v3977_v28 }
 0x66c   : > { %v4107_v36 = vadd.f32 %v4106_v6, %v4042_v10 }
 0x66e   : > { %4165 = vst [vmem:[%s5422_s19 + $0x58] sm:$0xff] %v4107_v36  ;;  %v3914_v7 = vpop.f32.mrf.mxu0 }
 0x66f   : > { %v3979_v32 = vpop.f32.mrf.mxu1 }
 0x670   : > { %v3980_v11 = vadd.f32 %v3979_v32, %v3914_v7 }
 0x671   : > { %v4044_v61 = vpop.f32.mrf.mxu2 }
 0x672   : > { %v4109_v5 = vpop.f32.mrf.mxu3  ;;  %v4045_v19 = vadd.f32 %v4044_v61, %v3980_v11 }
 0x674   : > { %v4110_v30 = vadd.f32 %v4109_v5, %v4045_v19 }
 0x676   : > { %4177 = vst [vmem:[%s5422_s19 + $0xb8] sm:$0xff] %v4110_v30  ;;  %v3917_v14 = vpop.f32.mrf.mxu0 }
 0x677   : > { %v3982_v24 = vpop.f32.mrf.mxu1 }
 0x678   : > { %v3983_v26 = vadd.f32 %v3982_v24, %v3917_v14 }
 0x679   : > { %v4047_v44 = vpop.f32.mrf.mxu2 }
 0x67a   : > { %v4112_v17 = vpop.f32.mrf.mxu3  ;;  %v4048_v8 = vadd.f32 %v4047_v44, %v3983_v26 }
 0x67c   : > { %v4113_v20 = vadd.f32 %v4112_v17, %v4048_v8 }
 0x67e   : > { %4189 = vst [vmem:[%s5422_s19 + $0x118] sm:$0xff] %v4113_v20  ;;  %v3920_v27 = vpop.f32.mrf.mxu0 }
 0x67f   : > { %v3985_v0 = vpop.f32.mrf.mxu1 }
 0x680   : > { %v3986_v47 = vadd.f32 %v3985_v0, %v3920_v27 }
 0x681   : > { %v4050_v62 = vpop.f32.mrf.mxu2 }
 0x682   : > { %v4115_v49 = vpop.f32.mrf.mxu3  ;;  %v4051_v25 = vadd.f32 %v4050_v62, %v3986_v47 }
 0x684   : > { %v4116_v42 = vadd.f32 %v4115_v49, %v4051_v25 }
 0x686   : > { %4201 = vst [vmem:[%s5422_s19 + $0x178] sm:$0xff] %v4116_v42  ;;  %v3923_v41 = vpop.f32.mrf.mxu0 }
 0x687   : > { %v3988_v13 = vpop.f32.mrf.mxu1 }
 0x688   : > { %v3989_v1 = vadd.f32 %v3988_v13, %v3923_v41 }
 0x689   : > { %v4053_v43 = vpop.f32.mrf.mxu2 }
 0x68a   : > { %v4118_v45 = vpop.f32.mrf.mxu3  ;;  %v4054_v59 = vadd.f32 %v4053_v43, %v3989_v1 }
 0x68c   : > { %v4119_v15 = vadd.f32 %v4118_v45, %v4054_v59 }
 0x68e   : > { %4213 = vst [vmem:[%s5422_s19 + $0x1d8] sm:$0xff] %v4119_v15  ;;  %v3926_v48 = vpop.f32.mrf.mxu0 }
 0x68f   : > { %v3991_v37 = vpop.f32.mrf.mxu1 }
 0x690   : > { %v3992_v56 = vadd.f32 %v3991_v37, %v3926_v48 }
 0x691   : > { %v4056_v33 = vpop.f32.mrf.mxu2 }
 0x692   : > { %v4121_v51 = vpop.f32.mrf.mxu3  ;;  %v4057_v38 = vadd.f32 %v4056_v33, %v3992_v56 }
 0x694   : > { %v4122_v23 = vadd.f32 %v4121_v51, %v4057_v38 }
 0x696   : > { %4225 = vst [vmem:[%s5422_s19 + $0x238] sm:$0xff] %v4122_v23  ;;  %v3929_v12 = vpop.f32.mrf.mxu0 }
 0x697   : > { %v3994_v40 = vpop.f32.mrf.mxu1 }
 0x698   : > { %v3995_v39 = vadd.f32 %v3994_v40, %v3929_v12 }
 0x699   : > { %v4059_v53 = vpop.f32.mrf.mxu2 }
 0x69a   : > { %v4124_v34 = vpop.f32.mrf.mxu3  ;;  %v4060_v16 = vadd.f32 %v4059_v53, %v3995_v39 }
 0x69c   : > { %v4125_v63 = vadd.f32 %v4124_v34, %v4060_v16 }
 0x69e   : > { %4237 = vst [vmem:[%s5422_s19 + $0x298] sm:$0xff] %v4125_v63  ;;  %v3932_v58 = vpop.f32.mrf.mxu0 }
 0x69f   : > { %v3997_v52 = vpop.f32.mrf.mxu1 }
 0x6a0   : > { %v3998_v46 = vadd.f32 %v3997_v52, %v3932_v58 }
 0x6a1   : > { %v4062_v9 = vpop.f32.mrf.mxu2 }
 0x6a2   : > { %v4127_v31 = vpop.f32.mrf.mxu3  ;;  %v4063_v4 = vadd.f32 %v4062_v9, %v3998_v46 }
 0x6a4   : > { %v4128_v50 = vadd.f32 %v4127_v31, %v4063_v4 }
 0x6a6   : > { %4249 = vst [vmem:[%s5422_s19 + $0x2f8] sm:$0xff] %v4128_v50  ;;  %v3935_v35 = vpop.f32.mrf.mxu0 }
 0x6a7   : > { %v4000_v3 = vpop.f32.mrf.mxu1 }
 0x6a8   : > { %v4001_v21 = vadd.f32 %v4000_v3, %v3935_v35 }
 0x6a9   : > { %v4065_v55 = vpop.f32.mrf.mxu2 }
 0x6aa   : > { %v4130_v54 = vpop.f32.mrf.mxu3  ;;  %v4066_v29 = vadd.f32 %v4065_v55, %v4001_v21 }
 0x6ac   : > { %v4131_v57 = vadd.f32 %v4130_v54, %v4066_v29 }
 0x6ae   : > { %4261 = vst [vmem:[%s5422_s19 + $0x358] sm:$0xff] %v4131_v57  ;;  %v3938_v2 = vpop.f32.mrf.mxu0 }
 0x6af   : > { %v4003_v60 = vpop.f32.mrf.mxu1 }
 0x6b0   : > { %v4004_v18 = vadd.f32 %v4003_v60, %v3938_v2 }
 0x6b1   : > { %v4068_v28 = vpop.f32.mrf.mxu2 }
 0x6b2   : > { %v4133_v22 = vpop.f32.mrf.mxu3  ;;  %v4069_v6 = vadd.f32 %v4068_v28, %v4004_v18 }
 0x6b4   : > { %v4134_v10 = vadd.f32 %v4133_v22, %v4069_v6 }
 0x6b6   : > { %4273 = vst [vmem:[%s5422_s19 + $0x3b8] sm:$0xff] %v4134_v10  ;;  %v3941_v36 = vpop.f32.mrf.mxu0 }
 0x6b7   : > { %v4006_v7 = vpop.f32.mrf.mxu1 }
 0x6b8   : > { %v4007_v32 = vadd.f32 %v4006_v7, %v3941_v36 }
 0x6b9   : > { %v4071_v11 = vpop.f32.mrf.mxu2 }
 0x6ba   : > { %v4136_v61 = vpop.f32.mrf.mxu3  ;;  %v4072_v5 = vadd.f32 %v4071_v11, %v4007_v32 }
 0x6bc   : > { %v4137_v19 = vadd.f32 %v4136_v61, %v4072_v5 }
 0x6be   : > { %4285 = vst [vmem:[%s5422_s19 + $0x418] sm:$0xff] %v4137_v19  ;;  %v3944_v30 = vpop.f32.mrf.mxu0 }
 0x6bf   : > { %v4009_v14 = vpop.f32.mrf.mxu1 }
 0x6c0   : > { %v4010_v24 = vadd.f32 %v4009_v14, %v3944_v30 }
 0x6c1   : > { %v4074_v26 = vpop.f32.mrf.mxu2 }
 0x6c2   : > { %v4139_v44 = vpop.f32.mrf.mxu3  ;;  %v4075_v17 = vadd.f32 %v4074_v26, %v4010_v24 }
 0x6c4   : > { %v4140_v8 = vadd.f32 %v4139_v44, %v4075_v17 }
 0x6c6   : > { %4297 = vst [vmem:[%s5422_s19 + $0x478] sm:$0xff] %v4140_v8  ;;  %v3947_v20 = vpop.f32.mrf.mxu0 }
 0x6c7   : > { %v4012_v27 = vpop.f32.mrf.mxu1 }
 0x6c8   : > { %v4013_v0 = vadd.f32 %v4012_v27, %v3947_v20 }
 0x6c9   : > { %v4077_v47 = vpop.f32.mrf.mxu2 }
 0x6ca   : > { %v4142_v62 = vpop.f32.mrf.mxu3  ;;  %v4078_v49 = vadd.f32 %v4077_v47, %v4013_v0 }
 0x6cc   : > { %v4143_v25 = vadd.f32 %v4142_v62, %v4078_v49 }
 0x6ce   : > { %4309 = vst [vmem:[%s5422_s19 + $0x4d8] sm:$0xff] %v4143_v25  ;;  %v3950_v42 = vpop.f32.mrf.mxu0 }
 0x6cf   : > { %v4015_v41 = vpop.f32.mrf.mxu1 }
 0x6d0   : > { %v4016_v13 = vadd.f32 %v4015_v41, %v3950_v42 }
 0x6d1   : > { %v4080_v1 = vpop.f32.mrf.mxu2 }
 0x6d2   : > { %v4145_v43 = vpop.f32.mrf.mxu3  ;;  %v4081_v45 = vadd.f32 %v4080_v1, %v4016_v13 }
 0x6d4   : > { %v4146_v59 = vadd.f32 %v4145_v43, %v4081_v45 }
 0x6d6   : > { %4321 = vst [vmem:[%s5422_s19 + $0x538] sm:$0xff] %v4146_v59  ;;  %v3953_v15 = vpop.f32.mrf.mxu0 }
 0x6d7   : > { %v4018_v48 = vpop.f32.mrf.mxu1 }
 0x6d8   : > { %v4019_v37 = vadd.f32 %v4018_v48, %v3953_v15 }
 0x6d9   : > { %v4083_v56 = vpop.f32.mrf.mxu2 }
 0x6da   : > { %v4148_v33 = vpop.f32.mrf.mxu3  ;;  %v4084_v51 = vadd.f32 %v4083_v56, %v4019_v37 }
 0x6dc   : > { %v4149_v38 = vadd.f32 %v4148_v33, %v4084_v51 }
 0x6de   : > { %4333 = vst [vmem:[%s5422_s19 + $0x598] sm:$0xff] %v4149_v38  ;;  %v3956_v23 = vpop.f32.mrf.mxu0 }
 0x6df   : > { %v4021_v12 = vpop.f32.mrf.mxu1 }
 0x6e0   : > { %v4022_v40 = vadd.f32 %v4021_v12, %v3956_v23 }
 0x6e1   : > { %v4086_v39 = vpop.f32.mrf.mxu2 }
 0x6e2   : > { %v4151_v53 = vpop.f32.mrf.mxu3  ;;  %v4087_v34 = vadd.f32 %v4086_v39, %v4022_v40 }
 0x6e4   : > { %v4152_v16 = vadd.f32 %v4151_v53, %v4087_v34 }
 0x6e6   : > { %4345 = vst [vmem:[%s5422_s19 + $0x5f8] sm:$0xff] %v4152_v16 }
 0x6e7   : > { %4965 = shalt.err (!%p4962_p0)
}
 0x6e8   : > { %s5031_s30 = smov 1536   ;;  %s5032_s7 = smov 96  }
 0x6e9   : > { %4485 = dma.vmem_to_hbm [thread:$0]  (%p5127_p5), %s4363_s21, 24576, %s4365_s22, %s4347_s12, %s5031_s30, %s5031_s30, %s5032_s7  }
 0x6ea PF: > { %s4379_s15 = sand.u32 1, %s5004_s9   ;;  %p4496_p3 = pnand %p4466_p11, %p5097_p6 }
 0x6eb   : > { %s4380_s17 = scalar_lea.sflag [#allocation4], %s4379_s15 }
 0x6ec   : > { %p4497_p7 = pneg %p4496_p3 }
 0x6ee   : > { %4999 = dma.done.wait (%p4497_p7), %s4380_s17, 24576  }
 0x6ef   : > { %5001 = vsyncadd (%p4497_p7), %s4380_s17, 4294942720  ;;  %s19_s14 = sadd.s32 1, %s5024_s14   ;;  %s7547_s9 = smov %s5008_s10 }
 0x6f0   : > { %p16_p9 = scmp.ge.s32.totalorder %s19_s14, 4   ;;  %s7548_s10 = smov %s5012_s11 }
 0x6f1   : > { %s7549_s11 = smov %s5136_s8  ;;  %s7550_s12 = smov %s5020_s13 }
 0x6f2   : > { %s7551_s13 = smov %s7553_s29  ;;  %18 = sbr.rel (!%p16_p9) target bundleno = 7 (0x7), region = 77 }
 0x6f7   :  { %4386 = vsyncpa [#allocation3], 1 }
 0x6f8   :  { %4388 = vsyncpa [#allocation3 + $0x1], 1 }
 0x6f9   :  { %4389 = vsyncpa [#allocation6], 1 }
 0x6fa   :  { %4390 = vsyncpa [#allocation4], 1 }
 0x6fb   :  { %4392 = vsyncpa [#allocation4 + $0x1], 1 }

</bundles_post_ra>
